<compile_context>
chip_gen: v7x
topology: tpu7x:2x2x1
jax: 0.10.0
libtpu: 0.0.40
codegen_flags: <defaults>
</compile_context>

<pallas_src>
import functools

import jax
import jax.numpy as jnp
import numpy as np
from jax import lax
from jax.experimental import pallas as pl
from jax.experimental.pallas import tpu as pltpu


def _round_up(x, m):
    return ((x + m - 1) // m) * m


def _sigmoid(x):
    # One EUP push (tanh) + free VPU fma instead of exp + reciprocal.
    return 0.5 * jnp.tanh(0.5 * x) + 0.5


def _lstm_recurrence(gproj, whh_ref, seq, c, T, BN, Hp, wdt):
    """Sequential part of one LSTM layer.

    gproj : VMEM ref (T*BN, 4*Hp) f32 -- x_t @ W_ih + b for all steps; the recurrent h@W_hh term
            is accumulated into it in place (gate slab stays VMEM-resident, no vreg spills).
    whh_ref: VMEM ref (Hp, 4*Hp), compute dtype.
    seq   : VMEM ref (T*BN, Hp), compute dtype -- receives h_t and is the h_{t-1} source.
    c     : VMEM ref (BN, Hp) f32 -- cell state.
    """
    def cell_update(rows, c_prev):
        # PyTorch gate order i, f, g, o; each block is Hp (128-lane aligned).
        i = _sigmoid(gproj[rows, pl.ds(0 * Hp, Hp)])
        gg = jnp.tanh(gproj[rows, pl.ds(2 * Hp, Hp)])
        o = _sigmoid(gproj[rows, pl.ds(3 * Hp, Hp)])
        if c_prev is None:                      # t == 0: c_{-1} = 0, forget-gate term vanishes
            c_new = i * gg
        else:
            f = _sigmoid(gproj[rows, pl.ds(1 * Hp, Hp)])
            c_new = f * c_prev + i * gg
        h_new = o * jnp.tanh(c_new)
        return c_new, h_new

    # ---- peeled t = 0: h_{-1} = 0 so there is no recurrent matmul at all ----
    rows0 = pl.ds(0, BN)
    c0, h0 = cell_update(rows0, None)
    c[...] = c0
    seq[rows0, :] = h0.astype(wdt)

    # ---- t = 1 .. T-1 ----
    def step(t, carry):
        prev = pl.ds(pl.multiple_of((t - 1) * BN, BN), BN)
        rows = pl.ds(pl.multiple_of(t * BN, BN), BN)
        # Accumulate h_{t-1} @ W_hh into the VMEM-resident gate slab.
        gproj[rows, :] += jnp.dot(seq[prev, :], whh_ref[...],
                                  preferred_element_type=jnp.float32)
        c_new, h_new = cell_update(rows, c[...])
        c[...] = c_new
        seq[rows, :] = h_new.astype(wdt)
        return carry

    # Full unroll for short sequences; partial unroll keeps code size bounded otherwise.
    lax.fori_loop(1, T, step, 0, unroll=True if T <= 16 else 8)


def ch_lstm_kernel(x_ref, wih1_ref, whh1_ref, b1_ref,
                   wih2_ref, whh2_ref, b2_ref,
                   wlin_ref, blin_ref,
                   out_ref,
                   gproj, seq, c):
    TB, Hp = seq.shape
    BN = c.shape[0]
    T = TB // BN
    wdt = whh1_ref.dtype

    # ---- LSTM layer 1: hoisted input projection, one MXU matmul over all T steps.
    # x arrives lane-dense as (C, T*BN); transpose (XLU, tiny) to (T*BN, C) for the MXU.
    x_t = x_ref[0].T.astype(wdt)                                      # (T*BN, C)
    gproj[...] = (jnp.dot(x_t, wih1_ref[...], preferred_element_type=jnp.float32)
                  + b1_ref[...])
    _lstm_recurrence(gproj, whh1_ref, seq, c, T, BN, Hp, wdt)

    # ---- LSTM layer 2: hoisted input projection over layer-1's full hidden sequence.
    gproj[...] = (jnp.dot(seq[...], wih2_ref[...], preferred_element_type=jnp.float32)
                  + b2_ref[...])
    _lstm_recurrence(gproj, whh2_ref, seq, c, T, BN, Hp, wdt)

    # ---- Linear head: (Op, Hp) x (T*BN, Hp)^T -> (Op, T*BN); lane-dense store, out_ch only
    # sublane-padded to Op = round_up(out_ch, 8) instead of 128 lanes.
    head = lax.dot_general(wlin_ref[...], seq[...],
                           (((1,), (1,)), ((), ())),
                           preferred_element_type=jnp.float32)
    out_ref[0] = head + blin_ref[...]


def _prepare_params(params, in_ch, feat_ch, out_ch, Hp, Op, wdt):
    """PyTorch-layout params -> pre-transposed, gate-block-padded kernel weights (compute dtype).

    Padded rows/columns are zero, so padded hidden units stay exactly 0 through the recurrence
    (g=0 -> i=f=o=0.5, tanh(0)=0 -> c stays 0, h stays 0) and never contaminate valid outputs.
    """
    (w_ih1, w_hh1, b_ih1, b_hh1,
     w_ih2, w_hh2, b_ih2, b_hh2,
     w_lin, b_lin) = params

    def pad_gate_w(w, in_dim, in_pad):                 # (4*feat, in_dim) -> (in_pad, 4*Hp)
        w4 = w.reshape(4, feat_ch, in_dim)
        w4 = jnp.pad(w4, ((0, 0), (0, Hp - feat_ch), (0, in_pad - in_dim)))
        return jnp.transpose(w4, (2, 0, 1)).reshape(in_pad, 4 * Hp).astype(wdt)

    def pad_gate_b(b_ih, b_hh):                        # (4*feat,) -> (1, 4*Hp), stays f32
        b = (b_ih + b_hh).reshape(4, feat_ch)
        b = jnp.pad(b, ((0, 0), (0, Hp - feat_ch)))
        return b.reshape(1, 4 * Hp).astype(jnp.float32)

    wih1_t = pad_gate_w(w_ih1, in_ch, in_ch)           # (C,  4*Hp)
    whh1_t = pad_gate_w(w_hh1, feat_ch, Hp)            # (Hp, 4*Hp)
    b1 = pad_gate_b(b_ih1, b_hh1)
    wih2_t = pad_gate_w(w_ih2, feat_ch, Hp)            # layer-2 input is the (padded) layer-1 hidden
    whh2_t = pad_gate_w(w_hh2, feat_ch, Hp)
    b2 = pad_gate_b(b_ih2, b_hh2)

    wlin_t = jnp.pad(w_lin, ((0, Op - out_ch), (0, Hp - feat_ch))).astype(wdt)   # (Op, Hp)
    blin = jnp.pad(b_lin, ((0, Op - out_ch),)).reshape(Op, 1).astype(jnp.float32)
    return wih1_t, whh1_t, b1, wih2_t, whh2_t, b2, wlin_t, blin


def _two_tensorcores():
    # v7x-class chips have 2 TensorCores per chip; v5e/v6e have 1.
    try:
        kind = jax.devices()[0].device_kind.lower()
    except Exception:
        return False
    return "7" in kind


def _choose_bn(n_rows, T, Hp, two_tc):
    """Rows per grid tile: big on single-TC chips, >=2 tiles + tighter VMEM budget on 2-TC chips."""
    g = 16                                             # keep row tiles aligned to packed-bf16 vreg groups
    n_rows_g = _round_up(max(n_rows, 1), g)
    bn_cap = 128 if two_tc else 256                    # v7x: 64 MiB VMEM / megacore; v5e/v6e: amortize steps
    budget = (36 if two_tc else 80) << 20              # per-tile scratch budget (bytes)
    per_row = 4 * Hp * (5 * T + 1)                     # gproj + seq + c per batch row (f32 upper bound)
    bn = _round_up(min(bn_cap, n_rows_g), g)
    while bn > g and bn * per_row > budget:
        bn = _round_up(bn // 2, g)
    if two_tc and n_rows_g >= 2 * g:
        bn = min(bn, _round_up((n_rows_g + 1) // 2, g))   # guarantee >= 2 tiles for both cores
    return max(bn, g)


def ch_lstm_forward(e5, params, feat_ch, out_ch, compute_dtype=jnp.bfloat16):
    """e5: (B, C, H, W) -> (B, out_ch, H, W). Layout plumbing in plain JAX."""
    B, C, H, W = e5.shape
    N, T = B * H, W
    Hp = _round_up(feat_ch, 128)            # 128-lane aligned gate blocks
    Op = _round_up(out_ch, 8)               # sublane-only padding on the head output

    two_tc = _two_tensorcores()
    BN = _choose_bn(N, T, Hp, two_tc)
    N_pad = _round_up(N, BN)
    n_tiles = N_pad // BN

    # NCHW -> (N, T, C), pad batch; per tile lay out as (C, t*BN + r) so the kernel's input
    # block is lane-dense along T*BN instead of along C (=4 here).
    x = jnp.transpose(e5, (0, 2, 3, 1)).reshape(N, T, C).astype(jnp.float32)
    x = jnp.pad(x, ((0, N_pad - N), (0, 0), (0, 0)))
    x = x.reshape(n_tiles, BN, T, C).transpose(0, 3, 2, 1).reshape(n_tiles, C, T * BN)

    wp = _prepare_params(params, C, feat_ch, out_ch, Hp, Op, compute_dtype)
    (wih1_t, whh1_t, b1, wih2_t, whh2_t, b2, wlin_t, blin) = wp

    full = lambda a: pl.BlockSpec(a.shape, lambda n: (0,) * a.ndim)

    # VMEM budget: scratch + double-buffered I/O blocks + weights, with headroom.
    wbytes = jnp.dtype(compute_dtype).itemsize
    scratch_bytes = T * BN * 4 * Hp * 4 + T * BN * Hp * wbytes + BN * Hp * 4
    io_bytes = 2 * (8 * T * BN * 4) + 2 * (Op * T * BN * 4)
    w_bytes = sum(int(np.prod(a.shape)) * a.dtype.itemsize for a in wp)
    est = scratch_bytes + io_bytes + 2 * w_bytes
    vmem_cap = (48 if two_tc else 100) << 20
    vmem_limit = int(min(vmem_cap, max(32 << 20, int(1.5 * est) + (4 << 20))))

    out_tiles = pl.pallas_call(
        ch_lstm_kernel,
        out_shape=jax.ShapeDtypeStruct((n_tiles, Op, T * BN), jnp.float32),
        grid_spec=pltpu.PrefetchScalarGridSpec(
            num_scalar_prefetch=0,
            grid=(n_tiles,),
            in_specs=[
                pl.BlockSpec((1, C, T * BN), lambda n: (n, 0, 0)),
                full(wih1_t), full(whh1_t), full(b1),
                full(wih2_t), full(whh2_t), full(b2),
                full(wlin_t), full(blin),
            ],
            out_specs=pl.BlockSpec((1, Op, T * BN), lambda n: (n, 0, 0)),
            scratch_shapes=[
                pltpu.VMEM((T * BN, 4 * Hp), jnp.float32),   # gate slab, all time steps
                pltpu.VMEM((T * BN, Hp), compute_dtype),     # hidden sequence of current layer
                pltpu.VMEM((BN, Hp), jnp.float32),           # cell state
            ],
        ),
        compiler_params=pltpu.CompilerParams(
            dimension_semantics=("parallel",),
            vmem_limit_bytes=vmem_limit,
        ),
    )(x, wih1_t, whh1_t, b1, wih2_t, whh2_t, b2, wlin_t, blin)

    # (n_tiles, Op, T*BN) -> (N_pad, T, Op) -> strip padding -> (B, out_ch, H, W)
    out = out_tiles.reshape(n_tiles, Op, T, BN).transpose(0, 3, 2, 1).reshape(N_pad, T, Op)
    out = out[:N, :, :out_ch].reshape(B, H, W, out_ch)
    return jnp.transpose(out, (0, 3, 1, 2))


def reference_forward(e5, params, feat_ch, out_ch):
    """Pure-JAX reference matching PyTorch nn.LSTM(num_layers=2) + nn.Linear semantics."""
    B, C, H, W = e5.shape
    N = B * H
    x = jnp.transpose(e5, (0, 2, 3, 1)).reshape(N, W, C).astype(jnp.float32)
    (w_ih1, w_hh1, b_ih1, b_hh1, w_ih2, w_hh2, b_ih2, b_hh2, w_lin, b_lin) = params

    def lstm_layer(seq, w_ih, w_hh, b_ih, b_hh):
        def step(carry, xt):
            h, c = carry
            g = xt @ w_ih.T + h @ w_hh.T + b_ih + b_hh
            i = jax.nn.sigmoid(g[:, 0 * feat_ch:1 * feat_ch])
            f = jax.nn.sigmoid(g[:, 1 * feat_ch:2 * feat_ch])
            gg = jnp.tanh(g[:, 2 * feat_ch:3 * feat_ch])
            o = jax.nn.sigmoid(g[:, 3 * feat_ch:4 * feat_ch])
            c = f * c + i * gg
            h = o * jnp.tanh(c)
            return (h, c), h
        h0 = jnp.zeros((N, feat_ch), jnp.float32)
        c0 = jnp.zeros((N, feat_ch), jnp.float32)
        _, hs = jax.lax.scan(step, (h0, c0), jnp.transpose(seq, (1, 0, 2)))
        return jnp.transpose(hs, (1, 0, 2))

    h1 = lstm_layer(x, w_ih1, w_hh1, b_ih1, b_hh1)
    h2 = lstm_layer(h1, w_ih2, w_hh2, b_ih2, b_hh2)
    out = h2 @ w_lin.T + b_lin
    out = out.reshape(B, H, W, out_ch)
    return jnp.transpose(out, (0, 3, 1, 2))


def init_params(key, in_ch, feat_ch, out_ch):
    """Deterministic synthetic parameters in PyTorch layout (uniform ±1/sqrt(hidden))."""
    ks = jax.random.split(key, 10)
    s = 1.0 / np.sqrt(feat_ch)
    u = lambda k, shape: jax.random.uniform(k, shape, jnp.float32, -s, s)
    w_ih1 = u(ks[0], (4 * feat_ch, in_ch))
    w_hh1 = u(ks[1], (4 * feat_ch, feat_ch))
    b_ih1 = u(ks[2], (4 * feat_ch,))
    b_hh1 = u(ks[3], (4 * feat_ch,))
    w_ih2 = u(ks[4], (4 * feat_ch, feat_ch))
    w_hh2 = u(ks[5], (4 * feat_ch, feat_ch))
    b_ih2 = u(ks[6], (4 * feat_ch,))
    b_hh2 = u(ks[7], (4 * feat_ch,))
    w_lin = u(ks[8], (out_ch, feat_ch))
    b_lin = u(ks[9], (out_ch,))
    return (w_ih1, w_hh1, b_ih1, b_hh1, w_ih2, w_hh2, b_ih2, b_hh2, w_lin, b_lin)


if __name__ == "__main__":
    B, C, H, W = 2, 4, 8, 16     # e5 NCHW; LSTM batch = B*H = 16, seq = W = 16
    feat_ch, out_ch = 32, 8

    key = jax.random.PRNGKey(0)
    kx, kp = jax.random.split(key)
    e5 = jax.random.normal(kx, (B, C, H, W), jnp.float32)
    params = init_params(kp, C, feat_ch, out_ch)

    ref = reference_forward(e5, params, feat_ch, out_ch)

    # Fast path: bf16 MXU operands, f32 accumulation (loosened tolerance).
    fwd_bf16 = jax.jit(functools.partial(ch_lstm_forward, feat_ch=feat_ch, out_ch=out_ch,
                                         compute_dtype=jnp.bfloat16))
    out_bf16 = fwd_bf16(e5, params)
    jax.block_until_ready(out_bf16)
    assert out_bf16.shape == (B, out_ch, H, W), out_bf16.shape
    np.testing.assert_allclose(np.asarray(out_bf16), np.asarray(ref), rtol=5e-2, atol=5e-2)

    # Precise path: full f32 compute, tight check of the kernel structure.
    fwd_f32 = jax.jit(functools.partial(ch_lstm_forward, feat_ch=feat_ch, out_ch=out_ch,
                                        compute_dtype=jnp.float32))
    out_f32 = fwd_f32(e5, params)
    jax.block_until_ready(out_f32)
    np.testing.assert_allclose(np.asarray(out_f32), np.asarray(ref), rtol=1e-4, atol=1e-4)

    print("KERNEL_OK")
</pallas_src>

<mosaic_0001>
module attributes {stable_mosaic.version = 11 : i64} {
  func.func @ch_lstm_kernel(%arg0: i32, %arg1: memref<1x4x256xf32, #tpu.memory_space<vmem>>, %arg2: memref<4x512xbf16, #tpu.memory_space<vmem>>, %arg3: memref<128x512xbf16, #tpu.memory_space<vmem>>, %arg4: memref<1x512xf32, #tpu.memory_space<vmem>>, %arg5: memref<128x512xbf16, #tpu.memory_space<vmem>>, %arg6: memref<128x512xbf16, #tpu.memory_space<vmem>>, %arg7: memref<1x512xf32, #tpu.memory_space<vmem>>, %arg8: memref<8x128xbf16, #tpu.memory_space<vmem>>, %arg9: memref<8x1xf32, #tpu.memory_space<vmem>>, %arg10: memref<1x8x256xf32, #tpu.memory_space<vmem>>, %arg11: memref<256x512xf32, #tpu.memory_space<vmem>>, %arg12: memref<256x128xbf16, #tpu.memory_space<vmem>>, %arg13: memref<16x128xf32, #tpu.memory_space<vmem>>) attributes {dimension_semantics = [#tpu.dimension_semantics<parallel>], iteration_bounds = array<i64: 1>, scalar_prefetch = 0 : i64, scratch_operands = 3 : i64, tpu.core_type = #tpu.core_type<tc>, window_params = [{transform_indices = @transform_0, window_bounds = array<i64: 1, 4, 256>}, {pipeline_mode = #tpu.pipeline_mode<synchronous>, transform_indices = @transform_1, window_bounds = array<i64: 4, 512>}, {pipeline_mode = #tpu.pipeline_mode<synchronous>, transform_indices = @transform_2, window_bounds = array<i64: 128, 512>}, {pipeline_mode = #tpu.pipeline_mode<synchronous>, transform_indices = @transform_3, window_bounds = array<i64: 1, 512>}, {pipeline_mode = #tpu.pipeline_mode<synchronous>, transform_indices = @transform_4, window_bounds = array<i64: 128, 512>}, {pipeline_mode = #tpu.pipeline_mode<synchronous>, transform_indices = @transform_5, window_bounds = array<i64: 128, 512>}, {pipeline_mode = #tpu.pipeline_mode<synchronous>, transform_indices = @transform_6, window_bounds = array<i64: 1, 512>}, {pipeline_mode = #tpu.pipeline_mode<synchronous>, transform_indices = @transform_7, window_bounds = array<i64: 8, 128>}, {pipeline_mode = #tpu.pipeline_mode<synchronous>, transform_indices = @transform_8, window_bounds = array<i64: 8, 1>}, {transform_indices = @transform_9, window_bounds = array<i64: 1, 8, 256>}]} {
    %c0 = arith.constant 0 : index
    %c0_0 = arith.constant 0 : index
    %c0_1 = arith.constant 0 : index
    %0 = vector.load %arg1[%c0, %c0_0, %c0_1] : memref<1x4x256xf32, #tpu.memory_space<vmem>>, vector<1x4x256xf32>
    %1 = vector.shape_cast %0 : vector<1x4x256xf32> to vector<4x256xf32>
    %2 = tpu.transpose %1, [1, 0] : vector<4x256xf32> -> vector<256x4xf32>
    %3 = arith.truncf %2 : vector<256x4xf32> to vector<256x4xbf16>
    %c0_2 = arith.constant 0 : index
    %c0_3 = arith.constant 0 : index
    %4 = vector.load %arg2[%c0_2, %c0_3] : memref<4x512xbf16, #tpu.memory_space<vmem>>, vector<4x512xbf16>
    %cst = arith.constant dense<0.000000e+00> : vector<256x512xf32>
    %5 = tpu.matmul %3, %4, %cst {dimension_numbers = #tpu.dot_dimension_numbers<[1], [0], [0], [1], [0, 0, 1, 1], [], []>} : vector<256x4xbf16>, vector<4x512xbf16>, vector<256x512xf32> -> vector<256x512xf32>
    %c0_4 = arith.constant 0 : index
    %c0_5 = arith.constant 0 : index
    %6 = vector.load %arg4[%c0_4, %c0_5] : memref<1x512xf32, #tpu.memory_space<vmem>>, vector<1x512xf32>
    %7 = vector.broadcast %6 : vector<1x512xf32> to vector<256x512xf32>
    %8 = arith.addf %5, %7 : vector<256x512xf32>
    %c0_6 = arith.constant 0 : index
    %c0_7 = arith.constant 0 : index
    %9 = vector.load %arg11[%c0_6, %c0_7] : memref<256x512xf32, #tpu.memory_space<vmem>>, vector<256x512xf32>
    tpu.vector_store %arg11[%c0_6, %c0_7], %8 {strides = array<i32>} : memref<256x512xf32, #tpu.memory_space<vmem>>, vector<256x512xf32>,
    %c0_8 = arith.constant 0 : index
    %c0_9 = arith.constant 0 : index
    %10 = vector.load %arg11[%c0_8, %c0_9] : memref<256x512xf32, #tpu.memory_space<vmem>>, vector<16x128xf32>
    %cst_10 = arith.constant 5.000000e-01 : f32
    %11 = vector.broadcast %cst_10 : f32 to vector<16x128xf32>
    %12 = arith.mulf %11, %10 : vector<16x128xf32>
    %13 = math.tanh %12 : vector<16x128xf32>
    %cst_11 = arith.constant 5.000000e-01 : f32
    %14 = vector.broadcast %cst_11 : f32 to vector<16x128xf32>
    %15 = arith.mulf %14, %13 : vector<16x128xf32>
    %cst_12 = arith.constant 5.000000e-01 : f32
    %16 = vector.broadcast %cst_12 : f32 to vector<16x128xf32>
    %17 = arith.addf %15, %16 : vector<16x128xf32>
    %c0_13 = arith.constant 0 : index
    %c256 = arith.constant 256 : index
    %18 = vector.load %arg11[%c0_13, %c256] : memref<256x512xf32, #tpu.memory_space<vmem>>, vector<16x128xf32>
    %19 = math.tanh %18 : vector<16x128xf32>
    %c0_14 = arith.constant 0 : index
    %c384 = arith.constant 384 : index
    %20 = vector.load %arg11[%c0_14, %c384] : memref<256x512xf32, #tpu.memory_space<vmem>>, vector<16x128xf32>
    %cst_15 = arith.constant 5.000000e-01 : f32
    %21 = vector.broadcast %cst_15 : f32 to vector<16x128xf32>
    %22 = arith.mulf %21, %20 : vector<16x128xf32>
    %23 = math.tanh %22 : vector<16x128xf32>
    %cst_16 = arith.constant 5.000000e-01 : f32
    %24 = vector.broadcast %cst_16 : f32 to vector<16x128xf32>
    %25 = arith.mulf %24, %23 : vector<16x128xf32>
    %cst_17 = arith.constant 5.000000e-01 : f32
    %26 = vector.broadcast %cst_17 : f32 to vector<16x128xf32>
    %27 = arith.addf %25, %26 : vector<16x128xf32>
    %28 = arith.mulf %17, %19 : vector<16x128xf32>
    %29 = math.tanh %28 : vector<16x128xf32>
    %30 = arith.mulf %27, %29 : vector<16x128xf32>
    %c0_18 = arith.constant 0 : index
    %c0_19 = arith.constant 0 : index
    %31 = vector.load %arg13[%c0_18, %c0_19] : memref<16x128xf32, #tpu.memory_space<vmem>>, vector<16x128xf32>
    tpu.vector_store %arg13[%c0_18, %c0_19], %28 {strides = array<i32>} : memref<16x128xf32, #tpu.memory_space<vmem>>, vector<16x128xf32>,
    %32 = arith.truncf %30 : vector<16x128xf32> to vector<16x128xbf16>
    %c0_20 = arith.constant 0 : index
    %c0_21 = arith.constant 0 : index
    %33 = vector.load %arg12[%c0_20, %c0_21] : memref<256x128xbf16, #tpu.memory_space<vmem>>, vector<16x128xbf16>
    tpu.vector_store %arg12[%c0_20, %c0_21], %32 {strides = array<i32>} : memref<256x128xbf16, #tpu.memory_space<vmem>>, vector<16x128xbf16>,
    %c1_i32 = arith.constant 1 : i32
    %c1_i32_22 = arith.constant 1 : i32
    %34 = arith.subi %c1_i32, %c1_i32_22 : i32
    %c16_i32 = arith.constant 16 : i32
    %35 = arith.muli %34, %c16_i32 : i32
    %36 = tpu.assume_multiple %35, 16 : i32
    %c16_i32_23 = arith.constant 16 : i32
    %37 = arith.muli %c1_i32, %c16_i32_23 : i32
    %38 = tpu.assume_multiple %37, 16 : i32
    %39 = arith.index_cast %38 : i32 to index
    %c0_24 = arith.constant 0 : index
    %40 = vector.load %arg11[%39, %c0_24] : memref<256x512xf32, #tpu.memory_space<vmem>>, vector<16x512xf32>
    %41 = arith.index_cast %36 : i32 to index
    %c0_25 = arith.constant 0 : index
    %42 = vector.load %arg12[%41, %c0_25] : memref<256x128xbf16, #tpu.memory_space<vmem>>, vector<16x128xbf16>
    %c0_26 = arith.constant 0 : index
    %c0_27 = arith.constant 0 : index
    %43 = vector.load %arg3[%c0_26, %c0_27] : memref<128x512xbf16, #tpu.memory_space<vmem>>, vector<128x512xbf16>
    %cst_28 = arith.constant dense<0.000000e+00> : vector<16x512xf32>
    %44 = tpu.matmul %42, %43, %cst_28 {dimension_numbers = #tpu.dot_dimension_numbers<[1], [0], [0], [1], [0, 0, 1, 1], [], []>} : vector<16x128xbf16>, vector<128x512xbf16>, vector<16x512xf32> -> vector<16x512xf32>
    %45 = arith.addf %40, %44 : vector<16x512xf32>
    %46 = arith.index_cast %38 : i32 to index
    %c0_29 = arith.constant 0 : index
    %47 = vector.load %arg11[%46, %c0_29] : memref<256x512xf32, #tpu.memory_space<vmem>>, vector<16x512xf32>
    tpu.vector_store %arg11[%46, %c0_29], %45 {strides = array<i32>} : memref<256x512xf32, #tpu.memory_space<vmem>>, vector<16x512xf32>,
    %c0_30 = arith.constant 0 : index
    %c0_31 = arith.constant 0 : index
    %48 = vector.load %arg13[%c0_30, %c0_31] : memref<16x128xf32, #tpu.memory_space<vmem>>, vector<16x128xf32>
    %49 = arith.index_cast %38 : i32 to index
    %c0_32 = arith.constant 0 : index
    %50 = vector.load %arg11[%49, %c0_32] : memref<256x512xf32, #tpu.memory_space<vmem>>, vector<16x128xf32>
    %cst_33 = arith.constant 5.000000e-01 : f32
    %51 = vector.broadcast %cst_33 : f32 to vector<16x128xf32>
    %52 = arith.mulf %51, %50 : vector<16x128xf32>
    %53 = math.tanh %52 : vector<16x128xf32>
    %cst_34 = arith.constant 5.000000e-01 : f32
    %54 = vector.broadcast %cst_34 : f32 to vector<16x128xf32>
    %55 = arith.mulf %54, %53 : vector<16x128xf32>
    %cst_35 = arith.constant 5.000000e-01 : f32
    %56 = vector.broadcast %cst_35 : f32 to vector<16x128xf32>
    %57 = arith.addf %55, %56 : vector<16x128xf32>
    %58 = arith.index_cast %38 : i32 to index
    %c256_36 = arith.constant 256 : index
    %59 = vector.load %arg11[%58, %c256_36] : memref<256x512xf32, #tpu.memory_space<vmem>>, vector<16x128xf32>
    %60 = math.tanh %59 : vector<16x128xf32>
    %61 = arith.index_cast %38 : i32 to index
    %c384_37 = arith.constant 384 : index
    %62 = vector.load %arg11[%61, %c384_37] : memref<256x512xf32, #tpu.memory_space<vmem>>, vector<16x128xf32>
    %cst_38 = arith.constant 5.000000e-01 : f32
    %63 = vector.broadcast %cst_38 : f32 to vector<16x128xf32>
    %64 = arith.mulf %63, %62 : vector<16x128xf32>
    %65 = math.tanh %64 : vector<16x128xf32>
    %cst_39 = arith.constant 5.000000e-01 : f32
    %66 = vector.broadcast %cst_39 : f32 to vector<16x128xf32>
    %67 = arith.mulf %66, %65 : vector<16x128xf32>
    %cst_40 = arith.constant 5.000000e-01 : f32
    %68 = vector.broadcast %cst_40 : f32 to vector<16x128xf32>
    %69 = arith.addf %67, %68 : vector<16x128xf32>
    %70 = arith.index_cast %38 : i32 to index
    %c128 = arith.constant 128 : index
    %71 = vector.load %arg11[%70, %c128] : memref<256x512xf32, #tpu.memory_space<vmem>>, vector<16x128xf32>
    %cst_41 = arith.constant 5.000000e-01 : f32
    %72 = vector.broadcast %cst_41 : f32 to vector<16x128xf32>
    %73 = arith.mulf %72, %71 : vector<16x128xf32>
    %74 = math.tanh %73 : vector<16x128xf32>
    %cst_42 = arith.constant 5.000000e-01 : f32
    %75 = vector.broadcast %cst_42 : f32 to vector<16x128xf32>
    %76 = arith.mulf %75, %74 : vector<16x128xf32>
    %cst_43 = arith.constant 5.000000e-01 : f32
    %77 = vector.broadcast %cst_43 : f32 to vector<16x128xf32>
    %78 = arith.addf %76, %77 : vector<16x128xf32>
    %79 = arith.mulf %78, %48 : vector<16x128xf32>
    %80 = arith.mulf %57, %60 : vector<16x128xf32>
    %81 = arith.addf %79, %80 : vector<16x128xf32>
    %82 = math.tanh %81 : vector<16x128xf32>
    %83 = arith.mulf %69, %82 : vector<16x128xf32>
    %c0_44 = arith.constant 0 : index
    %c0_45 = arith.constant 0 : index
    %84 = vector.load %arg13[%c0_44, %c0_45] : memref<16x128xf32, #tpu.memory_space<vmem>>, vector<16x128xf32>
    tpu.vector_store %arg13[%c0_44, %c0_45], %81 {strides = array<i32>} : memref<16x128xf32, #tpu.memory_space<vmem>>, vector<16x128xf32>,
    %85 = arith.truncf %83 : vector<16x128xf32> to vector<16x128xbf16>
    %86 = arith.index_cast %38 : i32 to index
    %c0_46 = arith.constant 0 : index
    %87 = vector.load %arg12[%86, %c0_46] : memref<256x128xbf16, #tpu.memory_space<vmem>>, vector<16x128xbf16>
    tpu.vector_store %arg12[%86, %c0_46], %85 {strides = array<i32>} : memref<256x128xbf16, #tpu.memory_space<vmem>>, vector<16x128xbf16>,
    %c2_i32 = arith.constant 2 : i32
    %c1_i32_47 = arith.constant 1 : i32
    %88 = arith.subi %c2_i32, %c1_i32_47 : i32
    %c16_i32_48 = arith.constant 16 : i32
    %89 = arith.muli %88, %c16_i32_48 : i32
    %90 = tpu.assume_multiple %89, 16 : i32
    %c16_i32_49 = arith.constant 16 : i32
    %91 = arith.muli %c2_i32, %c16_i32_49 : i32
    %92 = tpu.assume_multiple %91, 16 : i32
    %93 = arith.index_cast %92 : i32 to index
    %c0_50 = arith.constant 0 : index
    %94 = vector.load %arg11[%93, %c0_50] : memref<256x512xf32, #tpu.memory_space<vmem>>, vector<16x512xf32>
    %95 = arith.index_cast %90 : i32 to index
    %c0_51 = arith.constant 0 : index
    %96 = vector.load %arg12[%95, %c0_51] : memref<256x128xbf16, #tpu.memory_space<vmem>>, vector<16x128xbf16>
    %c0_52 = arith.constant 0 : index
    %c0_53 = arith.constant 0 : index
    %97 = vector.load %arg3[%c0_52, %c0_53] : memref<128x512xbf16, #tpu.memory_space<vmem>>, vector<128x512xbf16>
    %cst_54 = arith.constant dense<0.000000e+00> : vector<16x512xf32>
    %98 = tpu.matmul %96, %97, %cst_54 {dimension_numbers = #tpu.dot_dimension_numbers<[1], [0], [0], [1], [0, 0, 1, 1], [], []>} : vector<16x128xbf16>, vector<128x512xbf16>, vector<16x512xf32> -> vector<16x512xf32>
    %99 = arith.addf %94, %98 : vector<16x512xf32>
    %100 = arith.index_cast %92 : i32 to index
    %c0_55 = arith.constant 0 : index
    %101 = vector.load %arg11[%100, %c0_55] : memref<256x512xf32, #tpu.memory_space<vmem>>, vector<16x512xf32>
    tpu.vector_store %arg11[%100, %c0_55], %99 {strides = array<i32>} : memref<256x512xf32, #tpu.memory_space<vmem>>, vector<16x512xf32>,
    %c0_56 = arith.constant 0 : index
    %c0_57 = arith.constant 0 : index
    %102 = vector.load %arg13[%c0_56, %c0_57] : memref<16x128xf32, #tpu.memory_space<vmem>>, vector<16x128xf32>
    %103 = arith.index_cast %92 : i32 to index
    %c0_58 = arith.constant 0 : index
    %104 = vector.load %arg11[%103, %c0_58] : memref<256x512xf32, #tpu.memory_space<vmem>>, vector<16x128xf32>
    %cst_59 = arith.constant 5.000000e-01 : f32
    %105 = vector.broadcast %cst_59 : f32 to vector<16x128xf32>
    %106 = arith.mulf %105, %104 : vector<16x128xf32>
    %107 = math.tanh %106 : vector<16x128xf32>
    %cst_60 = arith.constant 5.000000e-01 : f32
    %108 = vector.broadcast %cst_60 : f32 to vector<16x128xf32>
    %109 = arith.mulf %108, %107 : vector<16x128xf32>
    %cst_61 = arith.constant 5.000000e-01 : f32
    %110 = vector.broadcast %cst_61 : f32 to vector<16x128xf32>
    %111 = arith.addf %109, %110 : vector<16x128xf32>
    %112 = arith.index_cast %92 : i32 to index
    %c256_62 = arith.constant 256 : index
    %113 = vector.load %arg11[%112, %c256_62] : memref<256x512xf32, #tpu.memory_space<vmem>>, vector<16x128xf32>
    %114 = math.tanh %113 : vector<16x128xf32>
    %115 = arith.index_cast %92 : i32 to index
    %c384_63 = arith.constant 384 : index
    %116 = vector.load %arg11[%115, %c384_63] : memref<256x512xf32, #tpu.memory_space<vmem>>, vector<16x128xf32>
    %cst_64 = arith.constant 5.000000e-01 : f32
    %117 = vector.broadcast %cst_64 : f32 to vector<16x128xf32>
    %118 = arith.mulf %117, %116 : vector<16x128xf32>
    %119 = math.tanh %118 : vector<16x128xf32>
    %cst_65 = arith.constant 5.000000e-01 : f32
    %120 = vector.broadcast %cst_65 : f32 to vector<16x128xf32>
    %121 = arith.mulf %120, %119 : vector<16x128xf32>
    %cst_66 = arith.constant 5.000000e-01 : f32
    %122 = vector.broadcast %cst_66 : f32 to vector<16x128xf32>
    %123 = arith.addf %121, %122 : vector<16x128xf32>
    %124 = arith.index_cast %92 : i32 to index
    %c128_67 = arith.constant 128 : index
    %125 = vector.load %arg11[%124, %c128_67] : memref<256x512xf32, #tpu.memory_space<vmem>>, vector<16x128xf32>
    %cst_68 = arith.constant 5.000000e-01 : f32
    %126 = vector.broadcast %cst_68 : f32 to vector<16x128xf32>
    %127 = arith.mulf %126, %125 : vector<16x128xf32>
    %128 = math.tanh %127 : vector<16x128xf32>
    %cst_69 = arith.constant 5.000000e-01 : f32
    %129 = vector.broadcast %cst_69 : f32 to vector<16x128xf32>
    %130 = arith.mulf %129, %128 : vector<16x128xf32>
    %cst_70 = arith.constant 5.000000e-01 : f32
    %131 = vector.broadcast %cst_70 : f32 to vector<16x128xf32>
    %132 = arith.addf %130, %131 : vector<16x128xf32>
    %133 = arith.mulf %132, %102 : vector<16x128xf32>
    %134 = arith.mulf %111, %114 : vector<16x128xf32>
    %135 = arith.addf %133, %134 : vector<16x128xf32>
    %136 = math.tanh %135 : vector<16x128xf32>
    %137 = arith.mulf %123, %136 : vector<16x128xf32>
    %c0_71 = arith.constant 0 : index
    %c0_72 = arith.constant 0 : index
    %138 = vector.load %arg13[%c0_71, %c0_72] : memref<16x128xf32, #tpu.memory_space<vmem>>, vector<16x128xf32>
    tpu.vector_store %arg13[%c0_71, %c0_72], %135 {strides = array<i32>} : memref<16x128xf32, #tpu.memory_space<vmem>>, vector<16x128xf32>,
    %139 = arith.truncf %137 : vector<16x128xf32> to vector<16x128xbf16>
    %140 = arith.index_cast %92 : i32 to index
    %c0_73 = arith.constant 0 : index
    %141 = vector.load %arg12[%140, %c0_73] : memref<256x128xbf16, #tpu.memory_space<vmem>>, vector<16x128xbf16>
    tpu.vector_store %arg12[%140, %c0_73], %139 {strides = array<i32>} : memref<256x128xbf16, #tpu.memory_space<vmem>>, vector<16x128xbf16>,
    %c3_i32 = arith.constant 3 : i32
    %c1_i32_74 = arith.constant 1 : i32
    %142 = arith.subi %c3_i32, %c1_i32_74 : i32
    %c16_i32_75 = arith.constant 16 : i32
    %143 = arith.muli %142, %c16_i32_75 : i32
    %144 = tpu.assume_multiple %143, 16 : i32
    %c16_i32_76 = arith.constant 16 : i32
    %145 = arith.muli %c3_i32, %c16_i32_76 : i32
    %146 = tpu.assume_multiple %145, 16 : i32
    %147 = arith.index_cast %146 : i32 to index
    %c0_77 = arith.constant 0 : index
    %148 = vector.load %arg11[%147, %c0_77] : memref<256x512xf32, #tpu.memory_space<vmem>>, vector<16x512xf32>
    %149 = arith.index_cast %144 : i32 to index
    %c0_78 = arith.constant 0 : index
    %150 = vector.load %arg12[%149, %c0_78] : memref<256x128xbf16, #tpu.memory_space<vmem>>, vector<16x128xbf16>
    %c0_79 = arith.constant 0 : index
    %c0_80 = arith.constant 0 : index
    %151 = vector.load %arg3[%c0_79, %c0_80] : memref<128x512xbf16, #tpu.memory_space<vmem>>, vector<128x512xbf16>
    %cst_81 = arith.constant dense<0.000000e+00> : vector<16x512xf32>
    %152 = tpu.matmul %150, %151, %cst_81 {dimension_numbers = #tpu.dot_dimension_numbers<[1], [0], [0], [1], [0, 0, 1, 1], [], []>} : vector<16x128xbf16>, vector<128x512xbf16>, vector<16x512xf32> -> vector<16x512xf32>
    %153 = arith.addf %148, %152 : vector<16x512xf32>
    %154 = arith.index_cast %146 : i32 to index
    %c0_82 = arith.constant 0 : index
    %155 = vector.load %arg11[%154, %c0_82] : memref<256x512xf32, #tpu.memory_space<vmem>>, vector<16x512xf32>
    tpu.vector_store %arg11[%154, %c0_82], %153 {strides = array<i32>} : memref<256x512xf32, #tpu.memory_space<vmem>>, vector<16x512xf32>,
    %c0_83 = arith.constant 0 : index
    %c0_84 = arith.constant 0 : index
    %156 = vector.load %arg13[%c0_83, %c0_84] : memref<16x128xf32, #tpu.memory_space<vmem>>, vector<16x128xf32>
    %157 = arith.index_cast %146 : i32 to index
    %c0_85 = arith.constant 0 : index
    %158 = vector.load %arg11[%157, %c0_85] : memref<256x512xf32, #tpu.memory_space<vmem>>, vector<16x128xf32>
    %cst_86 = arith.constant 5.000000e-01 : f32
    %159 = vector.broadcast %cst_86 : f32 to vector<16x128xf32>
    %160 = arith.mulf %159, %158 : vector<16x128xf32>
    %161 = math.tanh %160 : vector<16x128xf32>
    %cst_87 = arith.constant 5.000000e-01 : f32
    %162 = vector.broadcast %cst_87 : f32 to vector<16x128xf32>
    %163 = arith.mulf %162, %161 : vector<16x128xf32>
    %cst_88 = arith.constant 5.000000e-01 : f32
    %164 = vector.broadcast %cst_88 : f32 to vector<16x128xf32>
    %165 = arith.addf %163, %164 : vector<16x128xf32>
    %166 = arith.index_cast %146 : i32 to index
    %c256_89 = arith.constant 256 : index
    %167 = vector.load %arg11[%166, %c256_89] : memref<256x512xf32, #tpu.memory_space<vmem>>, vector<16x128xf32>
    %168 = math.tanh %167 : vector<16x128xf32>
    %169 = arith.index_cast %146 : i32 to index
    %c384_90 = arith.constant 384 : index
    %170 = vector.load %arg11[%169, %c384_90] : memref<256x512xf32, #tpu.memory_space<vmem>>, vector<16x128xf32>
    %cst_91 = arith.constant 5.000000e-01 : f32
    %171 = vector.broadcast %cst_91 : f32 to vector<16x128xf32>
    %172 = arith.mulf %171, %170 : vector<16x128xf32>
    %173 = math.tanh %172 : vector<16x128xf32>
    %cst_92 = arith.constant 5.000000e-01 : f32
    %174 = vector.broadcast %cst_92 : f32 to vector<16x128xf32>
    %175 = arith.mulf %174, %173 : vector<16x128xf32>
    %cst_93 = arith.constant 5.000000e-01 : f32
    %176 = vector.broadcast %cst_93 : f32 to vector<16x128xf32>
    %177 = arith.addf %175, %176 : vector<16x128xf32>
    %178 = arith.index_cast %146 : i32 to index
    %c128_94 = arith.constant 128 : index
    %179 = vector.load %arg11[%178, %c128_94] : memref<256x512xf32, #tpu.memory_space<vmem>>, vector<16x128xf32>
    %cst_95 = arith.constant 5.000000e-01 : f32
    %180 = vector.broadcast %cst_95 : f32 to vector<16x128xf32>
    %181 = arith.mulf %180, %179 : vector<16x128xf32>
    %182 = math.tanh %181 : vector<16x128xf32>
    %cst_96 = arith.constant 5.000000e-01 : f32
    %183 = vector.broadcast %cst_96 : f32 to vector<16x128xf32>
    %184 = arith.mulf %183, %182 : vector<16x128xf32>
    %cst_97 = arith.constant 5.000000e-01 : f32
    %185 = vector.broadcast %cst_97 : f32 to vector<16x128xf32>
    %186 = arith.addf %184, %185 : vector<16x128xf32>
    %187 = arith.mulf %186, %156 : vector<16x128xf32>
    %188 = arith.mulf %165, %168 : vector<16x128xf32>
    %189 = arith.addf %187, %188 : vector<16x128xf32>
    %190 = math.tanh %189 : vector<16x128xf32>
    %191 = arith.mulf %177, %190 : vector<16x128xf32>
    %c0_98 = arith.constant 0 : index
    %c0_99 = arith.constant 0 : index
    %192 = vector.load %arg13[%c0_98, %c0_99] : memref<16x128xf32, #tpu.memory_space<vmem>>, vector<16x128xf32>
    tpu.vector_store %arg13[%c0_98, %c0_99], %189 {strides = array<i32>} : memref<16x128xf32, #tpu.memory_space<vmem>>, vector<16x128xf32>,
    %193 = arith.truncf %191 : vector<16x128xf32> to vector<16x128xbf16>
    %194 = arith.index_cast %146 : i32 to index
    %c0_100 = arith.constant 0 : index
    %195 = vector.load %arg12[%194, %c0_100] : memref<256x128xbf16, #tpu.memory_space<vmem>>, vector<16x128xbf16>
    tpu.vector_store %arg12[%194, %c0_100], %193 {strides = array<i32>} : memref<256x128xbf16, #tpu.memory_space<vmem>>, vector<16x128xbf16>,
    %c4_i32 = arith.constant 4 : i32
    %c1_i32_101 = arith.constant 1 : i32
    %196 = arith.subi %c4_i32, %c1_i32_101 : i32
    %c16_i32_102 = arith.constant 16 : i32
    %197 = arith.muli %196, %c16_i32_102 : i32
    %198 = tpu.assume_multiple %197, 16 : i32
    %c16_i32_103 = arith.constant 16 : i32
    %199 = arith.muli %c4_i32, %c16_i32_103 : i32
    %200 = tpu.assume_multiple %199, 16 : i32
    %201 = arith.index_cast %200 : i32 to index
    %c0_104 = arith.constant 0 : index
    %202 = vector.load %arg11[%201, %c0_104] : memref<256x512xf32, #tpu.memory_space<vmem>>, vector<16x512xf32>
    %203 = arith.index_cast %198 : i32 to index
    %c0_105 = arith.constant 0 : index
    %204 = vector.load %arg12[%203, %c0_105] : memref<256x128xbf16, #tpu.memory_space<vmem>>, vector<16x128xbf16>
    %c0_106 = arith.constant 0 : index
    %c0_107 = arith.constant 0 : index
    %205 = vector.load %arg3[%c0_106, %c0_107] : memref<128x512xbf16, #tpu.memory_space<vmem>>, vector<128x512xbf16>
    %cst_108 = arith.constant dense<0.000000e+00> : vector<16x512xf32>
    %206 = tpu.matmul %204, %205, %cst_108 {dimension_numbers = #tpu.dot_dimension_numbers<[1], [0], [0], [1], [0, 0, 1, 1], [], []>} : vector<16x128xbf16>, vector<128x512xbf16>, vector<16x512xf32> -> vector<16x512xf32>
    %207 = arith.addf %202, %206 : vector<16x512xf32>
    %208 = arith.index_cast %200 : i32 to index
    %c0_109 = arith.constant 0 : index
    %209 = vector.load %arg11[%208, %c0_109] : memref<256x512xf32, #tpu.memory_space<vmem>>, vector<16x512xf32>
    tpu.vector_store %arg11[%208, %c0_109], %207 {strides = array<i32>} : memref<256x512xf32, #tpu.memory_space<vmem>>, vector<16x512xf32>,
    %c0_110 = arith.constant 0 : index
    %c0_111 = arith.constant 0 : index
    %210 = vector.load %arg13[%c0_110, %c0_111] : memref<16x128xf32, #tpu.memory_space<vmem>>, vector<16x128xf32>
    %211 = arith.index_cast %200 : i32 to index
    %c0_112 = arith.constant 0 : index
    %212 = vector.load %arg11[%211, %c0_112] : memref<256x512xf32, #tpu.memory_space<vmem>>, vector<16x128xf32>
    %cst_113 = arith.constant 5.000000e-01 : f32
    %213 = vector.broadcast %cst_113 : f32 to vector<16x128xf32>
    %214 = arith.mulf %213, %212 : vector<16x128xf32>
    %215 = math.tanh %214 : vector<16x128xf32>
    %cst_114 = arith.constant 5.000000e-01 : f32
    %216 = vector.broadcast %cst_114 : f32 to vector<16x128xf32>
    %217 = arith.mulf %216, %215 : vector<16x128xf32>
    %cst_115 = arith.constant 5.000000e-01 : f32
    %218 = vector.broadcast %cst_115 : f32 to vector<16x128xf32>
    %219 = arith.addf %217, %218 : vector<16x128xf32>
    %220 = arith.index_cast %200 : i32 to index
    %c256_116 = arith.constant 256 : index
    %221 = vector.load %arg11[%220, %c256_116] : memref<256x512xf32, #tpu.memory_space<vmem>>, vector<16x128xf32>
    %222 = math.tanh %221 : vector<16x128xf32>
    %223 = arith.index_cast %200 : i32 to index
    %c384_117 = arith.constant 384 : index
    %224 = vector.load %arg11[%223, %c384_117] : memref<256x512xf32, #tpu.memory_space<vmem>>, vector<16x128xf32>
    %cst_118 = arith.constant 5.000000e-01 : f32
    %225 = vector.broadcast %cst_118 : f32 to vector<16x128xf32>
    %226 = arith.mulf %225, %224 : vector<16x128xf32>
    %227 = math.tanh %226 : vector<16x128xf32>
    %cst_119 = arith.constant 5.000000e-01 : f32
    %228 = vector.broadcast %cst_119 : f32 to vector<16x128xf32>
    %229 = arith.mulf %228, %227 : vector<16x128xf32>
    %cst_120 = arith.constant 5.000000e-01 : f32
    %230 = vector.broadcast %cst_120 : f32 to vector<16x128xf32>
    %231 = arith.addf %229, %230 : vector<16x128xf32>
    %232 = arith.index_cast %200 : i32 to index
    %c128_121 = arith.constant 128 : index
    %233 = vector.load %arg11[%232, %c128_121] : memref<256x512xf32, #tpu.memory_space<vmem>>, vector<16x128xf32>
    %cst_122 = arith.constant 5.000000e-01 : f32
    %234 = vector.broadcast %cst_122 : f32 to vector<16x128xf32>
    %235 = arith.mulf %234, %233 : vector<16x128xf32>
    %236 = math.tanh %235 : vector<16x128xf32>
    %cst_123 = arith.constant 5.000000e-01 : f32
    %237 = vector.broadcast %cst_123 : f32 to vector<16x128xf32>
    %238 = arith.mulf %237, %236 : vector<16x128xf32>
    %cst_124 = arith.constant 5.000000e-01 : f32
    %239 = vector.broadcast %cst_124 : f32 to vector<16x128xf32>
    %240 = arith.addf %238, %239 : vector<16x128xf32>
    %241 = arith.mulf %240, %210 : vector<16x128xf32>
    %242 = arith.mulf %219, %222 : vector<16x128xf32>
    %243 = arith.addf %241, %242 : vector<16x128xf32>
    %244 = math.tanh %243 : vector<16x128xf32>
    %245 = arith.mulf %231, %244 : vector<16x128xf32>
    %c0_125 = arith.constant 0 : index
    %c0_126 = arith.constant 0 : index
    %246 = vector.load %arg13[%c0_125, %c0_126] : memref<16x128xf32, #tpu.memory_space<vmem>>, vector<16x128xf32>
    tpu.vector_store %arg13[%c0_125, %c0_126], %243 {strides = array<i32>} : memref<16x128xf32, #tpu.memory_space<vmem>>, vector<16x128xf32>,
    %247 = arith.truncf %245 : vector<16x128xf32> to vector<16x128xbf16>
    %248 = arith.index_cast %200 : i32 to index
    %c0_127 = arith.constant 0 : index
    %249 = vector.load %arg12[%248, %c0_127] : memref<256x128xbf16, #tpu.memory_space<vmem>>, vector<16x128xbf16>
    tpu.vector_store %arg12[%248, %c0_127], %247 {strides = array<i32>} : memref<256x128xbf16, #tpu.memory_space<vmem>>, vector<16x128xbf16>,
    %c5_i32 = arith.constant 5 : i32
    %c1_i32_128 = arith.constant 1 : i32
    %250 = arith.subi %c5_i32, %c1_i32_128 : i32
    %c16_i32_129 = arith.constant 16 : i32
    %251 = arith.muli %250, %c16_i32_129 : i32
    %252 = tpu.assume_multiple %251, 16 : i32
    %c16_i32_130 = arith.constant 16 : i32
    %253 = arith.muli %c5_i32, %c16_i32_130 : i32
    %254 = tpu.assume_multiple %253, 16 : i32
    %255 = arith.index_cast %254 : i32 to index
    %c0_131 = arith.constant 0 : index
    %256 = vector.load %arg11[%255, %c0_131] : memref<256x512xf32, #tpu.memory_space<vmem>>, vector<16x512xf32>
    %257 = arith.index_cast %252 : i32 to index
    %c0_132 = arith.constant 0 : index
    %258 = vector.load %arg12[%257, %c0_132] : memref<256x128xbf16, #tpu.memory_space<vmem>>, vector<16x128xbf16>
    %c0_133 = arith.constant 0 : index
    %c0_134 = arith.constant 0 : index
    %259 = vector.load %arg3[%c0_133, %c0_134] : memref<128x512xbf16, #tpu.memory_space<vmem>>, vector<128x512xbf16>
    %cst_135 = arith.constant dense<0.000000e+00> : vector<16x512xf32>
    %260 = tpu.matmul %258, %259, %cst_135 {dimension_numbers = #tpu.dot_dimension_numbers<[1], [0], [0], [1], [0, 0, 1, 1], [], []>} : vector<16x128xbf16>, vector<128x512xbf16>, vector<16x512xf32> -> vector<16x512xf32>
    %261 = arith.addf %256, %260 : vector<16x512xf32>
    %262 = arith.index_cast %254 : i32 to index
    %c0_136 = arith.constant 0 : index
    %263 = vector.load %arg11[%262, %c0_136] : memref<256x512xf32, #tpu.memory_space<vmem>>, vector<16x512xf32>
    tpu.vector_store %arg11[%262, %c0_136], %261 {strides = array<i32>} : memref<256x512xf32, #tpu.memory_space<vmem>>, vector<16x512xf32>,
    %c0_137 = arith.constant 0 : index
    %c0_138 = arith.constant 0 : index
    %264 = vector.load %arg13[%c0_137, %c0_138] : memref<16x128xf32, #tpu.memory_space<vmem>>, vector<16x128xf32>
    %265 = arith.index_cast %254 : i32 to index
    %c0_139 = arith.constant 0 : index
    %266 = vector.load %arg11[%265, %c0_139] : memref<256x512xf32, #tpu.memory_space<vmem>>, vector<16x128xf32>
    %cst_140 = arith.constant 5.000000e-01 : f32
    %267 = vector.broadcast %cst_140 : f32 to vector<16x128xf32>
    %268 = arith.mulf %267, %266 : vector<16x128xf32>
    %269 = math.tanh %268 : vector<16x128xf32>
    %cst_141 = arith.constant 5.000000e-01 : f32
    %270 = vector.broadcast %cst_141 : f32 to vector<16x128xf32>
    %271 = arith.mulf %270, %269 : vector<16x128xf32>
    %cst_142 = arith.constant 5.000000e-01 : f32
    %272 = vector.broadcast %cst_142 : f32 to vector<16x128xf32>
    %273 = arith.addf %271, %272 : vector<16x128xf32>
    %274 = arith.index_cast %254 : i32 to index
    %c256_143 = arith.constant 256 : index
    %275 = vector.load %arg11[%274, %c256_143] : memref<256x512xf32, #tpu.memory_space<vmem>>, vector<16x128xf32>
    %276 = math.tanh %275 : vector<16x128xf32>
    %277 = arith.index_cast %254 : i32 to index
    %c384_144 = arith.constant 384 : index
    %278 = vector.load %arg11[%277, %c384_144] : memref<256x512xf32, #tpu.memory_space<vmem>>, vector<16x128xf32>
    %cst_145 = arith.constant 5.000000e-01 : f32
    %279 = vector.broadcast %cst_145 : f32 to vector<16x128xf32>
    %280 = arith.mulf %279, %278 : vector<16x128xf32>
    %281 = math.tanh %280 : vector<16x128xf32>
    %cst_146 = arith.constant 5.000000e-01 : f32
    %282 = vector.broadcast %cst_146 : f32 to vector<16x128xf32>
    %283 = arith.mulf %282, %281 : vector<16x128xf32>
    %cst_147 = arith.constant 5.000000e-01 : f32
    %284 = vector.broadcast %cst_147 : f32 to vector<16x128xf32>
    %285 = arith.addf %283, %284 : vector<16x128xf32>
    %286 = arith.index_cast %254 : i32 to index
    %c128_148 = arith.constant 128 : index
    %287 = vector.load %arg11[%286, %c128_148] : memref<256x512xf32, #tpu.memory_space<vmem>>, vector<16x128xf32>
    %cst_149 = arith.constant 5.000000e-01 : f32
    %288 = vector.broadcast %cst_149 : f32 to vector<16x128xf32>
    %289 = arith.mulf %288, %287 : vector<16x128xf32>
    %290 = math.tanh %289 : vector<16x128xf32>
    %cst_150 = arith.constant 5.000000e-01 : f32
    %291 = vector.broadcast %cst_150 : f32 to vector<16x128xf32>
    %292 = arith.mulf %291, %290 : vector<16x128xf32>
    %cst_151 = arith.constant 5.000000e-01 : f32
    %293 = vector.broadcast %cst_151 : f32 to vector<16x128xf32>
    %294 = arith.addf %292, %293 : vector<16x128xf32>
    %295 = arith.mulf %294, %264 : vector<16x128xf32>
    %296 = arith.mulf %273, %276 : vector<16x128xf32>
    %297 = arith.addf %295, %296 : vector<16x128xf32>
    %298 = math.tanh %297 : vector<16x128xf32>
    %299 = arith.mulf %285, %298 : vector<16x128xf32>
    %c0_152 = arith.constant 0 : index
    %c0_153 = arith.constant 0 : index
    %300 = vector.load %arg13[%c0_152, %c0_153] : memref<16x128xf32, #tpu.memory_space<vmem>>, vector<16x128xf32>
    tpu.vector_store %arg13[%c0_152, %c0_153], %297 {strides = array<i32>} : memref<16x128xf32, #tpu.memory_space<vmem>>, vector<16x128xf32>,
    %301 = arith.truncf %299 : vector<16x128xf32> to vector<16x128xbf16>
    %302 = arith.index_cast %254 : i32 to index
    %c0_154 = arith.constant 0 : index
    %303 = vector.load %arg12[%302, %c0_154] : memref<256x128xbf16, #tpu.memory_space<vmem>>, vector<16x128xbf16>
    tpu.vector_store %arg12[%302, %c0_154], %301 {strides = array<i32>} : memref<256x128xbf16, #tpu.memory_space<vmem>>, vector<16x128xbf16>,
    %c6_i32 = arith.constant 6 : i32
    %c1_i32_155 = arith.constant 1 : i32
    %304 = arith.subi %c6_i32, %c1_i32_155 : i32
    %c16_i32_156 = arith.constant 16 : i32
    %305 = arith.muli %304, %c16_i32_156 : i32
    %306 = tpu.assume_multiple %305, 16 : i32
    %c16_i32_157 = arith.constant 16 : i32
    %307 = arith.muli %c6_i32, %c16_i32_157 : i32
    %308 = tpu.assume_multiple %307, 16 : i32
    %309 = arith.index_cast %308 : i32 to index
    %c0_158 = arith.constant 0 : index
    %310 = vector.load %arg11[%309, %c0_158] : memref<256x512xf32, #tpu.memory_space<vmem>>, vector<16x512xf32>
    %311 = arith.index_cast %306 : i32 to index
    %c0_159 = arith.constant 0 : index
    %312 = vector.load %arg12[%311, %c0_159] : memref<256x128xbf16, #tpu.memory_space<vmem>>, vector<16x128xbf16>
    %c0_160 = arith.constant 0 : index
    %c0_161 = arith.constant 0 : index
    %313 = vector.load %arg3[%c0_160, %c0_161] : memref<128x512xbf16, #tpu.memory_space<vmem>>, vector<128x512xbf16>
    %cst_162 = arith.constant dense<0.000000e+00> : vector<16x512xf32>
    %314 = tpu.matmul %312, %313, %cst_162 {dimension_numbers = #tpu.dot_dimension_numbers<[1], [0], [0], [1], [0, 0, 1, 1], [], []>} : vector<16x128xbf16>, vector<128x512xbf16>, vector<16x512xf32> -> vector<16x512xf32>
    %315 = arith.addf %310, %314 : vector<16x512xf32>
    %316 = arith.index_cast %308 : i32 to index
    %c0_163 = arith.constant 0 : index
    %317 = vector.load %arg11[%316, %c0_163] : memref<256x512xf32, #tpu.memory_space<vmem>>, vector<16x512xf32>
    tpu.vector_store %arg11[%316, %c0_163], %315 {strides = array<i32>} : memref<256x512xf32, #tpu.memory_space<vmem>>, vector<16x512xf32>,
    %c0_164 = arith.constant 0 : index
    %c0_165 = arith.constant 0 : index
    %318 = vector.load %arg13[%c0_164, %c0_165] : memref<16x128xf32, #tpu.memory_space<vmem>>, vector<16x128xf32>
    %319 = arith.index_cast %308 : i32 to index
    %c0_166 = arith.constant 0 : index
    %320 = vector.load %arg11[%319, %c0_166] : memref<256x512xf32, #tpu.memory_space<vmem>>, vector<16x128xf32>
    %cst_167 = arith.constant 5.000000e-01 : f32
    %321 = vector.broadcast %cst_167 : f32 to vector<16x128xf32>
    %322 = arith.mulf %321, %320 : vector<16x128xf32>
    %323 = math.tanh %322 : vector<16x128xf32>
    %cst_168 = arith.constant 5.000000e-01 : f32
    %324 = vector.broadcast %cst_168 : f32 to vector<16x128xf32>
    %325 = arith.mulf %324, %323 : vector<16x128xf32>
    %cst_169 = arith.constant 5.000000e-01 : f32
    %326 = vector.broadcast %cst_169 : f32 to vector<16x128xf32>
    %327 = arith.addf %325, %326 : vector<16x128xf32>
    %328 = arith.index_cast %308 : i32 to index
    %c256_170 = arith.constant 256 : index
    %329 = vector.load %arg11[%328, %c256_170] : memref<256x512xf32, #tpu.memory_space<vmem>>, vector<16x128xf32>
    %330 = math.tanh %329 : vector<16x128xf32>
    %331 = arith.index_cast %308 : i32 to index
    %c384_171 = arith.constant 384 : index
    %332 = vector.load %arg11[%331, %c384_171] : memref<256x512xf32, #tpu.memory_space<vmem>>, vector<16x128xf32>
    %cst_172 = arith.constant 5.000000e-01 : f32
    %333 = vector.broadcast %cst_172 : f32 to vector<16x128xf32>
    %334 = arith.mulf %333, %332 : vector<16x128xf32>
    %335 = math.tanh %334 : vector<16x128xf32>
    %cst_173 = arith.constant 5.000000e-01 : f32
    %336 = vector.broadcast %cst_173 : f32 to vector<16x128xf32>
    %337 = arith.mulf %336, %335 : vector<16x128xf32>
    %cst_174 = arith.constant 5.000000e-01 : f32
    %338 = vector.broadcast %cst_174 : f32 to vector<16x128xf32>
    %339 = arith.addf %337, %338 : vector<16x128xf32>
    %340 = arith.index_cast %308 : i32 to index
    %c128_175 = arith.constant 128 : index
    %341 = vector.load %arg11[%340, %c128_175] : memref<256x512xf32, #tpu.memory_space<vmem>>, vector<16x128xf32>
    %cst_176 = arith.constant 5.000000e-01 : f32
    %342 = vector.broadcast %cst_176 : f32 to vector<16x128xf32>
    %343 = arith.mulf %342, %341 : vector<16x128xf32>
    %344 = math.tanh %343 : vector<16x128xf32>
    %cst_177 = arith.constant 5.000000e-01 : f32
    %345 = vector.broadcast %cst_177 : f32 to vector<16x128xf32>
    %346 = arith.mulf %345, %344 : vector<16x128xf32>
    %cst_178 = arith.constant 5.000000e-01 : f32
    %347 = vector.broadcast %cst_178 : f32 to vector<16x128xf32>
    %348 = arith.addf %346, %347 : vector<16x128xf32>
    %349 = arith.mulf %348, %318 : vector<16x128xf32>
    %350 = arith.mulf %327, %330 : vector<16x128xf32>
    %351 = arith.addf %349, %350 : vector<16x128xf32>
    %352 = math.tanh %351 : vector<16x128xf32>
    %353 = arith.mulf %339, %352 : vector<16x128xf32>
    %c0_179 = arith.constant 0 : index
    %c0_180 = arith.constant 0 : index
    %354 = vector.load %arg13[%c0_179, %c0_180] : memref<16x128xf32, #tpu.memory_space<vmem>>, vector<16x128xf32>
    tpu.vector_store %arg13[%c0_179, %c0_180], %351 {strides = array<i32>} : memref<16x128xf32, #tpu.memory_space<vmem>>, vector<16x128xf32>,
    %355 = arith.truncf %353 : vector<16x128xf32> to vector<16x128xbf16>
    %356 = arith.index_cast %308 : i32 to index
    %c0_181 = arith.constant 0 : index
    %357 = vector.load %arg12[%356, %c0_181] : memref<256x128xbf16, #tpu.memory_space<vmem>>, vector<16x128xbf16>
    tpu.vector_store %arg12[%356, %c0_181], %355 {strides = array<i32>} : memref<256x128xbf16, #tpu.memory_space<vmem>>, vector<16x128xbf16>,
    %c7_i32 = arith.constant 7 : i32
    %c1_i32_182 = arith.constant 1 : i32
    %358 = arith.subi %c7_i32, %c1_i32_182 : i32
    %c16_i32_183 = arith.constant 16 : i32
    %359 = arith.muli %358, %c16_i32_183 : i32
    %360 = tpu.assume_multiple %359, 16 : i32
    %c16_i32_184 = arith.constant 16 : i32
    %361 = arith.muli %c7_i32, %c16_i32_184 : i32
    %362 = tpu.assume_multiple %361, 16 : i32
    %363 = arith.index_cast %362 : i32 to index
    %c0_185 = arith.constant 0 : index
    %364 = vector.load %arg11[%363, %c0_185] : memref<256x512xf32, #tpu.memory_space<vmem>>, vector<16x512xf32>
    %365 = arith.index_cast %360 : i32 to index
    %c0_186 = arith.constant 0 : index
    %366 = vector.load %arg12[%365, %c0_186] : memref<256x128xbf16, #tpu.memory_space<vmem>>, vector<16x128xbf16>
    %c0_187 = arith.constant 0 : index
    %c0_188 = arith.constant 0 : index
    %367 = vector.load %arg3[%c0_187, %c0_188] : memref<128x512xbf16, #tpu.memory_space<vmem>>, vector<128x512xbf16>
    %cst_189 = arith.constant dense<0.000000e+00> : vector<16x512xf32>
    %368 = tpu.matmul %366, %367, %cst_189 {dimension_numbers = #tpu.dot_dimension_numbers<[1], [0], [0], [1], [0, 0, 1, 1], [], []>} : vector<16x128xbf16>, vector<128x512xbf16>, vector<16x512xf32> -> vector<16x512xf32>
    %369 = arith.addf %364, %368 : vector<16x512xf32>
    %370 = arith.index_cast %362 : i32 to index
    %c0_190 = arith.constant 0 : index
    %371 = vector.load %arg11[%370, %c0_190] : memref<256x512xf32, #tpu.memory_space<vmem>>, vector<16x512xf32>
    tpu.vector_store %arg11[%370, %c0_190], %369 {strides = array<i32>} : memref<256x512xf32, #tpu.memory_space<vmem>>, vector<16x512xf32>,
    %c0_191 = arith.constant 0 : index
    %c0_192 = arith.constant 0 : index
    %372 = vector.load %arg13[%c0_191, %c0_192] : memref<16x128xf32, #tpu.memory_space<vmem>>, vector<16x128xf32>
    %373 = arith.index_cast %362 : i32 to index
    %c0_193 = arith.constant 0 : index
    %374 = vector.load %arg11[%373, %c0_193] : memref<256x512xf32, #tpu.memory_space<vmem>>, vector<16x128xf32>
    %cst_194 = arith.constant 5.000000e-01 : f32
    %375 = vector.broadcast %cst_194 : f32 to vector<16x128xf32>
    %376 = arith.mulf %375, %374 : vector<16x128xf32>
    %377 = math.tanh %376 : vector<16x128xf32>
    %cst_195 = arith.constant 5.000000e-01 : f32
    %378 = vector.broadcast %cst_195 : f32 to vector<16x128xf32>
    %379 = arith.mulf %378, %377 : vector<16x128xf32>
    %cst_196 = arith.constant 5.000000e-01 : f32
    %380 = vector.broadcast %cst_196 : f32 to vector<16x128xf32>
    %381 = arith.addf %379, %380 : vector<16x128xf32>
    %382 = arith.index_cast %362 : i32 to index
    %c256_197 = arith.constant 256 : index
    %383 = vector.load %arg11[%382, %c256_197] : memref<256x512xf32, #tpu.memory_space<vmem>>, vector<16x128xf32>
    %384 = math.tanh %383 : vector<16x128xf32>
    %385 = arith.index_cast %362 : i32 to index
    %c384_198 = arith.constant 384 : index
    %386 = vector.load %arg11[%385, %c384_198] : memref<256x512xf32, #tpu.memory_space<vmem>>, vector<16x128xf32>
    %cst_199 = arith.constant 5.000000e-01 : f32
    %387 = vector.broadcast %cst_199 : f32 to vector<16x128xf32>
    %388 = arith.mulf %387, %386 : vector<16x128xf32>
    %389 = math.tanh %388 : vector<16x128xf32>
    %cst_200 = arith.constant 5.000000e-01 : f32
    %390 = vector.broadcast %cst_200 : f32 to vector<16x128xf32>
    %391 = arith.mulf %390, %389 : vector<16x128xf32>
    %cst_201 = arith.constant 5.000000e-01 : f32
    %392 = vector.broadcast %cst_201 : f32 to vector<16x128xf32>
    %393 = arith.addf %391, %392 : vector<16x128xf32>
    %394 = arith.index_cast %362 : i32 to index
    %c128_202 = arith.constant 128 : index
    %395 = vector.load %arg11[%394, %c128_202] : memref<256x512xf32, #tpu.memory_space<vmem>>, vector<16x128xf32>
    %cst_203 = arith.constant 5.000000e-01 : f32
    %396 = vector.broadcast %cst_203 : f32 to vector<16x128xf32>
    %397 = arith.mulf %396, %395 : vector<16x128xf32>
    %398 = math.tanh %397 : vector<16x128xf32>
    %cst_204 = arith.constant 5.000000e-01 : f32
    %399 = vector.broadcast %cst_204 : f32 to vector<16x128xf32>
    %400 = arith.mulf %399, %398 : vector<16x128xf32>
    %cst_205 = arith.constant 5.000000e-01 : f32
    %401 = vector.broadcast %cst_205 : f32 to vector<16x128xf32>
    %402 = arith.addf %400, %401 : vector<16x128xf32>
    %403 = arith.mulf %402, %372 : vector<16x128xf32>
    %404 = arith.mulf %381, %384 : vector<16x128xf32>
    %405 = arith.addf %403, %404 : vector<16x128xf32>
    %406 = math.tanh %405 : vector<16x128xf32>
    %407 = arith.mulf %393, %406 : vector<16x128xf32>
    %c0_206 = arith.constant 0 : index
    %c0_207 = arith.constant 0 : index
    %408 = vector.load %arg13[%c0_206, %c0_207] : memref<16x128xf32, #tpu.memory_space<vmem>>, vector<16x128xf32>
    tpu.vector_store %arg13[%c0_206, %c0_207], %405 {strides = array<i32>} : memref<16x128xf32, #tpu.memory_space<vmem>>, vector<16x128xf32>,
    %409 = arith.truncf %407 : vector<16x128xf32> to vector<16x128xbf16>
    %410 = arith.index_cast %362 : i32 to index
    %c0_208 = arith.constant 0 : index
    %411 = vector.load %arg12[%410, %c0_208] : memref<256x128xbf16, #tpu.memory_space<vmem>>, vector<16x128xbf16>
    tpu.vector_store %arg12[%410, %c0_208], %409 {strides = array<i32>} : memref<256x128xbf16, #tpu.memory_space<vmem>>, vector<16x128xbf16>,
    %c8_i32 = arith.constant 8 : i32
    %c1_i32_209 = arith.constant 1 : i32
    %412 = arith.subi %c8_i32, %c1_i32_209 : i32
    %c16_i32_210 = arith.constant 16 : i32
    %413 = arith.muli %412, %c16_i32_210 : i32
    %414 = tpu.assume_multiple %413, 16 : i32
    %c16_i32_211 = arith.constant 16 : i32
    %415 = arith.muli %c8_i32, %c16_i32_211 : i32
    %416 = tpu.assume_multiple %415, 16 : i32
    %417 = arith.index_cast %416 : i32 to index
    %c0_212 = arith.constant 0 : index
    %418 = vector.load %arg11[%417, %c0_212] : memref<256x512xf32, #tpu.memory_space<vmem>>, vector<16x512xf32>
    %419 = arith.index_cast %414 : i32 to index
    %c0_213 = arith.constant 0 : index
    %420 = vector.load %arg12[%419, %c0_213] : memref<256x128xbf16, #tpu.memory_space<vmem>>, vector<16x128xbf16>
    %c0_214 = arith.constant 0 : index
    %c0_215 = arith.constant 0 : index
    %421 = vector.load %arg3[%c0_214, %c0_215] : memref<128x512xbf16, #tpu.memory_space<vmem>>, vector<128x512xbf16>
    %cst_216 = arith.constant dense<0.000000e+00> : vector<16x512xf32>
    %422 = tpu.matmul %420, %421, %cst_216 {dimension_numbers = #tpu.dot_dimension_numbers<[1], [0], [0], [1], [0, 0, 1, 1], [], []>} : vector<16x128xbf16>, vector<128x512xbf16>, vector<16x512xf32> -> vector<16x512xf32>
    %423 = arith.addf %418, %422 : vector<16x512xf32>
    %424 = arith.index_cast %416 : i32 to index
    %c0_217 = arith.constant 0 : index
    %425 = vector.load %arg11[%424, %c0_217] : memref<256x512xf32, #tpu.memory_space<vmem>>, vector<16x512xf32>
    tpu.vector_store %arg11[%424, %c0_217], %423 {strides = array<i32>} : memref<256x512xf32, #tpu.memory_space<vmem>>, vector<16x512xf32>,
    %c0_218 = arith.constant 0 : index
    %c0_219 = arith.constant 0 : index
    %426 = vector.load %arg13[%c0_218, %c0_219] : memref<16x128xf32, #tpu.memory_space<vmem>>, vector<16x128xf32>
    %427 = arith.index_cast %416 : i32 to index
    %c0_220 = arith.constant 0 : index
    %428 = vector.load %arg11[%427, %c0_220] : memref<256x512xf32, #tpu.memory_space<vmem>>, vector<16x128xf32>
    %cst_221 = arith.constant 5.000000e-01 : f32
    %429 = vector.broadcast %cst_221 : f32 to vector<16x128xf32>
    %430 = arith.mulf %429, %428 : vector<16x128xf32>
    %431 = math.tanh %430 : vector<16x128xf32>
    %cst_222 = arith.constant 5.000000e-01 : f32
    %432 = vector.broadcast %cst_222 : f32 to vector<16x128xf32>
    %433 = arith.mulf %432, %431 : vector<16x128xf32>
    %cst_223 = arith.constant 5.000000e-01 : f32
    %434 = vector.broadcast %cst_223 : f32 to vector<16x128xf32>
    %435 = arith.addf %433, %434 : vector<16x128xf32>
    %436 = arith.index_cast %416 : i32 to index
    %c256_224 = arith.constant 256 : index
    %437 = vector.load %arg11[%436, %c256_224] : memref<256x512xf32, #tpu.memory_space<vmem>>, vector<16x128xf32>
    %438 = math.tanh %437 : vector<16x128xf32>
    %439 = arith.index_cast %416 : i32 to index
    %c384_225 = arith.constant 384 : index
    %440 = vector.load %arg11[%439, %c384_225] : memref<256x512xf32, #tpu.memory_space<vmem>>, vector<16x128xf32>
    %cst_226 = arith.constant 5.000000e-01 : f32
    %441 = vector.broadcast %cst_226 : f32 to vector<16x128xf32>
    %442 = arith.mulf %441, %440 : vector<16x128xf32>
    %443 = math.tanh %442 : vector<16x128xf32>
    %cst_227 = arith.constant 5.000000e-01 : f32
    %444 = vector.broadcast %cst_227 : f32 to vector<16x128xf32>
    %445 = arith.mulf %444, %443 : vector<16x128xf32>
    %cst_228 = arith.constant 5.000000e-01 : f32
    %446 = vector.broadcast %cst_228 : f32 to vector<16x128xf32>
    %447 = arith.addf %445, %446 : vector<16x128xf32>
    %448 = arith.index_cast %416 : i32 to index
    %c128_229 = arith.constant 128 : index
    %449 = vector.load %arg11[%448, %c128_229] : memref<256x512xf32, #tpu.memory_space<vmem>>, vector<16x128xf32>
    %cst_230 = arith.constant 5.000000e-01 : f32
    %450 = vector.broadcast %cst_230 : f32 to vector<16x128xf32>
    %451 = arith.mulf %450, %449 : vector<16x128xf32>
    %452 = math.tanh %451 : vector<16x128xf32>
    %cst_231 = arith.constant 5.000000e-01 : f32
    %453 = vector.broadcast %cst_231 : f32 to vector<16x128xf32>
    %454 = arith.mulf %453, %452 : vector<16x128xf32>
    %cst_232 = arith.constant 5.000000e-01 : f32
    %455 = vector.broadcast %cst_232 : f32 to vector<16x128xf32>
    %456 = arith.addf %454, %455 : vector<16x128xf32>
    %457 = arith.mulf %456, %426 : vector<16x128xf32>
    %458 = arith.mulf %435, %438 : vector<16x128xf32>
    %459 = arith.addf %457, %458 : vector<16x128xf32>
    %460 = math.tanh %459 : vector<16x128xf32>
    %461 = arith.mulf %447, %460 : vector<16x128xf32>
    %c0_233 = arith.constant 0 : index
    %c0_234 = arith.constant 0 : index
    %462 = vector.load %arg13[%c0_233, %c0_234] : memref<16x128xf32, #tpu.memory_space<vmem>>, vector<16x128xf32>
    tpu.vector_store %arg13[%c0_233, %c0_234], %459 {strides = array<i32>} : memref<16x128xf32, #tpu.memory_space<vmem>>, vector<16x128xf32>,
    %463 = arith.truncf %461 : vector<16x128xf32> to vector<16x128xbf16>
    %464 = arith.index_cast %416 : i32 to index
    %c0_235 = arith.constant 0 : index
    %465 = vector.load %arg12[%464, %c0_235] : memref<256x128xbf16, #tpu.memory_space<vmem>>, vector<16x128xbf16>
    tpu.vector_store %arg12[%464, %c0_235], %463 {strides = array<i32>} : memref<256x128xbf16, #tpu.memory_space<vmem>>, vector<16x128xbf16>,
    %c9_i32 = arith.constant 9 : i32
    %c1_i32_236 = arith.constant 1 : i32
    %466 = arith.subi %c9_i32, %c1_i32_236 : i32
    %c16_i32_237 = arith.constant 16 : i32
    %467 = arith.muli %466, %c16_i32_237 : i32
    %468 = tpu.assume_multiple %467, 16 : i32
    %c16_i32_238 = arith.constant 16 : i32
    %469 = arith.muli %c9_i32, %c16_i32_238 : i32
    %470 = tpu.assume_multiple %469, 16 : i32
    %471 = arith.index_cast %470 : i32 to index
    %c0_239 = arith.constant 0 : index
    %472 = vector.load %arg11[%471, %c0_239] : memref<256x512xf32, #tpu.memory_space<vmem>>, vector<16x512xf32>
    %473 = arith.index_cast %468 : i32 to index
    %c0_240 = arith.constant 0 : index
    %474 = vector.load %arg12[%473, %c0_240] : memref<256x128xbf16, #tpu.memory_space<vmem>>, vector<16x128xbf16>
    %c0_241 = arith.constant 0 : index
    %c0_242 = arith.constant 0 : index
    %475 = vector.load %arg3[%c0_241, %c0_242] : memref<128x512xbf16, #tpu.memory_space<vmem>>, vector<128x512xbf16>
    %cst_243 = arith.constant dense<0.000000e+00> : vector<16x512xf32>
    %476 = tpu.matmul %474, %475, %cst_243 {dimension_numbers = #tpu.dot_dimension_numbers<[1], [0], [0], [1], [0, 0, 1, 1], [], []>} : vector<16x128xbf16>, vector<128x512xbf16>, vector<16x512xf32> -> vector<16x512xf32>
    %477 = arith.addf %472, %476 : vector<16x512xf32>
    %478 = arith.index_cast %470 : i32 to index
    %c0_244 = arith.constant 0 : index
    %479 = vector.load %arg11[%478, %c0_244] : memref<256x512xf32, #tpu.memory_space<vmem>>, vector<16x512xf32>
    tpu.vector_store %arg11[%478, %c0_244], %477 {strides = array<i32>} : memref<256x512xf32, #tpu.memory_space<vmem>>, vector<16x512xf32>,
    %c0_245 = arith.constant 0 : index
    %c0_246 = arith.constant 0 : index
    %480 = vector.load %arg13[%c0_245, %c0_246] : memref<16x128xf32, #tpu.memory_space<vmem>>, vector<16x128xf32>
    %481 = arith.index_cast %470 : i32 to index
    %c0_247 = arith.constant 0 : index
    %482 = vector.load %arg11[%481, %c0_247] : memref<256x512xf32, #tpu.memory_space<vmem>>, vector<16x128xf32>
    %cst_248 = arith.constant 5.000000e-01 : f32
    %483 = vector.broadcast %cst_248 : f32 to vector<16x128xf32>
    %484 = arith.mulf %483, %482 : vector<16x128xf32>
    %485 = math.tanh %484 : vector<16x128xf32>
    %cst_249 = arith.constant 5.000000e-01 : f32
    %486 = vector.broadcast %cst_249 : f32 to vector<16x128xf32>
    %487 = arith.mulf %486, %485 : vector<16x128xf32>
    %cst_250 = arith.constant 5.000000e-01 : f32
    %488 = vector.broadcast %cst_250 : f32 to vector<16x128xf32>
    %489 = arith.addf %487, %488 : vector<16x128xf32>
    %490 = arith.index_cast %470 : i32 to index
    %c256_251 = arith.constant 256 : index
    %491 = vector.load %arg11[%490, %c256_251] : memref<256x512xf32, #tpu.memory_space<vmem>>, vector<16x128xf32>
    %492 = math.tanh %491 : vector<16x128xf32>
    %493 = arith.index_cast %470 : i32 to index
    %c384_252 = arith.constant 384 : index
    %494 = vector.load %arg11[%493, %c384_252] : memref<256x512xf32, #tpu.memory_space<vmem>>, vector<16x128xf32>
    %cst_253 = arith.constant 5.000000e-01 : f32
    %495 = vector.broadcast %cst_253 : f32 to vector<16x128xf32>
    %496 = arith.mulf %495, %494 : vector<16x128xf32>
    %497 = math.tanh %496 : vector<16x128xf32>
    %cst_254 = arith.constant 5.000000e-01 : f32
    %498 = vector.broadcast %cst_254 : f32 to vector<16x128xf32>
    %499 = arith.mulf %498, %497 : vector<16x128xf32>
    %cst_255 = arith.constant 5.000000e-01 : f32
    %500 = vector.broadcast %cst_255 : f32 to vector<16x128xf32>
    %501 = arith.addf %499, %500 : vector<16x128xf32>
    %502 = arith.index_cast %470 : i32 to index
    %c128_256 = arith.constant 128 : index
    %503 = vector.load %arg11[%502, %c128_256] : memref<256x512xf32, #tpu.memory_space<vmem>>, vector<16x128xf32>
    %cst_257 = arith.constant 5.000000e-01 : f32
    %504 = vector.broadcast %cst_257 : f32 to vector<16x128xf32>
    %505 = arith.mulf %504, %503 : vector<16x128xf32>
    %506 = math.tanh %505 : vector<16x128xf32>
    %cst_258 = arith.constant 5.000000e-01 : f32
    %507 = vector.broadcast %cst_258 : f32 to vector<16x128xf32>
    %508 = arith.mulf %507, %506 : vector<16x128xf32>
    %cst_259 = arith.constant 5.000000e-01 : f32
    %509 = vector.broadcast %cst_259 : f32 to vector<16x128xf32>
    %510 = arith.addf %508, %509 : vector<16x128xf32>
    %511 = arith.mulf %510, %480 : vector<16x128xf32>
    %512 = arith.mulf %489, %492 : vector<16x128xf32>
    %513 = arith.addf %511, %512 : vector<16x128xf32>
    %514 = math.tanh %513 : vector<16x128xf32>
    %515 = arith.mulf %501, %514 : vector<16x128xf32>
    %c0_260 = arith.constant 0 : index
    %c0_261 = arith.constant 0 : index
    %516 = vector.load %arg13[%c0_260, %c0_261] : memref<16x128xf32, #tpu.memory_space<vmem>>, vector<16x128xf32>
    tpu.vector_store %arg13[%c0_260, %c0_261], %513 {strides = array<i32>} : memref<16x128xf32, #tpu.memory_space<vmem>>, vector<16x128xf32>,
    %517 = arith.truncf %515 : vector<16x128xf32> to vector<16x128xbf16>
    %518 = arith.index_cast %470 : i32 to index
    %c0_262 = arith.constant 0 : index
    %519 = vector.load %arg12[%518, %c0_262] : memref<256x128xbf16, #tpu.memory_space<vmem>>, vector<16x128xbf16>
    tpu.vector_store %arg12[%518, %c0_262], %517 {strides = array<i32>} : memref<256x128xbf16, #tpu.memory_space<vmem>>, vector<16x128xbf16>,
    %c10_i32 = arith.constant 10 : i32
    %c1_i32_263 = arith.constant 1 : i32
    %520 = arith.subi %c10_i32, %c1_i32_263 : i32
    %c16_i32_264 = arith.constant 16 : i32
    %521 = arith.muli %520, %c16_i32_264 : i32
    %522 = tpu.assume_multiple %521, 16 : i32
    %c16_i32_265 = arith.constant 16 : i32
    %523 = arith.muli %c10_i32, %c16_i32_265 : i32
    %524 = tpu.assume_multiple %523, 16 : i32
    %525 = arith.index_cast %524 : i32 to index
    %c0_266 = arith.constant 0 : index
    %526 = vector.load %arg11[%525, %c0_266] : memref<256x512xf32, #tpu.memory_space<vmem>>, vector<16x512xf32>
    %527 = arith.index_cast %522 : i32 to index
    %c0_267 = arith.constant 0 : index
    %528 = vector.load %arg12[%527, %c0_267] : memref<256x128xbf16, #tpu.memory_space<vmem>>, vector<16x128xbf16>
    %c0_268 = arith.constant 0 : index
    %c0_269 = arith.constant 0 : index
    %529 = vector.load %arg3[%c0_268, %c0_269] : memref<128x512xbf16, #tpu.memory_space<vmem>>, vector<128x512xbf16>
    %cst_270 = arith.constant dense<0.000000e+00> : vector<16x512xf32>
    %530 = tpu.matmul %528, %529, %cst_270 {dimension_numbers = #tpu.dot_dimension_numbers<[1], [0], [0], [1], [0, 0, 1, 1], [], []>} : vector<16x128xbf16>, vector<128x512xbf16>, vector<16x512xf32> -> vector<16x512xf32>
    %531 = arith.addf %526, %530 : vector<16x512xf32>
    %532 = arith.index_cast %524 : i32 to index
    %c0_271 = arith.constant 0 : index
    %533 = vector.load %arg11[%532, %c0_271] : memref<256x512xf32, #tpu.memory_space<vmem>>, vector<16x512xf32>
    tpu.vector_store %arg11[%532, %c0_271], %531 {strides = array<i32>} : memref<256x512xf32, #tpu.memory_space<vmem>>, vector<16x512xf32>,
    %c0_272 = arith.constant 0 : index
    %c0_273 = arith.constant 0 : index
    %534 = vector.load %arg13[%c0_272, %c0_273] : memref<16x128xf32, #tpu.memory_space<vmem>>, vector<16x128xf32>
    %535 = arith.index_cast %524 : i32 to index
    %c0_274 = arith.constant 0 : index
    %536 = vector.load %arg11[%535, %c0_274] : memref<256x512xf32, #tpu.memory_space<vmem>>, vector<16x128xf32>
    %cst_275 = arith.constant 5.000000e-01 : f32
    %537 = vector.broadcast %cst_275 : f32 to vector<16x128xf32>
    %538 = arith.mulf %537, %536 : vector<16x128xf32>
    %539 = math.tanh %538 : vector<16x128xf32>
    %cst_276 = arith.constant 5.000000e-01 : f32
    %540 = vector.broadcast %cst_276 : f32 to vector<16x128xf32>
    %541 = arith.mulf %540, %539 : vector<16x128xf32>
    %cst_277 = arith.constant 5.000000e-01 : f32
    %542 = vector.broadcast %cst_277 : f32 to vector<16x128xf32>
    %543 = arith.addf %541, %542 : vector<16x128xf32>
    %544 = arith.index_cast %524 : i32 to index
    %c256_278 = arith.constant 256 : index
    %545 = vector.load %arg11[%544, %c256_278] : memref<256x512xf32, #tpu.memory_space<vmem>>, vector<16x128xf32>
    %546 = math.tanh %545 : vector<16x128xf32>
    %547 = arith.index_cast %524 : i32 to index
    %c384_279 = arith.constant 384 : index
    %548 = vector.load %arg11[%547, %c384_279] : memref<256x512xf32, #tpu.memory_space<vmem>>, vector<16x128xf32>
    %cst_280 = arith.constant 5.000000e-01 : f32
    %549 = vector.broadcast %cst_280 : f32 to vector<16x128xf32>
    %550 = arith.mulf %549, %548 : vector<16x128xf32>
    %551 = math.tanh %550 : vector<16x128xf32>
    %cst_281 = arith.constant 5.000000e-01 : f32
    %552 = vector.broadcast %cst_281 : f32 to vector<16x128xf32>
    %553 = arith.mulf %552, %551 : vector<16x128xf32>
    %cst_282 = arith.constant 5.000000e-01 : f32
    %554 = vector.broadcast %cst_282 : f32 to vector<16x128xf32>
    %555 = arith.addf %553, %554 : vector<16x128xf32>
    %556 = arith.index_cast %524 : i32 to index
    %c128_283 = arith.constant 128 : index
    %557 = vector.load %arg11[%556, %c128_283] : memref<256x512xf32, #tpu.memory_space<vmem>>, vector<16x128xf32>
    %cst_284 = arith.constant 5.000000e-01 : f32
    %558 = vector.broadcast %cst_284 : f32 to vector<16x128xf32>
    %559 = arith.mulf %558, %557 : vector<16x128xf32>
    %560 = math.tanh %559 : vector<16x128xf32>
    %cst_285 = arith.constant 5.000000e-01 : f32
    %561 = vector.broadcast %cst_285 : f32 to vector<16x128xf32>
    %562 = arith.mulf %561, %560 : vector<16x128xf32>
    %cst_286 = arith.constant 5.000000e-01 : f32
    %563 = vector.broadcast %cst_286 : f32 to vector<16x128xf32>
    %564 = arith.addf %562, %563 : vector<16x128xf32>
    %565 = arith.mulf %564, %534 : vector<16x128xf32>
    %566 = arith.mulf %543, %546 : vector<16x128xf32>
    %567 = arith.addf %565, %566 : vector<16x128xf32>
    %568 = math.tanh %567 : vector<16x128xf32>
    %569 = arith.mulf %555, %568 : vector<16x128xf32>
    %c0_287 = arith.constant 0 : index
    %c0_288 = arith.constant 0 : index
    %570 = vector.load %arg13[%c0_287, %c0_288] : memref<16x128xf32, #tpu.memory_space<vmem>>, vector<16x128xf32>
    tpu.vector_store %arg13[%c0_287, %c0_288], %567 {strides = array<i32>} : memref<16x128xf32, #tpu.memory_space<vmem>>, vector<16x128xf32>,
    %571 = arith.truncf %569 : vector<16x128xf32> to vector<16x128xbf16>
    %572 = arith.index_cast %524 : i32 to index
    %c0_289 = arith.constant 0 : index
    %573 = vector.load %arg12[%572, %c0_289] : memref<256x128xbf16, #tpu.memory_space<vmem>>, vector<16x128xbf16>
    tpu.vector_store %arg12[%572, %c0_289], %571 {strides = array<i32>} : memref<256x128xbf16, #tpu.memory_space<vmem>>, vector<16x128xbf16>,
    %c11_i32 = arith.constant 11 : i32
    %c1_i32_290 = arith.constant 1 : i32
    %574 = arith.subi %c11_i32, %c1_i32_290 : i32
    %c16_i32_291 = arith.constant 16 : i32
    %575 = arith.muli %574, %c16_i32_291 : i32
    %576 = tpu.assume_multiple %575, 16 : i32
    %c16_i32_292 = arith.constant 16 : i32
    %577 = arith.muli %c11_i32, %c16_i32_292 : i32
    %578 = tpu.assume_multiple %577, 16 : i32
    %579 = arith.index_cast %578 : i32 to index
    %c0_293 = arith.constant 0 : index
    %580 = vector.load %arg11[%579, %c0_293] : memref<256x512xf32, #tpu.memory_space<vmem>>, vector<16x512xf32>
    %581 = arith.index_cast %576 : i32 to index
    %c0_294 = arith.constant 0 : index
    %582 = vector.load %arg12[%581, %c0_294] : memref<256x128xbf16, #tpu.memory_space<vmem>>, vector<16x128xbf16>
    %c0_295 = arith.constant 0 : index
    %c0_296 = arith.constant 0 : index
    %583 = vector.load %arg3[%c0_295, %c0_296] : memref<128x512xbf16, #tpu.memory_space<vmem>>, vector<128x512xbf16>
    %cst_297 = arith.constant dense<0.000000e+00> : vector<16x512xf32>
    %584 = tpu.matmul %582, %583, %cst_297 {dimension_numbers = #tpu.dot_dimension_numbers<[1], [0], [0], [1], [0, 0, 1, 1], [], []>} : vector<16x128xbf16>, vector<128x512xbf16>, vector<16x512xf32> -> vector<16x512xf32>
    %585 = arith.addf %580, %584 : vector<16x512xf32>
    %586 = arith.index_cast %578 : i32 to index
    %c0_298 = arith.constant 0 : index
    %587 = vector.load %arg11[%586, %c0_298] : memref<256x512xf32, #tpu.memory_space<vmem>>, vector<16x512xf32>
    tpu.vector_store %arg11[%586, %c0_298], %585 {strides = array<i32>} : memref<256x512xf32, #tpu.memory_space<vmem>>, vector<16x512xf32>,
    %c0_299 = arith.constant 0 : index
    %c0_300 = arith.constant 0 : index
    %588 = vector.load %arg13[%c0_299, %c0_300] : memref<16x128xf32, #tpu.memory_space<vmem>>, vector<16x128xf32>
    %589 = arith.index_cast %578 : i32 to index
    %c0_301 = arith.constant 0 : index
    %590 = vector.load %arg11[%589, %c0_301] : memref<256x512xf32, #tpu.memory_space<vmem>>, vector<16x128xf32>
    %cst_302 = arith.constant 5.000000e-01 : f32
    %591 = vector.broadcast %cst_302 : f32 to vector<16x128xf32>
    %592 = arith.mulf %591, %590 : vector<16x128xf32>
    %593 = math.tanh %592 : vector<16x128xf32>
    %cst_303 = arith.constant 5.000000e-01 : f32
    %594 = vector.broadcast %cst_303 : f32 to vector<16x128xf32>
    %595 = arith.mulf %594, %593 : vector<16x128xf32>
    %cst_304 = arith.constant 5.000000e-01 : f32
    %596 = vector.broadcast %cst_304 : f32 to vector<16x128xf32>
    %597 = arith.addf %595, %596 : vector<16x128xf32>
    %598 = arith.index_cast %578 : i32 to index
    %c256_305 = arith.constant 256 : index
    %599 = vector.load %arg11[%598, %c256_305] : memref<256x512xf32, #tpu.memory_space<vmem>>, vector<16x128xf32>
    %600 = math.tanh %599 : vector<16x128xf32>
    %601 = arith.index_cast %578 : i32 to index
    %c384_306 = arith.constant 384 : index
    %602 = vector.load %arg11[%601, %c384_306] : memref<256x512xf32, #tpu.memory_space<vmem>>, vector<16x128xf32>
    %cst_307 = arith.constant 5.000000e-01 : f32
    %603 = vector.broadcast %cst_307 : f32 to vector<16x128xf32>
    %604 = arith.mulf %603, %602 : vector<16x128xf32>
    %605 = math.tanh %604 : vector<16x128xf32>
    %cst_308 = arith.constant 5.000000e-01 : f32
    %606 = vector.broadcast %cst_308 : f32 to vector<16x128xf32>
    %607 = arith.mulf %606, %605 : vector<16x128xf32>
    %cst_309 = arith.constant 5.000000e-01 : f32
    %608 = vector.broadcast %cst_309 : f32 to vector<16x128xf32>
    %609 = arith.addf %607, %608 : vector<16x128xf32>
    %610 = arith.index_cast %578 : i32 to index
    %c128_310 = arith.constant 128 : index
    %611 = vector.load %arg11[%610, %c128_310] : memref<256x512xf32, #tpu.memory_space<vmem>>, vector<16x128xf32>
    %cst_311 = arith.constant 5.000000e-01 : f32
    %612 = vector.broadcast %cst_311 : f32 to vector<16x128xf32>
    %613 = arith.mulf %612, %611 : vector<16x128xf32>
    %614 = math.tanh %613 : vector<16x128xf32>
    %cst_312 = arith.constant 5.000000e-01 : f32
    %615 = vector.broadcast %cst_312 : f32 to vector<16x128xf32>
    %616 = arith.mulf %615, %614 : vector<16x128xf32>
    %cst_313 = arith.constant 5.000000e-01 : f32
    %617 = vector.broadcast %cst_313 : f32 to vector<16x128xf32>
    %618 = arith.addf %616, %617 : vector<16x128xf32>
    %619 = arith.mulf %618, %588 : vector<16x128xf32>
    %620 = arith.mulf %597, %600 : vector<16x128xf32>
    %621 = arith.addf %619, %620 : vector<16x128xf32>
    %622 = math.tanh %621 : vector<16x128xf32>
    %623 = arith.mulf %609, %622 : vector<16x128xf32>
    %c0_314 = arith.constant 0 : index
    %c0_315 = arith.constant 0 : index
    %624 = vector.load %arg13[%c0_314, %c0_315] : memref<16x128xf32, #tpu.memory_space<vmem>>, vector<16x128xf32>
    tpu.vector_store %arg13[%c0_314, %c0_315], %621 {strides = array<i32>} : memref<16x128xf32, #tpu.memory_space<vmem>>, vector<16x128xf32>,
    %625 = arith.truncf %623 : vector<16x128xf32> to vector<16x128xbf16>
    %626 = arith.index_cast %578 : i32 to index
    %c0_316 = arith.constant 0 : index
    %627 = vector.load %arg12[%626, %c0_316] : memref<256x128xbf16, #tpu.memory_space<vmem>>, vector<16x128xbf16>
    tpu.vector_store %arg12[%626, %c0_316], %625 {strides = array<i32>} : memref<256x128xbf16, #tpu.memory_space<vmem>>, vector<16x128xbf16>,
    %c12_i32 = arith.constant 12 : i32
    %c1_i32_317 = arith.constant 1 : i32
    %628 = arith.subi %c12_i32, %c1_i32_317 : i32
    %c16_i32_318 = arith.constant 16 : i32
    %629 = arith.muli %628, %c16_i32_318 : i32
    %630 = tpu.assume_multiple %629, 16 : i32
    %c16_i32_319 = arith.constant 16 : i32
    %631 = arith.muli %c12_i32, %c16_i32_319 : i32
    %632 = tpu.assume_multiple %631, 16 : i32
    %633 = arith.index_cast %632 : i32 to index
    %c0_320 = arith.constant 0 : index
    %634 = vector.load %arg11[%633, %c0_320] : memref<256x512xf32, #tpu.memory_space<vmem>>, vector<16x512xf32>
    %635 = arith.index_cast %630 : i32 to index
    %c0_321 = arith.constant 0 : index
    %636 = vector.load %arg12[%635, %c0_321] : memref<256x128xbf16, #tpu.memory_space<vmem>>, vector<16x128xbf16>
    %c0_322 = arith.constant 0 : index
    %c0_323 = arith.constant 0 : index
    %637 = vector.load %arg3[%c0_322, %c0_323] : memref<128x512xbf16, #tpu.memory_space<vmem>>, vector<128x512xbf16>
    %cst_324 = arith.constant dense<0.000000e+00> : vector<16x512xf32>
    %638 = tpu.matmul %636, %637, %cst_324 {dimension_numbers = #tpu.dot_dimension_numbers<[1], [0], [0], [1], [0, 0, 1, 1], [], []>} : vector<16x128xbf16>, vector<128x512xbf16>, vector<16x512xf32> -> vector<16x512xf32>
    %639 = arith.addf %634, %638 : vector<16x512xf32>
    %640 = arith.index_cast %632 : i32 to index
    %c0_325 = arith.constant 0 : index
    %641 = vector.load %arg11[%640, %c0_325] : memref<256x512xf32, #tpu.memory_space<vmem>>, vector<16x512xf32>
    tpu.vector_store %arg11[%640, %c0_325], %639 {strides = array<i32>} : memref<256x512xf32, #tpu.memory_space<vmem>>, vector<16x512xf32>,
    %c0_326 = arith.constant 0 : index
    %c0_327 = arith.constant 0 : index
    %642 = vector.load %arg13[%c0_326, %c0_327] : memref<16x128xf32, #tpu.memory_space<vmem>>, vector<16x128xf32>
    %643 = arith.index_cast %632 : i32 to index
    %c0_328 = arith.constant 0 : index
    %644 = vector.load %arg11[%643, %c0_328] : memref<256x512xf32, #tpu.memory_space<vmem>>, vector<16x128xf32>
    %cst_329 = arith.constant 5.000000e-01 : f32
    %645 = vector.broadcast %cst_329 : f32 to vector<16x128xf32>
    %646 = arith.mulf %645, %644 : vector<16x128xf32>
    %647 = math.tanh %646 : vector<16x128xf32>
    %cst_330 = arith.constant 5.000000e-01 : f32
    %648 = vector.broadcast %cst_330 : f32 to vector<16x128xf32>
    %649 = arith.mulf %648, %647 : vector<16x128xf32>
    %cst_331 = arith.constant 5.000000e-01 : f32
    %650 = vector.broadcast %cst_331 : f32 to vector<16x128xf32>
    %651 = arith.addf %649, %650 : vector<16x128xf32>
    %652 = arith.index_cast %632 : i32 to index
    %c256_332 = arith.constant 256 : index
    %653 = vector.load %arg11[%652, %c256_332] : memref<256x512xf32, #tpu.memory_space<vmem>>, vector<16x128xf32>
    %654 = math.tanh %653 : vector<16x128xf32>
    %655 = arith.index_cast %632 : i32 to index
    %c384_333 = arith.constant 384 : index
    %656 = vector.load %arg11[%655, %c384_333] : memref<256x512xf32, #tpu.memory_space<vmem>>, vector<16x128xf32>
    %cst_334 = arith.constant 5.000000e-01 : f32
    %657 = vector.broadcast %cst_334 : f32 to vector<16x128xf32>
    %658 = arith.mulf %657, %656 : vector<16x128xf32>
    %659 = math.tanh %658 : vector<16x128xf32>
    %cst_335 = arith.constant 5.000000e-01 : f32
    %660 = vector.broadcast %cst_335 : f32 to vector<16x128xf32>
    %661 = arith.mulf %660, %659 : vector<16x128xf32>
    %cst_336 = arith.constant 5.000000e-01 : f32
    %662 = vector.broadcast %cst_336 : f32 to vector<16x128xf32>
    %663 = arith.addf %661, %662 : vector<16x128xf32>
    %664 = arith.index_cast %632 : i32 to index
    %c128_337 = arith.constant 128 : index
    %665 = vector.load %arg11[%664, %c128_337] : memref<256x512xf32, #tpu.memory_space<vmem>>, vector<16x128xf32>
    %cst_338 = arith.constant 5.000000e-01 : f32
    %666 = vector.broadcast %cst_338 : f32 to vector<16x128xf32>
    %667 = arith.mulf %666, %665 : vector<16x128xf32>
    %668 = math.tanh %667 : vector<16x128xf32>
    %cst_339 = arith.constant 5.000000e-01 : f32
    %669 = vector.broadcast %cst_339 : f32 to vector<16x128xf32>
    %670 = arith.mulf %669, %668 : vector<16x128xf32>
    %cst_340 = arith.constant 5.000000e-01 : f32
    %671 = vector.broadcast %cst_340 : f32 to vector<16x128xf32>
    %672 = arith.addf %670, %671 : vector<16x128xf32>
    %673 = arith.mulf %672, %642 : vector<16x128xf32>
    %674 = arith.mulf %651, %654 : vector<16x128xf32>
    %675 = arith.addf %673, %674 : vector<16x128xf32>
    %676 = math.tanh %675 : vector<16x128xf32>
    %677 = arith.mulf %663, %676 : vector<16x128xf32>
    %c0_341 = arith.constant 0 : index
    %c0_342 = arith.constant 0 : index
    %678 = vector.load %arg13[%c0_341, %c0_342] : memref<16x128xf32, #tpu.memory_space<vmem>>, vector<16x128xf32>
    tpu.vector_store %arg13[%c0_341, %c0_342], %675 {strides = array<i32>} : memref<16x128xf32, #tpu.memory_space<vmem>>, vector<16x128xf32>,
    %679 = arith.truncf %677 : vector<16x128xf32> to vector<16x128xbf16>
    %680 = arith.index_cast %632 : i32 to index
    %c0_343 = arith.constant 0 : index
    %681 = vector.load %arg12[%680, %c0_343] : memref<256x128xbf16, #tpu.memory_space<vmem>>, vector<16x128xbf16>
    tpu.vector_store %arg12[%680, %c0_343], %679 {strides = array<i32>} : memref<256x128xbf16, #tpu.memory_space<vmem>>, vector<16x128xbf16>,
    %c13_i32 = arith.constant 13 : i32
    %c1_i32_344 = arith.constant 1 : i32
    %682 = arith.subi %c13_i32, %c1_i32_344 : i32
    %c16_i32_345 = arith.constant 16 : i32
    %683 = arith.muli %682, %c16_i32_345 : i32
    %684 = tpu.assume_multiple %683, 16 : i32
    %c16_i32_346 = arith.constant 16 : i32
    %685 = arith.muli %c13_i32, %c16_i32_346 : i32
    %686 = tpu.assume_multiple %685, 16 : i32
    %687 = arith.index_cast %686 : i32 to index
    %c0_347 = arith.constant 0 : index
    %688 = vector.load %arg11[%687, %c0_347] : memref<256x512xf32, #tpu.memory_space<vmem>>, vector<16x512xf32>
    %689 = arith.index_cast %684 : i32 to index
    %c0_348 = arith.constant 0 : index
    %690 = vector.load %arg12[%689, %c0_348] : memref<256x128xbf16, #tpu.memory_space<vmem>>, vector<16x128xbf16>
    %c0_349 = arith.constant 0 : index
    %c0_350 = arith.constant 0 : index
    %691 = vector.load %arg3[%c0_349, %c0_350] : memref<128x512xbf16, #tpu.memory_space<vmem>>, vector<128x512xbf16>
    %cst_351 = arith.constant dense<0.000000e+00> : vector<16x512xf32>
    %692 = tpu.matmul %690, %691, %cst_351 {dimension_numbers = #tpu.dot_dimension_numbers<[1], [0], [0], [1], [0, 0, 1, 1], [], []>} : vector<16x128xbf16>, vector<128x512xbf16>, vector<16x512xf32> -> vector<16x512xf32>
    %693 = arith.addf %688, %692 : vector<16x512xf32>
    %694 = arith.index_cast %686 : i32 to index
    %c0_352 = arith.constant 0 : index
    %695 = vector.load %arg11[%694, %c0_352] : memref<256x512xf32, #tpu.memory_space<vmem>>, vector<16x512xf32>
    tpu.vector_store %arg11[%694, %c0_352], %693 {strides = array<i32>} : memref<256x512xf32, #tpu.memory_space<vmem>>, vector<16x512xf32>,
    %c0_353 = arith.constant 0 : index
    %c0_354 = arith.constant 0 : index
    %696 = vector.load %arg13[%c0_353, %c0_354] : memref<16x128xf32, #tpu.memory_space<vmem>>, vector<16x128xf32>
    %697 = arith.index_cast %686 : i32 to index
    %c0_355 = arith.constant 0 : index
    %698 = vector.load %arg11[%697, %c0_355] : memref<256x512xf32, #tpu.memory_space<vmem>>, vector<16x128xf32>
    %cst_356 = arith.constant 5.000000e-01 : f32
    %699 = vector.broadcast %cst_356 : f32 to vector<16x128xf32>
    %700 = arith.mulf %699, %698 : vector<16x128xf32>
    %701 = math.tanh %700 : vector<16x128xf32>
    %cst_357 = arith.constant 5.000000e-01 : f32
    %702 = vector.broadcast %cst_357 : f32 to vector<16x128xf32>
    %703 = arith.mulf %702, %701 : vector<16x128xf32>
    %cst_358 = arith.constant 5.000000e-01 : f32
    %704 = vector.broadcast %cst_358 : f32 to vector<16x128xf32>
    %705 = arith.addf %703, %704 : vector<16x128xf32>
    %706 = arith.index_cast %686 : i32 to index
    %c256_359 = arith.constant 256 : index
    %707 = vector.load %arg11[%706, %c256_359] : memref<256x512xf32, #tpu.memory_space<vmem>>, vector<16x128xf32>
    %708 = math.tanh %707 : vector<16x128xf32>
    %709 = arith.index_cast %686 : i32 to index
    %c384_360 = arith.constant 384 : index
    %710 = vector.load %arg11[%709, %c384_360] : memref<256x512xf32, #tpu.memory_space<vmem>>, vector<16x128xf32>
    %cst_361 = arith.constant 5.000000e-01 : f32
    %711 = vector.broadcast %cst_361 : f32 to vector<16x128xf32>
    %712 = arith.mulf %711, %710 : vector<16x128xf32>
    %713 = math.tanh %712 : vector<16x128xf32>
    %cst_362 = arith.constant 5.000000e-01 : f32
    %714 = vector.broadcast %cst_362 : f32 to vector<16x128xf32>
    %715 = arith.mulf %714, %713 : vector<16x128xf32>
    %cst_363 = arith.constant 5.000000e-01 : f32
    %716 = vector.broadcast %cst_363 : f32 to vector<16x128xf32>
    %717 = arith.addf %715, %716 : vector<16x128xf32>
    %718 = arith.index_cast %686 : i32 to index
    %c128_364 = arith.constant 128 : index
    %719 = vector.load %arg11[%718, %c128_364] : memref<256x512xf32, #tpu.memory_space<vmem>>, vector<16x128xf32>
    %cst_365 = arith.constant 5.000000e-01 : f32
    %720 = vector.broadcast %cst_365 : f32 to vector<16x128xf32>
    %721 = arith.mulf %720, %719 : vector<16x128xf32>
    %722 = math.tanh %721 : vector<16x128xf32>
    %cst_366 = arith.constant 5.000000e-01 : f32
    %723 = vector.broadcast %cst_366 : f32 to vector<16x128xf32>
    %724 = arith.mulf %723, %722 : vector<16x128xf32>
    %cst_367 = arith.constant 5.000000e-01 : f32
    %725 = vector.broadcast %cst_367 : f32 to vector<16x128xf32>
    %726 = arith.addf %724, %725 : vector<16x128xf32>
    %727 = arith.mulf %726, %696 : vector<16x128xf32>
    %728 = arith.mulf %705, %708 : vector<16x128xf32>
    %729 = arith.addf %727, %728 : vector<16x128xf32>
    %730 = math.tanh %729 : vector<16x128xf32>
    %731 = arith.mulf %717, %730 : vector<16x128xf32>
    %c0_368 = arith.constant 0 : index
    %c0_369 = arith.constant 0 : index
    %732 = vector.load %arg13[%c0_368, %c0_369] : memref<16x128xf32, #tpu.memory_space<vmem>>, vector<16x128xf32>
    tpu.vector_store %arg13[%c0_368, %c0_369], %729 {strides = array<i32>} : memref<16x128xf32, #tpu.memory_space<vmem>>, vector<16x128xf32>,
    %733 = arith.truncf %731 : vector<16x128xf32> to vector<16x128xbf16>
    %734 = arith.index_cast %686 : i32 to index
    %c0_370 = arith.constant 0 : index
    %735 = vector.load %arg12[%734, %c0_370] : memref<256x128xbf16, #tpu.memory_space<vmem>>, vector<16x128xbf16>
    tpu.vector_store %arg12[%734, %c0_370], %733 {strides = array<i32>} : memref<256x128xbf16, #tpu.memory_space<vmem>>, vector<16x128xbf16>,
    %c14_i32 = arith.constant 14 : i32
    %c1_i32_371 = arith.constant 1 : i32
    %736 = arith.subi %c14_i32, %c1_i32_371 : i32
    %c16_i32_372 = arith.constant 16 : i32
    %737 = arith.muli %736, %c16_i32_372 : i32
    %738 = tpu.assume_multiple %737, 16 : i32
    %c16_i32_373 = arith.constant 16 : i32
    %739 = arith.muli %c14_i32, %c16_i32_373 : i32
    %740 = tpu.assume_multiple %739, 16 : i32
    %741 = arith.index_cast %740 : i32 to index
    %c0_374 = arith.constant 0 : index
    %742 = vector.load %arg11[%741, %c0_374] : memref<256x512xf32, #tpu.memory_space<vmem>>, vector<16x512xf32>
    %743 = arith.index_cast %738 : i32 to index
    %c0_375 = arith.constant 0 : index
    %744 = vector.load %arg12[%743, %c0_375] : memref<256x128xbf16, #tpu.memory_space<vmem>>, vector<16x128xbf16>
    %c0_376 = arith.constant 0 : index
    %c0_377 = arith.constant 0 : index
    %745 = vector.load %arg3[%c0_376, %c0_377] : memref<128x512xbf16, #tpu.memory_space<vmem>>, vector<128x512xbf16>
    %cst_378 = arith.constant dense<0.000000e+00> : vector<16x512xf32>
    %746 = tpu.matmul %744, %745, %cst_378 {dimension_numbers = #tpu.dot_dimension_numbers<[1], [0], [0], [1], [0, 0, 1, 1], [], []>} : vector<16x128xbf16>, vector<128x512xbf16>, vector<16x512xf32> -> vector<16x512xf32>
    %747 = arith.addf %742, %746 : vector<16x512xf32>
    %748 = arith.index_cast %740 : i32 to index
    %c0_379 = arith.constant 0 : index
    %749 = vector.load %arg11[%748, %c0_379] : memref<256x512xf32, #tpu.memory_space<vmem>>, vector<16x512xf32>
    tpu.vector_store %arg11[%748, %c0_379], %747 {strides = array<i32>} : memref<256x512xf32, #tpu.memory_space<vmem>>, vector<16x512xf32>,
    %c0_380 = arith.constant 0 : index
    %c0_381 = arith.constant 0 : index
    %750 = vector.load %arg13[%c0_380, %c0_381] : memref<16x128xf32, #tpu.memory_space<vmem>>, vector<16x128xf32>
    %751 = arith.index_cast %740 : i32 to index
    %c0_382 = arith.constant 0 : index
    %752 = vector.load %arg11[%751, %c0_382] : memref<256x512xf32, #tpu.memory_space<vmem>>, vector<16x128xf32>
    %cst_383 = arith.constant 5.000000e-01 : f32
    %753 = vector.broadcast %cst_383 : f32 to vector<16x128xf32>
    %754 = arith.mulf %753, %752 : vector<16x128xf32>
    %755 = math.tanh %754 : vector<16x128xf32>
    %cst_384 = arith.constant 5.000000e-01 : f32
    %756 = vector.broadcast %cst_384 : f32 to vector<16x128xf32>
    %757 = arith.mulf %756, %755 : vector<16x128xf32>
    %cst_385 = arith.constant 5.000000e-01 : f32
    %758 = vector.broadcast %cst_385 : f32 to vector<16x128xf32>
    %759 = arith.addf %757, %758 : vector<16x128xf32>
    %760 = arith.index_cast %740 : i32 to index
    %c256_386 = arith.constant 256 : index
    %761 = vector.load %arg11[%760, %c256_386] : memref<256x512xf32, #tpu.memory_space<vmem>>, vector<16x128xf32>
    %762 = math.tanh %761 : vector<16x128xf32>
    %763 = arith.index_cast %740 : i32 to index
    %c384_387 = arith.constant 384 : index
    %764 = vector.load %arg11[%763, %c384_387] : memref<256x512xf32, #tpu.memory_space<vmem>>, vector<16x128xf32>
    %cst_388 = arith.constant 5.000000e-01 : f32
    %765 = vector.broadcast %cst_388 : f32 to vector<16x128xf32>
    %766 = arith.mulf %765, %764 : vector<16x128xf32>
    %767 = math.tanh %766 : vector<16x128xf32>
    %cst_389 = arith.constant 5.000000e-01 : f32
    %768 = vector.broadcast %cst_389 : f32 to vector<16x128xf32>
    %769 = arith.mulf %768, %767 : vector<16x128xf32>
    %cst_390 = arith.constant 5.000000e-01 : f32
    %770 = vector.broadcast %cst_390 : f32 to vector<16x128xf32>
    %771 = arith.addf %769, %770 : vector<16x128xf32>
    %772 = arith.index_cast %740 : i32 to index
    %c128_391 = arith.constant 128 : index
    %773 = vector.load %arg11[%772, %c128_391] : memref<256x512xf32, #tpu.memory_space<vmem>>, vector<16x128xf32>
    %cst_392 = arith.constant 5.000000e-01 : f32
    %774 = vector.broadcast %cst_392 : f32 to vector<16x128xf32>
    %775 = arith.mulf %774, %773 : vector<16x128xf32>
    %776 = math.tanh %775 : vector<16x128xf32>
    %cst_393 = arith.constant 5.000000e-01 : f32
    %777 = vector.broadcast %cst_393 : f32 to vector<16x128xf32>
    %778 = arith.mulf %777, %776 : vector<16x128xf32>
    %cst_394 = arith.constant 5.000000e-01 : f32
    %779 = vector.broadcast %cst_394 : f32 to vector<16x128xf32>
    %780 = arith.addf %778, %779 : vector<16x128xf32>
    %781 = arith.mulf %780, %750 : vector<16x128xf32>
    %782 = arith.mulf %759, %762 : vector<16x128xf32>
    %783 = arith.addf %781, %782 : vector<16x128xf32>
    %784 = math.tanh %783 : vector<16x128xf32>
    %785 = arith.mulf %771, %784 : vector<16x128xf32>
    %c0_395 = arith.constant 0 : index
    %c0_396 = arith.constant 0 : index
    %786 = vector.load %arg13[%c0_395, %c0_396] : memref<16x128xf32, #tpu.memory_space<vmem>>, vector<16x128xf32>
    tpu.vector_store %arg13[%c0_395, %c0_396], %783 {strides = array<i32>} : memref<16x128xf32, #tpu.memory_space<vmem>>, vector<16x128xf32>,
    %787 = arith.truncf %785 : vector<16x128xf32> to vector<16x128xbf16>
    %788 = arith.index_cast %740 : i32 to index
    %c0_397 = arith.constant 0 : index
    %789 = vector.load %arg12[%788, %c0_397] : memref<256x128xbf16, #tpu.memory_space<vmem>>, vector<16x128xbf16>
    tpu.vector_store %arg12[%788, %c0_397], %787 {strides = array<i32>} : memref<256x128xbf16, #tpu.memory_space<vmem>>, vector<16x128xbf16>,
    %c15_i32 = arith.constant 15 : i32
    %c1_i32_398 = arith.constant 1 : i32
    %790 = arith.subi %c15_i32, %c1_i32_398 : i32
    %c16_i32_399 = arith.constant 16 : i32
    %791 = arith.muli %790, %c16_i32_399 : i32
    %792 = tpu.assume_multiple %791, 16 : i32
    %c16_i32_400 = arith.constant 16 : i32
    %793 = arith.muli %c15_i32, %c16_i32_400 : i32
    %794 = tpu.assume_multiple %793, 16 : i32
    %795 = arith.index_cast %794 : i32 to index
    %c0_401 = arith.constant 0 : index
    %796 = vector.load %arg11[%795, %c0_401] : memref<256x512xf32, #tpu.memory_space<vmem>>, vector<16x512xf32>
    %797 = arith.index_cast %792 : i32 to index
    %c0_402 = arith.constant 0 : index
    %798 = vector.load %arg12[%797, %c0_402] : memref<256x128xbf16, #tpu.memory_space<vmem>>, vector<16x128xbf16>
    %c0_403 = arith.constant 0 : index
    %c0_404 = arith.constant 0 : index
    %799 = vector.load %arg3[%c0_403, %c0_404] : memref<128x512xbf16, #tpu.memory_space<vmem>>, vector<128x512xbf16>
    %cst_405 = arith.constant dense<0.000000e+00> : vector<16x512xf32>
    %800 = tpu.matmul %798, %799, %cst_405 {dimension_numbers = #tpu.dot_dimension_numbers<[1], [0], [0], [1], [0, 0, 1, 1], [], []>} : vector<16x128xbf16>, vector<128x512xbf16>, vector<16x512xf32> -> vector<16x512xf32>
    %801 = arith.addf %796, %800 : vector<16x512xf32>
    %802 = arith.index_cast %794 : i32 to index
    %c0_406 = arith.constant 0 : index
    %803 = vector.load %arg11[%802, %c0_406] : memref<256x512xf32, #tpu.memory_space<vmem>>, vector<16x512xf32>
    tpu.vector_store %arg11[%802, %c0_406], %801 {strides = array<i32>} : memref<256x512xf32, #tpu.memory_space<vmem>>, vector<16x512xf32>,
    %c0_407 = arith.constant 0 : index
    %c0_408 = arith.constant 0 : index
    %804 = vector.load %arg13[%c0_407, %c0_408] : memref<16x128xf32, #tpu.memory_space<vmem>>, vector<16x128xf32>
    %805 = arith.index_cast %794 : i32 to index
    %c0_409 = arith.constant 0 : index
    %806 = vector.load %arg11[%805, %c0_409] : memref<256x512xf32, #tpu.memory_space<vmem>>, vector<16x128xf32>
    %cst_410 = arith.constant 5.000000e-01 : f32
    %807 = vector.broadcast %cst_410 : f32 to vector<16x128xf32>
    %808 = arith.mulf %807, %806 : vector<16x128xf32>
    %809 = math.tanh %808 : vector<16x128xf32>
    %cst_411 = arith.constant 5.000000e-01 : f32
    %810 = vector.broadcast %cst_411 : f32 to vector<16x128xf32>
    %811 = arith.mulf %810, %809 : vector<16x128xf32>
    %cst_412 = arith.constant 5.000000e-01 : f32
    %812 = vector.broadcast %cst_412 : f32 to vector<16x128xf32>
    %813 = arith.addf %811, %812 : vector<16x128xf32>
    %814 = arith.index_cast %794 : i32 to index
    %c256_413 = arith.constant 256 : index
    %815 = vector.load %arg11[%814, %c256_413] : memref<256x512xf32, #tpu.memory_space<vmem>>, vector<16x128xf32>
    %816 = math.tanh %815 : vector<16x128xf32>
    %817 = arith.index_cast %794 : i32 to index
    %c384_414 = arith.constant 384 : index
    %818 = vector.load %arg11[%817, %c384_414] : memref<256x512xf32, #tpu.memory_space<vmem>>, vector<16x128xf32>
    %cst_415 = arith.constant 5.000000e-01 : f32
    %819 = vector.broadcast %cst_415 : f32 to vector<16x128xf32>
    %820 = arith.mulf %819, %818 : vector<16x128xf32>
    %821 = math.tanh %820 : vector<16x128xf32>
    %cst_416 = arith.constant 5.000000e-01 : f32
    %822 = vector.broadcast %cst_416 : f32 to vector<16x128xf32>
    %823 = arith.mulf %822, %821 : vector<16x128xf32>
    %cst_417 = arith.constant 5.000000e-01 : f32
    %824 = vector.broadcast %cst_417 : f32 to vector<16x128xf32>
    %825 = arith.addf %823, %824 : vector<16x128xf32>
    %826 = arith.index_cast %794 : i32 to index
    %c128_418 = arith.constant 128 : index
    %827 = vector.load %arg11[%826, %c128_418] : memref<256x512xf32, #tpu.memory_space<vmem>>, vector<16x128xf32>
    %cst_419 = arith.constant 5.000000e-01 : f32
    %828 = vector.broadcast %cst_419 : f32 to vector<16x128xf32>
    %829 = arith.mulf %828, %827 : vector<16x128xf32>
    %830 = math.tanh %829 : vector<16x128xf32>
    %cst_420 = arith.constant 5.000000e-01 : f32
    %831 = vector.broadcast %cst_420 : f32 to vector<16x128xf32>
    %832 = arith.mulf %831, %830 : vector<16x128xf32>
    %cst_421 = arith.constant 5.000000e-01 : f32
    %833 = vector.broadcast %cst_421 : f32 to vector<16x128xf32>
    %834 = arith.addf %832, %833 : vector<16x128xf32>
    %835 = arith.mulf %834, %804 : vector<16x128xf32>
    %836 = arith.mulf %813, %816 : vector<16x128xf32>
    %837 = arith.addf %835, %836 : vector<16x128xf32>
    %838 = math.tanh %837 : vector<16x128xf32>
    %839 = arith.mulf %825, %838 : vector<16x128xf32>
    %c0_422 = arith.constant 0 : index
    %c0_423 = arith.constant 0 : index
    %840 = vector.load %arg13[%c0_422, %c0_423] : memref<16x128xf32, #tpu.memory_space<vmem>>, vector<16x128xf32>
    tpu.vector_store %arg13[%c0_422, %c0_423], %837 {strides = array<i32>} : memref<16x128xf32, #tpu.memory_space<vmem>>, vector<16x128xf32>,
    %841 = arith.truncf %839 : vector<16x128xf32> to vector<16x128xbf16>
    %842 = arith.index_cast %794 : i32 to index
    %c0_424 = arith.constant 0 : index
    %843 = vector.load %arg12[%842, %c0_424] : memref<256x128xbf16, #tpu.memory_space<vmem>>, vector<16x128xbf16>
    tpu.vector_store %arg12[%842, %c0_424], %841 {strides = array<i32>} : memref<256x128xbf16, #tpu.memory_space<vmem>>, vector<16x128xbf16>,
    %c15_i32_425 = arith.constant 15 : i32
    %c0_426 = arith.constant 0 : index
    %c0_427 = arith.constant 0 : index
    %844 = vector.load %arg12[%c0_426, %c0_427] : memref<256x128xbf16, #tpu.memory_space<vmem>>, vector<256x128xbf16>
    %c0_428 = arith.constant 0 : index
    %c0_429 = arith.constant 0 : index
    %845 = vector.load %arg5[%c0_428, %c0_429] : memref<128x512xbf16, #tpu.memory_space<vmem>>, vector<128x512xbf16>
    %cst_430 = arith.constant dense<0.000000e+00> : vector<256x512xf32>
    %846 = tpu.matmul %844, %845, %cst_430 {dimension_numbers = #tpu.dot_dimension_numbers<[1], [0], [0], [1], [0, 0, 1, 1], [], []>} : vector<256x128xbf16>, vector<128x512xbf16>, vector<256x512xf32> -> vector<256x512xf32>
    %c0_431 = arith.constant 0 : index
    %c0_432 = arith.constant 0 : index
    %847 = vector.load %arg7[%c0_431, %c0_432] : memref<1x512xf32, #tpu.memory_space<vmem>>, vector<1x512xf32>
    %848 = vector.broadcast %847 : vector<1x512xf32> to vector<256x512xf32>
    %849 = arith.addf %846, %848 : vector<256x512xf32>
    %c0_433 = arith.constant 0 : index
    %c0_434 = arith.constant 0 : index
    %850 = vector.load %arg11[%c0_433, %c0_434] : memref<256x512xf32, #tpu.memory_space<vmem>>, vector<256x512xf32>
    tpu.vector_store %arg11[%c0_433, %c0_434], %849 {strides = array<i32>} : memref<256x512xf32, #tpu.memory_space<vmem>>, vector<256x512xf32>,
    %c0_435 = arith.constant 0 : index
    %c0_436 = arith.constant 0 : index
    %851 = vector.load %arg11[%c0_435, %c0_436] : memref<256x512xf32, #tpu.memory_space<vmem>>, vector<16x128xf32>
    %cst_437 = arith.constant 5.000000e-01 : f32
    %852 = vector.broadcast %cst_437 : f32 to vector<16x128xf32>
    %853 = arith.mulf %852, %851 : vector<16x128xf32>
    %854 = math.tanh %853 : vector<16x128xf32>
    %cst_438 = arith.constant 5.000000e-01 : f32
    %855 = vector.broadcast %cst_438 : f32 to vector<16x128xf32>
    %856 = arith.mulf %855, %854 : vector<16x128xf32>
    %cst_439 = arith.constant 5.000000e-01 : f32
    %857 = vector.broadcast %cst_439 : f32 to vector<16x128xf32>
    %858 = arith.addf %856, %857 : vector<16x128xf32>
    %c0_440 = arith.constant 0 : index
    %c256_441 = arith.constant 256 : index
    %859 = vector.load %arg11[%c0_440, %c256_441] : memref<256x512xf32, #tpu.memory_space<vmem>>, vector<16x128xf32>
    %860 = math.tanh %859 : vector<16x128xf32>
    %c0_442 = arith.constant 0 : index
    %c384_443 = arith.constant 384 : index
    %861 = vector.load %arg11[%c0_442, %c384_443] : memref<256x512xf32, #tpu.memory_space<vmem>>, vector<16x128xf32>
    %cst_444 = arith.constant 5.000000e-01 : f32
    %862 = vector.broadcast %cst_444 : f32 to vector<16x128xf32>
    %863 = arith.mulf %862, %861 : vector<16x128xf32>
    %864 = math.tanh %863 : vector<16x128xf32>
    %cst_445 = arith.constant 5.000000e-01 : f32
    %865 = vector.broadcast %cst_445 : f32 to vector<16x128xf32>
    %866 = arith.mulf %865, %864 : vector<16x128xf32>
    %cst_446 = arith.constant 5.000000e-01 : f32
    %867 = vector.broadcast %cst_446 : f32 to vector<16x128xf32>
    %868 = arith.addf %866, %867 : vector<16x128xf32>
    %869 = arith.mulf %858, %860 : vector<16x128xf32>
    %870 = math.tanh %869 : vector<16x128xf32>
    %871 = arith.mulf %868, %870 : vector<16x128xf32>
    %c0_447 = arith.constant 0 : index
    %c0_448 = arith.constant 0 : index
    %872 = vector.load %arg13[%c0_447, %c0_448] : memref<16x128xf32, #tpu.memory_space<vmem>>, vector<16x128xf32>
    tpu.vector_store %arg13[%c0_447, %c0_448], %869 {strides = array<i32>} : memref<16x128xf32, #tpu.memory_space<vmem>>, vector<16x128xf32>,
    %873 = arith.truncf %871 : vector<16x128xf32> to vector<16x128xbf16>
    %c0_449 = arith.constant 0 : index
    %c0_450 = arith.constant 0 : index
    %874 = vector.load %arg12[%c0_449, %c0_450] : memref<256x128xbf16, #tpu.memory_space<vmem>>, vector<16x128xbf16>
    tpu.vector_store %arg12[%c0_449, %c0_450], %873 {strides = array<i32>} : memref<256x128xbf16, #tpu.memory_space<vmem>>, vector<16x128xbf16>,
    %c1_i32_451 = arith.constant 1 : i32
    %c1_i32_452 = arith.constant 1 : i32
    %875 = arith.subi %c1_i32_451, %c1_i32_452 : i32
    %c16_i32_453 = arith.constant 16 : i32
    %876 = arith.muli %875, %c16_i32_453 : i32
    %877 = tpu.assume_multiple %876, 16 : i32
    %c16_i32_454 = arith.constant 16 : i32
    %878 = arith.muli %c1_i32_451, %c16_i32_454 : i32
    %879 = tpu.assume_multiple %878, 16 : i32
    %880 = arith.index_cast %879 : i32 to index
    %c0_455 = arith.constant 0 : index
    %881 = vector.load %arg11[%880, %c0_455] : memref<256x512xf32, #tpu.memory_space<vmem>>, vector<16x512xf32>
    %882 = arith.index_cast %877 : i32 to index
    %c0_456 = arith.constant 0 : index
    %883 = vector.load %arg12[%882, %c0_456] : memref<256x128xbf16, #tpu.memory_space<vmem>>, vector<16x128xbf16>
    %c0_457 = arith.constant 0 : index
    %c0_458 = arith.constant 0 : index
    %884 = vector.load %arg6[%c0_457, %c0_458] : memref<128x512xbf16, #tpu.memory_space<vmem>>, vector<128x512xbf16>
    %cst_459 = arith.constant dense<0.000000e+00> : vector<16x512xf32>
    %885 = tpu.matmul %883, %884, %cst_459 {dimension_numbers = #tpu.dot_dimension_numbers<[1], [0], [0], [1], [0, 0, 1, 1], [], []>} : vector<16x128xbf16>, vector<128x512xbf16>, vector<16x512xf32> -> vector<16x512xf32>
    %886 = arith.addf %881, %885 : vector<16x512xf32>
    %887 = arith.index_cast %879 : i32 to index
    %c0_460 = arith.constant 0 : index
    %888 = vector.load %arg11[%887, %c0_460] : memref<256x512xf32, #tpu.memory_space<vmem>>, vector<16x512xf32>
    tpu.vector_store %arg11[%887, %c0_460], %886 {strides = array<i32>} : memref<256x512xf32, #tpu.memory_space<vmem>>, vector<16x512xf32>,
    %c0_461 = arith.constant 0 : index
    %c0_462 = arith.constant 0 : index
    %889 = vector.load %arg13[%c0_461, %c0_462] : memref<16x128xf32, #tpu.memory_space<vmem>>, vector<16x128xf32>
    %890 = arith.index_cast %879 : i32 to index
    %c0_463 = arith.constant 0 : index
    %891 = vector.load %arg11[%890, %c0_463] : memref<256x512xf32, #tpu.memory_space<vmem>>, vector<16x128xf32>
    %cst_464 = arith.constant 5.000000e-01 : f32
    %892 = vector.broadcast %cst_464 : f32 to vector<16x128xf32>
    %893 = arith.mulf %892, %891 : vector<16x128xf32>
    %894 = math.tanh %893 : vector<16x128xf32>
    %cst_465 = arith.constant 5.000000e-01 : f32
    %895 = vector.broadcast %cst_465 : f32 to vector<16x128xf32>
    %896 = arith.mulf %895, %894 : vector<16x128xf32>
    %cst_466 = arith.constant 5.000000e-01 : f32
    %897 = vector.broadcast %cst_466 : f32 to vector<16x128xf32>
    %898 = arith.addf %896, %897 : vector<16x128xf32>
    %899 = arith.index_cast %879 : i32 to index
    %c256_467 = arith.constant 256 : index
    %900 = vector.load %arg11[%899, %c256_467] : memref<256x512xf32, #tpu.memory_space<vmem>>, vector<16x128xf32>
    %901 = math.tanh %900 : vector<16x128xf32>
    %902 = arith.index_cast %879 : i32 to index
    %c384_468 = arith.constant 384 : index
    %903 = vector.load %arg11[%902, %c384_468] : memref<256x512xf32, #tpu.memory_space<vmem>>, vector<16x128xf32>
    %cst_469 = arith.constant 5.000000e-01 : f32
    %904 = vector.broadcast %cst_469 : f32 to vector<16x128xf32>
    %905 = arith.mulf %904, %903 : vector<16x128xf32>
    %906 = math.tanh %905 : vector<16x128xf32>
    %cst_470 = arith.constant 5.000000e-01 : f32
    %907 = vector.broadcast %cst_470 : f32 to vector<16x128xf32>
    %908 = arith.mulf %907, %906 : vector<16x128xf32>
    %cst_471 = arith.constant 5.000000e-01 : f32
    %909 = vector.broadcast %cst_471 : f32 to vector<16x128xf32>
    %910 = arith.addf %908, %909 : vector<16x128xf32>
    %911 = arith.index_cast %879 : i32 to index
    %c128_472 = arith.constant 128 : index
    %912 = vector.load %arg11[%911, %c128_472] : memref<256x512xf32, #tpu.memory_space<vmem>>, vector<16x128xf32>
    %cst_473 = arith.constant 5.000000e-01 : f32
    %913 = vector.broadcast %cst_473 : f32 to vector<16x128xf32>
    %914 = arith.mulf %913, %912 : vector<16x128xf32>
    %915 = math.tanh %914 : vector<16x128xf32>
    %cst_474 = arith.constant 5.000000e-01 : f32
    %916 = vector.broadcast %cst_474 : f32 to vector<16x128xf32>
    %917 = arith.mulf %916, %915 : vector<16x128xf32>
    %cst_475 = arith.constant 5.000000e-01 : f32
    %918 = vector.broadcast %cst_475 : f32 to vector<16x128xf32>
    %919 = arith.addf %917, %918 : vector<16x128xf32>
    %920 = arith.mulf %919, %889 : vector<16x128xf32>
    %921 = arith.mulf %898, %901 : vector<16x128xf32>
    %922 = arith.addf %920, %921 : vector<16x128xf32>
    %923 = math.tanh %922 : vector<16x128xf32>
    %924 = arith.mulf %910, %923 : vector<16x128xf32>
    %c0_476 = arith.constant 0 : index
    %c0_477 = arith.constant 0 : index
    %925 = vector.load %arg13[%c0_476, %c0_477] : memref<16x128xf32, #tpu.memory_space<vmem>>, vector<16x128xf32>
    tpu.vector_store %arg13[%c0_476, %c0_477], %922 {strides = array<i32>} : memref<16x128xf32, #tpu.memory_space<vmem>>, vector<16x128xf32>,
    %926 = arith.truncf %924 : vector<16x128xf32> to vector<16x128xbf16>
    %927 = arith.index_cast %879 : i32 to index
    %c0_478 = arith.constant 0 : index
    %928 = vector.load %arg12[%927, %c0_478] : memref<256x128xbf16, #tpu.memory_space<vmem>>, vector<16x128xbf16>
    tpu.vector_store %arg12[%927, %c0_478], %926 {strides = array<i32>} : memref<256x128xbf16, #tpu.memory_space<vmem>>, vector<16x128xbf16>,
    %c2_i32_479 = arith.constant 2 : i32
    %c1_i32_480 = arith.constant 1 : i32
    %929 = arith.subi %c2_i32_479, %c1_i32_480 : i32
    %c16_i32_481 = arith.constant 16 : i32
    %930 = arith.muli %929, %c16_i32_481 : i32
    %931 = tpu.assume_multiple %930, 16 : i32
    %c16_i32_482 = arith.constant 16 : i32
    %932 = arith.muli %c2_i32_479, %c16_i32_482 : i32
    %933 = tpu.assume_multiple %932, 16 : i32
    %934 = arith.index_cast %933 : i32 to index
    %c0_483 = arith.constant 0 : index
    %935 = vector.load %arg11[%934, %c0_483] : memref<256x512xf32, #tpu.memory_space<vmem>>, vector<16x512xf32>
    %936 = arith.index_cast %931 : i32 to index
    %c0_484 = arith.constant 0 : index
    %937 = vector.load %arg12[%936, %c0_484] : memref<256x128xbf16, #tpu.memory_space<vmem>>, vector<16x128xbf16>
    %c0_485 = arith.constant 0 : index
    %c0_486 = arith.constant 0 : index
    %938 = vector.load %arg6[%c0_485, %c0_486] : memref<128x512xbf16, #tpu.memory_space<vmem>>, vector<128x512xbf16>
    %cst_487 = arith.constant dense<0.000000e+00> : vector<16x512xf32>
    %939 = tpu.matmul %937, %938, %cst_487 {dimension_numbers = #tpu.dot_dimension_numbers<[1], [0], [0], [1], [0, 0, 1, 1], [], []>} : vector<16x128xbf16>, vector<128x512xbf16>, vector<16x512xf32> -> vector<16x512xf32>
    %940 = arith.addf %935, %939 : vector<16x512xf32>
    %941 = arith.index_cast %933 : i32 to index
    %c0_488 = arith.constant 0 : index
    %942 = vector.load %arg11[%941, %c0_488] : memref<256x512xf32, #tpu.memory_space<vmem>>, vector<16x512xf32>
    tpu.vector_store %arg11[%941, %c0_488], %940 {strides = array<i32>} : memref<256x512xf32, #tpu.memory_space<vmem>>, vector<16x512xf32>,
    %c0_489 = arith.constant 0 : index
    %c0_490 = arith.constant 0 : index
    %943 = vector.load %arg13[%c0_489, %c0_490] : memref<16x128xf32, #tpu.memory_space<vmem>>, vector<16x128xf32>
    %944 = arith.index_cast %933 : i32 to index
    %c0_491 = arith.constant 0 : index
    %945 = vector.load %arg11[%944, %c0_491] : memref<256x512xf32, #tpu.memory_space<vmem>>, vector<16x128xf32>
    %cst_492 = arith.constant 5.000000e-01 : f32
    %946 = vector.broadcast %cst_492 : f32 to vector<16x128xf32>
    %947 = arith.mulf %946, %945 : vector<16x128xf32>
    %948 = math.tanh %947 : vector<16x128xf32>
    %cst_493 = arith.constant 5.000000e-01 : f32
    %949 = vector.broadcast %cst_493 : f32 to vector<16x128xf32>
    %950 = arith.mulf %949, %948 : vector<16x128xf32>
    %cst_494 = arith.constant 5.000000e-01 : f32
    %951 = vector.broadcast %cst_494 : f32 to vector<16x128xf32>
    %952 = arith.addf %950, %951 : vector<16x128xf32>
    %953 = arith.index_cast %933 : i32 to index
    %c256_495 = arith.constant 256 : index
    %954 = vector.load %arg11[%953, %c256_495] : memref<256x512xf32, #tpu.memory_space<vmem>>, vector<16x128xf32>
    %955 = math.tanh %954 : vector<16x128xf32>
    %956 = arith.index_cast %933 : i32 to index
    %c384_496 = arith.constant 384 : index
    %957 = vector.load %arg11[%956, %c384_496] : memref<256x512xf32, #tpu.memory_space<vmem>>, vector<16x128xf32>
    %cst_497 = arith.constant 5.000000e-01 : f32
    %958 = vector.broadcast %cst_497 : f32 to vector<16x128xf32>
    %959 = arith.mulf %958, %957 : vector<16x128xf32>
    %960 = math.tanh %959 : vector<16x128xf32>
    %cst_498 = arith.constant 5.000000e-01 : f32
    %961 = vector.broadcast %cst_498 : f32 to vector<16x128xf32>
    %962 = arith.mulf %961, %960 : vector<16x128xf32>
    %cst_499 = arith.constant 5.000000e-01 : f32
    %963 = vector.broadcast %cst_499 : f32 to vector<16x128xf32>
    %964 = arith.addf %962, %963 : vector<16x128xf32>
    %965 = arith.index_cast %933 : i32 to index
    %c128_500 = arith.constant 128 : index
    %966 = vector.load %arg11[%965, %c128_500] : memref<256x512xf32, #tpu.memory_space<vmem>>, vector<16x128xf32>
    %cst_501 = arith.constant 5.000000e-01 : f32
    %967 = vector.broadcast %cst_501 : f32 to vector<16x128xf32>
    %968 = arith.mulf %967, %966 : vector<16x128xf32>
    %969 = math.tanh %968 : vector<16x128xf32>
    %cst_502 = arith.constant 5.000000e-01 : f32
    %970 = vector.broadcast %cst_502 : f32 to vector<16x128xf32>
    %971 = arith.mulf %970, %969 : vector<16x128xf32>
    %cst_503 = arith.constant 5.000000e-01 : f32
    %972 = vector.broadcast %cst_503 : f32 to vector<16x128xf32>
    %973 = arith.addf %971, %972 : vector<16x128xf32>
    %974 = arith.mulf %973, %943 : vector<16x128xf32>
    %975 = arith.mulf %952, %955 : vector<16x128xf32>
    %976 = arith.addf %974, %975 : vector<16x128xf32>
    %977 = math.tanh %976 : vector<16x128xf32>
    %978 = arith.mulf %964, %977 : vector<16x128xf32>
    %c0_504 = arith.constant 0 : index
    %c0_505 = arith.constant 0 : index
    %979 = vector.load %arg13[%c0_504, %c0_505] : memref<16x128xf32, #tpu.memory_space<vmem>>, vector<16x128xf32>
    tpu.vector_store %arg13[%c0_504, %c0_505], %976 {strides = array<i32>} : memref<16x128xf32, #tpu.memory_space<vmem>>, vector<16x128xf32>,
    %980 = arith.truncf %978 : vector<16x128xf32> to vector<16x128xbf16>
    %981 = arith.index_cast %933 : i32 to index
    %c0_506 = arith.constant 0 : index
    %982 = vector.load %arg12[%981, %c0_506] : memref<256x128xbf16, #tpu.memory_space<vmem>>, vector<16x128xbf16>
    tpu.vector_store %arg12[%981, %c0_506], %980 {strides = array<i32>} : memref<256x128xbf16, #tpu.memory_space<vmem>>, vector<16x128xbf16>,
    %c3_i32_507 = arith.constant 3 : i32
    %c1_i32_508 = arith.constant 1 : i32
    %983 = arith.subi %c3_i32_507, %c1_i32_508 : i32
    %c16_i32_509 = arith.constant 16 : i32
    %984 = arith.muli %983, %c16_i32_509 : i32
    %985 = tpu.assume_multiple %984, 16 : i32
    %c16_i32_510 = arith.constant 16 : i32
    %986 = arith.muli %c3_i32_507, %c16_i32_510 : i32
    %987 = tpu.assume_multiple %986, 16 : i32
    %988 = arith.index_cast %987 : i32 to index
    %c0_511 = arith.constant 0 : index
    %989 = vector.load %arg11[%988, %c0_511] : memref<256x512xf32, #tpu.memory_space<vmem>>, vector<16x512xf32>
    %990 = arith.index_cast %985 : i32 to index
    %c0_512 = arith.constant 0 : index
    %991 = vector.load %arg12[%990, %c0_512] : memref<256x128xbf16, #tpu.memory_space<vmem>>, vector<16x128xbf16>
    %c0_513 = arith.constant 0 : index
    %c0_514 = arith.constant 0 : index
    %992 = vector.load %arg6[%c0_513, %c0_514] : memref<128x512xbf16, #tpu.memory_space<vmem>>, vector<128x512xbf16>
    %cst_515 = arith.constant dense<0.000000e+00> : vector<16x512xf32>
    %993 = tpu.matmul %991, %992, %cst_515 {dimension_numbers = #tpu.dot_dimension_numbers<[1], [0], [0], [1], [0, 0, 1, 1], [], []>} : vector<16x128xbf16>, vector<128x512xbf16>, vector<16x512xf32> -> vector<16x512xf32>
    %994 = arith.addf %989, %993 : vector<16x512xf32>
    %995 = arith.index_cast %987 : i32 to index
    %c0_516 = arith.constant 0 : index
    %996 = vector.load %arg11[%995, %c0_516] : memref<256x512xf32, #tpu.memory_space<vmem>>, vector<16x512xf32>
    tpu.vector_store %arg11[%995, %c0_516], %994 {strides = array<i32>} : memref<256x512xf32, #tpu.memory_space<vmem>>, vector<16x512xf32>,
    %c0_517 = arith.constant 0 : index
    %c0_518 = arith.constant 0 : index
    %997 = vector.load %arg13[%c0_517, %c0_518] : memref<16x128xf32, #tpu.memory_space<vmem>>, vector<16x128xf32>
    %998 = arith.index_cast %987 : i32 to index
    %c0_519 = arith.constant 0 : index
    %999 = vector.load %arg11[%998, %c0_519] : memref<256x512xf32, #tpu.memory_space<vmem>>, vector<16x128xf32>
    %cst_520 = arith.constant 5.000000e-01 : f32
    %1000 = vector.broadcast %cst_520 : f32 to vector<16x128xf32>
    %1001 = arith.mulf %1000, %999 : vector<16x128xf32>
    %1002 = math.tanh %1001 : vector<16x128xf32>
    %cst_521 = arith.constant 5.000000e-01 : f32
    %1003 = vector.broadcast %cst_521 : f32 to vector<16x128xf32>
    %1004 = arith.mulf %1003, %1002 : vector<16x128xf32>
    %cst_522 = arith.constant 5.000000e-01 : f32
    %1005 = vector.broadcast %cst_522 : f32 to vector<16x128xf32>
    %1006 = arith.addf %1004, %1005 : vector<16x128xf32>
    %1007 = arith.index_cast %987 : i32 to index
    %c256_523 = arith.constant 256 : index
    %1008 = vector.load %arg11[%1007, %c256_523] : memref<256x512xf32, #tpu.memory_space<vmem>>, vector<16x128xf32>
    %1009 = math.tanh %1008 : vector<16x128xf32>
    %1010 = arith.index_cast %987 : i32 to index
    %c384_524 = arith.constant 384 : index
    %1011 = vector.load %arg11[%1010, %c384_524] : memref<256x512xf32, #tpu.memory_space<vmem>>, vector<16x128xf32>
    %cst_525 = arith.constant 5.000000e-01 : f32
    %1012 = vector.broadcast %cst_525 : f32 to vector<16x128xf32>
    %1013 = arith.mulf %1012, %1011 : vector<16x128xf32>
    %1014 = math.tanh %1013 : vector<16x128xf32>
    %cst_526 = arith.constant 5.000000e-01 : f32
    %1015 = vector.broadcast %cst_526 : f32 to vector<16x128xf32>
    %1016 = arith.mulf %1015, %1014 : vector<16x128xf32>
    %cst_527 = arith.constant 5.000000e-01 : f32
    %1017 = vector.broadcast %cst_527 : f32 to vector<16x128xf32>
    %1018 = arith.addf %1016, %1017 : vector<16x128xf32>
    %1019 = arith.index_cast %987 : i32 to index
    %c128_528 = arith.constant 128 : index
    %1020 = vector.load %arg11[%1019, %c128_528] : memref<256x512xf32, #tpu.memory_space<vmem>>, vector<16x128xf32>
    %cst_529 = arith.constant 5.000000e-01 : f32
    %1021 = vector.broadcast %cst_529 : f32 to vector<16x128xf32>
    %1022 = arith.mulf %1021, %1020 : vector<16x128xf32>
    %1023 = math.tanh %1022 : vector<16x128xf32>
    %cst_530 = arith.constant 5.000000e-01 : f32
    %1024 = vector.broadcast %cst_530 : f32 to vector<16x128xf32>
    %1025 = arith.mulf %1024, %1023 : vector<16x128xf32>
    %cst_531 = arith.constant 5.000000e-01 : f32
    %1026 = vector.broadcast %cst_531 : f32 to vector<16x128xf32>
    %1027 = arith.addf %1025, %1026 : vector<16x128xf32>
    %1028 = arith.mulf %1027, %997 : vector<16x128xf32>
    %1029 = arith.mulf %1006, %1009 : vector<16x128xf32>
    %1030 = arith.addf %1028, %1029 : vector<16x128xf32>
    %1031 = math.tanh %1030 : vector<16x128xf32>
    %1032 = arith.mulf %1018, %1031 : vector<16x128xf32>
    %c0_532 = arith.constant 0 : index
    %c0_533 = arith.constant 0 : index
    %1033 = vector.load %arg13[%c0_532, %c0_533] : memref<16x128xf32, #tpu.memory_space<vmem>>, vector<16x128xf32>
    tpu.vector_store %arg13[%c0_532, %c0_533], %1030 {strides = array<i32>} : memref<16x128xf32, #tpu.memory_space<vmem>>, vector<16x128xf32>,
    %1034 = arith.truncf %1032 : vector<16x128xf32> to vector<16x128xbf16>
    %1035 = arith.index_cast %987 : i32 to index
    %c0_534 = arith.constant 0 : index
    %1036 = vector.load %arg12[%1035, %c0_534] : memref<256x128xbf16, #tpu.memory_space<vmem>>, vector<16x128xbf16>
    tpu.vector_store %arg12[%1035, %c0_534], %1034 {strides = array<i32>} : memref<256x128xbf16, #tpu.memory_space<vmem>>, vector<16x128xbf16>,
    %c4_i32_535 = arith.constant 4 : i32
    %c1_i32_536 = arith.constant 1 : i32
    %1037 = arith.subi %c4_i32_535, %c1_i32_536 : i32
    %c16_i32_537 = arith.constant 16 : i32
    %1038 = arith.muli %1037, %c16_i32_537 : i32
    %1039 = tpu.assume_multiple %1038, 16 : i32
    %c16_i32_538 = arith.constant 16 : i32
    %1040 = arith.muli %c4_i32_535, %c16_i32_538 : i32
    %1041 = tpu.assume_multiple %1040, 16 : i32
    %1042 = arith.index_cast %1041 : i32 to index
    %c0_539 = arith.constant 0 : index
    %1043 = vector.load %arg11[%1042, %c0_539] : memref<256x512xf32, #tpu.memory_space<vmem>>, vector<16x512xf32>
    %1044 = arith.index_cast %1039 : i32 to index
    %c0_540 = arith.constant 0 : index
    %1045 = vector.load %arg12[%1044, %c0_540] : memref<256x128xbf16, #tpu.memory_space<vmem>>, vector<16x128xbf16>
    %c0_541 = arith.constant 0 : index
    %c0_542 = arith.constant 0 : index
    %1046 = vector.load %arg6[%c0_541, %c0_542] : memref<128x512xbf16, #tpu.memory_space<vmem>>, vector<128x512xbf16>
    %cst_543 = arith.constant dense<0.000000e+00> : vector<16x512xf32>
    %1047 = tpu.matmul %1045, %1046, %cst_543 {dimension_numbers = #tpu.dot_dimension_numbers<[1], [0], [0], [1], [0, 0, 1, 1], [], []>} : vector<16x128xbf16>, vector<128x512xbf16>, vector<16x512xf32> -> vector<16x512xf32>
    %1048 = arith.addf %1043, %1047 : vector<16x512xf32>
    %1049 = arith.index_cast %1041 : i32 to index
    %c0_544 = arith.constant 0 : index
    %1050 = vector.load %arg11[%1049, %c0_544] : memref<256x512xf32, #tpu.memory_space<vmem>>, vector<16x512xf32>
    tpu.vector_store %arg11[%1049, %c0_544], %1048 {strides = array<i32>} : memref<256x512xf32, #tpu.memory_space<vmem>>, vector<16x512xf32>,
    %c0_545 = arith.constant 0 : index
    %c0_546 = arith.constant 0 : index
    %1051 = vector.load %arg13[%c0_545, %c0_546] : memref<16x128xf32, #tpu.memory_space<vmem>>, vector<16x128xf32>
    %1052 = arith.index_cast %1041 : i32 to index
    %c0_547 = arith.constant 0 : index
    %1053 = vector.load %arg11[%1052, %c0_547] : memref<256x512xf32, #tpu.memory_space<vmem>>, vector<16x128xf32>
    %cst_548 = arith.constant 5.000000e-01 : f32
    %1054 = vector.broadcast %cst_548 : f32 to vector<16x128xf32>
    %1055 = arith.mulf %1054, %1053 : vector<16x128xf32>
    %1056 = math.tanh %1055 : vector<16x128xf32>
    %cst_549 = arith.constant 5.000000e-01 : f32
    %1057 = vector.broadcast %cst_549 : f32 to vector<16x128xf32>
    %1058 = arith.mulf %1057, %1056 : vector<16x128xf32>
    %cst_550 = arith.constant 5.000000e-01 : f32
    %1059 = vector.broadcast %cst_550 : f32 to vector<16x128xf32>
    %1060 = arith.addf %1058, %1059 : vector<16x128xf32>
    %1061 = arith.index_cast %1041 : i32 to index
    %c256_551 = arith.constant 256 : index
    %1062 = vector.load %arg11[%1061, %c256_551] : memref<256x512xf32, #tpu.memory_space<vmem>>, vector<16x128xf32>
    %1063 = math.tanh %1062 : vector<16x128xf32>
    %1064 = arith.index_cast %1041 : i32 to index
    %c384_552 = arith.constant 384 : index
    %1065 = vector.load %arg11[%1064, %c384_552] : memref<256x512xf32, #tpu.memory_space<vmem>>, vector<16x128xf32>
    %cst_553 = arith.constant 5.000000e-01 : f32
    %1066 = vector.broadcast %cst_553 : f32 to vector<16x128xf32>
    %1067 = arith.mulf %1066, %1065 : vector<16x128xf32>
    %1068 = math.tanh %1067 : vector<16x128xf32>
    %cst_554 = arith.constant 5.000000e-01 : f32
    %1069 = vector.broadcast %cst_554 : f32 to vector<16x128xf32>
    %1070 = arith.mulf %1069, %1068 : vector<16x128xf32>
    %cst_555 = arith.constant 5.000000e-01 : f32
    %1071 = vector.broadcast %cst_555 : f32 to vector<16x128xf32>
    %1072 = arith.addf %1070, %1071 : vector<16x128xf32>
    %1073 = arith.index_cast %1041 : i32 to index
    %c128_556 = arith.constant 128 : index
    %1074 = vector.load %arg11[%1073, %c128_556] : memref<256x512xf32, #tpu.memory_space<vmem>>, vector<16x128xf32>
    %cst_557 = arith.constant 5.000000e-01 : f32
    %1075 = vector.broadcast %cst_557 : f32 to vector<16x128xf32>
    %1076 = arith.mulf %1075, %1074 : vector<16x128xf32>
    %1077 = math.tanh %1076 : vector<16x128xf32>
    %cst_558 = arith.constant 5.000000e-01 : f32
    %1078 = vector.broadcast %cst_558 : f32 to vector<16x128xf32>
    %1079 = arith.mulf %1078, %1077 : vector<16x128xf32>
    %cst_559 = arith.constant 5.000000e-01 : f32
    %1080 = vector.broadcast %cst_559 : f32 to vector<16x128xf32>
    %1081 = arith.addf %1079, %1080 : vector<16x128xf32>
    %1082 = arith.mulf %1081, %1051 : vector<16x128xf32>
    %1083 = arith.mulf %1060, %1063 : vector<16x128xf32>
    %1084 = arith.addf %1082, %1083 : vector<16x128xf32>
    %1085 = math.tanh %1084 : vector<16x128xf32>
    %1086 = arith.mulf %1072, %1085 : vector<16x128xf32>
    %c0_560 = arith.constant 0 : index
    %c0_561 = arith.constant 0 : index
    %1087 = vector.load %arg13[%c0_560, %c0_561] : memref<16x128xf32, #tpu.memory_space<vmem>>, vector<16x128xf32>
    tpu.vector_store %arg13[%c0_560, %c0_561], %1084 {strides = array<i32>} : memref<16x128xf32, #tpu.memory_space<vmem>>, vector<16x128xf32>,
    %1088 = arith.truncf %1086 : vector<16x128xf32> to vector<16x128xbf16>
    %1089 = arith.index_cast %1041 : i32 to index
    %c0_562 = arith.constant 0 : index
    %1090 = vector.load %arg12[%1089, %c0_562] : memref<256x128xbf16, #tpu.memory_space<vmem>>, vector<16x128xbf16>
    tpu.vector_store %arg12[%1089, %c0_562], %1088 {strides = array<i32>} : memref<256x128xbf16, #tpu.memory_space<vmem>>, vector<16x128xbf16>,
    %c5_i32_563 = arith.constant 5 : i32
    %c1_i32_564 = arith.constant 1 : i32
    %1091 = arith.subi %c5_i32_563, %c1_i32_564 : i32
    %c16_i32_565 = arith.constant 16 : i32
    %1092 = arith.muli %1091, %c16_i32_565 : i32
    %1093 = tpu.assume_multiple %1092, 16 : i32
    %c16_i32_566 = arith.constant 16 : i32
    %1094 = arith.muli %c5_i32_563, %c16_i32_566 : i32
    %1095 = tpu.assume_multiple %1094, 16 : i32
    %1096 = arith.index_cast %1095 : i32 to index
    %c0_567 = arith.constant 0 : index
    %1097 = vector.load %arg11[%1096, %c0_567] : memref<256x512xf32, #tpu.memory_space<vmem>>, vector<16x512xf32>
    %1098 = arith.index_cast %1093 : i32 to index
    %c0_568 = arith.constant 0 : index
    %1099 = vector.load %arg12[%1098, %c0_568] : memref<256x128xbf16, #tpu.memory_space<vmem>>, vector<16x128xbf16>
    %c0_569 = arith.constant 0 : index
    %c0_570 = arith.constant 0 : index
    %1100 = vector.load %arg6[%c0_569, %c0_570] : memref<128x512xbf16, #tpu.memory_space<vmem>>, vector<128x512xbf16>
    %cst_571 = arith.constant dense<0.000000e+00> : vector<16x512xf32>
    %1101 = tpu.matmul %1099, %1100, %cst_571 {dimension_numbers = #tpu.dot_dimension_numbers<[1], [0], [0], [1], [0, 0, 1, 1], [], []>} : vector<16x128xbf16>, vector<128x512xbf16>, vector<16x512xf32> -> vector<16x512xf32>
    %1102 = arith.addf %1097, %1101 : vector<16x512xf32>
    %1103 = arith.index_cast %1095 : i32 to index
    %c0_572 = arith.constant 0 : index
    %1104 = vector.load %arg11[%1103, %c0_572] : memref<256x512xf32, #tpu.memory_space<vmem>>, vector<16x512xf32>
    tpu.vector_store %arg11[%1103, %c0_572], %1102 {strides = array<i32>} : memref<256x512xf32, #tpu.memory_space<vmem>>, vector<16x512xf32>,
    %c0_573 = arith.constant 0 : index
    %c0_574 = arith.constant 0 : index
    %1105 = vector.load %arg13[%c0_573, %c0_574] : memref<16x128xf32, #tpu.memory_space<vmem>>, vector<16x128xf32>
    %1106 = arith.index_cast %1095 : i32 to index
    %c0_575 = arith.constant 0 : index
    %1107 = vector.load %arg11[%1106, %c0_575] : memref<256x512xf32, #tpu.memory_space<vmem>>, vector<16x128xf32>
    %cst_576 = arith.constant 5.000000e-01 : f32
    %1108 = vector.broadcast %cst_576 : f32 to vector<16x128xf32>
    %1109 = arith.mulf %1108, %1107 : vector<16x128xf32>
    %1110 = math.tanh %1109 : vector<16x128xf32>
    %cst_577 = arith.constant 5.000000e-01 : f32
    %1111 = vector.broadcast %cst_577 : f32 to vector<16x128xf32>
    %1112 = arith.mulf %1111, %1110 : vector<16x128xf32>
    %cst_578 = arith.constant 5.000000e-01 : f32
    %1113 = vector.broadcast %cst_578 : f32 to vector<16x128xf32>
    %1114 = arith.addf %1112, %1113 : vector<16x128xf32>
    %1115 = arith.index_cast %1095 : i32 to index
    %c256_579 = arith.constant 256 : index
    %1116 = vector.load %arg11[%1115, %c256_579] : memref<256x512xf32, #tpu.memory_space<vmem>>, vector<16x128xf32>
    %1117 = math.tanh %1116 : vector<16x128xf32>
    %1118 = arith.index_cast %1095 : i32 to index
    %c384_580 = arith.constant 384 : index
    %1119 = vector.load %arg11[%1118, %c384_580] : memref<256x512xf32, #tpu.memory_space<vmem>>, vector<16x128xf32>
    %cst_581 = arith.constant 5.000000e-01 : f32
    %1120 = vector.broadcast %cst_581 : f32 to vector<16x128xf32>
    %1121 = arith.mulf %1120, %1119 : vector<16x128xf32>
    %1122 = math.tanh %1121 : vector<16x128xf32>
    %cst_582 = arith.constant 5.000000e-01 : f32
    %1123 = vector.broadcast %cst_582 : f32 to vector<16x128xf32>
    %1124 = arith.mulf %1123, %1122 : vector<16x128xf32>
    %cst_583 = arith.constant 5.000000e-01 : f32
    %1125 = vector.broadcast %cst_583 : f32 to vector<16x128xf32>
    %1126 = arith.addf %1124, %1125 : vector<16x128xf32>
    %1127 = arith.index_cast %1095 : i32 to index
    %c128_584 = arith.constant 128 : index
    %1128 = vector.load %arg11[%1127, %c128_584] : memref<256x512xf32, #tpu.memory_space<vmem>>, vector<16x128xf32>
    %cst_585 = arith.constant 5.000000e-01 : f32
    %1129 = vector.broadcast %cst_585 : f32 to vector<16x128xf32>
    %1130 = arith.mulf %1129, %1128 : vector<16x128xf32>
    %1131 = math.tanh %1130 : vector<16x128xf32>
    %cst_586 = arith.constant 5.000000e-01 : f32
    %1132 = vector.broadcast %cst_586 : f32 to vector<16x128xf32>
    %1133 = arith.mulf %1132, %1131 : vector<16x128xf32>
    %cst_587 = arith.constant 5.000000e-01 : f32
    %1134 = vector.broadcast %cst_587 : f32 to vector<16x128xf32>
    %1135 = arith.addf %1133, %1134 : vector<16x128xf32>
    %1136 = arith.mulf %1135, %1105 : vector<16x128xf32>
    %1137 = arith.mulf %1114, %1117 : vector<16x128xf32>
    %1138 = arith.addf %1136, %1137 : vector<16x128xf32>
    %1139 = math.tanh %1138 : vector<16x128xf32>
    %1140 = arith.mulf %1126, %1139 : vector<16x128xf32>
    %c0_588 = arith.constant 0 : index
    %c0_589 = arith.constant 0 : index
    %1141 = vector.load %arg13[%c0_588, %c0_589] : memref<16x128xf32, #tpu.memory_space<vmem>>, vector<16x128xf32>
    tpu.vector_store %arg13[%c0_588, %c0_589], %1138 {strides = array<i32>} : memref<16x128xf32, #tpu.memory_space<vmem>>, vector<16x128xf32>,
    %1142 = arith.truncf %1140 : vector<16x128xf32> to vector<16x128xbf16>
    %1143 = arith.index_cast %1095 : i32 to index
    %c0_590 = arith.constant 0 : index
    %1144 = vector.load %arg12[%1143, %c0_590] : memref<256x128xbf16, #tpu.memory_space<vmem>>, vector<16x128xbf16>
    tpu.vector_store %arg12[%1143, %c0_590], %1142 {strides = array<i32>} : memref<256x128xbf16, #tpu.memory_space<vmem>>, vector<16x128xbf16>,
    %c6_i32_591 = arith.constant 6 : i32
    %c1_i32_592 = arith.constant 1 : i32
    %1145 = arith.subi %c6_i32_591, %c1_i32_592 : i32
    %c16_i32_593 = arith.constant 16 : i32
    %1146 = arith.muli %1145, %c16_i32_593 : i32
    %1147 = tpu.assume_multiple %1146, 16 : i32
    %c16_i32_594 = arith.constant 16 : i32
    %1148 = arith.muli %c6_i32_591, %c16_i32_594 : i32
    %1149 = tpu.assume_multiple %1148, 16 : i32
    %1150 = arith.index_cast %1149 : i32 to index
    %c0_595 = arith.constant 0 : index
    %1151 = vector.load %arg11[%1150, %c0_595] : memref<256x512xf32, #tpu.memory_space<vmem>>, vector<16x512xf32>
    %1152 = arith.index_cast %1147 : i32 to index
    %c0_596 = arith.constant 0 : index
    %1153 = vector.load %arg12[%1152, %c0_596] : memref<256x128xbf16, #tpu.memory_space<vmem>>, vector<16x128xbf16>
    %c0_597 = arith.constant 0 : index
    %c0_598 = arith.constant 0 : index
    %1154 = vector.load %arg6[%c0_597, %c0_598] : memref<128x512xbf16, #tpu.memory_space<vmem>>, vector<128x512xbf16>
    %cst_599 = arith.constant dense<0.000000e+00> : vector<16x512xf32>
    %1155 = tpu.matmul %1153, %1154, %cst_599 {dimension_numbers = #tpu.dot_dimension_numbers<[1], [0], [0], [1], [0, 0, 1, 1], [], []>} : vector<16x128xbf16>, vector<128x512xbf16>, vector<16x512xf32> -> vector<16x512xf32>
    %1156 = arith.addf %1151, %1155 : vector<16x512xf32>
    %1157 = arith.index_cast %1149 : i32 to index
    %c0_600 = arith.constant 0 : index
    %1158 = vector.load %arg11[%1157, %c0_600] : memref<256x512xf32, #tpu.memory_space<vmem>>, vector<16x512xf32>
    tpu.vector_store %arg11[%1157, %c0_600], %1156 {strides = array<i32>} : memref<256x512xf32, #tpu.memory_space<vmem>>, vector<16x512xf32>,
    %c0_601 = arith.constant 0 : index
    %c0_602 = arith.constant 0 : index
    %1159 = vector.load %arg13[%c0_601, %c0_602] : memref<16x128xf32, #tpu.memory_space<vmem>>, vector<16x128xf32>
    %1160 = arith.index_cast %1149 : i32 to index
    %c0_603 = arith.constant 0 : index
    %1161 = vector.load %arg11[%1160, %c0_603] : memref<256x512xf32, #tpu.memory_space<vmem>>, vector<16x128xf32>
    %cst_604 = arith.constant 5.000000e-01 : f32
    %1162 = vector.broadcast %cst_604 : f32 to vector<16x128xf32>
    %1163 = arith.mulf %1162, %1161 : vector<16x128xf32>
    %1164 = math.tanh %1163 : vector<16x128xf32>
    %cst_605 = arith.constant 5.000000e-01 : f32
    %1165 = vector.broadcast %cst_605 : f32 to vector<16x128xf32>
    %1166 = arith.mulf %1165, %1164 : vector<16x128xf32>
    %cst_606 = arith.constant 5.000000e-01 : f32
    %1167 = vector.broadcast %cst_606 : f32 to vector<16x128xf32>
    %1168 = arith.addf %1166, %1167 : vector<16x128xf32>
    %1169 = arith.index_cast %1149 : i32 to index
    %c256_607 = arith.constant 256 : index
    %1170 = vector.load %arg11[%1169, %c256_607] : memref<256x512xf32, #tpu.memory_space<vmem>>, vector<16x128xf32>
    %1171 = math.tanh %1170 : vector<16x128xf32>
    %1172 = arith.index_cast %1149 : i32 to index
    %c384_608 = arith.constant 384 : index
    %1173 = vector.load %arg11[%1172, %c384_608] : memref<256x512xf32, #tpu.memory_space<vmem>>, vector<16x128xf32>
    %cst_609 = arith.constant 5.000000e-01 : f32
    %1174 = vector.broadcast %cst_609 : f32 to vector<16x128xf32>
    %1175 = arith.mulf %1174, %1173 : vector<16x128xf32>
    %1176 = math.tanh %1175 : vector<16x128xf32>
    %cst_610 = arith.constant 5.000000e-01 : f32
    %1177 = vector.broadcast %cst_610 : f32 to vector<16x128xf32>
    %1178 = arith.mulf %1177, %1176 : vector<16x128xf32>
    %cst_611 = arith.constant 5.000000e-01 : f32
    %1179 = vector.broadcast %cst_611 : f32 to vector<16x128xf32>
    %1180 = arith.addf %1178, %1179 : vector<16x128xf32>
    %1181 = arith.index_cast %1149 : i32 to index
    %c128_612 = arith.constant 128 : index
    %1182 = vector.load %arg11[%1181, %c128_612] : memref<256x512xf32, #tpu.memory_space<vmem>>, vector<16x128xf32>
    %cst_613 = arith.constant 5.000000e-01 : f32
    %1183 = vector.broadcast %cst_613 : f32 to vector<16x128xf32>
    %1184 = arith.mulf %1183, %1182 : vector<16x128xf32>
    %1185 = math.tanh %1184 : vector<16x128xf32>
    %cst_614 = arith.constant 5.000000e-01 : f32
    %1186 = vector.broadcast %cst_614 : f32 to vector<16x128xf32>
    %1187 = arith.mulf %1186, %1185 : vector<16x128xf32>
    %cst_615 = arith.constant 5.000000e-01 : f32
    %1188 = vector.broadcast %cst_615 : f32 to vector<16x128xf32>
    %1189 = arith.addf %1187, %1188 : vector<16x128xf32>
    %1190 = arith.mulf %1189, %1159 : vector<16x128xf32>
    %1191 = arith.mulf %1168, %1171 : vector<16x128xf32>
    %1192 = arith.addf %1190, %1191 : vector<16x128xf32>
    %1193 = math.tanh %1192 : vector<16x128xf32>
    %1194 = arith.mulf %1180, %1193 : vector<16x128xf32>
    %c0_616 = arith.constant 0 : index
    %c0_617 = arith.constant 0 : index
    %1195 = vector.load %arg13[%c0_616, %c0_617] : memref<16x128xf32, #tpu.memory_space<vmem>>, vector<16x128xf32>
    tpu.vector_store %arg13[%c0_616, %c0_617], %1192 {strides = array<i32>} : memref<16x128xf32, #tpu.memory_space<vmem>>, vector<16x128xf32>,
    %1196 = arith.truncf %1194 : vector<16x128xf32> to vector<16x128xbf16>
    %1197 = arith.index_cast %1149 : i32 to index
    %c0_618 = arith.constant 0 : index
    %1198 = vector.load %arg12[%1197, %c0_618] : memref<256x128xbf16, #tpu.memory_space<vmem>>, vector<16x128xbf16>
    tpu.vector_store %arg12[%1197, %c0_618], %1196 {strides = array<i32>} : memref<256x128xbf16, #tpu.memory_space<vmem>>, vector<16x128xbf16>,
    %c7_i32_619 = arith.constant 7 : i32
    %c1_i32_620 = arith.constant 1 : i32
    %1199 = arith.subi %c7_i32_619, %c1_i32_620 : i32
    %c16_i32_621 = arith.constant 16 : i32
    %1200 = arith.muli %1199, %c16_i32_621 : i32
    %1201 = tpu.assume_multiple %1200, 16 : i32
    %c16_i32_622 = arith.constant 16 : i32
    %1202 = arith.muli %c7_i32_619, %c16_i32_622 : i32
    %1203 = tpu.assume_multiple %1202, 16 : i32
    %1204 = arith.index_cast %1203 : i32 to index
    %c0_623 = arith.constant 0 : index
    %1205 = vector.load %arg11[%1204, %c0_623] : memref<256x512xf32, #tpu.memory_space<vmem>>, vector<16x512xf32>
    %1206 = arith.index_cast %1201 : i32 to index
    %c0_624 = arith.constant 0 : index
    %1207 = vector.load %arg12[%1206, %c0_624] : memref<256x128xbf16, #tpu.memory_space<vmem>>, vector<16x128xbf16>
    %c0_625 = arith.constant 0 : index
    %c0_626 = arith.constant 0 : index
    %1208 = vector.load %arg6[%c0_625, %c0_626] : memref<128x512xbf16, #tpu.memory_space<vmem>>, vector<128x512xbf16>
    %cst_627 = arith.constant dense<0.000000e+00> : vector<16x512xf32>
    %1209 = tpu.matmul %1207, %1208, %cst_627 {dimension_numbers = #tpu.dot_dimension_numbers<[1], [0], [0], [1], [0, 0, 1, 1], [], []>} : vector<16x128xbf16>, vector<128x512xbf16>, vector<16x512xf32> -> vector<16x512xf32>
    %1210 = arith.addf %1205, %1209 : vector<16x512xf32>
    %1211 = arith.index_cast %1203 : i32 to index
    %c0_628 = arith.constant 0 : index
    %1212 = vector.load %arg11[%1211, %c0_628] : memref<256x512xf32, #tpu.memory_space<vmem>>, vector<16x512xf32>
    tpu.vector_store %arg11[%1211, %c0_628], %1210 {strides = array<i32>} : memref<256x512xf32, #tpu.memory_space<vmem>>, vector<16x512xf32>,
    %c0_629 = arith.constant 0 : index
    %c0_630 = arith.constant 0 : index
    %1213 = vector.load %arg13[%c0_629, %c0_630] : memref<16x128xf32, #tpu.memory_space<vmem>>, vector<16x128xf32>
    %1214 = arith.index_cast %1203 : i32 to index
    %c0_631 = arith.constant 0 : index
    %1215 = vector.load %arg11[%1214, %c0_631] : memref<256x512xf32, #tpu.memory_space<vmem>>, vector<16x128xf32>
    %cst_632 = arith.constant 5.000000e-01 : f32
    %1216 = vector.broadcast %cst_632 : f32 to vector<16x128xf32>
    %1217 = arith.mulf %1216, %1215 : vector<16x128xf32>
    %1218 = math.tanh %1217 : vector<16x128xf32>
    %cst_633 = arith.constant 5.000000e-01 : f32
    %1219 = vector.broadcast %cst_633 : f32 to vector<16x128xf32>
    %1220 = arith.mulf %1219, %1218 : vector<16x128xf32>
    %cst_634 = arith.constant 5.000000e-01 : f32
    %1221 = vector.broadcast %cst_634 : f32 to vector<16x128xf32>
    %1222 = arith.addf %1220, %1221 : vector<16x128xf32>
    %1223 = arith.index_cast %1203 : i32 to index
    %c256_635 = arith.constant 256 : index
    %1224 = vector.load %arg11[%1223, %c256_635] : memref<256x512xf32, #tpu.memory_space<vmem>>, vector<16x128xf32>
    %1225 = math.tanh %1224 : vector<16x128xf32>
    %1226 = arith.index_cast %1203 : i32 to index
    %c384_636 = arith.constant 384 : index
    %1227 = vector.load %arg11[%1226, %c384_636] : memref<256x512xf32, #tpu.memory_space<vmem>>, vector<16x128xf32>
    %cst_637 = arith.constant 5.000000e-01 : f32
    %1228 = vector.broadcast %cst_637 : f32 to vector<16x128xf32>
    %1229 = arith.mulf %1228, %1227 : vector<16x128xf32>
    %1230 = math.tanh %1229 : vector<16x128xf32>
    %cst_638 = arith.constant 5.000000e-01 : f32
    %1231 = vector.broadcast %cst_638 : f32 to vector<16x128xf32>
    %1232 = arith.mulf %1231, %1230 : vector<16x128xf32>
    %cst_639 = arith.constant 5.000000e-01 : f32
    %1233 = vector.broadcast %cst_639 : f32 to vector<16x128xf32>
    %1234 = arith.addf %1232, %1233 : vector<16x128xf32>
    %1235 = arith.index_cast %1203 : i32 to index
    %c128_640 = arith.constant 128 : index
    %1236 = vector.load %arg11[%1235, %c128_640] : memref<256x512xf32, #tpu.memory_space<vmem>>, vector<16x128xf32>
    %cst_641 = arith.constant 5.000000e-01 : f32
    %1237 = vector.broadcast %cst_641 : f32 to vector<16x128xf32>
    %1238 = arith.mulf %1237, %1236 : vector<16x128xf32>
    %1239 = math.tanh %1238 : vector<16x128xf32>
    %cst_642 = arith.constant 5.000000e-01 : f32
    %1240 = vector.broadcast %cst_642 : f32 to vector<16x128xf32>
    %1241 = arith.mulf %1240, %1239 : vector<16x128xf32>
    %cst_643 = arith.constant 5.000000e-01 : f32
    %1242 = vector.broadcast %cst_643 : f32 to vector<16x128xf32>
    %1243 = arith.addf %1241, %1242 : vector<16x128xf32>
    %1244 = arith.mulf %1243, %1213 : vector<16x128xf32>
    %1245 = arith.mulf %1222, %1225 : vector<16x128xf32>
    %1246 = arith.addf %1244, %1245 : vector<16x128xf32>
    %1247 = math.tanh %1246 : vector<16x128xf32>
    %1248 = arith.mulf %1234, %1247 : vector<16x128xf32>
    %c0_644 = arith.constant 0 : index
    %c0_645 = arith.constant 0 : index
    %1249 = vector.load %arg13[%c0_644, %c0_645] : memref<16x128xf32, #tpu.memory_space<vmem>>, vector<16x128xf32>
    tpu.vector_store %arg13[%c0_644, %c0_645], %1246 {strides = array<i32>} : memref<16x128xf32, #tpu.memory_space<vmem>>, vector<16x128xf32>,
    %1250 = arith.truncf %1248 : vector<16x128xf32> to vector<16x128xbf16>
    %1251 = arith.index_cast %1203 : i32 to index
    %c0_646 = arith.constant 0 : index
    %1252 = vector.load %arg12[%1251, %c0_646] : memref<256x128xbf16, #tpu.memory_space<vmem>>, vector<16x128xbf16>
    tpu.vector_store %arg12[%1251, %c0_646], %1250 {strides = array<i32>} : memref<256x128xbf16, #tpu.memory_space<vmem>>, vector<16x128xbf16>,
    %c8_i32_647 = arith.constant 8 : i32
    %c1_i32_648 = arith.constant 1 : i32
    %1253 = arith.subi %c8_i32_647, %c1_i32_648 : i32
    %c16_i32_649 = arith.constant 16 : i32
    %1254 = arith.muli %1253, %c16_i32_649 : i32
    %1255 = tpu.assume_multiple %1254, 16 : i32
    %c16_i32_650 = arith.constant 16 : i32
    %1256 = arith.muli %c8_i32_647, %c16_i32_650 : i32
    %1257 = tpu.assume_multiple %1256, 16 : i32
    %1258 = arith.index_cast %1257 : i32 to index
    %c0_651 = arith.constant 0 : index
    %1259 = vector.load %arg11[%1258, %c0_651] : memref<256x512xf32, #tpu.memory_space<vmem>>, vector<16x512xf32>
    %1260 = arith.index_cast %1255 : i32 to index
    %c0_652 = arith.constant 0 : index
    %1261 = vector.load %arg12[%1260, %c0_652] : memref<256x128xbf16, #tpu.memory_space<vmem>>, vector<16x128xbf16>
    %c0_653 = arith.constant 0 : index
    %c0_654 = arith.constant 0 : index
    %1262 = vector.load %arg6[%c0_653, %c0_654] : memref<128x512xbf16, #tpu.memory_space<vmem>>, vector<128x512xbf16>
    %cst_655 = arith.constant dense<0.000000e+00> : vector<16x512xf32>
    %1263 = tpu.matmul %1261, %1262, %cst_655 {dimension_numbers = #tpu.dot_dimension_numbers<[1], [0], [0], [1], [0, 0, 1, 1], [], []>} : vector<16x128xbf16>, vector<128x512xbf16>, vector<16x512xf32> -> vector<16x512xf32>
    %1264 = arith.addf %1259, %1263 : vector<16x512xf32>
    %1265 = arith.index_cast %1257 : i32 to index
    %c0_656 = arith.constant 0 : index
    %1266 = vector.load %arg11[%1265, %c0_656] : memref<256x512xf32, #tpu.memory_space<vmem>>, vector<16x512xf32>
    tpu.vector_store %arg11[%1265, %c0_656], %1264 {strides = array<i32>} : memref<256x512xf32, #tpu.memory_space<vmem>>, vector<16x512xf32>,
    %c0_657 = arith.constant 0 : index
    %c0_658 = arith.constant 0 : index
    %1267 = vector.load %arg13[%c0_657, %c0_658] : memref<16x128xf32, #tpu.memory_space<vmem>>, vector<16x128xf32>
    %1268 = arith.index_cast %1257 : i32 to index
    %c0_659 = arith.constant 0 : index
    %1269 = vector.load %arg11[%1268, %c0_659] : memref<256x512xf32, #tpu.memory_space<vmem>>, vector<16x128xf32>
    %cst_660 = arith.constant 5.000000e-01 : f32
    %1270 = vector.broadcast %cst_660 : f32 to vector<16x128xf32>
    %1271 = arith.mulf %1270, %1269 : vector<16x128xf32>
    %1272 = math.tanh %1271 : vector<16x128xf32>
    %cst_661 = arith.constant 5.000000e-01 : f32
    %1273 = vector.broadcast %cst_661 : f32 to vector<16x128xf32>
    %1274 = arith.mulf %1273, %1272 : vector<16x128xf32>
    %cst_662 = arith.constant 5.000000e-01 : f32
    %1275 = vector.broadcast %cst_662 : f32 to vector<16x128xf32>
    %1276 = arith.addf %1274, %1275 : vector<16x128xf32>
    %1277 = arith.index_cast %1257 : i32 to index
    %c256_663 = arith.constant 256 : index
    %1278 = vector.load %arg11[%1277, %c256_663] : memref<256x512xf32, #tpu.memory_space<vmem>>, vector<16x128xf32>
    %1279 = math.tanh %1278 : vector<16x128xf32>
    %1280 = arith.index_cast %1257 : i32 to index
    %c384_664 = arith.constant 384 : index
    %1281 = vector.load %arg11[%1280, %c384_664] : memref<256x512xf32, #tpu.memory_space<vmem>>, vector<16x128xf32>
    %cst_665 = arith.constant 5.000000e-01 : f32
    %1282 = vector.broadcast %cst_665 : f32 to vector<16x128xf32>
    %1283 = arith.mulf %1282, %1281 : vector<16x128xf32>
    %1284 = math.tanh %1283 : vector<16x128xf32>
    %cst_666 = arith.constant 5.000000e-01 : f32
    %1285 = vector.broadcast %cst_666 : f32 to vector<16x128xf32>
    %1286 = arith.mulf %1285, %1284 : vector<16x128xf32>
    %cst_667 = arith.constant 5.000000e-01 : f32
    %1287 = vector.broadcast %cst_667 : f32 to vector<16x128xf32>
    %1288 = arith.addf %1286, %1287 : vector<16x128xf32>
    %1289 = arith.index_cast %1257 : i32 to index
    %c128_668 = arith.constant 128 : index
    %1290 = vector.load %arg11[%1289, %c128_668] : memref<256x512xf32, #tpu.memory_space<vmem>>, vector<16x128xf32>
    %cst_669 = arith.constant 5.000000e-01 : f32
    %1291 = vector.broadcast %cst_669 : f32 to vector<16x128xf32>
    %1292 = arith.mulf %1291, %1290 : vector<16x128xf32>
    %1293 = math.tanh %1292 : vector<16x128xf32>
    %cst_670 = arith.constant 5.000000e-01 : f32
    %1294 = vector.broadcast %cst_670 : f32 to vector<16x128xf32>
    %1295 = arith.mulf %1294, %1293 : vector<16x128xf32>
    %cst_671 = arith.constant 5.000000e-01 : f32
    %1296 = vector.broadcast %cst_671 : f32 to vector<16x128xf32>
    %1297 = arith.addf %1295, %1296 : vector<16x128xf32>
    %1298 = arith.mulf %1297, %1267 : vector<16x128xf32>
    %1299 = arith.mulf %1276, %1279 : vector<16x128xf32>
    %1300 = arith.addf %1298, %1299 : vector<16x128xf32>
    %1301 = math.tanh %1300 : vector<16x128xf32>
    %1302 = arith.mulf %1288, %1301 : vector<16x128xf32>
    %c0_672 = arith.constant 0 : index
    %c0_673 = arith.constant 0 : index
    %1303 = vector.load %arg13[%c0_672, %c0_673] : memref<16x128xf32, #tpu.memory_space<vmem>>, vector<16x128xf32>
    tpu.vector_store %arg13[%c0_672, %c0_673], %1300 {strides = array<i32>} : memref<16x128xf32, #tpu.memory_space<vmem>>, vector<16x128xf32>,
    %1304 = arith.truncf %1302 : vector<16x128xf32> to vector<16x128xbf16>
    %1305 = arith.index_cast %1257 : i32 to index
    %c0_674 = arith.constant 0 : index
    %1306 = vector.load %arg12[%1305, %c0_674] : memref<256x128xbf16, #tpu.memory_space<vmem>>, vector<16x128xbf16>
    tpu.vector_store %arg12[%1305, %c0_674], %1304 {strides = array<i32>} : memref<256x128xbf16, #tpu.memory_space<vmem>>, vector<16x128xbf16>,
    %c9_i32_675 = arith.constant 9 : i32
    %c1_i32_676 = arith.constant 1 : i32
    %1307 = arith.subi %c9_i32_675, %c1_i32_676 : i32
    %c16_i32_677 = arith.constant 16 : i32
    %1308 = arith.muli %1307, %c16_i32_677 : i32
    %1309 = tpu.assume_multiple %1308, 16 : i32
    %c16_i32_678 = arith.constant 16 : i32
    %1310 = arith.muli %c9_i32_675, %c16_i32_678 : i32
    %1311 = tpu.assume_multiple %1310, 16 : i32
    %1312 = arith.index_cast %1311 : i32 to index
    %c0_679 = arith.constant 0 : index
    %1313 = vector.load %arg11[%1312, %c0_679] : memref<256x512xf32, #tpu.memory_space<vmem>>, vector<16x512xf32>
    %1314 = arith.index_cast %1309 : i32 to index
    %c0_680 = arith.constant 0 : index
    %1315 = vector.load %arg12[%1314, %c0_680] : memref<256x128xbf16, #tpu.memory_space<vmem>>, vector<16x128xbf16>
    %c0_681 = arith.constant 0 : index
    %c0_682 = arith.constant 0 : index
    %1316 = vector.load %arg6[%c0_681, %c0_682] : memref<128x512xbf16, #tpu.memory_space<vmem>>, vector<128x512xbf16>
    %cst_683 = arith.constant dense<0.000000e+00> : vector<16x512xf32>
    %1317 = tpu.matmul %1315, %1316, %cst_683 {dimension_numbers = #tpu.dot_dimension_numbers<[1], [0], [0], [1], [0, 0, 1, 1], [], []>} : vector<16x128xbf16>, vector<128x512xbf16>, vector<16x512xf32> -> vector<16x512xf32>
    %1318 = arith.addf %1313, %1317 : vector<16x512xf32>
    %1319 = arith.index_cast %1311 : i32 to index
    %c0_684 = arith.constant 0 : index
    %1320 = vector.load %arg11[%1319, %c0_684] : memref<256x512xf32, #tpu.memory_space<vmem>>, vector<16x512xf32>
    tpu.vector_store %arg11[%1319, %c0_684], %1318 {strides = array<i32>} : memref<256x512xf32, #tpu.memory_space<vmem>>, vector<16x512xf32>,
    %c0_685 = arith.constant 0 : index
    %c0_686 = arith.constant 0 : index
    %1321 = vector.load %arg13[%c0_685, %c0_686] : memref<16x128xf32, #tpu.memory_space<vmem>>, vector<16x128xf32>
    %1322 = arith.index_cast %1311 : i32 to index
    %c0_687 = arith.constant 0 : index
    %1323 = vector.load %arg11[%1322, %c0_687] : memref<256x512xf32, #tpu.memory_space<vmem>>, vector<16x128xf32>
    %cst_688 = arith.constant 5.000000e-01 : f32
    %1324 = vector.broadcast %cst_688 : f32 to vector<16x128xf32>
    %1325 = arith.mulf %1324, %1323 : vector<16x128xf32>
    %1326 = math.tanh %1325 : vector<16x128xf32>
    %cst_689 = arith.constant 5.000000e-01 : f32
    %1327 = vector.broadcast %cst_689 : f32 to vector<16x128xf32>
    %1328 = arith.mulf %1327, %1326 : vector<16x128xf32>
    %cst_690 = arith.constant 5.000000e-01 : f32
    %1329 = vector.broadcast %cst_690 : f32 to vector<16x128xf32>
    %1330 = arith.addf %1328, %1329 : vector<16x128xf32>
    %1331 = arith.index_cast %1311 : i32 to index
    %c256_691 = arith.constant 256 : index
    %1332 = vector.load %arg11[%1331, %c256_691] : memref<256x512xf32, #tpu.memory_space<vmem>>, vector<16x128xf32>
    %1333 = math.tanh %1332 : vector<16x128xf32>
    %1334 = arith.index_cast %1311 : i32 to index
    %c384_692 = arith.constant 384 : index
    %1335 = vector.load %arg11[%1334, %c384_692] : memref<256x512xf32, #tpu.memory_space<vmem>>, vector<16x128xf32>
    %cst_693 = arith.constant 5.000000e-01 : f32
    %1336 = vector.broadcast %cst_693 : f32 to vector<16x128xf32>
    %1337 = arith.mulf %1336, %1335 : vector<16x128xf32>
    %1338 = math.tanh %1337 : vector<16x128xf32>
    %cst_694 = arith.constant 5.000000e-01 : f32
    %1339 = vector.broadcast %cst_694 : f32 to vector<16x128xf32>
    %1340 = arith.mulf %1339, %1338 : vector<16x128xf32>
    %cst_695 = arith.constant 5.000000e-01 : f32
    %1341 = vector.broadcast %cst_695 : f32 to vector<16x128xf32>
    %1342 = arith.addf %1340, %1341 : vector<16x128xf32>
    %1343 = arith.index_cast %1311 : i32 to index
    %c128_696 = arith.constant 128 : index
    %1344 = vector.load %arg11[%1343, %c128_696] : memref<256x512xf32, #tpu.memory_space<vmem>>, vector<16x128xf32>
    %cst_697 = arith.constant 5.000000e-01 : f32
    %1345 = vector.broadcast %cst_697 : f32 to vector<16x128xf32>
    %1346 = arith.mulf %1345, %1344 : vector<16x128xf32>
    %1347 = math.tanh %1346 : vector<16x128xf32>
    %cst_698 = arith.constant 5.000000e-01 : f32
    %1348 = vector.broadcast %cst_698 : f32 to vector<16x128xf32>
    %1349 = arith.mulf %1348, %1347 : vector<16x128xf32>
    %cst_699 = arith.constant 5.000000e-01 : f32
    %1350 = vector.broadcast %cst_699 : f32 to vector<16x128xf32>
    %1351 = arith.addf %1349, %1350 : vector<16x128xf32>
    %1352 = arith.mulf %1351, %1321 : vector<16x128xf32>
    %1353 = arith.mulf %1330, %1333 : vector<16x128xf32>
    %1354 = arith.addf %1352, %1353 : vector<16x128xf32>
    %1355 = math.tanh %1354 : vector<16x128xf32>
    %1356 = arith.mulf %1342, %1355 : vector<16x128xf32>
    %c0_700 = arith.constant 0 : index
    %c0_701 = arith.constant 0 : index
    %1357 = vector.load %arg13[%c0_700, %c0_701] : memref<16x128xf32, #tpu.memory_space<vmem>>, vector<16x128xf32>
    tpu.vector_store %arg13[%c0_700, %c0_701], %1354 {strides = array<i32>} : memref<16x128xf32, #tpu.memory_space<vmem>>, vector<16x128xf32>,
    %1358 = arith.truncf %1356 : vector<16x128xf32> to vector<16x128xbf16>
    %1359 = arith.index_cast %1311 : i32 to index
    %c0_702 = arith.constant 0 : index
    %1360 = vector.load %arg12[%1359, %c0_702] : memref<256x128xbf16, #tpu.memory_space<vmem>>, vector<16x128xbf16>
    tpu.vector_store %arg12[%1359, %c0_702], %1358 {strides = array<i32>} : memref<256x128xbf16, #tpu.memory_space<vmem>>, vector<16x128xbf16>,
    %c10_i32_703 = arith.constant 10 : i32
    %c1_i32_704 = arith.constant 1 : i32
    %1361 = arith.subi %c10_i32_703, %c1_i32_704 : i32
    %c16_i32_705 = arith.constant 16 : i32
    %1362 = arith.muli %1361, %c16_i32_705 : i32
    %1363 = tpu.assume_multiple %1362, 16 : i32
    %c16_i32_706 = arith.constant 16 : i32
    %1364 = arith.muli %c10_i32_703, %c16_i32_706 : i32
    %1365 = tpu.assume_multiple %1364, 16 : i32
    %1366 = arith.index_cast %1365 : i32 to index
    %c0_707 = arith.constant 0 : index
    %1367 = vector.load %arg11[%1366, %c0_707] : memref<256x512xf32, #tpu.memory_space<vmem>>, vector<16x512xf32>
    %1368 = arith.index_cast %1363 : i32 to index
    %c0_708 = arith.constant 0 : index
    %1369 = vector.load %arg12[%1368, %c0_708] : memref<256x128xbf16, #tpu.memory_space<vmem>>, vector<16x128xbf16>
    %c0_709 = arith.constant 0 : index
    %c0_710 = arith.constant 0 : index
    %1370 = vector.load %arg6[%c0_709, %c0_710] : memref<128x512xbf16, #tpu.memory_space<vmem>>, vector<128x512xbf16>
    %cst_711 = arith.constant dense<0.000000e+00> : vector<16x512xf32>
    %1371 = tpu.matmul %1369, %1370, %cst_711 {dimension_numbers = #tpu.dot_dimension_numbers<[1], [0], [0], [1], [0, 0, 1, 1], [], []>} : vector<16x128xbf16>, vector<128x512xbf16>, vector<16x512xf32> -> vector<16x512xf32>
    %1372 = arith.addf %1367, %1371 : vector<16x512xf32>
    %1373 = arith.index_cast %1365 : i32 to index
    %c0_712 = arith.constant 0 : index
    %1374 = vector.load %arg11[%1373, %c0_712] : memref<256x512xf32, #tpu.memory_space<vmem>>, vector<16x512xf32>
    tpu.vector_store %arg11[%1373, %c0_712], %1372 {strides = array<i32>} : memref<256x512xf32, #tpu.memory_space<vmem>>, vector<16x512xf32>,
    %c0_713 = arith.constant 0 : index
    %c0_714 = arith.constant 0 : index
    %1375 = vector.load %arg13[%c0_713, %c0_714] : memref<16x128xf32, #tpu.memory_space<vmem>>, vector<16x128xf32>
    %1376 = arith.index_cast %1365 : i32 to index
    %c0_715 = arith.constant 0 : index
    %1377 = vector.load %arg11[%1376, %c0_715] : memref<256x512xf32, #tpu.memory_space<vmem>>, vector<16x128xf32>
    %cst_716 = arith.constant 5.000000e-01 : f32
    %1378 = vector.broadcast %cst_716 : f32 to vector<16x128xf32>
    %1379 = arith.mulf %1378, %1377 : vector<16x128xf32>
    %1380 = math.tanh %1379 : vector<16x128xf32>
    %cst_717 = arith.constant 5.000000e-01 : f32
    %1381 = vector.broadcast %cst_717 : f32 to vector<16x128xf32>
    %1382 = arith.mulf %1381, %1380 : vector<16x128xf32>
    %cst_718 = arith.constant 5.000000e-01 : f32
    %1383 = vector.broadcast %cst_718 : f32 to vector<16x128xf32>
    %1384 = arith.addf %1382, %1383 : vector<16x128xf32>
    %1385 = arith.index_cast %1365 : i32 to index
    %c256_719 = arith.constant 256 : index
    %1386 = vector.load %arg11[%1385, %c256_719] : memref<256x512xf32, #tpu.memory_space<vmem>>, vector<16x128xf32>
    %1387 = math.tanh %1386 : vector<16x128xf32>
    %1388 = arith.index_cast %1365 : i32 to index
    %c384_720 = arith.constant 384 : index
    %1389 = vector.load %arg11[%1388, %c384_720] : memref<256x512xf32, #tpu.memory_space<vmem>>, vector<16x128xf32>
    %cst_721 = arith.constant 5.000000e-01 : f32
    %1390 = vector.broadcast %cst_721 : f32 to vector<16x128xf32>
    %1391 = arith.mulf %1390, %1389 : vector<16x128xf32>
    %1392 = math.tanh %1391 : vector<16x128xf32>
    %cst_722 = arith.constant 5.000000e-01 : f32
    %1393 = vector.broadcast %cst_722 : f32 to vector<16x128xf32>
    %1394 = arith.mulf %1393, %1392 : vector<16x128xf32>
    %cst_723 = arith.constant 5.000000e-01 : f32
    %1395 = vector.broadcast %cst_723 : f32 to vector<16x128xf32>
    %1396 = arith.addf %1394, %1395 : vector<16x128xf32>
    %1397 = arith.index_cast %1365 : i32 to index
    %c128_724 = arith.constant 128 : index
    %1398 = vector.load %arg11[%1397, %c128_724] : memref<256x512xf32, #tpu.memory_space<vmem>>, vector<16x128xf32>
    %cst_725 = arith.constant 5.000000e-01 : f32
    %1399 = vector.broadcast %cst_725 : f32 to vector<16x128xf32>
    %1400 = arith.mulf %1399, %1398 : vector<16x128xf32>
    %1401 = math.tanh %1400 : vector<16x128xf32>
    %cst_726 = arith.constant 5.000000e-01 : f32
    %1402 = vector.broadcast %cst_726 : f32 to vector<16x128xf32>
    %1403 = arith.mulf %1402, %1401 : vector<16x128xf32>
    %cst_727 = arith.constant 5.000000e-01 : f32
    %1404 = vector.broadcast %cst_727 : f32 to vector<16x128xf32>
    %1405 = arith.addf %1403, %1404 : vector<16x128xf32>
    %1406 = arith.mulf %1405, %1375 : vector<16x128xf32>
    %1407 = arith.mulf %1384, %1387 : vector<16x128xf32>
    %1408 = arith.addf %1406, %1407 : vector<16x128xf32>
    %1409 = math.tanh %1408 : vector<16x128xf32>
    %1410 = arith.mulf %1396, %1409 : vector<16x128xf32>
    %c0_728 = arith.constant 0 : index
    %c0_729 = arith.constant 0 : index
    %1411 = vector.load %arg13[%c0_728, %c0_729] : memref<16x128xf32, #tpu.memory_space<vmem>>, vector<16x128xf32>
    tpu.vector_store %arg13[%c0_728, %c0_729], %1408 {strides = array<i32>} : memref<16x128xf32, #tpu.memory_space<vmem>>, vector<16x128xf32>,
    %1412 = arith.truncf %1410 : vector<16x128xf32> to vector<16x128xbf16>
    %1413 = arith.index_cast %1365 : i32 to index
    %c0_730 = arith.constant 0 : index
    %1414 = vector.load %arg12[%1413, %c0_730] : memref<256x128xbf16, #tpu.memory_space<vmem>>, vector<16x128xbf16>
    tpu.vector_store %arg12[%1413, %c0_730], %1412 {strides = array<i32>} : memref<256x128xbf16, #tpu.memory_space<vmem>>, vector<16x128xbf16>,
    %c11_i32_731 = arith.constant 11 : i32
    %c1_i32_732 = arith.constant 1 : i32
    %1415 = arith.subi %c11_i32_731, %c1_i32_732 : i32
    %c16_i32_733 = arith.constant 16 : i32
    %1416 = arith.muli %1415, %c16_i32_733 : i32
    %1417 = tpu.assume_multiple %1416, 16 : i32
    %c16_i32_734 = arith.constant 16 : i32
    %1418 = arith.muli %c11_i32_731, %c16_i32_734 : i32
    %1419 = tpu.assume_multiple %1418, 16 : i32
    %1420 = arith.index_cast %1419 : i32 to index
    %c0_735 = arith.constant 0 : index
    %1421 = vector.load %arg11[%1420, %c0_735] : memref<256x512xf32, #tpu.memory_space<vmem>>, vector<16x512xf32>
    %1422 = arith.index_cast %1417 : i32 to index
    %c0_736 = arith.constant 0 : index
    %1423 = vector.load %arg12[%1422, %c0_736] : memref<256x128xbf16, #tpu.memory_space<vmem>>, vector<16x128xbf16>
    %c0_737 = arith.constant 0 : index
    %c0_738 = arith.constant 0 : index
    %1424 = vector.load %arg6[%c0_737, %c0_738] : memref<128x512xbf16, #tpu.memory_space<vmem>>, vector<128x512xbf16>
    %cst_739 = arith.constant dense<0.000000e+00> : vector<16x512xf32>
    %1425 = tpu.matmul %1423, %1424, %cst_739 {dimension_numbers = #tpu.dot_dimension_numbers<[1], [0], [0], [1], [0, 0, 1, 1], [], []>} : vector<16x128xbf16>, vector<128x512xbf16>, vector<16x512xf32> -> vector<16x512xf32>
    %1426 = arith.addf %1421, %1425 : vector<16x512xf32>
    %1427 = arith.index_cast %1419 : i32 to index
    %c0_740 = arith.constant 0 : index
    %1428 = vector.load %arg11[%1427, %c0_740] : memref<256x512xf32, #tpu.memory_space<vmem>>, vector<16x512xf32>
    tpu.vector_store %arg11[%1427, %c0_740], %1426 {strides = array<i32>} : memref<256x512xf32, #tpu.memory_space<vmem>>, vector<16x512xf32>,
    %c0_741 = arith.constant 0 : index
    %c0_742 = arith.constant 0 : index
    %1429 = vector.load %arg13[%c0_741, %c0_742] : memref<16x128xf32, #tpu.memory_space<vmem>>, vector<16x128xf32>
    %1430 = arith.index_cast %1419 : i32 to index
    %c0_743 = arith.constant 0 : index
    %1431 = vector.load %arg11[%1430, %c0_743] : memref<256x512xf32, #tpu.memory_space<vmem>>, vector<16x128xf32>
    %cst_744 = arith.constant 5.000000e-01 : f32
    %1432 = vector.broadcast %cst_744 : f32 to vector<16x128xf32>
    %1433 = arith.mulf %1432, %1431 : vector<16x128xf32>
    %1434 = math.tanh %1433 : vector<16x128xf32>
    %cst_745 = arith.constant 5.000000e-01 : f32
    %1435 = vector.broadcast %cst_745 : f32 to vector<16x128xf32>
    %1436 = arith.mulf %1435, %1434 : vector<16x128xf32>
    %cst_746 = arith.constant 5.000000e-01 : f32
    %1437 = vector.broadcast %cst_746 : f32 to vector<16x128xf32>
    %1438 = arith.addf %1436, %1437 : vector<16x128xf32>
    %1439 = arith.index_cast %1419 : i32 to index
    %c256_747 = arith.constant 256 : index
    %1440 = vector.load %arg11[%1439, %c256_747] : memref<256x512xf32, #tpu.memory_space<vmem>>, vector<16x128xf32>
    %1441 = math.tanh %1440 : vector<16x128xf32>
    %1442 = arith.index_cast %1419 : i32 to index
    %c384_748 = arith.constant 384 : index
    %1443 = vector.load %arg11[%1442, %c384_748] : memref<256x512xf32, #tpu.memory_space<vmem>>, vector<16x128xf32>
    %cst_749 = arith.constant 5.000000e-01 : f32
    %1444 = vector.broadcast %cst_749 : f32 to vector<16x128xf32>
    %1445 = arith.mulf %1444, %1443 : vector<16x128xf32>
    %1446 = math.tanh %1445 : vector<16x128xf32>
    %cst_750 = arith.constant 5.000000e-01 : f32
    %1447 = vector.broadcast %cst_750 : f32 to vector<16x128xf32>
    %1448 = arith.mulf %1447, %1446 : vector<16x128xf32>
    %cst_751 = arith.constant 5.000000e-01 : f32
    %1449 = vector.broadcast %cst_751 : f32 to vector<16x128xf32>
    %1450 = arith.addf %1448, %1449 : vector<16x128xf32>
    %1451 = arith.index_cast %1419 : i32 to index
    %c128_752 = arith.constant 128 : index
    %1452 = vector.load %arg11[%1451, %c128_752] : memref<256x512xf32, #tpu.memory_space<vmem>>, vector<16x128xf32>
    %cst_753 = arith.constant 5.000000e-01 : f32
    %1453 = vector.broadcast %cst_753 : f32 to vector<16x128xf32>
    %1454 = arith.mulf %1453, %1452 : vector<16x128xf32>
    %1455 = math.tanh %1454 : vector<16x128xf32>
    %cst_754 = arith.constant 5.000000e-01 : f32
    %1456 = vector.broadcast %cst_754 : f32 to vector<16x128xf32>
    %1457 = arith.mulf %1456, %1455 : vector<16x128xf32>
    %cst_755 = arith.constant 5.000000e-01 : f32
    %1458 = vector.broadcast %cst_755 : f32 to vector<16x128xf32>
    %1459 = arith.addf %1457, %1458 : vector<16x128xf32>
    %1460 = arith.mulf %1459, %1429 : vector<16x128xf32>
    %1461 = arith.mulf %1438, %1441 : vector<16x128xf32>
    %1462 = arith.addf %1460, %1461 : vector<16x128xf32>
    %1463 = math.tanh %1462 : vector<16x128xf32>
    %1464 = arith.mulf %1450, %1463 : vector<16x128xf32>
    %c0_756 = arith.constant 0 : index
    %c0_757 = arith.constant 0 : index
    %1465 = vector.load %arg13[%c0_756, %c0_757] : memref<16x128xf32, #tpu.memory_space<vmem>>, vector<16x128xf32>
    tpu.vector_store %arg13[%c0_756, %c0_757], %1462 {strides = array<i32>} : memref<16x128xf32, #tpu.memory_space<vmem>>, vector<16x128xf32>,
    %1466 = arith.truncf %1464 : vector<16x128xf32> to vector<16x128xbf16>
    %1467 = arith.index_cast %1419 : i32 to index
    %c0_758 = arith.constant 0 : index
    %1468 = vector.load %arg12[%1467, %c0_758] : memref<256x128xbf16, #tpu.memory_space<vmem>>, vector<16x128xbf16>
    tpu.vector_store %arg12[%1467, %c0_758], %1466 {strides = array<i32>} : memref<256x128xbf16, #tpu.memory_space<vmem>>, vector<16x128xbf16>,
    %c12_i32_759 = arith.constant 12 : i32
    %c1_i32_760 = arith.constant 1 : i32
    %1469 = arith.subi %c12_i32_759, %c1_i32_760 : i32
    %c16_i32_761 = arith.constant 16 : i32
    %1470 = arith.muli %1469, %c16_i32_761 : i32
    %1471 = tpu.assume_multiple %1470, 16 : i32
    %c16_i32_762 = arith.constant 16 : i32
    %1472 = arith.muli %c12_i32_759, %c16_i32_762 : i32
    %1473 = tpu.assume_multiple %1472, 16 : i32
    %1474 = arith.index_cast %1473 : i32 to index
    %c0_763 = arith.constant 0 : index
    %1475 = vector.load %arg11[%1474, %c0_763] : memref<256x512xf32, #tpu.memory_space<vmem>>, vector<16x512xf32>
    %1476 = arith.index_cast %1471 : i32 to index
    %c0_764 = arith.constant 0 : index
    %1477 = vector.load %arg12[%1476, %c0_764] : memref<256x128xbf16, #tpu.memory_space<vmem>>, vector<16x128xbf16>
    %c0_765 = arith.constant 0 : index
    %c0_766 = arith.constant 0 : index
    %1478 = vector.load %arg6[%c0_765, %c0_766] : memref<128x512xbf16, #tpu.memory_space<vmem>>, vector<128x512xbf16>
    %cst_767 = arith.constant dense<0.000000e+00> : vector<16x512xf32>
    %1479 = tpu.matmul %1477, %1478, %cst_767 {dimension_numbers = #tpu.dot_dimension_numbers<[1], [0], [0], [1], [0, 0, 1, 1], [], []>} : vector<16x128xbf16>, vector<128x512xbf16>, vector<16x512xf32> -> vector<16x512xf32>
    %1480 = arith.addf %1475, %1479 : vector<16x512xf32>
    %1481 = arith.index_cast %1473 : i32 to index
    %c0_768 = arith.constant 0 : index
    %1482 = vector.load %arg11[%1481, %c0_768] : memref<256x512xf32, #tpu.memory_space<vmem>>, vector<16x512xf32>
    tpu.vector_store %arg11[%1481, %c0_768], %1480 {strides = array<i32>} : memref<256x512xf32, #tpu.memory_space<vmem>>, vector<16x512xf32>,
    %c0_769 = arith.constant 0 : index
    %c0_770 = arith.constant 0 : index
    %1483 = vector.load %arg13[%c0_769, %c0_770] : memref<16x128xf32, #tpu.memory_space<vmem>>, vector<16x128xf32>
    %1484 = arith.index_cast %1473 : i32 to index
    %c0_771 = arith.constant 0 : index
    %1485 = vector.load %arg11[%1484, %c0_771] : memref<256x512xf32, #tpu.memory_space<vmem>>, vector<16x128xf32>
    %cst_772 = arith.constant 5.000000e-01 : f32
    %1486 = vector.broadcast %cst_772 : f32 to vector<16x128xf32>
    %1487 = arith.mulf %1486, %1485 : vector<16x128xf32>
    %1488 = math.tanh %1487 : vector<16x128xf32>
    %cst_773 = arith.constant 5.000000e-01 : f32
    %1489 = vector.broadcast %cst_773 : f32 to vector<16x128xf32>
    %1490 = arith.mulf %1489, %1488 : vector<16x128xf32>
    %cst_774 = arith.constant 5.000000e-01 : f32
    %1491 = vector.broadcast %cst_774 : f32 to vector<16x128xf32>
    %1492 = arith.addf %1490, %1491 : vector<16x128xf32>
    %1493 = arith.index_cast %1473 : i32 to index
    %c256_775 = arith.constant 256 : index
    %1494 = vector.load %arg11[%1493, %c256_775] : memref<256x512xf32, #tpu.memory_space<vmem>>, vector<16x128xf32>
    %1495 = math.tanh %1494 : vector<16x128xf32>
    %1496 = arith.index_cast %1473 : i32 to index
    %c384_776 = arith.constant 384 : index
    %1497 = vector.load %arg11[%1496, %c384_776] : memref<256x512xf32, #tpu.memory_space<vmem>>, vector<16x128xf32>
    %cst_777 = arith.constant 5.000000e-01 : f32
    %1498 = vector.broadcast %cst_777 : f32 to vector<16x128xf32>
    %1499 = arith.mulf %1498, %1497 : vector<16x128xf32>
    %1500 = math.tanh %1499 : vector<16x128xf32>
    %cst_778 = arith.constant 5.000000e-01 : f32
    %1501 = vector.broadcast %cst_778 : f32 to vector<16x128xf32>
    %1502 = arith.mulf %1501, %1500 : vector<16x128xf32>
    %cst_779 = arith.constant 5.000000e-01 : f32
    %1503 = vector.broadcast %cst_779 : f32 to vector<16x128xf32>
    %1504 = arith.addf %1502, %1503 : vector<16x128xf32>
    %1505 = arith.index_cast %1473 : i32 to index
    %c128_780 = arith.constant 128 : index
    %1506 = vector.load %arg11[%1505, %c128_780] : memref<256x512xf32, #tpu.memory_space<vmem>>, vector<16x128xf32>
    %cst_781 = arith.constant 5.000000e-01 : f32
    %1507 = vector.broadcast %cst_781 : f32 to vector<16x128xf32>
    %1508 = arith.mulf %1507, %1506 : vector<16x128xf32>
    %1509 = math.tanh %1508 : vector<16x128xf32>
    %cst_782 = arith.constant 5.000000e-01 : f32
    %1510 = vector.broadcast %cst_782 : f32 to vector<16x128xf32>
    %1511 = arith.mulf %1510, %1509 : vector<16x128xf32>
    %cst_783 = arith.constant 5.000000e-01 : f32
    %1512 = vector.broadcast %cst_783 : f32 to vector<16x128xf32>
    %1513 = arith.addf %1511, %1512 : vector<16x128xf32>
    %1514 = arith.mulf %1513, %1483 : vector<16x128xf32>
    %1515 = arith.mulf %1492, %1495 : vector<16x128xf32>
    %1516 = arith.addf %1514, %1515 : vector<16x128xf32>
    %1517 = math.tanh %1516 : vector<16x128xf32>
    %1518 = arith.mulf %1504, %1517 : vector<16x128xf32>
    %c0_784 = arith.constant 0 : index
    %c0_785 = arith.constant 0 : index
    %1519 = vector.load %arg13[%c0_784, %c0_785] : memref<16x128xf32, #tpu.memory_space<vmem>>, vector<16x128xf32>
    tpu.vector_store %arg13[%c0_784, %c0_785], %1516 {strides = array<i32>} : memref<16x128xf32, #tpu.memory_space<vmem>>, vector<16x128xf32>,
    %1520 = arith.truncf %1518 : vector<16x128xf32> to vector<16x128xbf16>
    %1521 = arith.index_cast %1473 : i32 to index
    %c0_786 = arith.constant 0 : index
    %1522 = vector.load %arg12[%1521, %c0_786] : memref<256x128xbf16, #tpu.memory_space<vmem>>, vector<16x128xbf16>
    tpu.vector_store %arg12[%1521, %c0_786], %1520 {strides = array<i32>} : memref<256x128xbf16, #tpu.memory_space<vmem>>, vector<16x128xbf16>,
    %c13_i32_787 = arith.constant 13 : i32
    %c1_i32_788 = arith.constant 1 : i32
    %1523 = arith.subi %c13_i32_787, %c1_i32_788 : i32
    %c16_i32_789 = arith.constant 16 : i32
    %1524 = arith.muli %1523, %c16_i32_789 : i32
    %1525 = tpu.assume_multiple %1524, 16 : i32
    %c16_i32_790 = arith.constant 16 : i32
    %1526 = arith.muli %c13_i32_787, %c16_i32_790 : i32
    %1527 = tpu.assume_multiple %1526, 16 : i32
    %1528 = arith.index_cast %1527 : i32 to index
    %c0_791 = arith.constant 0 : index
    %1529 = vector.load %arg11[%1528, %c0_791] : memref<256x512xf32, #tpu.memory_space<vmem>>, vector<16x512xf32>
    %1530 = arith.index_cast %1525 : i32 to index
    %c0_792 = arith.constant 0 : index
    %1531 = vector.load %arg12[%1530, %c0_792] : memref<256x128xbf16, #tpu.memory_space<vmem>>, vector<16x128xbf16>
    %c0_793 = arith.constant 0 : index
    %c0_794 = arith.constant 0 : index
    %1532 = vector.load %arg6[%c0_793, %c0_794] : memref<128x512xbf16, #tpu.memory_space<vmem>>, vector<128x512xbf16>
    %cst_795 = arith.constant dense<0.000000e+00> : vector<16x512xf32>
    %1533 = tpu.matmul %1531, %1532, %cst_795 {dimension_numbers = #tpu.dot_dimension_numbers<[1], [0], [0], [1], [0, 0, 1, 1], [], []>} : vector<16x128xbf16>, vector<128x512xbf16>, vector<16x512xf32> -> vector<16x512xf32>
    %1534 = arith.addf %1529, %1533 : vector<16x512xf32>
    %1535 = arith.index_cast %1527 : i32 to index
    %c0_796 = arith.constant 0 : index
    %1536 = vector.load %arg11[%1535, %c0_796] : memref<256x512xf32, #tpu.memory_space<vmem>>, vector<16x512xf32>
    tpu.vector_store %arg11[%1535, %c0_796], %1534 {strides = array<i32>} : memref<256x512xf32, #tpu.memory_space<vmem>>, vector<16x512xf32>,
    %c0_797 = arith.constant 0 : index
    %c0_798 = arith.constant 0 : index
    %1537 = vector.load %arg13[%c0_797, %c0_798] : memref<16x128xf32, #tpu.memory_space<vmem>>, vector<16x128xf32>
    %1538 = arith.index_cast %1527 : i32 to index
    %c0_799 = arith.constant 0 : index
    %1539 = vector.load %arg11[%1538, %c0_799] : memref<256x512xf32, #tpu.memory_space<vmem>>, vector<16x128xf32>
    %cst_800 = arith.constant 5.000000e-01 : f32
    %1540 = vector.broadcast %cst_800 : f32 to vector<16x128xf32>
    %1541 = arith.mulf %1540, %1539 : vector<16x128xf32>
    %1542 = math.tanh %1541 : vector<16x128xf32>
    %cst_801 = arith.constant 5.000000e-01 : f32
    %1543 = vector.broadcast %cst_801 : f32 to vector<16x128xf32>
    %1544 = arith.mulf %1543, %1542 : vector<16x128xf32>
    %cst_802 = arith.constant 5.000000e-01 : f32
    %1545 = vector.broadcast %cst_802 : f32 to vector<16x128xf32>
    %1546 = arith.addf %1544, %1545 : vector<16x128xf32>
    %1547 = arith.index_cast %1527 : i32 to index
    %c256_803 = arith.constant 256 : index
    %1548 = vector.load %arg11[%1547, %c256_803] : memref<256x512xf32, #tpu.memory_space<vmem>>, vector<16x128xf32>
    %1549 = math.tanh %1548 : vector<16x128xf32>
    %1550 = arith.index_cast %1527 : i32 to index
    %c384_804 = arith.constant 384 : index
    %1551 = vector.load %arg11[%1550, %c384_804] : memref<256x512xf32, #tpu.memory_space<vmem>>, vector<16x128xf32>
    %cst_805 = arith.constant 5.000000e-01 : f32
    %1552 = vector.broadcast %cst_805 : f32 to vector<16x128xf32>
    %1553 = arith.mulf %1552, %1551 : vector<16x128xf32>
    %1554 = math.tanh %1553 : vector<16x128xf32>
    %cst_806 = arith.constant 5.000000e-01 : f32
    %1555 = vector.broadcast %cst_806 : f32 to vector<16x128xf32>
    %1556 = arith.mulf %1555, %1554 : vector<16x128xf32>
    %cst_807 = arith.constant 5.000000e-01 : f32
    %1557 = vector.broadcast %cst_807 : f32 to vector<16x128xf32>
    %1558 = arith.addf %1556, %1557 : vector<16x128xf32>
    %1559 = arith.index_cast %1527 : i32 to index
    %c128_808 = arith.constant 128 : index
    %1560 = vector.load %arg11[%1559, %c128_808] : memref<256x512xf32, #tpu.memory_space<vmem>>, vector<16x128xf32>
    %cst_809 = arith.constant 5.000000e-01 : f32
    %1561 = vector.broadcast %cst_809 : f32 to vector<16x128xf32>
    %1562 = arith.mulf %1561, %1560 : vector<16x128xf32>
    %1563 = math.tanh %1562 : vector<16x128xf32>
    %cst_810 = arith.constant 5.000000e-01 : f32
    %1564 = vector.broadcast %cst_810 : f32 to vector<16x128xf32>
    %1565 = arith.mulf %1564, %1563 : vector<16x128xf32>
    %cst_811 = arith.constant 5.000000e-01 : f32
    %1566 = vector.broadcast %cst_811 : f32 to vector<16x128xf32>
    %1567 = arith.addf %1565, %1566 : vector<16x128xf32>
    %1568 = arith.mulf %1567, %1537 : vector<16x128xf32>
    %1569 = arith.mulf %1546, %1549 : vector<16x128xf32>
    %1570 = arith.addf %1568, %1569 : vector<16x128xf32>
    %1571 = math.tanh %1570 : vector<16x128xf32>
    %1572 = arith.mulf %1558, %1571 : vector<16x128xf32>
    %c0_812 = arith.constant 0 : index
    %c0_813 = arith.constant 0 : index
    %1573 = vector.load %arg13[%c0_812, %c0_813] : memref<16x128xf32, #tpu.memory_space<vmem>>, vector<16x128xf32>
    tpu.vector_store %arg13[%c0_812, %c0_813], %1570 {strides = array<i32>} : memref<16x128xf32, #tpu.memory_space<vmem>>, vector<16x128xf32>,
    %1574 = arith.truncf %1572 : vector<16x128xf32> to vector<16x128xbf16>
    %1575 = arith.index_cast %1527 : i32 to index
    %c0_814 = arith.constant 0 : index
    %1576 = vector.load %arg12[%1575, %c0_814] : memref<256x128xbf16, #tpu.memory_space<vmem>>, vector<16x128xbf16>
    tpu.vector_store %arg12[%1575, %c0_814], %1574 {strides = array<i32>} : memref<256x128xbf16, #tpu.memory_space<vmem>>, vector<16x128xbf16>,
    %c14_i32_815 = arith.constant 14 : i32
    %c1_i32_816 = arith.constant 1 : i32
    %1577 = arith.subi %c14_i32_815, %c1_i32_816 : i32
    %c16_i32_817 = arith.constant 16 : i32
    %1578 = arith.muli %1577, %c16_i32_817 : i32
    %1579 = tpu.assume_multiple %1578, 16 : i32
    %c16_i32_818 = arith.constant 16 : i32
    %1580 = arith.muli %c14_i32_815, %c16_i32_818 : i32
    %1581 = tpu.assume_multiple %1580, 16 : i32
    %1582 = arith.index_cast %1581 : i32 to index
    %c0_819 = arith.constant 0 : index
    %1583 = vector.load %arg11[%1582, %c0_819] : memref<256x512xf32, #tpu.memory_space<vmem>>, vector<16x512xf32>
    %1584 = arith.index_cast %1579 : i32 to index
    %c0_820 = arith.constant 0 : index
    %1585 = vector.load %arg12[%1584, %c0_820] : memref<256x128xbf16, #tpu.memory_space<vmem>>, vector<16x128xbf16>
    %c0_821 = arith.constant 0 : index
    %c0_822 = arith.constant 0 : index
    %1586 = vector.load %arg6[%c0_821, %c0_822] : memref<128x512xbf16, #tpu.memory_space<vmem>>, vector<128x512xbf16>
    %cst_823 = arith.constant dense<0.000000e+00> : vector<16x512xf32>
    %1587 = tpu.matmul %1585, %1586, %cst_823 {dimension_numbers = #tpu.dot_dimension_numbers<[1], [0], [0], [1], [0, 0, 1, 1], [], []>} : vector<16x128xbf16>, vector<128x512xbf16>, vector<16x512xf32> -> vector<16x512xf32>
    %1588 = arith.addf %1583, %1587 : vector<16x512xf32>
    %1589 = arith.index_cast %1581 : i32 to index
    %c0_824 = arith.constant 0 : index
    %1590 = vector.load %arg11[%1589, %c0_824] : memref<256x512xf32, #tpu.memory_space<vmem>>, vector<16x512xf32>
    tpu.vector_store %arg11[%1589, %c0_824], %1588 {strides = array<i32>} : memref<256x512xf32, #tpu.memory_space<vmem>>, vector<16x512xf32>,
    %c0_825 = arith.constant 0 : index
    %c0_826 = arith.constant 0 : index
    %1591 = vector.load %arg13[%c0_825, %c0_826] : memref<16x128xf32, #tpu.memory_space<vmem>>, vector<16x128xf32>
    %1592 = arith.index_cast %1581 : i32 to index
    %c0_827 = arith.constant 0 : index
    %1593 = vector.load %arg11[%1592, %c0_827] : memref<256x512xf32, #tpu.memory_space<vmem>>, vector<16x128xf32>
    %cst_828 = arith.constant 5.000000e-01 : f32
    %1594 = vector.broadcast %cst_828 : f32 to vector<16x128xf32>
    %1595 = arith.mulf %1594, %1593 : vector<16x128xf32>
    %1596 = math.tanh %1595 : vector<16x128xf32>
    %cst_829 = arith.constant 5.000000e-01 : f32
    %1597 = vector.broadcast %cst_829 : f32 to vector<16x128xf32>
    %1598 = arith.mulf %1597, %1596 : vector<16x128xf32>
    %cst_830 = arith.constant 5.000000e-01 : f32
    %1599 = vector.broadcast %cst_830 : f32 to vector<16x128xf32>
    %1600 = arith.addf %1598, %1599 : vector<16x128xf32>
    %1601 = arith.index_cast %1581 : i32 to index
    %c256_831 = arith.constant 256 : index
    %1602 = vector.load %arg11[%1601, %c256_831] : memref<256x512xf32, #tpu.memory_space<vmem>>, vector<16x128xf32>
    %1603 = math.tanh %1602 : vector<16x128xf32>
    %1604 = arith.index_cast %1581 : i32 to index
    %c384_832 = arith.constant 384 : index
    %1605 = vector.load %arg11[%1604, %c384_832] : memref<256x512xf32, #tpu.memory_space<vmem>>, vector<16x128xf32>
    %cst_833 = arith.constant 5.000000e-01 : f32
    %1606 = vector.broadcast %cst_833 : f32 to vector<16x128xf32>
    %1607 = arith.mulf %1606, %1605 : vector<16x128xf32>
    %1608 = math.tanh %1607 : vector<16x128xf32>
    %cst_834 = arith.constant 5.000000e-01 : f32
    %1609 = vector.broadcast %cst_834 : f32 to vector<16x128xf32>
    %1610 = arith.mulf %1609, %1608 : vector<16x128xf32>
    %cst_835 = arith.constant 5.000000e-01 : f32
    %1611 = vector.broadcast %cst_835 : f32 to vector<16x128xf32>
    %1612 = arith.addf %1610, %1611 : vector<16x128xf32>
    %1613 = arith.index_cast %1581 : i32 to index
    %c128_836 = arith.constant 128 : index
    %1614 = vector.load %arg11[%1613, %c128_836] : memref<256x512xf32, #tpu.memory_space<vmem>>, vector<16x128xf32>
    %cst_837 = arith.constant 5.000000e-01 : f32
    %1615 = vector.broadcast %cst_837 : f32 to vector<16x128xf32>
    %1616 = arith.mulf %1615, %1614 : vector<16x128xf32>
    %1617 = math.tanh %1616 : vector<16x128xf32>
    %cst_838 = arith.constant 5.000000e-01 : f32
    %1618 = vector.broadcast %cst_838 : f32 to vector<16x128xf32>
    %1619 = arith.mulf %1618, %1617 : vector<16x128xf32>
    %cst_839 = arith.constant 5.000000e-01 : f32
    %1620 = vector.broadcast %cst_839 : f32 to vector<16x128xf32>
    %1621 = arith.addf %1619, %1620 : vector<16x128xf32>
    %1622 = arith.mulf %1621, %1591 : vector<16x128xf32>
    %1623 = arith.mulf %1600, %1603 : vector<16x128xf32>
    %1624 = arith.addf %1622, %1623 : vector<16x128xf32>
    %1625 = math.tanh %1624 : vector<16x128xf32>
    %1626 = arith.mulf %1612, %1625 : vector<16x128xf32>
    %c0_840 = arith.constant 0 : index
    %c0_841 = arith.constant 0 : index
    %1627 = vector.load %arg13[%c0_840, %c0_841] : memref<16x128xf32, #tpu.memory_space<vmem>>, vector<16x128xf32>
    tpu.vector_store %arg13[%c0_840, %c0_841], %1624 {strides = array<i32>} : memref<16x128xf32, #tpu.memory_space<vmem>>, vector<16x128xf32>,
    %1628 = arith.truncf %1626 : vector<16x128xf32> to vector<16x128xbf16>
    %1629 = arith.index_cast %1581 : i32 to index
    %c0_842 = arith.constant 0 : index
    %1630 = vector.load %arg12[%1629, %c0_842] : memref<256x128xbf16, #tpu.memory_space<vmem>>, vector<16x128xbf16>
    tpu.vector_store %arg12[%1629, %c0_842], %1628 {strides = array<i32>} : memref<256x128xbf16, #tpu.memory_space<vmem>>, vector<16x128xbf16>,
    %c15_i32_843 = arith.constant 15 : i32
    %c1_i32_844 = arith.constant 1 : i32
    %1631 = arith.subi %c15_i32_843, %c1_i32_844 : i32
    %c16_i32_845 = arith.constant 16 : i32
    %1632 = arith.muli %1631, %c16_i32_845 : i32
    %1633 = tpu.assume_multiple %1632, 16 : i32
    %c16_i32_846 = arith.constant 16 : i32
    %1634 = arith.muli %c15_i32_843, %c16_i32_846 : i32
    %1635 = tpu.assume_multiple %1634, 16 : i32
    %1636 = arith.index_cast %1635 : i32 to index
    %c0_847 = arith.constant 0 : index
    %1637 = vector.load %arg11[%1636, %c0_847] : memref<256x512xf32, #tpu.memory_space<vmem>>, vector<16x512xf32>
    %1638 = arith.index_cast %1633 : i32 to index
    %c0_848 = arith.constant 0 : index
    %1639 = vector.load %arg12[%1638, %c0_848] : memref<256x128xbf16, #tpu.memory_space<vmem>>, vector<16x128xbf16>
    %c0_849 = arith.constant 0 : index
    %c0_850 = arith.constant 0 : index
    %1640 = vector.load %arg6[%c0_849, %c0_850] : memref<128x512xbf16, #tpu.memory_space<vmem>>, vector<128x512xbf16>
    %cst_851 = arith.constant dense<0.000000e+00> : vector<16x512xf32>
    %1641 = tpu.matmul %1639, %1640, %cst_851 {dimension_numbers = #tpu.dot_dimension_numbers<[1], [0], [0], [1], [0, 0, 1, 1], [], []>} : vector<16x128xbf16>, vector<128x512xbf16>, vector<16x512xf32> -> vector<16x512xf32>
    %1642 = arith.addf %1637, %1641 : vector<16x512xf32>
    %1643 = arith.index_cast %1635 : i32 to index
    %c0_852 = arith.constant 0 : index
    %1644 = vector.load %arg11[%1643, %c0_852] : memref<256x512xf32, #tpu.memory_space<vmem>>, vector<16x512xf32>
    tpu.vector_store %arg11[%1643, %c0_852], %1642 {strides = array<i32>} : memref<256x512xf32, #tpu.memory_space<vmem>>, vector<16x512xf32>,
    %c0_853 = arith.constant 0 : index
    %c0_854 = arith.constant 0 : index
    %1645 = vector.load %arg13[%c0_853, %c0_854] : memref<16x128xf32, #tpu.memory_space<vmem>>, vector<16x128xf32>
    %1646 = arith.index_cast %1635 : i32 to index
    %c0_855 = arith.constant 0 : index
    %1647 = vector.load %arg11[%1646, %c0_855] : memref<256x512xf32, #tpu.memory_space<vmem>>, vector<16x128xf32>
    %cst_856 = arith.constant 5.000000e-01 : f32
    %1648 = vector.broadcast %cst_856 : f32 to vector<16x128xf32>
    %1649 = arith.mulf %1648, %1647 : vector<16x128xf32>
    %1650 = math.tanh %1649 : vector<16x128xf32>
    %cst_857 = arith.constant 5.000000e-01 : f32
    %1651 = vector.broadcast %cst_857 : f32 to vector<16x128xf32>
    %1652 = arith.mulf %1651, %1650 : vector<16x128xf32>
    %cst_858 = arith.constant 5.000000e-01 : f32
    %1653 = vector.broadcast %cst_858 : f32 to vector<16x128xf32>
    %1654 = arith.addf %1652, %1653 : vector<16x128xf32>
    %1655 = arith.index_cast %1635 : i32 to index
    %c256_859 = arith.constant 256 : index
    %1656 = vector.load %arg11[%1655, %c256_859] : memref<256x512xf32, #tpu.memory_space<vmem>>, vector<16x128xf32>
    %1657 = math.tanh %1656 : vector<16x128xf32>
    %1658 = arith.index_cast %1635 : i32 to index
    %c384_860 = arith.constant 384 : index
    %1659 = vector.load %arg11[%1658, %c384_860] : memref<256x512xf32, #tpu.memory_space<vmem>>, vector<16x128xf32>
    %cst_861 = arith.constant 5.000000e-01 : f32
    %1660 = vector.broadcast %cst_861 : f32 to vector<16x128xf32>
    %1661 = arith.mulf %1660, %1659 : vector<16x128xf32>
    %1662 = math.tanh %1661 : vector<16x128xf32>
    %cst_862 = arith.constant 5.000000e-01 : f32
    %1663 = vector.broadcast %cst_862 : f32 to vector<16x128xf32>
    %1664 = arith.mulf %1663, %1662 : vector<16x128xf32>
    %cst_863 = arith.constant 5.000000e-01 : f32
    %1665 = vector.broadcast %cst_863 : f32 to vector<16x128xf32>
    %1666 = arith.addf %1664, %1665 : vector<16x128xf32>
    %1667 = arith.index_cast %1635 : i32 to index
    %c128_864 = arith.constant 128 : index
    %1668 = vector.load %arg11[%1667, %c128_864] : memref<256x512xf32, #tpu.memory_space<vmem>>, vector<16x128xf32>
    %cst_865 = arith.constant 5.000000e-01 : f32
    %1669 = vector.broadcast %cst_865 : f32 to vector<16x128xf32>
    %1670 = arith.mulf %1669, %1668 : vector<16x128xf32>
    %1671 = math.tanh %1670 : vector<16x128xf32>
    %cst_866 = arith.constant 5.000000e-01 : f32
    %1672 = vector.broadcast %cst_866 : f32 to vector<16x128xf32>
    %1673 = arith.mulf %1672, %1671 : vector<16x128xf32>
    %cst_867 = arith.constant 5.000000e-01 : f32
    %1674 = vector.broadcast %cst_867 : f32 to vector<16x128xf32>
    %1675 = arith.addf %1673, %1674 : vector<16x128xf32>
    %1676 = arith.mulf %1675, %1645 : vector<16x128xf32>
    %1677 = arith.mulf %1654, %1657 : vector<16x128xf32>
    %1678 = arith.addf %1676, %1677 : vector<16x128xf32>
    %1679 = math.tanh %1678 : vector<16x128xf32>
    %1680 = arith.mulf %1666, %1679 : vector<16x128xf32>
    %c0_868 = arith.constant 0 : index
    %c0_869 = arith.constant 0 : index
    %1681 = vector.load %arg13[%c0_868, %c0_869] : memref<16x128xf32, #tpu.memory_space<vmem>>, vector<16x128xf32>
    tpu.vector_store %arg13[%c0_868, %c0_869], %1678 {strides = array<i32>} : memref<16x128xf32, #tpu.memory_space<vmem>>, vector<16x128xf32>,
    %1682 = arith.truncf %1680 : vector<16x128xf32> to vector<16x128xbf16>
    %1683 = arith.index_cast %1635 : i32 to index
    %c0_870 = arith.constant 0 : index
    %1684 = vector.load %arg12[%1683, %c0_870] : memref<256x128xbf16, #tpu.memory_space<vmem>>, vector<16x128xbf16>
    tpu.vector_store %arg12[%1683, %c0_870], %1682 {strides = array<i32>} : memref<256x128xbf16, #tpu.memory_space<vmem>>, vector<16x128xbf16>,
    %c15_i32_871 = arith.constant 15 : i32
    %c0_872 = arith.constant 0 : index
    %c0_873 = arith.constant 0 : index
    %1685 = vector.load %arg8[%c0_872, %c0_873] : memref<8x128xbf16, #tpu.memory_space<vmem>>, vector<8x128xbf16>
    %c0_874 = arith.constant 0 : index
    %c0_875 = arith.constant 0 : index
    %1686 = vector.load %arg12[%c0_874, %c0_875] : memref<256x128xbf16, #tpu.memory_space<vmem>>, vector<256x128xbf16>
    %cst_876 = arith.constant dense<0.000000e+00> : vector<8x256xf32>
    %1687 = tpu.matmul %1685, %1686, %cst_876 {dimension_numbers = #tpu.dot_dimension_numbers<[1], [1], [0], [0], [0, 0, 1, 0], [], []>} : vector<8x128xbf16>, vector<256x128xbf16>, vector<8x256xf32> -> vector<8x256xf32>
    %c0_877 = arith.constant 0 : index
    %c0_878 = arith.constant 0 : index
    %1688 = vector.load %arg9[%c0_877, %c0_878] : memref<8x1xf32, #tpu.memory_space<vmem>>, vector<8x1xf32>
    %1689 = vector.broadcast %1688 : vector<8x1xf32> to vector<8x256xf32>
    %1690 = arith.addf %1687, %1689 : vector<8x256xf32>
    %c0_879 = arith.constant 0 : index
    %c0_880 = arith.constant 0 : index
    %c0_881 = arith.constant 0 : index
    %1691 = vector.load %arg10[%c0_879, %c0_880, %c0_881] : memref<1x8x256xf32, #tpu.memory_space<vmem>>, vector<1x8x256xf32>
    %1692 = vector.shape_cast %1691 : vector<1x8x256xf32> to vector<8x256xf32>
    %1693 = vector.shape_cast %1690 : vector<8x256xf32> to vector<1x8x256xf32>
    tpu.vector_store %arg10[%c0_879, %c0_880, %c0_881], %1693 {strides = array<i32>} : memref<1x8x256xf32, #tpu.memory_space<vmem>>, vector<1x8x256xf32>,
    return
  }
  func.func @transform_0(%arg0: i32) -> (i32, i32, i32) {
    %c0_i32 = arith.constant 0 : i32
    %c0_i32_0 = arith.constant 0 : i32
    %c0_i32_1 = arith.constant 0 : i32
    return %arg0, %c0_i32, %c0_i32_0 : i32, i32, i32
  }
  func.func @transform_1(%arg0: i32) -> (i32, i32) {
    %c0_i32 = arith.constant 0 : i32
    %c0_i32_0 = arith.constant 0 : i32
    %c0_i32_1 = arith.constant 0 : i32
    return %c0_i32, %c0_i32_0 : i32, i32
  }
  func.func @transform_2(%arg0: i32) -> (i32, i32) {
    %c0_i32 = arith.constant 0 : i32
    %c0_i32_0 = arith.constant 0 : i32
    %c0_i32_1 = arith.constant 0 : i32
    return %c0_i32, %c0_i32_0 : i32, i32
  }
  func.func @transform_3(%arg0: i32) -> (i32, i32) {
    %c0_i32 = arith.constant 0 : i32
    %c0_i32_0 = arith.constant 0 : i32
    %c0_i32_1 = arith.constant 0 : i32
    return %c0_i32, %c0_i32_0 : i32, i32
  }
  func.func @transform_4(%arg0: i32) -> (i32, i32) {
    %c0_i32 = arith.constant 0 : i32
    %c0_i32_0 = arith.constant 0 : i32
    %c0_i32_1 = arith.constant 0 : i32
    return %c0_i32, %c0_i32_0 : i32, i32
  }
  func.func @transform_5(%arg0: i32) -> (i32, i32) {
    %c0_i32 = arith.constant 0 : i32
    %c0_i32_0 = arith.constant 0 : i32
    %c0_i32_1 = arith.constant 0 : i32
    return %c0_i32, %c0_i32_0 : i32, i32
  }
  func.func @transform_6(%arg0: i32) -> (i32, i32) {
    %c0_i32 = arith.constant 0 : i32
    %c0_i32_0 = arith.constant 0 : i32
    %c0_i32_1 = arith.constant 0 : i32
    return %c0_i32, %c0_i32_0 : i32, i32
  }
  func.func @transform_7(%arg0: i32) -> (i32, i32) {
    %c0_i32 = arith.constant 0 : i32
    %c0_i32_0 = arith.constant 0 : i32
    %c0_i32_1 = arith.constant 0 : i32
    return %c0_i32, %c0_i32_0 : i32, i32
  }
  func.func @transform_8(%arg0: i32) -> (i32, i32) {
    %c0_i32 = arith.constant 0 : i32
    %c0_i32_0 = arith.constant 0 : i32
    %c0_i32_1 = arith.constant 0 : i32
    return %c0_i32, %c0_i32_0 : i32, i32
  }
  func.func @transform_9(%arg0: i32) -> (i32, i32, i32) {
    %c0_i32 = arith.constant 0 : i32
    %c0_i32_0 = arith.constant 0 : i32
    %c0_i32_1 = arith.constant 0 : i32
    return %arg0, %c0_i32, %c0_i32_0 : i32, i32, i32
  }
}

</mosaic_0001>

<bundles_post_ra>
// kernel: ch_lstm_forward.1
= control target key start
LH: loop header
LB: loop body
LE: loop exit
PB: predicated region body
PF: predicated region fallthrough
CT: control target
= control target key end

     0   :  { %v120_v2 = vlaneseq  ;;  %v14879_v3 = vmov 1983009808   ;;  %vm207_vm0 = vcmask 1041408   ;;  %v18244_v19 = vmov 0   ;;  %s18234_s0 = inlined_call_operand.vmem [shape: f32[1,4,256], index: 0, kind: input, shape index: {}]   ;;  %s18235_s1 = inlined_call_operand.vmem [shape: bf16[4,512], index: 1, kind: input, shape index: {}]   ;;  %s18236_s3 = inlined_call_operand.vmem [shape: f32[1,512], index: 3, kind: input, shape index: {}]   ;;  %s18237_s6 = inlined_call_operand.vmem [shape: f32[1,512], index: 6, kind: input, shape index: {}]   ;;  %s18238_s2 = inlined_call_operand.vmem [shape: bf16[128,512], index: 2, kind: input, shape index: {}]   ;;  %s18239_s4 = inlined_call_operand.vmem [shape: bf16[128,512], index: 4, kind: input, shape index: {}]   ;;  %s18240_s5 = inlined_call_operand.vmem [shape: bf16[128,512], index: 5, kind: input, shape index: {}]   ;;  %s18241_s7 = inlined_call_operand.vmem [shape: bf16[8,128], index: 7, kind: input, shape index: {}]   ;;  %s18242_s8 = inlined_call_operand.vmem [shape: f32[8,1], index: 8, kind: input, shape index: {}]   ;;  %s18243_s9 = inlined_call_operand.vmem [shape: f32[1,8,256], index: 9, kind: output, shape index: {}]  }
   0x1   :  { %v33_v0 = vld [vmem:[%s18234_s0] sm:$0xff]  ;;  %v143_v4 = vunpack.c.l.s4 %v14879_v3  ;;  %372 = vmatprep.mubr.bf16.mxu1 %v18244_v19  ;;  %252 = vmatprep.mubr.bf16.mxu0 %v18244_v19  ;;  %vm158_vm1 = vcmask 31744   ;;  %v14994_v47 = vld [vmem:[%s18238_s2 + $0xc] ss:$16 sps:$4 sm:$0xff]   ;;  %v15005_v50 = vld [vmem:[%s18238_s2 + $0x8] ss:$16 sps:$4 sm:$0xff]  }
   0x2   :  { %v35_v1 = vcombine.high %v33_v0, %v33_v0  ;;  %v14934_v5 = vshrl.u32 %v120_v2, 7  ;;  %v117_v8 = vld [vmem:[%s18235_s1] sm:$0xff]  ;;  %13810 = vset.pattern.permute.xlu1 %v18244_v19  ;;  %v15016_v53 = vld [vmem:[%s18238_s2 + $0x2c] ss:$16 sps:$4 sm:$0xff]   ;;  %v15028_v55 = vld [vmem:[%s18238_s2 + $0x28] ss:$16 sps:$4 sm:$0xff]  }
   0x3   :  { %v144_v6 = vunpack.c.0.s8 %v143_v4  ;;  %v14944_v11 = vld [vmem:[%s18236_s3] sm:$0xf]  ;;  %v141_v12 = vcombine.high %v117_v8, %v117_v8  ;;  %v15000_v48 = vld [vmem:[%s18238_s2 + $0x4] ss:$16 sps:$4 sm:$0xff]   ;;  %v15035_v57 = vld [vmem:[%s18238_s2 + $0x4c] ss:$16 sps:$4 sm:$0xff]  }
   0x4   :  { %69 = vxpose.xlu0.b32.start.end [1/1] (short) %v35_v1, 128  ;;  %18279 = vst [vmem:[#allocation5_spill] sm:$0xff] %v14934_v5  ;;  %v126_v10 = vsub.s32 1, %v14934_v5  ;;  %v6171_v15 = vld [vmem:[%s18237_s6] sm:$0xf]  ;;  %v15021_v54 = vld [vmem:[%s18238_s2 + $0x24] ss:$16 sps:$4 sm:$0xff]  }
   0x5   :  { %v147_v7 = vsub.s32 %v144_v6, %v14934_v5  ;;  %v15010_v52 = vld [vmem:[%s18238_s2] ss:$16 sps:$4 sm:$0xff]   ;;  %v15047_v59 = vld [vmem:[%s18238_s2 + $0x44] ss:$16 sps:$4 sm:$0xff]   ;;  %v15054_v60 = vld [vmem:[%s18238_s2 + $0x48] ss:$16 sps:$4 sm:$0xff]  }
   0x6   :  { %v14947_v14 = vrot.slane %v14944_v11, %v126_v10  ;;  %v14953_v16 = vrot.slane %v6171_v15, %v126_v10  ;;  %v15040_v58 = vld [vmem:[%s18238_s2 + $0x20] ss:$16 sps:$4 sm:$0xff]   ;;  %v15064_v63 = vld [vmem:[%s18238_s2 + $0x6c] ss:$16 sps:$4 sm:$0xff]   ;;  %v15075_v1 = vld [vmem:[%s18238_s2 + $0x68] ss:$16 sps:$4 sm:$0xff]  }
   0x7   :  { %v148_v9 = vrot.slane %v117_v8, %v147_v7  ;;  %v155_v17 = vrot.slane %v141_v12, %v147_v7  ;;  %v15059_v61 = vld [vmem:[%s18238_s2 + $0x40] ss:$16 sps:$4 sm:$0xff]  }
   0x8   :  { %18280 = vst [vmem:[#allocation6_spill] sm:$0xff] %v14953_v16 }
   0x9   :  { %v156_v13 = vcombine.high %v148_v9, %v148_v9  ;;  %v209_v18 = vsel %vm207_vm0, %v148_v9, 0  ;;  %v157_v20 = vcombine.high %v155_v17, %v155_v17  ;;  %v215_v21 = vsel %vm207_vm0, %v155_v17, 0 }
   0xb   :  { %13325 = vmatprep.subr.msk.bf16.mxu1 %vm207_vm0, %v156_v13  ;;  %12281 = vmatprep.subr.msk.bf16.mxu0 %vm207_vm0, %v156_v13 }
   0xc   :  { %13326 = vmatpush1.bf16.msra.mxu1 %v209_v18  ;;  %221 = vmatpush1.bf16.msra.mxu0 %v209_v18 }
   0xd   :  { %12298 = vmatprep.subr.msk.bf16.mxu1 %vm207_vm0, %v157_v20  ;;  %972 = vmatprep.subr.bf16.mxu0 %v15000_v48 }
  0x41   :  { %37 = vxpose.xlu0.b32.start.end [1/1] (short) %v33_v0, 128 }
  0x6a   :  { %13811 = vset.pattern.permute.xlu0 %v18244_v19 }
  0x84   :  { %v85_v22 = vpop.trf.xlu0 }
  0x88   :  { %v86_v23 = vpop.trf.xlu0 }
  0x89   :  { %v14963_v24 = vpack.c.bf16 %v86_v23, %v85_v22 }
  0x8c   :  { %v87_v25 = vpop.trf.xlu0 }
  0x90   :  { %v88_v26 = vpop.trf.xlu0 }
  0x91   :  { %v14965_v27 = vpack.c.bf16 %v88_v26, %v87_v25  ;;  %v15110_v26 = vld [vmem:[%s18238_s2 + $0x64] ss:$16 sps:$4 sm:$0xff]  }
  0x94   :  { %v89_v28 = vpop.trf.xlu0 }
  0x98   :  { %v90_v29 = vpop.trf.xlu0 }
  0x99   :  { %v14967_v30 = vpack.c.bf16 %v90_v29, %v89_v28  ;;  %v15115_v28 = vld [vmem:[%s18238_s2 + $0x60] ss:$16 sps:$4 sm:$0xff]   ;;  %v15120_v29 = vld [vmem:[%s18238_s2 + $0x88] ss:$16 sps:$4 sm:$0xff]  }
  0x9c   :  { %v91_v31 = vpop.trf.xlu0 }
  0xa0   :  { %v92_v32 = vpop.trf.xlu0 }
  0xa1   :  { %v14969_v33 = vpack.c.bf16 %v92_v32, %v91_v31  ;;  %v15125_v31 = vld [vmem:[%s18238_s2 + $0x8c] ss:$16 sps:$4 sm:$0xff]   ;;  %v15140_v32 = vld [vmem:[%s18238_s2 + $0x80] ss:$16 sps:$4 sm:$0xff]  }
  0xa4   :  { %v93_v34 = vpop.trf.xlu0 }
  0xa8   :  { %v94_v35 = vpop.trf.xlu0 }
  0xa9   :  { %v14971_v36 = vpack.c.bf16 %v94_v35, %v93_v34  ;;  %v15158_v34 = vld [vmem:[%s18238_s2 + $0xa8] ss:$16 sps:$4 sm:$0xff]   ;;  %v15163_v35 = vld [vmem:[%s18238_s2 + $0xac] ss:$16 sps:$4 sm:$0xff]  }
  0xab   :  { %12294 = vmatmul.mubr.msk.bf16.vlgmr.msra.gmra.mrb[0].mxu1 %vm158_vm1, %v14971_v36 }
  0xac   :  { %v95_v37 = vpop.trf.xlu0  ;;  %414 = vmatpush1.bf16.msra.mxu1 %v215_v21  ;;  %382 = vmatprep.mubr.bf16.mxu1 %v18244_v19 }
  0xad   :  { %1015 = vmatprep.subr.bf16.mxu1 %v14994_v47 }
  0xb0   :  { %v96_v38 = vpop.trf.xlu0 }
  0xb1   :  { %v14976_v39 = vpack.c.bf16 %v96_v38, %v95_v37  ;;  %v15213_v37 = vld [vmem:[%s18238_s2 + $0xc8] ss:$16 sps:$4 sm:$0xff]   ;;  %v15218_v38 = vld [vmem:[%s18238_s2 + $0xc0] ss:$16 sps:$4 sm:$0xff]  }
  0xb3   :  { %12295 = vmatmul.mubr.msk.bf16.gmra.mrb[4].mxu1 %vm158_vm1, %v14976_v39 }
  0xb4   :  { %v97_v40 = vpop.trf.xlu0  ;;  %392 = vmatprep.mubr.bf16.mxu1 %v18244_v19 }
  0xb8   :  { %v98_v41 = vpop.trf.xlu0 }
  0xb9   :  { %v14981_v42 = vpack.c.bf16 %v98_v41, %v97_v40  ;;  %v15232_v40 = vld [vmem:[%s18238_s2 + $0xec] ss:$16 sps:$4 sm:$0xff]   ;;  %v15239_v41 = vld [vmem:[%s18238_s2 + $0xe0] ss:$16 sps:$4 sm:$0xff]  }
  0xbb   :  { %12296 = vmatmul.mubr.msk.bf16.gmra.mrb[8].mxu1 %vm158_vm1, %v14981_v42 }
  0xbc   :  { %v99_v43 = vpop.trf.xlu0  ;;  %402 = vmatprep.mubr.bf16.mxu1 %v18244_v19 }
  0xc0   :  { %v100_v44 = vpop.trf.xlu0 }
  0xc1   :  { %v14986_v45 = vpack.c.bf16 %v100_v44, %v99_v43 }
  0xc3   :  { %12297 = vmatmul.mubr.msk.bf16.gmra.mrb[12].mxu1 %vm158_vm1, %v14986_v45 }
  0xc4   :  { %v53_v46 = vpop.trf.xlu0  ;;  %445 = vmatprep.mubr.bf16.mxu1 %v18244_v19 }
  0xc8   :  { %v54_v49 = vpop.trf.xlu0 }
  0xc9   :  { %v101_v51 = vpack.c.bf16 %v54_v49, %v53_v46 }
  0xcb   :  { %12282 = vmatmul.mubr.msk.bf16.vlgmr.msra.gmra.mrb[0].mxu0 %vm158_vm1, %v101_v51  ;;  %12299 = vmatmul.mubr.msk.bf16.vlgmr.msra.gmra.mrb[16].mxu1 %vm158_vm1, %v101_v51 }
  0xcc   :  { %v55_v56 = vpop.trf.xlu0  ;;  %262 = vmatprep.mubr.bf16.mxu0 %v18244_v19  ;;  %455 = vmatprep.mubr.bf16.mxu1 %v18244_v19 }
  0xcd   :  { %1016 = vmatpush1.bf16.msra.mxu1 %v15005_v50  ;;  %973 = vmatpush1.bf16.msra.mxu0 %v15010_v52 }
  0xce   :  { %1017 = vmatprep.subr.bf16.mxu1 %v15016_v53  ;;  %974 = vmatprep.subr.bf16.mxu0 %v15021_v54 }
  0xd0   :  { %v56_v62 = vpop.trf.xlu0 }
  0xd1   :  { %v102_v0 = vpack.c.bf16 %v56_v62, %v55_v56  ;;  %1018 = vmatpush1.bf16.msra.mxu1 %v15028_v55  ;;  %975 = vmatpush1.bf16.msra.mxu0 %v15040_v58 }
  0xd2   :  { %1019 = vmatprep.subr.bf16.mxu1 %v15035_v57  ;;  %976 = vmatprep.subr.bf16.mxu0 %v15047_v59 }
  0xd3   :  { %12283 = vmatmul.mubr.msk.bf16.gmra.mrb[4].mxu0 %vm158_vm1, %v102_v0  ;;  %12300 = vmatmul.mubr.msk.bf16.gmra.mrb[20].mxu1 %vm158_vm1, %v102_v0 }
  0xd4   :  { %v57_v2 = vpop.trf.xlu0  ;;  %272 = vmatprep.mubr.bf16.mxu0 %v18244_v19  ;;  %465 = vmatprep.mubr.bf16.mxu1 %v18244_v19 }
  0xd5   :  { %1020 = vmatpush1.bf16.msra.mxu1 %v15054_v60  ;;  %977 = vmatpush1.bf16.msra.mxu0 %v15059_v61 }
  0xd6   :  { %1021 = vmatprep.subr.bf16.mxu1 %v15064_v63  ;;  %978 = vmatprep.subr.bf16.mxu0 %v15110_v26 }
  0xd8   :  { %v58_v3 = vpop.trf.xlu0 }
  0xd9   :  { %v103_v4 = vpack.c.bf16 %v58_v3, %v57_v2  ;;  %1022 = vmatpush1.bf16.msra.mxu1 %v15075_v1  ;;  %979 = vmatpush1.bf16.msra.mxu0 %v15115_v28 }
  0xda   :  { %1023 = vmatprep.subr.bf16.mxu1 %v15125_v31 }
  0xdb   :  { %12284 = vmatmul.mubr.msk.bf16.gmra.mrb[8].mxu0 %vm158_vm1, %v103_v4  ;;  %12301 = vmatmul.mubr.msk.bf16.gmra.mrb[24].mxu1 %vm158_vm1, %v103_v4 }
  0xdc   :  { %v59_v6 = vpop.trf.xlu0  ;;  %282 = vmatprep.mubr.bf16.mxu0 %v18244_v19  ;;  %475 = vmatprep.mubr.bf16.mxu1 %v18244_v19 }
  0xdd   :  { %1024 = vmatpush1.bf16.msra.mxu1 %v15120_v29 }
  0xde   :  { %1025 = vmatprep.subr.bf16.mxu1 %v15163_v35 }
  0xe0   :  { %v60_v7 = vpop.trf.xlu0 }
  0xe1   :  { %v104_v8 = vpack.c.bf16 %v60_v7, %v59_v6  ;;  %1026 = vmatpush1.bf16.msra.mxu1 %v15158_v34 }
  0xe3   :  { %12285 = vmatmul.mubr.msk.bf16.gmra.mrb[12].mxu0 %vm158_vm1, %v104_v8  ;;  %12302 = vmatmul.mubr.msk.bf16.gmra.mrb[28].mxu1 %vm158_vm1, %v104_v8 }
  0xe4   :  { %v61_v9 = vpop.trf.xlu0  ;;  %292 = vmatprep.mubr.bf16.mxu0 %v18244_v19  ;;  %485 = vmatprep.mubr.bf16.mxu1 %v18244_v19 }
  0xe8   :  { %v62_v10 = vpop.trf.xlu0 }
  0xe9   :  { %v105_v12 = vpack.c.bf16 %v62_v10, %v61_v9  ;;  %v18246_v9 = vsub.s32 0, %v14934_v5 }
  0xeb   :  { %12286 = vmatmul.mubr.msk.bf16.gmra.mrb[16].mxu0 %vm158_vm1, %v105_v12  ;;  %12303 = vmatmul.mubr.msk.bf16.gmra.mrb[32].mxu1 %vm158_vm1, %v105_v12  ;;  %v18248_v12 = vsub.s32 2, %v14934_v5 }
  0xec   :  { %v63_v13 = vpop.trf.xlu0  ;;  %302 = vmatprep.mubr.bf16.mxu0 %v18244_v19  ;;  %495 = vmatprep.mubr.bf16.mxu1 %v18244_v19 }
  0xf0   :  { %v64_v15 = vpop.trf.xlu0 }
  0xf1   :  { %v106_v17 = vpack.c.bf16 %v64_v15, %v63_v13  ;;  %v15290_v13 = vrot.slane %v14944_v11, %v18246_v9  ;;  %v18251_v15 = vsub.s32 3, %v14934_v5 }
  0xf3   :  { %12287 = vmatmul.mubr.msk.bf16.gmra.mrb[20].mxu0 %vm158_vm1, %v106_v17  ;;  %12304 = vmatmul.mubr.msk.bf16.gmra.mrb[36].mxu1 %vm158_vm1, %v106_v17  ;;  %v15302_v9 = vrot.slane %v14944_v11, %v18251_v15 }
  0xf4   :  { %v65_v18 = vpop.trf.xlu0  ;;  %312 = vmatprep.mubr.bf16.mxu0 %v18244_v19  ;;  %505 = vmatprep.mubr.bf16.mxu1 %v18244_v19 }
  0xf8   :  { %v66_v20 = vpop.trf.xlu0 }
  0xf9   :  { %v107_v21 = vpack.c.bf16 %v66_v20, %v65_v18  ;;  %v15296_v20 = vrot.slane %v14944_v11, %v18248_v12 }
  0xfb   :  { %12288 = vmatmul.mubr.msk.bf16.gmra.mrb[24].mxu0 %vm158_vm1, %v107_v21  ;;  %12305 = vmatmul.mubr.msk.bf16.gmra.mrb[40].mxu1 %vm158_vm1, %v107_v21 }
  0xfc   :  { %v67_v22 = vpop.trf.xlu0  ;;  %322 = vmatprep.mubr.bf16.mxu0 %v18244_v19  ;;  %515 = vmatprep.mubr.bf16.mxu1 %v18244_v19 }
 0x100   :  { %v68_v23 = vpop.trf.xlu0 }
 0x101   :  { %v108_v25 = vpack.c.bf16 %v68_v23, %v67_v22 }
 0x103   :  { %12289 = vmatmul.mubr.msk.bf16.gmra.mrb[28].mxu0 %vm158_vm1, %v108_v25  ;;  %12306 = vmatmul.mubr.msk.bf16.gmra.mrb[44].mxu1 %vm158_vm1, %v108_v25 }
 0x104   :  { %332 = vmatprep.mubr.bf16.mxu0 %v18244_v19  ;;  %525 = vmatprep.mubr.bf16.mxu1 %v18244_v19 }
 0x10b   :  { %12290 = vmatmul.mubr.msk.bf16.gmra.mrb[32].mxu0 %vm158_vm1, %v14963_v24  ;;  %12307 = vmatmul.mubr.msk.bf16.gmra.mrb[48].mxu1 %vm158_vm1, %v14963_v24  ;;  %v15145_v24 = vld [vmem:[%s18238_s2 + $0x84] ss:$16 sps:$4 sm:$0xff]  }
 0x10c   :  { %342 = vmatprep.mubr.bf16.mxu0 %v18244_v19  ;;  %535 = vmatprep.mubr.bf16.mxu1 %v18244_v19 }
 0x10d   :  { %980 = vmatprep.subr.bf16.mxu0 %v15145_v24 }
 0x10e   :  { %981 = vmatpush1.bf16.msra.mxu0 %v15140_v32 }
 0x113   :  { %12291 = vmatmul.mubr.msk.bf16.gmra.mrb[36].mxu0 %vm158_vm1, %v14965_v27  ;;  %12308 = vmatmul.mubr.msk.bf16.gmra.mrb[52].mxu1 %vm158_vm1, %v14965_v27  ;;  %v15188_v27 = vld [vmem:[%s18238_s2 + $0xa4] ss:$16 sps:$4 sm:$0xff]  }
 0x114   :  { %352 = vmatprep.mubr.bf16.mxu0 %v18244_v19  ;;  %545 = vmatprep.mubr.bf16.mxu1 %v18244_v19 }
 0x115   :  { %982 = vmatprep.subr.bf16.mxu0 %v15188_v27 }
 0x11b   :  { %12292 = vmatmul.mubr.msk.bf16.gmra.mrb[40].mxu0 %vm158_vm1, %v14967_v30  ;;  %12309 = vmatmul.mubr.msk.bf16.gmra.mrb[56].mxu1 %vm158_vm1, %v14967_v30  ;;  %v15195_v30 = vld [vmem:[%s18238_s2 + $0xa0] ss:$16 sps:$4 sm:$0xff]  }
 0x11c   :  { %362 = vmatprep.mubr.bf16.mxu0 %v18244_v19  ;;  %555 = vmatprep.mubr.bf16.mxu1 %v18244_v19 }
 0x11d   :  { %983 = vmatpush1.bf16.msra.mxu0 %v15195_v30 }
 0x123   :  { %12293 = vmatmul.mubr.msk.bf16.gmra.mrb[44].mxu0 %vm158_vm1, %v14969_v33  ;;  %12310 = vmatmul.mubr.msk.bf16.gmra.mrb[60].mxu1 %vm158_vm1, %v14969_v33  ;;  %v15203_v33 = vld [vmem:[%s18238_s2 + $0xcc] ss:$16 sps:$4 sm:$0xff]  }
 0x124   :  { %565 = vmatprep.mubr.bf16.mxu1 %v18244_v19  ;;  %1004 = vmatprep.mubr.bf16.mxu0 %v18244_v19 }
 0x125   :  { %1027 = vmatprep.subr.bf16.mxu1 %v15203_v33 }
 0x126   :  { %1028 = vmatpush1.bf16.msra.mxu1 %v15213_v37 }
 0x127   :  { %1029 = vmatprep.subr.bf16.mxu1 %v15232_v40 }
 0x12b   :  { %12311 = vmatmul.mubr.msk.bf16.gmra.mrb[64].mxu1 %vm158_vm1, %v14971_v36  ;;  %v15208_v36 = vld [vmem:[%s18238_s2 + $0xc4] ss:$16 sps:$4 sm:$0xff]  }
 0x12c   :  { %575 = vmatprep.mubr.bf16.mxu1 %v18244_v19  ;;  %984 = vmatprep.subr.bf16.mxu0 %v15208_v36 }
 0x12d   :  { %985 = vmatpush1.bf16.msra.mxu0 %v15218_v38 }
 0x133   :  { %12312 = vmatmul.mubr.msk.bf16.gmra.mrb[68].mxu1 %vm158_vm1, %v14976_v39  ;;  %v15227_v39 = vld [vmem:[%s18238_s2 + $0xe4] ss:$16 sps:$4 sm:$0xff]  }
 0x134   :  { %585 = vmatprep.mubr.bf16.mxu1 %v18244_v19  ;;  %986 = vmatprep.subr.bf16.mxu0 %v15227_v39 }
 0x135   :  { %987 = vmatpush1.bf16.msra.mxu0 %v15239_v41 }
 0x136   :  { %1329 = vmatprep.subr.bf16.mxu0 %v15000_v48 }
 0x13b   :  { %12313 = vmatmul.mubr.msk.bf16.gmra.mrb[72].mxu1 %vm158_vm1, %v14981_v42  ;;  %v15244_v42 = vld [vmem:[%s18238_s2 + $0xe8] ss:$16 sps:$4 sm:$0xff]  }
 0x13c   :  { %595 = vmatprep.mubr.bf16.mxu1 %v18244_v19  ;;  %1030 = vmatpush1.bf16.msra.mxu1 %v15244_v42 }
 0x13d   :  { %1372 = vmatprep.subr.bf16.mxu1 %v14994_v47 }
 0x143   :  { %12314 = vmatmul.mubr.msk.bf16.gmra.mrb[76].mxu1 %vm158_vm1, %v14986_v45 }
 0x144   :  { %1047 = vmatprep.mubr.bf16.mxu1 %v18244_v19 }
 0x17e   :  { %v15253_v43 = vpop.f32.mrb[0].mxu1 }
 0x17f   :  { %v15255_v44 = vpop.f32.mrb[1].mxu1 }
 0x180   :  { %v15257_v45 = vpop.f32.mrb[2].mxu1 }
 0x181   :  { %v15259_v46 = vpop.f32.mrb[3].mxu1 }
 0x186   :  { %v15261_v49 = vpop.f32.mrb[4].mxu1 }
 0x187   :  { %v15263_v51 = vpop.f32.mrb[5].mxu1 }
 0x188   :  { %18281 = vst [vmem:[#allocation7_spill] sm:$0xff] %v15263_v51  ;;  %v15265_v56 = vpop.f32.mrb[6].mxu1 }
 0x189   :  { %18282 = vst [vmem:[#allocation8_spill] sm:$0xff] %v15265_v56  ;;  %v15267_v62 = vpop.f32.mrb[7].mxu1 }
 0x18a   :  { %18283 = vst [vmem:[#allocation9_spill] sm:$0xff] %v15267_v62 }
 0x18e   :  { %v15269_v0 = vpop.f32.mrb[8].mxu1 }
 0x18f   :  { %18284 = vst [vmem:[#allocation10_spill] sm:$0xff] %v15269_v0  ;;  %v15271_v2 = vpop.f32.mrb[9].mxu1 }
 0x190   :  { %18285 = vst [vmem:[#allocation11_spill] sm:$0xff] %v15271_v2  ;;  %v15273_v3 = vpop.f32.mrb[10].mxu1 }
 0x191   :  { %18286 = vst [vmem:[#allocation12_spill] sm:$0xff] %v15273_v3  ;;  %v15275_v4 = vpop.f32.mrb[11].mxu1 }
 0x192   :  { %18287 = vst [vmem:[#allocation13_spill] sm:$0xff] %v15275_v4 }
 0x196   :  { %v15277_v6 = vpop.f32.mrb[12].mxu1 }
 0x197   :  { %18288 = vst [vmem:[#allocation14_spill] sm:$0xff] %v15277_v6  ;;  %v15279_v7 = vpop.f32.mrb[13].mxu1 }
 0x198   :  { %18289 = vst [vmem:[#allocation15_spill] sm:$0xff] %v15279_v7  ;;  %v15281_v8 = vpop.f32.mrb[14].mxu1 }
 0x199   :  { %18290 = vst [vmem:[#allocation16_spill] sm:$0xff] %v15281_v8  ;;  %v15284_v10 = vpop.f32.mrb[15].mxu1 }
 0x19a   :  { %18291 = vst [vmem:[#allocation17_spill] sm:$0xff] %v15284_v10 }
 0x19e   :  { %v254_v17 = vpop.f32.mrb[0].mxu0  ;;  %v447_v18 = vpop.f32.mrb[16].mxu1 }
 0x19f   :  { %v255_v21 = vadd.f32 %v254_v17, %v15290_v13  ;;  %v256_v22 = vpop.f32.mrb[1].mxu0  ;;  %v449_v23 = vpop.f32.mrb[17].mxu1  ;;  %v448_v12 = vadd.f32 %v447_v18, %v15296_v20 }
 0x1a0   :  { %v258_v25 = vpop.f32.mrb[2].mxu0  ;;  %v451_v19 = vpop.f32.mrb[18].mxu1  ;;  %v450_v17 = vadd.f32 %v449_v23, %v15302_v9 }
 0x1a1   :  { %v736_v16 = vmul.f32 0.5, %v255_v21  ;;  %v259_v10 = vadd.f32 %v258_v25, %v15290_v13  ;;  %v260_v8 = vpop.f32.mrb[3].mxu0  ;;  %v453_v7 = vpop.f32.mrb[19].mxu1  ;;  %v452_v22 = vadd.f32 %v451_v19, %v15296_v20 }
 0x1a2   :  { %v454_v4 = vadd.f32 %v453_v7, %v15302_v9  ;;  %v750_v5 = vmul.f32 0.5, %v450_v17 }
 0x1a3   :  { %14246 = vtanh.f32 %v736_v16  ;;  %v737_v6 = vmul.f32 0.5, %v259_v10 }
 0x1a4   :  { %v751_v11 = vmul.f32 0.5, %v454_v4 }
 0x1a5   :  { %14248 = vtanh.f32 %v737_v6 }
 0x1a6   :  { %14250 = vtanh.f32 %v448_v12 }
 0x1a7   :  { %14252 = vtanh.f32 %v452_v22 }
 0x1a8   :  { %14254 = vtanh.f32 %v750_v5 }
 0x1a9   :  { %14256 = vtanh.f32 %v751_v11 }
 0x1ad   :  { %v14247_v21 = vpop.eup %14246 }
 0x1ae   :  { %v740_v25 = vmul.f32 0.5, %v14247_v21 }
 0x1af   :  { %v14249_v8 = vpop.eup %14248 }
 0x1b0   :  { %v742_v16 = vadd.f32 0.5, %v740_v25  ;;  %v741_v15 = vmul.f32 0.5, %v14249_v8  ;;  %v14251_v18 = vpop.eup %14250 }
 0x1b1   :  { %v14253_v6 = vpop.eup %14252 }
 0x1b2   :  { %v15309_v10 = vmul.f32 %v14251_v18, %v742_v16  ;;  %v743_v23 = vadd.f32 0.5, %v741_v15  ;;  %v14255_v7 = vpop.eup %14254  ;;  %v18293_v15 = vmov 0  }
 0x1b3   :  { %v14257_v4 = vpop.eup %14256  ;;  %v754_v12 = vmul.f32 0.5, %v14255_v7 }
 0x1b4   :  { %14258 = vtanh.f32 %v15309_v10  ;;  %v15312_v19 = vmul.f32 %v14253_v6, %v743_v23  ;;  %v755_v5 = vmul.f32 0.5, %v14257_v4 }
 0x1b5   :  { %v756_v22 = vadd.f32 0.5, %v754_v12 }
 0x1b6   :  { %14260 = vtanh.f32 %v15312_v19  ;;  %v757_v11 = vadd.f32 0.5, %v755_v5 }
 0x1be   :  { %v14259_v17 = vpop.eup %14258 }
 0x1bf   :  { %v762_v25 = vmul.f32 %v14259_v17, %v756_v22 }
 0x1c0   :  { %v14261_v21 = vpop.eup %14260 }
 0x1c1   :  { %v763_v8 = vmul.f32 %v14261_v21, %v757_v11 }
 0x1c3   :  { %v15315_v16 = vpack.c.bf16 %v763_v8, %v762_v25 }
 0x1c5   :  { %18292 = vst [vmem:[#allocation18_spill] sm:$0xff] %v15315_v16  ;;  %1005 = vmatmul.mubr.bf16.vlgmr.msra.gmra.mrb[4].mxu0 %v15315_v16  ;;  %1048 = vmatmul.mubr.bf16.vlgmr.msra.gmra.mrb[20].mxu1 %v15315_v16 }
 0x1c6   :  { %1330 = vmatpush1.bf16.msra.mxu0 %v15010_v52  ;;  %1373 = vmatpush1.bf16.msra.mxu1 %v15005_v50 }
 0x1c7   :  { %1331 = vmatprep.subr.bf16.mxu0 %v15021_v54  ;;  %1374 = vmatprep.subr.bf16.mxu1 %v15016_v53 }
 0x1c8   :  { %1361 = vmatprep.mubr.bf16.mxu0 %v18293_v15  ;;  %1404 = vmatprep.mubr.bf16.mxu1 %v18293_v15 }
 0x1ca   :  { %1332 = vmatpush1.bf16.msra.mxu0 %v15040_v58  ;;  %1375 = vmatpush1.bf16.msra.mxu1 %v15028_v55 }
 0x1cb   :  { %1333 = vmatprep.subr.bf16.mxu0 %v15047_v59  ;;  %1376 = vmatprep.subr.bf16.mxu1 %v15035_v57 }
 0x1ce   :  { %1334 = vmatpush1.bf16.msra.mxu0 %v15059_v61  ;;  %1377 = vmatpush1.bf16.msra.mxu1 %v15054_v60 }
 0x1cf   :  { %1335 = vmatprep.subr.bf16.mxu0 %v15110_v26  ;;  %1378 = vmatprep.subr.bf16.mxu1 %v15064_v63 }
 0x1d2   :  { %1336 = vmatpush1.bf16.msra.mxu0 %v15115_v28  ;;  %1379 = vmatpush1.bf16.msra.mxu1 %v15075_v1 }
 0x1d3   :  { %1337 = vmatprep.subr.bf16.mxu0 %v15145_v24  ;;  %1380 = vmatprep.subr.bf16.mxu1 %v15125_v31 }
 0x1d6   :  { %1338 = vmatpush1.bf16.msra.mxu0 %v15140_v32  ;;  %1381 = vmatpush1.bf16.msra.mxu1 %v15120_v29 }
 0x1d7   :  { %1339 = vmatprep.subr.bf16.mxu0 %v15188_v27  ;;  %1382 = vmatprep.subr.bf16.mxu1 %v15163_v35 }
 0x1da   :  { %1340 = vmatpush1.bf16.msra.mxu0 %v15195_v30  ;;  %1383 = vmatpush1.bf16.msra.mxu1 %v15158_v34 }
 0x1db   :  { %1341 = vmatprep.subr.bf16.mxu0 %v15208_v36  ;;  %1384 = vmatprep.subr.bf16.mxu1 %v15203_v33 }
 0x1de   :  { %1342 = vmatpush1.bf16.msra.mxu0 %v15218_v38  ;;  %1385 = vmatpush1.bf16.msra.mxu1 %v15213_v37 }
 0x1df   :  { %1343 = vmatprep.subr.bf16.mxu0 %v15227_v39  ;;  %1386 = vmatprep.subr.bf16.mxu1 %v15232_v40 }
 0x1e2   :  { %1344 = vmatpush1.bf16.msra.mxu0 %v15239_v41  ;;  %1387 = vmatpush1.bf16.msra.mxu1 %v15244_v42 }
 0x1e3   :  { %1686 = vmatprep.subr.bf16.mxu0 %v15000_v48  ;;  %1729 = vmatprep.subr.bf16.mxu1 %v14994_v47 }
 0x298   :  { %v1006_v18 = vpop.f32.mrb[4].mxu0  ;;  %v1049_v23 = vpop.f32.mrb[20].mxu1 }
 0x299   :  { %v13327_v6 = vadd.f32 %v1006_v18, %v15290_v13  ;;  %v1008_v7 = vpop.f32.mrb[5].mxu0  ;;  %v1051_v4 = vpop.f32.mrb[21].mxu1  ;;  %v13403_v47 = vadd.f32 %v1049_v23, %v15296_v20 }
 0x29a   :  { %v13328_v12 = vadd.f32 %v1008_v7, %v14947_v14  ;;  %v1010_v5 = vpop.f32.mrb[6].mxu0  ;;  %v1053_v17 = vpop.f32.mrb[22].mxu1 }
 0x29b   :  { %v1078_v22 = vmul.f32 0.5, %v13327_v6  ;;  %v13329_v11 = vadd.f32 %v1010_v5, %v15290_v13  ;;  %v1012_v21 = vpop.f32.mrb[7].mxu0  ;;  %v1055_v25 = vpop.f32.mrb[23].mxu1  ;;  %v13405_v3 = vadd.f32 %v1053_v17, %v15296_v20  ;;  %v13404_v6 = vadd.f32 %v1051_v4, %v15302_v9 }
 0x29c   :  { %v1102_v8 = vmul.f32 0.5, %v13328_v12  ;;  %v13330_v48 = vadd.f32 %v1012_v21, %v14947_v14  ;;  %v13406_v7 = vadd.f32 %v1055_v25, %v15302_v9 }
 0x29d   :  { %14262 = vtanh.f32 %v1078_v22  ;;  %v1079_v16 = vmul.f32 0.5, %v13329_v11  ;;  %v1092_v21 = vmul.f32 0.5, %v13404_v6 }
 0x29e   :  { %14264 = vtanh.f32 %v1102_v8  ;;  %v1103_v18 = vmul.f32 0.5, %v13330_v48  ;;  %v1093_v0 = vmul.f32 0.5, %v13406_v7 }
 0x29f   :  { %14266 = vtanh.f32 %v1079_v16 }
 0x2a0   :  { %14268 = vtanh.f32 %v13403_v47 }
 0x2a1   :  { %14270 = vtanh.f32 %v1103_v18 }
 0x2a2   :  { %14272 = vtanh.f32 %v13405_v3 }
 0x2a3   :  { %14274 = vtanh.f32 %v1092_v21 }
 0x2a4   :  { %14276 = vtanh.f32 %v1093_v0 }
 0x2a7   :  { %v14263_v5 = vpop.eup %14262 }
 0x2a8   :  { %v14265_v12 = vpop.eup %14264  ;;  %v1082_v2 = vmul.f32 0.5, %v14263_v5 }
 0x2a9   :  { %v1106_v22 = vmul.f32 0.5, %v14265_v12  ;;  %v14267_v23 = vpop.eup %14266 }
 0x2aa   :  { %v1084_v11 = vadd.f32 0.5, %v1082_v2  ;;  %v14269_v8 = vpop.eup %14268  ;;  %v1083_v16 = vmul.f32 0.5, %v14267_v23 }
 0x2ab   :  { %v1108_v48 = vadd.f32 0.5, %v1106_v22  ;;  %v14271_v62 = vpop.eup %14270 }
 0x2ac   :  { %v1112_v17 = vmul.f32 %v14269_v8, %v1084_v11  ;;  %v1085_v4 = vadd.f32 0.5, %v1083_v16  ;;  %v1107_v3 = vmul.f32 0.5, %v14271_v62  ;;  %v14273_v25 = vpop.eup %14272 }
 0x2ad   :  { %v1110_v47 = vmul.f32 %v1108_v48, %v15309_v10  ;;  %v14275_v12 = vpop.eup %14274 }
 0x2ae   :  { %v1109_v5 = vadd.f32 0.5, %v1107_v3  ;;  %v1113_v6 = vmul.f32 %v14273_v25, %v1085_v4  ;;  %v14277_v21 = vpop.eup %14276  ;;  %v1096_v22 = vmul.f32 0.5, %v14275_v12 }
 0x2af   :  { %v15362_v18 = vadd.f32 %v1112_v17, %v1110_v47  ;;  %v1097_v10 = vmul.f32 0.5, %v14277_v21 }
 0x2b0   :  { %v1111_v7 = vmul.f32 %v1109_v5, %v15312_v19  ;;  %v1098_v62 = vadd.f32 0.5, %v1096_v22 }
 0x2b1   :  { %14278 = vtanh.f32 %v15362_v18  ;;  %v1099_v0 = vadd.f32 0.5, %v1097_v10 }
 0x2b2   :  { %v15366_v2 = vadd.f32 %v1113_v6, %v1111_v7 }
 0x2b4   :  { %14280 = vtanh.f32 %v15366_v2 }
 0x2bb   :  { %v14279_v23 = vpop.eup %14278 }
 0x2bc   :  { %v1118_v8 = vmul.f32 %v14279_v23, %v1098_v62 }
 0x2be   :  { %v14281_v11 = vpop.eup %14280 }
 0x2bf   :  { %v1119_v48 = vmul.f32 %v14281_v11, %v1099_v0 }
 0x2c1   :  { %v15369_v16 = vpack.c.bf16 %v1119_v48, %v1118_v8 }
 0x2c3   :  { %18294 = vst [vmem:[#allocation19_spill] sm:$0xff] %v15369_v16  ;;  %1362 = vmatmul.mubr.bf16.vlgmr.msra.gmra.mrb[8].mxu0 %v15369_v16  ;;  %1405 = vmatmul.mubr.bf16.vlgmr.msra.gmra.mrb[24].mxu1 %v15369_v16 }
 0x2c4   :  { %1687 = vmatpush1.bf16.msra.mxu0 %v15010_v52  ;;  %1730 = vmatpush1.bf16.msra.mxu1 %v15005_v50 }
 0x2c5   :  { %1688 = vmatprep.subr.bf16.mxu0 %v15021_v54  ;;  %1731 = vmatprep.subr.bf16.mxu1 %v15016_v53 }
 0x2c6   :  { %1718 = vmatprep.mubr.bf16.mxu0 %v18293_v15  ;;  %1761 = vmatprep.mubr.bf16.mxu1 %v18293_v15 }
 0x2c8   :  { %1689 = vmatpush1.bf16.msra.mxu0 %v15040_v58  ;;  %1732 = vmatpush1.bf16.msra.mxu1 %v15028_v55 }
 0x2c9   :  { %1690 = vmatprep.subr.bf16.mxu0 %v15047_v59  ;;  %1733 = vmatprep.subr.bf16.mxu1 %v15035_v57 }
 0x2cc   :  { %1691 = vmatpush1.bf16.msra.mxu0 %v15059_v61  ;;  %1734 = vmatpush1.bf16.msra.mxu1 %v15054_v60 }
 0x2cd   :  { %1692 = vmatprep.subr.bf16.mxu0 %v15110_v26  ;;  %1735 = vmatprep.subr.bf16.mxu1 %v15064_v63 }
 0x2d0   :  { %1693 = vmatpush1.bf16.msra.mxu0 %v15115_v28  ;;  %1736 = vmatpush1.bf16.msra.mxu1 %v15075_v1 }
 0x2d1   :  { %1694 = vmatprep.subr.bf16.mxu0 %v15145_v24  ;;  %1737 = vmatprep.subr.bf16.mxu1 %v15125_v31 }
 0x2d4   :  { %1695 = vmatpush1.bf16.msra.mxu0 %v15140_v32  ;;  %1738 = vmatpush1.bf16.msra.mxu1 %v15120_v29 }
 0x2d5   :  { %1696 = vmatprep.subr.bf16.mxu0 %v15188_v27  ;;  %1739 = vmatprep.subr.bf16.mxu1 %v15163_v35 }
 0x2d8   :  { %1697 = vmatpush1.bf16.msra.mxu0 %v15195_v30  ;;  %1740 = vmatpush1.bf16.msra.mxu1 %v15158_v34 }
 0x2d9   :  { %1698 = vmatprep.subr.bf16.mxu0 %v15208_v36  ;;  %1741 = vmatprep.subr.bf16.mxu1 %v15203_v33 }
 0x2dc   :  { %1699 = vmatpush1.bf16.msra.mxu0 %v15218_v38  ;;  %1742 = vmatpush1.bf16.msra.mxu1 %v15213_v37 }
 0x2dd   :  { %1700 = vmatprep.subr.bf16.mxu0 %v15227_v39  ;;  %1743 = vmatprep.subr.bf16.mxu1 %v15232_v40 }
 0x2e0   :  { %1701 = vmatpush1.bf16.msra.mxu0 %v15239_v41  ;;  %1744 = vmatpush1.bf16.msra.mxu1 %v15244_v42 }
 0x396   :  { %v1363_v50 = vpop.f32.mrb[8].mxu0  ;;  %v1406_v52 = vpop.f32.mrb[24].mxu1 }
 0x397   :  { %v13331_v53 = vadd.f32 %v1363_v50, %v15290_v13  ;;  %v1365_v54 = vpop.f32.mrb[9].mxu0  ;;  %v1408_v55 = vpop.f32.mrb[25].mxu1  ;;  %v13407_v19 = vadd.f32 %v1406_v52, %v15296_v20 }
 0x398   :  { %v13332_v57 = vadd.f32 %v1365_v54, %v14947_v14  ;;  %v1367_v58 = vpop.f32.mrb[10].mxu0  ;;  %v1410_v59 = vpop.f32.mrb[26].mxu1  ;;  %v13408_v3 = vadd.f32 %v1408_v55, %v15302_v9 }
 0x399   :  { %v1435_v60 = vmul.f32 0.5, %v13331_v53  ;;  %v13333_v61 = vadd.f32 %v1367_v58, %v15290_v13  ;;  %v1369_v63 = vpop.f32.mrb[11].mxu0  ;;  %v1412_v1 = vpop.f32.mrb[27].mxu1  ;;  %v13409_v4 = vadd.f32 %v1410_v59, %v15296_v20 }
 0x39a   :  { %v1459_v29 = vmul.f32 0.5, %v13332_v57  ;;  %v13334_v31 = vadd.f32 %v1369_v63, %v14947_v14  ;;  %v13410_v25 = vadd.f32 %v1412_v1, %v15302_v9  ;;  %v1449_v12 = vmul.f32 0.5, %v13408_v3 }
 0x39b   :  { %14282 = vtanh.f32 %v1435_v60  ;;  %v1436_v17 = vmul.f32 0.5, %v13333_v61 }
 0x39c   :  { %14284 = vtanh.f32 %v1459_v29  ;;  %v1460_v47 = vmul.f32 0.5, %v13334_v31  ;;  %v1450_v22 = vmul.f32 0.5, %v13410_v25  ;;  %v15435_v25 = vld [vmem:[%s18238_s2 + $0xc] ss:$16 sps:$4 sm:$0xff]  }
 0x39d   :  { %14286 = vtanh.f32 %v1436_v17  ;;  %2086 = vmatprep.subr.bf16.mxu1 %v15435_v25 }
 0x39e   :  { %14288 = vtanh.f32 %v13407_v19 }
 0x39f   :  { %14290 = vtanh.f32 %v1460_v47 }
 0x3a0   :  { %14292 = vtanh.f32 %v13409_v4 }
 0x3a1   :  { %14294 = vtanh.f32 %v1449_v12  ;;  %v15459_v12 = vld [vmem:[%s18238_s2 + $0x2c] ss:$16 sps:$4 sm:$0xff]  }
 0x3a2   :  { %14296 = vtanh.f32 %v1450_v22  ;;  %v15469_v22 = vld [vmem:[%s18238_s2 + $0x28] ss:$16 sps:$4 sm:$0xff]  }
 0x3a5   :  { %v14283_v5 = vpop.eup %14282 }
 0x3a6   :  { %v14285_v6 = vpop.eup %14284  ;;  %v1439_v7 = vmul.f32 0.5, %v14283_v5  ;;  %v15440_v5 = vld [vmem:[%s18238_s2] ss:$16 sps:$4 sm:$0xff]  }
 0x3a7   :  { %v1463_v21 = vmul.f32 0.5, %v14285_v6  ;;  %v14287_v10 = vpop.eup %14286  ;;  %v15445_v6 = vld [vmem:[%s18238_s2 + $0x8] ss:$16 sps:$4 sm:$0xff]  }
 0x3a8   :  { %v1441_v23 = vadd.f32 0.5, %v1439_v7  ;;  %v14289_v62 = vpop.eup %14288  ;;  %v1440_v11 = vmul.f32 0.5, %v14287_v10  ;;  %v15454_v7 = vld [vmem:[%s18238_s2 + $0x24] ss:$16 sps:$4 sm:$0xff]  }
 0x3a9   :  { %v1465_v0 = vadd.f32 0.5, %v1463_v21  ;;  %v14291_v8 = vpop.eup %14290  ;;  %v15464_v21 = vld [vmem:[%s18238_s2 + $0x20] ss:$16 sps:$4 sm:$0xff]   ;;  %v15478_v10 = vld [vmem:[%s18238_s2 + $0x44] ss:$16 sps:$4 sm:$0xff]  }
 0x3aa   :  { %v1469_v48 = vmul.f32 %v14289_v62, %v1441_v23  ;;  %v1442_v52 = vadd.f32 0.5, %v1440_v11  ;;  %v1464_v53 = vmul.f32 0.5, %v14291_v8  ;;  %v14293_v54 = vpop.eup %14292  ;;  %v15483_v23 = vld [vmem:[%s18238_s2 + $0x4c] ss:$16 sps:$4 sm:$0xff]   ;;  %v15488_v62 = vld [vmem:[%s18238_s2 + $0x40] ss:$16 sps:$4 sm:$0xff]  }
 0x3ab   :  { %v1467_v50 = vmul.f32 %v1465_v0, %v15362_v18  ;;  %v14295_v61 = vpop.eup %14294  ;;  %v15493_v0 = vld [vmem:[%s18238_s2 + $0x48] ss:$16 sps:$4 sm:$0xff]   ;;  %v15503_v11 = vld [vmem:[%s18238_s2 + $0x6c] ss:$16 sps:$4 sm:$0xff]  }
 0x3ac   :  { %v1466_v57 = vadd.f32 0.5, %v1464_v53  ;;  %v1470_v58 = vmul.f32 %v14293_v54, %v1442_v52  ;;  %v14297_v63 = vpop.eup %14296  ;;  %v1453_v1 = vmul.f32 0.5, %v14295_v61  ;;  %v15508_v8 = vld [vmem:[%s18238_s2 + $0x68] ss:$16 sps:$4 sm:$0xff]  }
 0x3ad   :  { %v15414_v55 = vadd.f32 %v1469_v48, %v1467_v50  ;;  %v1454_v18 = vmul.f32 0.5, %v14297_v63  ;;  %v15522_v48 = vld [vmem:[%s18238_s2 + $0x88] ss:$16 sps:$4 sm:$0xff]  }
 0x3ae   :  { %v1468_v59 = vmul.f32 %v1466_v57, %v15366_v2  ;;  %v1455_v31 = vadd.f32 0.5, %v1453_v1  ;;  %v15430_v2 = vld [vmem:[%s18238_s2 + $0x4] ss:$16 sps:$4 sm:$0xff]  }
 0x3af   :  { %14298 = vtanh.f32 %v15414_v55  ;;  %v1456_v19 = vadd.f32 0.5, %v1454_v18  ;;  %2043 = vmatprep.subr.bf16.mxu0 %v15430_v2 }
 0x3b0   :  { %v15418_v60 = vadd.f32 %v1470_v58, %v1468_v59 }
 0x3b2   :  { %14300 = vtanh.f32 %v15418_v60 }
 0x3b9   :  { %v14299_v29 = vpop.eup %14298 }
 0x3ba   :  { %v1475_v47 = vmul.f32 %v14299_v29, %v1455_v31 }
 0x3bc   :  { %v14301_v17 = vpop.eup %14300 }
 0x3bd   :  { %v1476_v4 = vmul.f32 %v14301_v17, %v1456_v19 }
 0x3bf   :  { %v15421_v3 = vpack.c.bf16 %v1476_v4, %v1475_v47 }
 0x3c1   :  { %18295 = vst [vmem:[#allocation20_spill] sm:$0xff] %v15421_v3  ;;  %1719 = vmatmul.mubr.bf16.vlgmr.msra.gmra.mrb[12].mxu0 %v15421_v3  ;;  %1762 = vmatmul.mubr.bf16.vlgmr.msra.gmra.mrb[28].mxu1 %v15421_v3 }
 0x3c2   :  { %2075 = vmatprep.mubr.bf16.mxu0 %v18293_v15  ;;  %2118 = vmatprep.mubr.bf16.mxu1 %v18293_v15 }
 0x3c3   :  { %2044 = vmatpush1.bf16.msra.mxu0 %v15440_v5  ;;  %2087 = vmatpush1.bf16.msra.mxu1 %v15445_v6 }
 0x3c4   :  { %2045 = vmatprep.subr.bf16.mxu0 %v15454_v7  ;;  %2088 = vmatprep.subr.bf16.mxu1 %v15459_v12 }
 0x3c7   :  { %2046 = vmatpush1.bf16.msra.mxu0 %v15464_v21  ;;  %2089 = vmatpush1.bf16.msra.mxu1 %v15469_v22 }
 0x3c8   :  { %2047 = vmatprep.subr.bf16.mxu0 %v15478_v10  ;;  %2090 = vmatprep.subr.bf16.mxu1 %v15483_v23 }
 0x3cb   :  { %2048 = vmatpush1.bf16.msra.mxu0 %v15488_v62  ;;  %2091 = vmatpush1.bf16.msra.mxu1 %v15493_v0 }
 0x3cc   :  { %2049 = vmatprep.subr.bf16.mxu0 %v15110_v26  ;;  %2092 = vmatprep.subr.bf16.mxu1 %v15503_v11  ;;  %v15517_v26 = vld [vmem:[%s18238_s2 + $0x8c] ss:$16 sps:$4 sm:$0xff]  }
 0x3cf   :  { %2050 = vmatpush1.bf16.msra.mxu0 %v15115_v28  ;;  %2093 = vmatpush1.bf16.msra.mxu1 %v15508_v8 }
 0x3d0   :  { %2051 = vmatprep.subr.bf16.mxu0 %v15145_v24  ;;  %2094 = vmatprep.subr.bf16.mxu1 %v15517_v26 }
 0x3d3   :  { %2052 = vmatpush1.bf16.msra.mxu0 %v15140_v32  ;;  %2095 = vmatpush1.bf16.msra.mxu1 %v15522_v48 }
 0x3d4   :  { %2053 = vmatprep.subr.bf16.mxu0 %v15188_v27  ;;  %2096 = vmatprep.subr.bf16.mxu1 %v15163_v35 }
 0x3d7   :  { %2054 = vmatpush1.bf16.msra.mxu0 %v15195_v30  ;;  %2097 = vmatpush1.bf16.msra.mxu1 %v15158_v34 }
 0x3d8   :  { %2055 = vmatprep.subr.bf16.mxu0 %v15208_v36  ;;  %2098 = vmatprep.subr.bf16.mxu1 %v15203_v33 }
 0x3db   :  { %2056 = vmatpush1.bf16.msra.mxu0 %v15218_v38  ;;  %2099 = vmatpush1.bf16.msra.mxu1 %v15213_v37 }
 0x3dc   :  { %2057 = vmatprep.subr.bf16.mxu0 %v15227_v39  ;;  %2100 = vmatprep.subr.bf16.mxu1 %v15232_v40 }
 0x3df   :  { %2058 = vmatpush1.bf16.msra.mxu0 %v15239_v41  ;;  %2101 = vmatpush1.bf16.msra.mxu1 %v15244_v42 }
 0x3e0   :  { %2400 = vmatprep.subr.bf16.mxu0 %v15430_v2  ;;  %2443 = vmatprep.subr.bf16.mxu1 %v15435_v25 }
 0x494   :  { %v1720_v28 = vpop.f32.mrb[12].mxu0  ;;  %v1763_v32 = vpop.f32.mrb[28].mxu1 }
 0x495   :  { %v13335_v24 = vadd.f32 %v1720_v28, %v15290_v13  ;;  %v1722_v34 = vpop.f32.mrb[13].mxu0  ;;  %v1765_v35 = vpop.f32.mrb[29].mxu1  ;;  %v13411_v42 = vadd.f32 %v1763_v32, %v15296_v20 }
 0x496   :  { %v13336_v27 = vadd.f32 %v1722_v34, %v14947_v14  ;;  %v1724_v30 = vpop.f32.mrb[14].mxu0  ;;  %v1767_v33 = vpop.f32.mrb[30].mxu1  ;;  %v13412_v54 = vadd.f32 %v1765_v35, %v15302_v9 }
 0x497   :  { %v1792_v36 = vmul.f32 0.5, %v13335_v24  ;;  %v13337_v37 = vadd.f32 %v1724_v30, %v15290_v13  ;;  %v1726_v38 = vpop.f32.mrb[15].mxu0  ;;  %v1769_v39 = vpop.f32.mrb[31].mxu1  ;;  %v13413_v53 = vadd.f32 %v1767_v33, %v15296_v20 }
 0x498   :  { %v1816_v40 = vmul.f32 0.5, %v13336_v27  ;;  %v13338_v41 = vadd.f32 %v1726_v38, %v14947_v14  ;;  %v13414_v57 = vadd.f32 %v1769_v39, %v15302_v9  ;;  %v1806_v63 = vmul.f32 0.5, %v13412_v54 }
 0x499   :  { %14302 = vtanh.f32 %v1792_v36  ;;  %v1793_v50 = vmul.f32 0.5, %v13337_v37 }
 0x49a   :  { %14304 = vtanh.f32 %v1816_v40  ;;  %v1817_v52 = vmul.f32 0.5, %v13338_v41  ;;  %v1807_v18 = vmul.f32 0.5, %v13414_v57 }
 0x49b   :  { %14306 = vtanh.f32 %v1793_v50 }
 0x49c   :  { %14308 = vtanh.f32 %v13411_v42 }
 0x49d   :  { %14310 = vtanh.f32 %v1817_v52 }
 0x49e   :  { %14312 = vtanh.f32 %v13413_v53 }
 0x49f   :  { %14314 = vtanh.f32 %v1806_v63  ;;  %v15604_v63 = vld [vmem:[%s18238_s2 + $0xa4] ss:$16 sps:$4 sm:$0xff]  }
 0x4a0   :  { %14316 = vtanh.f32 %v1807_v18  ;;  %v15614_v18 = vld [vmem:[%s18238_s2 + $0xa0] ss:$16 sps:$4 sm:$0xff]  }
 0x4a3   :  { %v14303_v58 = vpop.eup %14302 }
 0x4a4   :  { %v14305_v59 = vpop.eup %14304  ;;  %v1796_v61 = vmul.f32 0.5, %v14303_v58  ;;  %v15585_v58 = vld [vmem:[%s18238_s2 + $0x60] ss:$16 sps:$4 sm:$0xff]  }
 0x4a5   :  { %v1820_v1 = vmul.f32 0.5, %v14305_v59  ;;  %v14307_v29 = vpop.eup %14306  ;;  %v15592_v59 = vld [vmem:[%s18238_s2 + $0x84] ss:$16 sps:$4 sm:$0xff]  }
 0x4a6   :  { %v1798_v31 = vadd.f32 0.5, %v1796_v61  ;;  %v14309_v19 = vpop.eup %14308  ;;  %v1797_v47 = vmul.f32 0.5, %v14307_v29  ;;  %v15597_v61 = vld [vmem:[%s18238_s2 + $0x80] ss:$16 sps:$4 sm:$0xff]   ;;  %v15619_v29 = vld [vmem:[%s18238_s2 + $0xa8] ss:$16 sps:$4 sm:$0xff]  }
 0x4a7   :  { %v1822_v17 = vadd.f32 0.5, %v1820_v1  ;;  %v14311_v4 = vpop.eup %14310  ;;  %v15609_v1 = vld [vmem:[%s18238_s2 + $0xac] ss:$16 sps:$4 sm:$0xff]  }
 0x4a8   :  { %v1826_v28 = vmul.f32 %v14309_v19, %v1798_v31  ;;  %v1799_v24 = vadd.f32 0.5, %v1797_v47  ;;  %v1821_v34 = vmul.f32 0.5, %v14311_v4  ;;  %v14313_v35 = vpop.eup %14312  ;;  %v15628_v31 = vld [vmem:[%s18238_s2 + $0xc4] ss:$16 sps:$4 sm:$0xff]   ;;  %v15633_v19 = vld [vmem:[%s18238_s2 + $0xcc] ss:$16 sps:$4 sm:$0xff]  }
 0x4a9   :  { %v1824_v32 = vmul.f32 %v1822_v17, %v15414_v55  ;;  %v14315_v38 = vpop.eup %14314  ;;  %v15638_v17 = vld [vmem:[%s18238_s2 + $0xc0] ss:$16 sps:$4 sm:$0xff]   ;;  %v15643_v47 = vld [vmem:[%s18238_s2 + $0xc8] ss:$16 sps:$4 sm:$0xff]  }
 0x4aa   :  { %v1823_v30 = vadd.f32 0.5, %v1821_v34  ;;  %v1827_v33 = vmul.f32 %v14313_v35, %v1799_v24  ;;  %v14317_v39 = vpop.eup %14316  ;;  %v1810_v40 = vmul.f32 0.5, %v14315_v38  ;;  %v15652_v4 = vld [vmem:[%s18238_s2 + $0xe0] ss:$16 sps:$4 sm:$0xff]   ;;  %v15667_v24 = vld [vmem:[%s18238_s2 + $0xec] ss:$16 sps:$4 sm:$0xff]  }
 0x4ab   :  { %v15550_v27 = vadd.f32 %v1826_v28, %v1824_v32  ;;  %v1811_v55 = vmul.f32 0.5, %v14317_v39  ;;  %v15657_v28 = vld [vmem:[%s18238_s2 + $0xe4] ss:$16 sps:$4 sm:$0xff]   ;;  %v15662_v32 = vld [vmem:[%s18238_s2 + $0xe8] ss:$16 sps:$4 sm:$0xff]  }
 0x4ac   :  { %v1825_v36 = vmul.f32 %v1823_v30, %v15418_v60  ;;  %v1812_v42 = vadd.f32 0.5, %v1810_v40  ;;  %v15580_v60 = vld [vmem:[%s18238_s2 + $0x64] ss:$16 sps:$4 sm:$0xff]  }
 0x4ad   :  { %14318 = vtanh.f32 %v15550_v27  ;;  %v1813_v50 = vadd.f32 0.5, %v1811_v55 }
 0x4ae   :  { %v15554_v37 = vadd.f32 %v1827_v33, %v1825_v36 }
 0x4b0   :  { %14320 = vtanh.f32 %v15554_v37 }
 0x4b7   :  { %v14319_v41 = vpop.eup %14318 }
 0x4b8   :  { %v1832_v53 = vmul.f32 %v14319_v41, %v1812_v42 }
 0x4ba   :  { %v14321_v52 = vpop.eup %14320 }
 0x4bb   :  { %v1833_v54 = vmul.f32 %v14321_v52, %v1813_v50 }
 0x4bd   :  { %v15557_v57 = vpack.c.bf16 %v1833_v54, %v1832_v53 }
 0x4bf   :  { %18296 = vst [vmem:[#allocation21_spill] sm:$0xff] %v15557_v57  ;;  %2076 = vmatmul.mubr.bf16.vlgmr.msra.gmra.mrb[16].mxu0 %v15557_v57  ;;  %2119 = vmatmul.mubr.bf16.vlgmr.msra.gmra.mrb[32].mxu1 %v15557_v57 }
 0x4c0   :  { %2401 = vmatpush1.bf16.msra.mxu0 %v15440_v5  ;;  %2444 = vmatpush1.bf16.msra.mxu1 %v15445_v6 }
 0x4c1   :  { %2402 = vmatprep.subr.bf16.mxu0 %v15454_v7  ;;  %2445 = vmatprep.subr.bf16.mxu1 %v15459_v12 }
 0x4c2   :  { %2432 = vmatprep.mubr.bf16.mxu0 %v18293_v15  ;;  %2475 = vmatprep.mubr.bf16.mxu1 %v18293_v15 }
 0x4c4   :  { %2403 = vmatpush1.bf16.msra.mxu0 %v15464_v21  ;;  %2446 = vmatpush1.bf16.msra.mxu1 %v15469_v22 }
 0x4c5   :  { %2404 = vmatprep.subr.bf16.mxu0 %v15478_v10  ;;  %2447 = vmatprep.subr.bf16.mxu1 %v15483_v23 }
 0x4c8   :  { %2405 = vmatpush1.bf16.msra.mxu0 %v15488_v62  ;;  %2448 = vmatpush1.bf16.msra.mxu1 %v15493_v0 }
 0x4c9   :  { %2449 = vmatprep.subr.bf16.mxu1 %v15503_v11  ;;  %2406 = vmatprep.subr.bf16.mxu0 %v15580_v60 }
 0x4cc   :  { %2450 = vmatpush1.bf16.msra.mxu1 %v15508_v8  ;;  %2407 = vmatpush1.bf16.msra.mxu0 %v15585_v58 }
 0x4cd   :  { %2451 = vmatprep.subr.bf16.mxu1 %v15517_v26  ;;  %2408 = vmatprep.subr.bf16.mxu0 %v15592_v59 }
 0x4d0   :  { %2452 = vmatpush1.bf16.msra.mxu1 %v15522_v48  ;;  %2409 = vmatpush1.bf16.msra.mxu0 %v15597_v61 }
 0x4d1   :  { %2410 = vmatprep.subr.bf16.mxu0 %v15604_v63  ;;  %2453 = vmatprep.subr.bf16.mxu1 %v15609_v1 }
 0x4d4   :  { %2411 = vmatpush1.bf16.msra.mxu0 %v15614_v18  ;;  %2454 = vmatpush1.bf16.msra.mxu1 %v15619_v29 }
 0x4d5   :  { %2412 = vmatprep.subr.bf16.mxu0 %v15628_v31  ;;  %2455 = vmatprep.subr.bf16.mxu1 %v15633_v19 }
 0x4d8   :  { %2413 = vmatpush1.bf16.msra.mxu0 %v15638_v17  ;;  %2456 = vmatpush1.bf16.msra.mxu1 %v15643_v47 }
 0x4d9   :  { %2414 = vmatprep.subr.bf16.mxu0 %v15657_v28  ;;  %2457 = vmatprep.subr.bf16.mxu1 %v15667_v24 }
 0x4dc   :  { %2415 = vmatpush1.bf16.msra.mxu0 %v15652_v4  ;;  %2458 = vmatpush1.bf16.msra.mxu1 %v15662_v32 }
 0x4dd   :  { %2757 = vmatprep.subr.bf16.mxu0 %v15430_v2  ;;  %2800 = vmatprep.subr.bf16.mxu1 %v15435_v25 }
 0x592   :  { %v2077_v34 = vpop.f32.mrb[16].mxu0  ;;  %v2120_v35 = vpop.f32.mrb[32].mxu1 }
 0x593   :  { %v13339_v30 = vadd.f32 %v2077_v34, %v15290_v13  ;;  %v2079_v33 = vpop.f32.mrb[17].mxu0  ;;  %v2122_v36 = vpop.f32.mrb[33].mxu1  ;;  %v13415_v54 = vadd.f32 %v2120_v35, %v15296_v20 }
 0x594   :  { %v13340_v38 = vadd.f32 %v2079_v33, %v14947_v14  ;;  %v2081_v39 = vpop.f32.mrb[18].mxu0  ;;  %v2124_v40 = vpop.f32.mrb[34].mxu1 }
 0x595   :  { %v2149_v55 = vmul.f32 0.5, %v13339_v30  ;;  %v13341_v41 = vadd.f32 %v2081_v39, %v15290_v13  ;;  %v2083_v42 = vpop.f32.mrb[19].mxu0  ;;  %v2126_v50 = vpop.f32.mrb[35].mxu1  ;;  %v13417_v3 = vadd.f32 %v2124_v40, %v15296_v20  ;;  %v13416_v30 = vadd.f32 %v2122_v36, %v15302_v9 }
 0x596   :  { %v2173_v52 = vmul.f32 0.5, %v13340_v38  ;;  %v13342_v53 = vadd.f32 %v2083_v42, %v14947_v14  ;;  %v13418_v33 = vadd.f32 %v2126_v50, %v15302_v9 }
 0x597   :  { %14322 = vtanh.f32 %v2149_v55  ;;  %v2150_v57 = vmul.f32 0.5, %v13341_v41  ;;  %v2163_v42 = vmul.f32 0.5, %v13416_v30 }
 0x598   :  { %14324 = vtanh.f32 %v2173_v52  ;;  %v2174_v34 = vmul.f32 0.5, %v13342_v53  ;;  %v2164_v56 = vmul.f32 0.5, %v13418_v33 }
 0x599   :  { %14326 = vtanh.f32 %v2150_v57 }
 0x59a   :  { %14328 = vtanh.f32 %v13415_v54 }
 0x59b   :  { %14330 = vtanh.f32 %v2174_v34 }
 0x59c   :  { %14332 = vtanh.f32 %v13417_v3 }
 0x59d   :  { %14334 = vtanh.f32 %v2163_v42 }
 0x59e   :  { %14336 = vtanh.f32 %v2164_v56 }
 0x5a1   :  { %v14323_v39 = vpop.eup %14322 }
 0x5a2   :  { %v14325_v38 = vpop.eup %14324  ;;  %v2153_v16 = vmul.f32 0.5, %v14323_v39 }
 0x5a3   :  { %v2177_v55 = vmul.f32 0.5, %v14325_v38  ;;  %v14327_v35 = vpop.eup %14326 }
 0x5a4   :  { %v2155_v41 = vadd.f32 0.5, %v2153_v16  ;;  %v14329_v52 = vpop.eup %14328  ;;  %v2154_v57 = vmul.f32 0.5, %v14327_v35 }
 0x5a5   :  { %v2179_v53 = vadd.f32 0.5, %v2177_v55  ;;  %v14331_v51 = vpop.eup %14330 }
 0x5a6   :  { %v2183_v40 = vmul.f32 %v14329_v52, %v2155_v41  ;;  %v2156_v36 = vadd.f32 0.5, %v2154_v57  ;;  %v2178_v3 = vmul.f32 0.5, %v14331_v51  ;;  %v14333_v50 = vpop.eup %14332 }
 0x5a7   :  { %v2181_v54 = vmul.f32 %v2179_v53, %v15550_v27  ;;  %v14335_v38 = vpop.eup %14334 }
 0x5a8   :  { %v2180_v39 = vadd.f32 0.5, %v2178_v3  ;;  %v2184_v30 = vmul.f32 %v14333_v50, %v2156_v36  ;;  %v14337_v42 = vpop.eup %14336  ;;  %v2167_v55 = vmul.f32 0.5, %v14335_v38 }
 0x5a9   :  { %v15684_v34 = vadd.f32 %v2183_v40, %v2181_v54  ;;  %v2168_v27 = vmul.f32 0.5, %v14337_v42 }
 0x5aa   :  { %v2182_v33 = vmul.f32 %v2180_v39, %v15554_v37  ;;  %v2169_v51 = vadd.f32 0.5, %v2167_v55 }
 0x5ab   :  { %14338 = vtanh.f32 %v15684_v34  ;;  %v2170_v56 = vadd.f32 0.5, %v2168_v27 }
 0x5ac   :  { %v15688_v16 = vadd.f32 %v2184_v30, %v2182_v33 }
 0x5ae   :  { %14340 = vtanh.f32 %v15688_v16 }
 0x5b5   :  { %v14339_v35 = vpop.eup %14338 }
 0x5b6   :  { %v2189_v52 = vmul.f32 %v14339_v35, %v2169_v51 }
 0x5b8   :  { %v14341_v41 = vpop.eup %14340 }
 0x5b9   :  { %v2190_v53 = vmul.f32 %v14341_v41, %v2170_v56 }
 0x5bb   :  { %v15691_v57 = vpack.c.bf16 %v2190_v53, %v2189_v52 }
 0x5bd   :  { %18297 = vst [vmem:[#allocation22_spill] sm:$0xff] %v15691_v57  ;;  %2433 = vmatmul.mubr.bf16.vlgmr.msra.gmra.mrb[20].mxu0 %v15691_v57  ;;  %2476 = vmatmul.mubr.bf16.vlgmr.msra.gmra.mrb[36].mxu1 %v15691_v57 }
 0x5be   :  { %2758 = vmatpush1.bf16.msra.mxu0 %v15440_v5  ;;  %2801 = vmatpush1.bf16.msra.mxu1 %v15445_v6 }
 0x5bf   :  { %2759 = vmatprep.subr.bf16.mxu0 %v15454_v7  ;;  %2802 = vmatprep.subr.bf16.mxu1 %v15459_v12 }
 0x5c0   :  { %2789 = vmatprep.mubr.bf16.mxu0 %v18293_v15  ;;  %2832 = vmatprep.mubr.bf16.mxu1 %v18293_v15 }
 0x5c2   :  { %2760 = vmatpush1.bf16.msra.mxu0 %v15464_v21  ;;  %2803 = vmatpush1.bf16.msra.mxu1 %v15469_v22 }
 0x5c3   :  { %2761 = vmatprep.subr.bf16.mxu0 %v15478_v10  ;;  %2804 = vmatprep.subr.bf16.mxu1 %v15483_v23 }
 0x5c6   :  { %2762 = vmatpush1.bf16.msra.mxu0 %v15488_v62  ;;  %2805 = vmatpush1.bf16.msra.mxu1 %v15493_v0 }
 0x5c7   :  { %2763 = vmatprep.subr.bf16.mxu0 %v15580_v60  ;;  %2806 = vmatprep.subr.bf16.mxu1 %v15503_v11 }
 0x5ca   :  { %2764 = vmatpush1.bf16.msra.mxu0 %v15585_v58  ;;  %2807 = vmatpush1.bf16.msra.mxu1 %v15508_v8 }
 0x5cb   :  { %2765 = vmatprep.subr.bf16.mxu0 %v15592_v59  ;;  %2808 = vmatprep.subr.bf16.mxu1 %v15517_v26 }
 0x5ce   :  { %2766 = vmatpush1.bf16.msra.mxu0 %v15597_v61  ;;  %2809 = vmatpush1.bf16.msra.mxu1 %v15522_v48 }
 0x5cf   :  { %2767 = vmatprep.subr.bf16.mxu0 %v15604_v63  ;;  %2810 = vmatprep.subr.bf16.mxu1 %v15609_v1 }
 0x5d2   :  { %2768 = vmatpush1.bf16.msra.mxu0 %v15614_v18  ;;  %2811 = vmatpush1.bf16.msra.mxu1 %v15619_v29 }
 0x5d3   :  { %2769 = vmatprep.subr.bf16.mxu0 %v15628_v31  ;;  %2812 = vmatprep.subr.bf16.mxu1 %v15633_v19 }
 0x5d6   :  { %2770 = vmatpush1.bf16.msra.mxu0 %v15638_v17  ;;  %2813 = vmatpush1.bf16.msra.mxu1 %v15643_v47 }
 0x5d7   :  { %2771 = vmatprep.subr.bf16.mxu0 %v15657_v28  ;;  %2814 = vmatprep.subr.bf16.mxu1 %v15667_v24 }
 0x5da   :  { %2772 = vmatpush1.bf16.msra.mxu0 %v15652_v4  ;;  %2815 = vmatpush1.bf16.msra.mxu1 %v15662_v32 }
 0x5db   :  { %3114 = vmatprep.subr.bf16.mxu0 %v15430_v2  ;;  %3157 = vmatprep.subr.bf16.mxu1 %v15435_v25 }
 0x690   :  { %v2434_v37 = vpop.f32.mrb[20].mxu0  ;;  %v2477_v40 = vpop.f32.mrb[36].mxu1 }
 0x691   :  { %v13343_v54 = vadd.f32 %v2434_v37, %v15290_v13  ;;  %v2436_v36 = vpop.f32.mrb[21].mxu0  ;;  %v2479_v3 = vpop.f32.mrb[37].mxu1  ;;  %v13419_v25 = vadd.f32 %v2477_v40, %v15296_v20 }
 0x692   :  { %v13344_v50 = vadd.f32 %v2436_v36, %v14947_v14  ;;  %v2438_v39 = vpop.f32.mrb[22].mxu0  ;;  %v2481_v30 = vpop.f32.mrb[38].mxu1  ;;  %v13420_v41 = vadd.f32 %v2479_v3, %v15302_v9 }
 0x693   :  { %v2506_v33 = vmul.f32 0.5, %v13343_v54  ;;  %v13345_v38 = vadd.f32 %v2438_v39, %v15290_v13  ;;  %v2440_v42 = vpop.f32.mrb[23].mxu0  ;;  %v2483_v55 = vpop.f32.mrb[39].mxu1  ;;  %v13421_v56 = vadd.f32 %v2481_v30, %v15296_v20 }
 0x694   :  { %v2530_v27 = vmul.f32 0.5, %v13344_v50  ;;  %v13346_v2 = vadd.f32 %v2440_v42, %v14947_v14  ;;  %v13422_v52 = vadd.f32 %v2483_v55, %v15302_v9  ;;  %v2520_v36 = vmul.f32 0.5, %v13420_v41 }
 0x695   :  { %14342 = vtanh.f32 %v2506_v33  ;;  %v2507_v35 = vmul.f32 0.5, %v13345_v38 }
 0x696   :  { %14344 = vtanh.f32 %v2530_v27  ;;  %v2531_v51 = vmul.f32 0.5, %v13346_v2  ;;  %v2521_v39 = vmul.f32 0.5, %v13422_v52 }
 0x697   :  { %14346 = vtanh.f32 %v2507_v35 }
 0x698   :  { %14348 = vtanh.f32 %v13419_v25 }
 0x699   :  { %14350 = vtanh.f32 %v2531_v51 }
 0x69a   :  { %14352 = vtanh.f32 %v13421_v56 }
 0x69b   :  { %14354 = vtanh.f32 %v2520_v36 }
 0x69c   :  { %14356 = vtanh.f32 %v2521_v39 }
 0x69f   :  { %v14343_v53 = vpop.eup %14342 }
 0x6a0   :  { %v14345_v37 = vpop.eup %14344  ;;  %v2510_v54 = vmul.f32 0.5, %v14343_v53 }
 0x6a1   :  { %v2534_v50 = vmul.f32 0.5, %v14345_v37  ;;  %v14347_v40 = vpop.eup %14346 }
 0x6a2   :  { %v2512_v33 = vadd.f32 0.5, %v2510_v54  ;;  %v14349_v38 = vpop.eup %14348  ;;  %v2511_v27 = vmul.f32 0.5, %v14347_v40 }
 0x6a3   :  { %v2536_v42 = vadd.f32 0.5, %v2534_v50  ;;  %v14351_v2 = vpop.eup %14350 }
 0x6a4   :  { %v2540_v30 = vmul.f32 %v14349_v38, %v2512_v33  ;;  %v2513_v3 = vadd.f32 0.5, %v2511_v27  ;;  %v2535_v35 = vmul.f32 0.5, %v14351_v2  ;;  %v14353_v55 = vpop.eup %14352 }
 0x6a5   :  { %v2538_v25 = vmul.f32 %v2536_v42, %v15684_v34  ;;  %v14355_v37 = vpop.eup %14354 }
 0x6a6   :  { %v2537_v56 = vadd.f32 0.5, %v2535_v35  ;;  %v2541_v41 = vmul.f32 %v14353_v55, %v2513_v3  ;;  %v14357_v54 = vpop.eup %14356  ;;  %v2524_v36 = vmul.f32 0.5, %v14355_v37 }
 0x6a7   :  { %v15738_v51 = vadd.f32 %v2540_v30, %v2538_v25  ;;  %v2525_v34 = vmul.f32 0.5, %v14357_v54 }
 0x6a8   :  { %v2539_v52 = vmul.f32 %v2537_v56, %v15688_v16  ;;  %v2526_v40 = vadd.f32 0.5, %v2524_v36 }
 0x6a9   :  { %14358 = vtanh.f32 %v15738_v51  ;;  %v2527_v39 = vadd.f32 0.5, %v2525_v34 }
 0x6aa   :  { %v15742_v53 = vadd.f32 %v2541_v41, %v2539_v52 }
 0x6ac   :  { %14360 = vtanh.f32 %v15742_v53 }
 0x6b3   :  { %v14359_v50 = vpop.eup %14358 }
 0x6b4   :  { %v2546_v38 = vmul.f32 %v14359_v50, %v2526_v40 }
 0x6b6   :  { %v14361_v33 = vpop.eup %14360 }
 0x6b7   :  { %v2547_v42 = vmul.f32 %v14361_v33, %v2527_v39 }
 0x6b9   :  { %v15745_v27 = vpack.c.bf16 %v2547_v42, %v2546_v38 }
 0x6bb   :  { %18298 = vst [vmem:[#allocation23_spill] sm:$0xff] %v15745_v27  ;;  %2790 = vmatmul.mubr.bf16.vlgmr.msra.gmra.mrb[24].mxu0 %v15745_v27  ;;  %2833 = vmatmul.mubr.bf16.vlgmr.msra.gmra.mrb[40].mxu1 %v15745_v27 }
 0x6bc   :  { %3115 = vmatpush1.bf16.msra.mxu0 %v15440_v5  ;;  %3158 = vmatpush1.bf16.msra.mxu1 %v15445_v6 }
 0x6bd   :  { %3116 = vmatprep.subr.bf16.mxu0 %v15454_v7  ;;  %3159 = vmatprep.subr.bf16.mxu1 %v15459_v12 }
 0x6be   :  { %3146 = vmatprep.mubr.bf16.mxu0 %v18293_v15  ;;  %3189 = vmatprep.mubr.bf16.mxu1 %v18293_v15 }
 0x6c0   :  { %3117 = vmatpush1.bf16.msra.mxu0 %v15464_v21  ;;  %3160 = vmatpush1.bf16.msra.mxu1 %v15469_v22 }
 0x6c1   :  { %3118 = vmatprep.subr.bf16.mxu0 %v15478_v10  ;;  %3161 = vmatprep.subr.bf16.mxu1 %v15483_v23 }
 0x6c4   :  { %3119 = vmatpush1.bf16.msra.mxu0 %v15488_v62  ;;  %3162 = vmatpush1.bf16.msra.mxu1 %v15493_v0 }
 0x6c5   :  { %3120 = vmatprep.subr.bf16.mxu0 %v15580_v60  ;;  %3163 = vmatprep.subr.bf16.mxu1 %v15503_v11 }
 0x6c8   :  { %3121 = vmatpush1.bf16.msra.mxu0 %v15585_v58  ;;  %3164 = vmatpush1.bf16.msra.mxu1 %v15508_v8 }
 0x6c9   :  { %3122 = vmatprep.subr.bf16.mxu0 %v15592_v59  ;;  %3165 = vmatprep.subr.bf16.mxu1 %v15517_v26 }
 0x6cc   :  { %3123 = vmatpush1.bf16.msra.mxu0 %v15597_v61  ;;  %3166 = vmatpush1.bf16.msra.mxu1 %v15522_v48 }
 0x6cd   :  { %3124 = vmatprep.subr.bf16.mxu0 %v15604_v63  ;;  %3167 = vmatprep.subr.bf16.mxu1 %v15609_v1 }
 0x6d0   :  { %3125 = vmatpush1.bf16.msra.mxu0 %v15614_v18  ;;  %3168 = vmatpush1.bf16.msra.mxu1 %v15619_v29 }
 0x6d1   :  { %3126 = vmatprep.subr.bf16.mxu0 %v15628_v31  ;;  %3169 = vmatprep.subr.bf16.mxu1 %v15633_v19 }
 0x6d4   :  { %3127 = vmatpush1.bf16.msra.mxu0 %v15638_v17  ;;  %3170 = vmatpush1.bf16.msra.mxu1 %v15643_v47 }
 0x6d5   :  { %3128 = vmatprep.subr.bf16.mxu0 %v15657_v28  ;;  %3171 = vmatprep.subr.bf16.mxu1 %v15667_v24 }
 0x6d8   :  { %3129 = vmatpush1.bf16.msra.mxu0 %v15652_v4  ;;  %3172 = vmatpush1.bf16.msra.mxu1 %v15662_v32 }
 0x78e   :  { %v2791_v5 = vpop.f32.mrb[24].mxu0  ;;  %v2834_v6 = vpop.f32.mrb[40].mxu1 }
 0x78f   :  { %v13347_v7 = vadd.f32 %v2791_v5, %v15290_v13  ;;  %v2793_v12 = vpop.f32.mrb[25].mxu0  ;;  %v2836_v21 = vpop.f32.mrb[41].mxu1  ;;  %v13423_v16 = vadd.f32 %v2834_v6, %v15296_v20 }
 0x790   :  { %v13348_v22 = vadd.f32 %v2793_v12, %v14947_v14  ;;  %v2795_v10 = vpop.f32.mrb[26].mxu0  ;;  %v2838_v23 = vpop.f32.mrb[42].mxu1  ;;  %v13424_v3 = vadd.f32 %v2836_v21, %v15302_v9 }
 0x791   :  { %v2863_v62 = vmul.f32 0.5, %v13347_v7  ;;  %v13349_v0 = vadd.f32 %v2795_v10, %v15290_v13  ;;  %v2797_v11 = vpop.f32.mrb[27].mxu0  ;;  %v2840_v8 = vpop.f32.mrb[43].mxu1  ;;  %v13425_v25 = vadd.f32 %v2838_v23, %v15296_v20 }
 0x792   :  { %v2887_v26 = vmul.f32 0.5, %v13348_v22  ;;  %v13350_v48 = vadd.f32 %v2797_v11, %v14947_v14  ;;  %v13426_v35 = vadd.f32 %v2840_v8, %v15302_v9  ;;  %v2877_v52 = vmul.f32 0.5, %v13424_v3  ;;  %v15811_v3 = vld [vmem:[%s18238_s2 + $0xc] ss:$16 sps:$4 sm:$0xff]  }
 0x793   :  { %14362 = vtanh.f32 %v2863_v62  ;;  %v2864_v2 = vmul.f32 0.5, %v13349_v0  ;;  %3514 = vmatprep.subr.bf16.mxu1 %v15811_v3 }
 0x794   :  { %14364 = vtanh.f32 %v2887_v26  ;;  %v2888_v30 = vmul.f32 0.5, %v13350_v48  ;;  %v2878_v54 = vmul.f32 0.5, %v13426_v35  ;;  %v15816_v35 = vld [vmem:[%s18238_s2] ss:$16 sps:$4 sm:$0xff]  }
 0x795   :  { %14366 = vtanh.f32 %v2864_v2 }
 0x796   :  { %14368 = vtanh.f32 %v13423_v16 }
 0x797   :  { %14370 = vtanh.f32 %v2888_v30 }
 0x798   :  { %14372 = vtanh.f32 %v13425_v25 }
 0x799   :  { %14374 = vtanh.f32 %v2877_v52  ;;  %v15840_v52 = vld [vmem:[%s18238_s2 + $0x20] ss:$16 sps:$4 sm:$0xff]  }
 0x79a   :  { %14376 = vtanh.f32 %v2878_v54  ;;  %v15854_v54 = vld [vmem:[%s18238_s2 + $0x44] ss:$16 sps:$4 sm:$0xff]  }
 0x79d   :  { %v14363_v55 = vpop.eup %14362 }
 0x79e   :  { %v14365_v56 = vpop.eup %14364  ;;  %v2867_v41 = vmul.f32 0.5, %v14363_v55  ;;  %v15821_v55 = vld [vmem:[%s18238_s2 + $0x8] ss:$16 sps:$4 sm:$0xff]  }
 0x79f   :  { %v2891_v37 = vmul.f32 0.5, %v14365_v56  ;;  %v14367_v36 = vpop.eup %14366  ;;  %v15830_v56 = vld [vmem:[%s18238_s2 + $0x24] ss:$16 sps:$4 sm:$0xff]  }
 0x7a0   :  { %v2869_v34 = vadd.f32 0.5, %v2867_v41  ;;  %v14369_v50 = vpop.eup %14368  ;;  %v2868_v39 = vmul.f32 0.5, %v14367_v36  ;;  %v15835_v41 = vld [vmem:[%s18238_s2 + $0x2c] ss:$16 sps:$4 sm:$0xff]  }
 0x7a1   :  { %v2893_v40 = vadd.f32 0.5, %v2891_v37  ;;  %v14371_v33 = vpop.eup %14370  ;;  %v15845_v37 = vld [vmem:[%s18238_s2 + $0x28] ss:$16 sps:$4 sm:$0xff]   ;;  %v15859_v36 = vld [vmem:[%s18238_s2 + $0x4c] ss:$16 sps:$4 sm:$0xff]  }
 0x7a2   :  { %v2897_v38 = vmul.f32 %v14369_v50, %v2869_v34  ;;  %v2870_v5 = vadd.f32 0.5, %v2868_v39  ;;  %v2892_v6 = vmul.f32 0.5, %v14371_v33  ;;  %v14373_v7 = vpop.eup %14372  ;;  %v15864_v34 = vld [vmem:[%s18238_s2 + $0x40] ss:$16 sps:$4 sm:$0xff]   ;;  %v15869_v50 = vld [vmem:[%s18238_s2 + $0x48] ss:$16 sps:$4 sm:$0xff]  }
 0x7a3   :  { %v2895_v42 = vmul.f32 %v2893_v40, %v15738_v51  ;;  %v14375_v62 = vpop.eup %14374  ;;  %v15879_v40 = vld [vmem:[%s18238_s2 + $0x6c] ss:$16 sps:$4 sm:$0xff]   ;;  %v15884_v39 = vld [vmem:[%s18238_s2 + $0x68] ss:$16 sps:$4 sm:$0xff]  }
 0x7a4   :  { %v2894_v21 = vadd.f32 0.5, %v2892_v6  ;;  %v2898_v22 = vmul.f32 %v14373_v7, %v2870_v5  ;;  %v14377_v0 = vpop.eup %14376  ;;  %v2881_v11 = vmul.f32 0.5, %v14375_v62  ;;  %v15898_v33 = vld [vmem:[%s18238_s2 + $0x88] ss:$16 sps:$4 sm:$0xff]  }
 0x7a5   :  { %v15790_v12 = vadd.f32 %v2897_v38, %v2895_v42  ;;  %v2882_v51 = vmul.f32 0.5, %v14377_v0 }
 0x7a6   :  { %v2896_v10 = vmul.f32 %v2894_v21, %v15742_v53  ;;  %v2883_v26 = vadd.f32 0.5, %v2881_v11  ;;  %v15806_v53 = vld [vmem:[%s18238_s2 + $0x4] ss:$16 sps:$4 sm:$0xff]  }
 0x7a7   :  { %14378 = vtanh.f32 %v15790_v12  ;;  %v2884_v48 = vadd.f32 0.5, %v2882_v51  ;;  %3471 = vmatprep.subr.bf16.mxu0 %v15806_v53 }
 0x7a8   :  { %v15794_v23 = vadd.f32 %v2898_v22, %v2896_v10 }
 0x7aa   :  { %14380 = vtanh.f32 %v15794_v23 }
 0x7b1   :  { %v14379_v8 = vpop.eup %14378 }
 0x7b2   :  { %v2903_v2 = vmul.f32 %v14379_v8, %v2883_v26 }
 0x7b4   :  { %v14381_v16 = vpop.eup %14380 }
 0x7b5   :  { %v2904_v30 = vmul.f32 %v14381_v16, %v2884_v48 }
 0x7b7   :  { %v15797_v25 = vpack.c.bf16 %v2904_v30, %v2903_v2 }
 0x7b9   :  { %18299 = vst [vmem:[#allocation24_spill] sm:$0xff] %v15797_v25  ;;  %3147 = vmatmul.mubr.bf16.vlgmr.msra.gmra.mrb[28].mxu0 %v15797_v25  ;;  %3190 = vmatmul.mubr.bf16.vlgmr.msra.gmra.mrb[44].mxu1 %v15797_v25 }
 0x7ba   :  { %3503 = vmatprep.mubr.bf16.mxu0 %v18293_v15  ;;  %3546 = vmatprep.mubr.bf16.mxu1 %v18293_v15 }
 0x7bb   :  { %3472 = vmatpush1.bf16.msra.mxu0 %v15816_v35  ;;  %3515 = vmatpush1.bf16.msra.mxu1 %v15821_v55 }
 0x7bc   :  { %3473 = vmatprep.subr.bf16.mxu0 %v15830_v56  ;;  %3516 = vmatprep.subr.bf16.mxu1 %v15835_v41 }
 0x7bf   :  { %3474 = vmatpush1.bf16.msra.mxu0 %v15840_v52  ;;  %3517 = vmatpush1.bf16.msra.mxu1 %v15845_v37 }
 0x7c0   :  { %3475 = vmatprep.subr.bf16.mxu0 %v15854_v54  ;;  %3518 = vmatprep.subr.bf16.mxu1 %v15859_v36 }
 0x7c3   :  { %3476 = vmatpush1.bf16.msra.mxu0 %v15864_v34  ;;  %3519 = vmatpush1.bf16.msra.mxu1 %v15869_v50 }
 0x7c4   :  { %3477 = vmatprep.subr.bf16.mxu0 %v15580_v60  ;;  %3520 = vmatprep.subr.bf16.mxu1 %v15879_v40  ;;  %v15893_v60 = vld [vmem:[%s18238_s2 + $0x8c] ss:$16 sps:$4 sm:$0xff]  }
 0x7c7   :  { %3478 = vmatpush1.bf16.msra.mxu0 %v15585_v58  ;;  %3521 = vmatpush1.bf16.msra.mxu1 %v15884_v39 }
 0x7c8   :  { %3479 = vmatprep.subr.bf16.mxu0 %v15592_v59  ;;  %3522 = vmatprep.subr.bf16.mxu1 %v15893_v60 }
 0x7cb   :  { %3480 = vmatpush1.bf16.msra.mxu0 %v15597_v61  ;;  %3523 = vmatpush1.bf16.msra.mxu1 %v15898_v33 }
 0x7cc   :  { %3481 = vmatprep.subr.bf16.mxu0 %v15604_v63  ;;  %3524 = vmatprep.subr.bf16.mxu1 %v15609_v1 }
 0x7cf   :  { %3482 = vmatpush1.bf16.msra.mxu0 %v15614_v18  ;;  %3525 = vmatpush1.bf16.msra.mxu1 %v15619_v29 }
 0x7d0   :  { %3483 = vmatprep.subr.bf16.mxu0 %v15628_v31  ;;  %3526 = vmatprep.subr.bf16.mxu1 %v15633_v19 }
 0x7d3   :  { %3484 = vmatpush1.bf16.msra.mxu0 %v15638_v17  ;;  %3527 = vmatpush1.bf16.msra.mxu1 %v15643_v47 }
 0x7d4   :  { %3485 = vmatprep.subr.bf16.mxu0 %v15657_v28  ;;  %3528 = vmatprep.subr.bf16.mxu1 %v15667_v24 }
 0x7d7   :  { %3486 = vmatpush1.bf16.msra.mxu0 %v15652_v4  ;;  %3529 = vmatpush1.bf16.msra.mxu1 %v15662_v32 }
 0x7d8   :  { %3828 = vmatprep.subr.bf16.mxu0 %v15806_v53  ;;  %3871 = vmatprep.subr.bf16.mxu1 %v15811_v3 }
 0x88c   :  { %v3148_v58 = vpop.f32.mrb[28].mxu0  ;;  %v3191_v59 = vpop.f32.mrb[44].mxu1 }
 0x88d   :  { %v13351_v61 = vadd.f32 %v3148_v58, %v15290_v13  ;;  %v3150_v63 = vpop.f32.mrb[29].mxu0  ;;  %v3193_v1 = vpop.f32.mrb[45].mxu1  ;;  %v13427_v24 = vadd.f32 %v3191_v59, %v15296_v20 }
 0x88e   :  { %v13352_v18 = vadd.f32 %v3150_v63, %v14947_v14  ;;  %v3152_v29 = vpop.f32.mrb[30].mxu0  ;;  %v3195_v31 = vpop.f32.mrb[46].mxu1  ;;  %v13428_v6 = vadd.f32 %v3193_v1, %v15302_v9 }
 0x88f   :  { %v3220_v19 = vmul.f32 0.5, %v13351_v61  ;;  %v13353_v17 = vadd.f32 %v3152_v29, %v15290_v13  ;;  %v3154_v47 = vpop.f32.mrb[31].mxu0  ;;  %v3197_v4 = vpop.f32.mrb[47].mxu1  ;;  %v13429_v5 = vadd.f32 %v3195_v31, %v15296_v20 }
 0x890   :  { %v3244_v28 = vmul.f32 0.5, %v13352_v18  ;;  %v13354_v32 = vadd.f32 %v3154_v47, %v14947_v14  ;;  %v13430_v7 = vadd.f32 %v3197_v4, %v15302_v9  ;;  %v3234_v62 = vmul.f32 0.5, %v13428_v6 }
 0x891   :  { %14382 = vtanh.f32 %v3220_v19  ;;  %v3221_v38 = vmul.f32 0.5, %v13353_v17 }
 0x892   :  { %14384 = vtanh.f32 %v3244_v28  ;;  %v3245_v42 = vmul.f32 0.5, %v13354_v32  ;;  %v3235_v11 = vmul.f32 0.5, %v13430_v7  ;;  %v15961_v7 = vld [vmem:[%s18238_s2 + $0x60] ss:$16 sps:$4 sm:$0xff]  }
 0x893   :  { %14386 = vtanh.f32 %v3221_v38 }
 0x894   :  { %14388 = vtanh.f32 %v13427_v24 }
 0x895   :  { %14390 = vtanh.f32 %v3245_v42 }
 0x896   :  { %14392 = vtanh.f32 %v13429_v5 }
 0x897   :  { %14394 = vtanh.f32 %v3234_v62  ;;  %v15985_v62 = vld [vmem:[%s18238_s2 + $0xac] ss:$16 sps:$4 sm:$0xff]  }
 0x898   :  { %14396 = vtanh.f32 %v3235_v11  ;;  %v15995_v11 = vld [vmem:[%s18238_s2 + $0xa8] ss:$16 sps:$4 sm:$0xff]  }
 0x89b   :  { %v14383_v21 = vpop.eup %14382 }
 0x89c   :  { %v14385_v22 = vpop.eup %14384  ;;  %v3224_v10 = vmul.f32 0.5, %v14383_v21  ;;  %v15968_v21 = vld [vmem:[%s18238_s2 + $0x84] ss:$16 sps:$4 sm:$0xff]  }
 0x89d   :  { %v3248_v0 = vmul.f32 0.5, %v14385_v22  ;;  %v14387_v51 = vpop.eup %14386  ;;  %v15973_v22 = vld [vmem:[%s18238_s2 + $0x80] ss:$16 sps:$4 sm:$0xff]  }
 0x89e   :  { %v3226_v8 = vadd.f32 0.5, %v3224_v10  ;;  %v14389_v26 = vpop.eup %14388  ;;  %v3225_v16 = vmul.f32 0.5, %v14387_v51  ;;  %v15980_v10 = vld [vmem:[%s18238_s2 + $0xa4] ss:$16 sps:$4 sm:$0xff]  }
 0x89f   :  { %v3250_v48 = vadd.f32 0.5, %v3248_v0  ;;  %v14391_v2 = vpop.eup %14390  ;;  %v15990_v0 = vld [vmem:[%s18238_s2 + $0xa0] ss:$16 sps:$4 sm:$0xff]   ;;  %v16004_v51 = vld [vmem:[%s18238_s2 + $0xc4] ss:$16 sps:$4 sm:$0xff]  }
 0x8a0   :  { %v3254_v30 = vmul.f32 %v14389_v26, %v3226_v8  ;;  %v3227_v59 = vadd.f32 0.5, %v3225_v16  ;;  %v3249_v61 = vmul.f32 0.5, %v14391_v2  ;;  %v14393_v63 = vpop.eup %14392  ;;  %v16009_v8 = vld [vmem:[%s18238_s2 + $0xcc] ss:$16 sps:$4 sm:$0xff]   ;;  %v16014_v26 = vld [vmem:[%s18238_s2 + $0xc0] ss:$16 sps:$4 sm:$0xff]  }
 0x8a1   :  { %v3252_v58 = vmul.f32 %v3250_v48, %v15790_v12  ;;  %v14395_v17 = vpop.eup %14394  ;;  %v16019_v48 = vld [vmem:[%s18238_s2 + $0xc8] ss:$16 sps:$4 sm:$0xff]   ;;  %v16028_v16 = vld [vmem:[%s18238_s2 + $0xe0] ss:$16 sps:$4 sm:$0xff]   ;;  %v16033_v2 = vld [vmem:[%s18238_s2 + $0xe4] ss:$16 sps:$4 sm:$0xff]  }
 0x8a2   :  { %v3251_v18 = vadd.f32 0.5, %v3249_v61  ;;  %v3255_v29 = vmul.f32 %v14393_v63, %v3227_v59  ;;  %v14397_v47 = vpop.eup %14396  ;;  %v3238_v4 = vmul.f32 0.5, %v14395_v17 }
 0x8a3   :  { %v15926_v1 = vadd.f32 %v3254_v30, %v3252_v58  ;;  %v3239_v12 = vmul.f32 0.5, %v14397_v47  ;;  %v16038_v30 = vld [vmem:[%s18238_s2 + $0xe8] ss:$16 sps:$4 sm:$0xff]   ;;  %v16043_v58 = vld [vmem:[%s18238_s2 + $0xec] ss:$16 sps:$4 sm:$0xff]  }
 0x8a4   :  { %v3253_v31 = vmul.f32 %v3251_v18, %v15794_v23  ;;  %v3240_v32 = vadd.f32 0.5, %v3238_v4  ;;  %v15956_v23 = vld [vmem:[%s18238_s2 + $0x64] ss:$16 sps:$4 sm:$0xff]  }
 0x8a5   :  { %14398 = vtanh.f32 %v15926_v1  ;;  %v3241_v24 = vadd.f32 0.5, %v3239_v12 }
 0x8a6   :  { %v15930_v19 = vadd.f32 %v3255_v29, %v3253_v31 }
 0x8a8   :  { %14400 = vtanh.f32 %v15930_v19 }
 0x8af   :  { %v14399_v28 = vpop.eup %14398 }
 0x8b0   :  { %v3260_v42 = vmul.f32 %v14399_v28, %v3240_v32 }
 0x8b2   :  { %v14401_v38 = vpop.eup %14400 }
 0x8b3   :  { %v3261_v5 = vmul.f32 %v14401_v38, %v3241_v24 }
 0x8b5   :  { %v15933_v6 = vpack.c.bf16 %v3261_v5, %v3260_v42 }
 0x8b7   :  { %18300 = vst [vmem:[#allocation25_spill] sm:$0xff] %v15933_v6  ;;  %3504 = vmatmul.mubr.bf16.vlgmr.msra.gmra.mrb[32].mxu0 %v15933_v6  ;;  %3547 = vmatmul.mubr.bf16.vlgmr.msra.gmra.mrb[48].mxu1 %v15933_v6 }
 0x8b8   :  { %3829 = vmatpush1.bf16.msra.mxu0 %v15816_v35  ;;  %3872 = vmatpush1.bf16.msra.mxu1 %v15821_v55 }
 0x8b9   :  { %3830 = vmatprep.subr.bf16.mxu0 %v15830_v56  ;;  %3873 = vmatprep.subr.bf16.mxu1 %v15835_v41 }
 0x8ba   :  { %3860 = vmatprep.mubr.bf16.mxu0 %v18293_v15  ;;  %3903 = vmatprep.mubr.bf16.mxu1 %v18293_v15 }
 0x8bc   :  { %3831 = vmatpush1.bf16.msra.mxu0 %v15840_v52  ;;  %3874 = vmatpush1.bf16.msra.mxu1 %v15845_v37 }
 0x8bd   :  { %3832 = vmatprep.subr.bf16.mxu0 %v15854_v54  ;;  %3875 = vmatprep.subr.bf16.mxu1 %v15859_v36 }
 0x8c0   :  { %3833 = vmatpush1.bf16.msra.mxu0 %v15864_v34  ;;  %3876 = vmatpush1.bf16.msra.mxu1 %v15869_v50 }
 0x8c1   :  { %3877 = vmatprep.subr.bf16.mxu1 %v15879_v40  ;;  %3834 = vmatprep.subr.bf16.mxu0 %v15956_v23 }
 0x8c4   :  { %3878 = vmatpush1.bf16.msra.mxu1 %v15884_v39  ;;  %3835 = vmatpush1.bf16.msra.mxu0 %v15961_v7 }
 0x8c5   :  { %3879 = vmatprep.subr.bf16.mxu1 %v15893_v60  ;;  %3836 = vmatprep.subr.bf16.mxu0 %v15968_v21 }
 0x8c8   :  { %3880 = vmatpush1.bf16.msra.mxu1 %v15898_v33  ;;  %3837 = vmatpush1.bf16.msra.mxu0 %v15973_v22 }
 0x8c9   :  { %3838 = vmatprep.subr.bf16.mxu0 %v15980_v10  ;;  %3881 = vmatprep.subr.bf16.mxu1 %v15985_v62 }
 0x8cc   :  { %3839 = vmatpush1.bf16.msra.mxu0 %v15990_v0  ;;  %3882 = vmatpush1.bf16.msra.mxu1 %v15995_v11 }
 0x8cd   :  { %3840 = vmatprep.subr.bf16.mxu0 %v16004_v51  ;;  %3883 = vmatprep.subr.bf16.mxu1 %v16009_v8 }
 0x8d0   :  { %3841 = vmatpush1.bf16.msra.mxu0 %v16014_v26  ;;  %3884 = vmatpush1.bf16.msra.mxu1 %v16019_v48 }
 0x8d1   :  { %3842 = vmatprep.subr.bf16.mxu0 %v16033_v2  ;;  %3885 = vmatprep.subr.bf16.mxu1 %v16043_v58 }
 0x8d4   :  { %3843 = vmatpush1.bf16.msra.mxu0 %v16028_v16  ;;  %3886 = vmatpush1.bf16.msra.mxu1 %v16038_v30 }
 0x8d5   :  { %4185 = vmatprep.subr.bf16.mxu0 %v15806_v53  ;;  %4228 = vmatprep.subr.bf16.mxu1 %v15811_v3 }
 0x98a   :  { %v3505_v59 = vpop.f32.mrb[32].mxu0  ;;  %v3548_v61 = vpop.f32.mrb[48].mxu1 }
 0x98b   :  { %v13355_v63 = vadd.f32 %v3505_v59, %v15290_v13  ;;  %v3507_v18 = vpop.f32.mrb[33].mxu0  ;;  %v3550_v29 = vpop.f32.mrb[49].mxu1  ;;  %v13431_v42 = vadd.f32 %v3548_v61, %v15296_v20 }
 0x98c   :  { %v13356_v31 = vadd.f32 %v3507_v18, %v14947_v14  ;;  %v3509_v17 = vpop.f32.mrb[34].mxu0  ;;  %v3552_v47 = vpop.f32.mrb[50].mxu1 }
 0x98d   :  { %v3577_v4 = vmul.f32 0.5, %v13355_v63  ;;  %v13357_v12 = vadd.f32 %v3509_v17, %v15290_v13  ;;  %v3511_v28 = vpop.f32.mrb[35].mxu0  ;;  %v3554_v32 = vpop.f32.mrb[51].mxu1  ;;  %v13433_v6 = vadd.f32 %v3552_v47, %v15296_v20  ;;  %v13432_v63 = vadd.f32 %v3550_v29, %v15302_v9 }
 0x98e   :  { %v3601_v24 = vmul.f32 0.5, %v13356_v31  ;;  %v13358_v38 = vadd.f32 %v3511_v28, %v14947_v14  ;;  %v13434_v18 = vadd.f32 %v3554_v32, %v15302_v9 }
 0x98f   :  { %14402 = vtanh.f32 %v3577_v4  ;;  %v3578_v5 = vmul.f32 0.5, %v13357_v12  ;;  %v3591_v28 = vmul.f32 0.5, %v13432_v63 }
 0x990   :  { %14404 = vtanh.f32 %v3601_v24  ;;  %v3602_v59 = vmul.f32 0.5, %v13358_v38  ;;  %v3592_v27 = vmul.f32 0.5, %v13434_v18 }
 0x991   :  { %14406 = vtanh.f32 %v3578_v5 }
 0x992   :  { %14408 = vtanh.f32 %v13431_v42 }
 0x993   :  { %14410 = vtanh.f32 %v3602_v59 }
 0x994   :  { %14412 = vtanh.f32 %v13433_v6 }
 0x995   :  { %14414 = vtanh.f32 %v3591_v28 }
 0x996   :  { %14416 = vtanh.f32 %v3592_v27 }
 0x999   :  { %v14403_v17 = vpop.eup %14402 }
 0x99a   :  { %v14405_v31 = vpop.eup %14404  ;;  %v3581_v25 = vmul.f32 0.5, %v14403_v17 }
 0x99b   :  { %v3605_v4 = vmul.f32 0.5, %v14405_v31  ;;  %v14407_v61 = vpop.eup %14406 }
 0x99c   :  { %v3583_v12 = vadd.f32 0.5, %v3581_v25  ;;  %v14409_v24 = vpop.eup %14408  ;;  %v3582_v5 = vmul.f32 0.5, %v14407_v61 }
 0x99d   :  { %v3607_v38 = vadd.f32 0.5, %v3605_v4  ;;  %v14411_v57 = vpop.eup %14410 }
 0x99e   :  { %v3611_v47 = vmul.f32 %v14409_v24, %v3583_v12  ;;  %v3584_v29 = vadd.f32 0.5, %v3582_v5  ;;  %v3606_v6 = vmul.f32 0.5, %v14411_v57  ;;  %v14413_v32 = vpop.eup %14412 }
 0x99f   :  { %v3609_v42 = vmul.f32 %v3607_v38, %v15926_v1  ;;  %v14415_v31 = vpop.eup %14414 }
 0x9a0   :  { %v3608_v17 = vadd.f32 0.5, %v3606_v6  ;;  %v3612_v63 = vmul.f32 %v14413_v32, %v3584_v29  ;;  %v14417_v28 = vpop.eup %14416  ;;  %v3595_v4 = vmul.f32 0.5, %v14415_v31 }
 0x9a1   :  { %v16060_v59 = vadd.f32 %v3611_v47, %v3609_v42  ;;  %v3596_v1 = vmul.f32 0.5, %v14417_v28 }
 0x9a2   :  { %v3610_v18 = vmul.f32 %v3608_v17, %v15930_v19  ;;  %v3597_v57 = vadd.f32 0.5, %v3595_v4 }
 0x9a3   :  { %14418 = vtanh.f32 %v16060_v59  ;;  %v3598_v27 = vadd.f32 0.5, %v3596_v1 }
 0x9a4   :  { %v16064_v25 = vadd.f32 %v3612_v63, %v3610_v18 }
 0x9a6   :  { %14420 = vtanh.f32 %v16064_v25 }
 0x9ad   :  { %v14419_v61 = vpop.eup %14418 }
 0x9ae   :  { %v3617_v24 = vmul.f32 %v14419_v61, %v3597_v57 }
 0x9b0   :  { %v14421_v12 = vpop.eup %14420 }
 0x9b1   :  { %v3618_v38 = vmul.f32 %v14421_v12, %v3598_v27 }
 0x9b3   :  { %v16067_v5 = vpack.c.bf16 %v3618_v38, %v3617_v24 }
 0x9b5   :  { %3861 = vmatmul.mubr.bf16.vlgmr.msra.gmra.mrb[36].mxu0 %v16067_v5  ;;  %3904 = vmatmul.mubr.bf16.vlgmr.msra.gmra.mrb[52].mxu1 %v16067_v5 }
 0x9b6   :  { %4186 = vmatpush1.bf16.msra.mxu0 %v15816_v35  ;;  %4229 = vmatpush1.bf16.msra.mxu1 %v15821_v55 }
 0x9b7   :  { %4187 = vmatprep.subr.bf16.mxu0 %v15830_v56  ;;  %4230 = vmatprep.subr.bf16.mxu1 %v15835_v41 }
 0x9b8   :  { %4217 = vmatprep.mubr.bf16.mxu0 %v18293_v15  ;;  %4260 = vmatprep.mubr.bf16.mxu1 %v18293_v15 }
 0x9ba   :  { %4188 = vmatpush1.bf16.msra.mxu0 %v15840_v52  ;;  %4231 = vmatpush1.bf16.msra.mxu1 %v15845_v37 }
 0x9bb   :  { %4189 = vmatprep.subr.bf16.mxu0 %v15854_v54  ;;  %4232 = vmatprep.subr.bf16.mxu1 %v15859_v36 }
 0x9be   :  { %4190 = vmatpush1.bf16.msra.mxu0 %v15864_v34  ;;  %4233 = vmatpush1.bf16.msra.mxu1 %v15869_v50 }
 0x9bf   :  { %4191 = vmatprep.subr.bf16.mxu0 %v15956_v23  ;;  %4234 = vmatprep.subr.bf16.mxu1 %v15879_v40 }
 0x9c2   :  { %4192 = vmatpush1.bf16.msra.mxu0 %v15961_v7  ;;  %4235 = vmatpush1.bf16.msra.mxu1 %v15884_v39 }
 0x9c3   :  { %4193 = vmatprep.subr.bf16.mxu0 %v15968_v21  ;;  %4236 = vmatprep.subr.bf16.mxu1 %v15893_v60 }
 0x9c6   :  { %4194 = vmatpush1.bf16.msra.mxu0 %v15973_v22  ;;  %4237 = vmatpush1.bf16.msra.mxu1 %v15898_v33 }
 0x9c7   :  { %4195 = vmatprep.subr.bf16.mxu0 %v15980_v10  ;;  %4238 = vmatprep.subr.bf16.mxu1 %v15985_v62 }
 0x9ca   :  { %4196 = vmatpush1.bf16.msra.mxu0 %v15990_v0  ;;  %4239 = vmatpush1.bf16.msra.mxu1 %v15995_v11 }
 0x9cb   :  { %4197 = vmatprep.subr.bf16.mxu0 %v16004_v51  ;;  %4240 = vmatprep.subr.bf16.mxu1 %v16009_v8 }
 0x9ce   :  { %4198 = vmatpush1.bf16.msra.mxu0 %v16014_v26  ;;  %4241 = vmatpush1.bf16.msra.mxu1 %v16019_v48 }
 0x9cf   :  { %4199 = vmatprep.subr.bf16.mxu0 %v16033_v2  ;;  %4242 = vmatprep.subr.bf16.mxu1 %v16043_v58 }
 0x9d2   :  { %4200 = vmatpush1.bf16.msra.mxu0 %v16028_v16  ;;  %4243 = vmatpush1.bf16.msra.mxu1 %v16038_v30 }
 0x9d3   :  { %4542 = vmatprep.subr.bf16.mxu0 %v15806_v53  ;;  %4585 = vmatprep.subr.bf16.mxu1 %v15811_v3 }
 0xa88   :  { %v3862_v19 = vpop.f32.mrb[36].mxu0  ;;  %v3905_v47 = vpop.f32.mrb[52].mxu1 }
 0xa89   :  { %v13359_v42 = vadd.f32 %v3862_v19, %v15290_v13  ;;  %v3864_v29 = vpop.f32.mrb[37].mxu0  ;;  %v3907_v6 = vpop.f32.mrb[53].mxu1  ;;  %v13435_v3 = vadd.f32 %v3905_v47, %v15296_v20 }
 0xa8a   :  { %v13360_v32 = vadd.f32 %v3864_v29, %v14947_v14  ;;  %v3866_v17 = vpop.f32.mrb[38].mxu0  ;;  %v3909_v63 = vpop.f32.mrb[54].mxu1  ;;  %v13436_v12 = vadd.f32 %v3907_v6, %v15302_v9 }
 0xa8b   :  { %v3934_v18 = vmul.f32 0.5, %v13359_v42  ;;  %v13361_v31 = vadd.f32 %v3866_v17, %v15290_v13  ;;  %v3868_v28 = vpop.f32.mrb[39].mxu0  ;;  %v3911_v4 = vpop.f32.mrb[55].mxu1  ;;  %v13437_v27 = vadd.f32 %v3909_v63, %v15296_v20 }
 0xa8c   :  { %v3958_v1 = vmul.f32 0.5, %v13360_v32  ;;  %v13362_v53 = vadd.f32 %v3868_v28, %v14947_v14  ;;  %v13438_v24 = vadd.f32 %v3911_v4, %v15302_v9  ;;  %v3948_v29 = vmul.f32 0.5, %v13436_v12 }
 0xa8d   :  { %14422 = vtanh.f32 %v3934_v18  ;;  %v3935_v61 = vmul.f32 0.5, %v13361_v31 }
 0xa8e   :  { %14424 = vtanh.f32 %v3958_v1  ;;  %v3959_v57 = vmul.f32 0.5, %v13362_v53  ;;  %v3949_v17 = vmul.f32 0.5, %v13438_v24 }
 0xa8f   :  { %14426 = vtanh.f32 %v3935_v61 }
 0xa90   :  { %14428 = vtanh.f32 %v13435_v3 }
 0xa91   :  { %14430 = vtanh.f32 %v3959_v57 }
 0xa92   :  { %14432 = vtanh.f32 %v13437_v27 }
 0xa93   :  { %14434 = vtanh.f32 %v3948_v29 }
 0xa94   :  { %14436 = vtanh.f32 %v3949_v17 }
 0xa97   :  { %v14423_v38 = vpop.eup %14422 }
 0xa98   :  { %v14425_v19 = vpop.eup %14424  ;;  %v3938_v42 = vmul.f32 0.5, %v14423_v38 }
 0xa99   :  { %v3962_v32 = vmul.f32 0.5, %v14425_v19  ;;  %v14427_v47 = vpop.eup %14426 }
 0xa9a   :  { %v3940_v18 = vadd.f32 0.5, %v3938_v42  ;;  %v14429_v31 = vpop.eup %14428  ;;  %v3939_v1 = vmul.f32 0.5, %v14427_v47 }
 0xa9b   :  { %v3964_v28 = vadd.f32 0.5, %v3962_v32  ;;  %v14431_v53 = vpop.eup %14430 }
 0xa9c   :  { %v3968_v63 = vmul.f32 %v14429_v31, %v3940_v18  ;;  %v3941_v6 = vadd.f32 0.5, %v3939_v1  ;;  %v3963_v61 = vmul.f32 0.5, %v14431_v53  ;;  %v14433_v4 = vpop.eup %14432 }
 0xa9d   :  { %v3966_v3 = vmul.f32 %v3964_v28, %v16060_v59  ;;  %v14435_v19 = vpop.eup %14434 }
 0xa9e   :  { %v3965_v27 = vadd.f32 0.5, %v3963_v61  ;;  %v3969_v12 = vmul.f32 %v14433_v4, %v3941_v6  ;;  %v14437_v42 = vpop.eup %14436  ;;  %v3952_v29 = vmul.f32 0.5, %v14435_v19 }
 0xa9f   :  { %v16114_v57 = vadd.f32 %v3968_v63, %v3966_v3  ;;  %v3953_v59 = vmul.f32 0.5, %v14437_v42 }
 0xaa0   :  { %v3967_v24 = vmul.f32 %v3965_v27, %v16064_v25  ;;  %v3954_v47 = vadd.f32 0.5, %v3952_v29 }
 0xaa1   :  { %14438 = vtanh.f32 %v16114_v57  ;;  %v3955_v17 = vadd.f32 0.5, %v3953_v59 }
 0xaa2   :  { %v16118_v38 = vadd.f32 %v3969_v12, %v3967_v24 }
 0xaa4   :  { %14440 = vtanh.f32 %v16118_v38 }
 0xaab   :  { %v14439_v32 = vpop.eup %14438 }
 0xaac   :  { %v3974_v31 = vmul.f32 %v14439_v32, %v3954_v47 }
 0xaae   :  { %v14441_v18 = vpop.eup %14440 }
 0xaaf   :  { %v3975_v28 = vmul.f32 %v14441_v18, %v3955_v17 }
 0xab1   :  { %v16121_v1 = vpack.c.bf16 %v3975_v28, %v3974_v31 }
 0xab3   :  { %4218 = vmatmul.mubr.bf16.vlgmr.msra.gmra.mrb[40].mxu0 %v16121_v1  ;;  %4261 = vmatmul.mubr.bf16.vlgmr.msra.gmra.mrb[56].mxu1 %v16121_v1 }
 0xab4   :  { %4543 = vmatpush1.bf16.msra.mxu0 %v15816_v35  ;;  %4586 = vmatpush1.bf16.msra.mxu1 %v15821_v55 }
 0xab5   :  { %4544 = vmatprep.subr.bf16.mxu0 %v15830_v56  ;;  %4587 = vmatprep.subr.bf16.mxu1 %v15835_v41 }
 0xab6   :  { %4574 = vmatprep.mubr.bf16.mxu0 %v18293_v15  ;;  %4617 = vmatprep.mubr.bf16.mxu1 %v18293_v15 }
 0xab8   :  { %4545 = vmatpush1.bf16.msra.mxu0 %v15840_v52  ;;  %4588 = vmatpush1.bf16.msra.mxu1 %v15845_v37 }
 0xab9   :  { %4546 = vmatprep.subr.bf16.mxu0 %v15854_v54  ;;  %4589 = vmatprep.subr.bf16.mxu1 %v15859_v36 }
 0xabc   :  { %4547 = vmatpush1.bf16.msra.mxu0 %v15864_v34  ;;  %4590 = vmatpush1.bf16.msra.mxu1 %v15869_v50 }
 0xabd   :  { %4548 = vmatprep.subr.bf16.mxu0 %v15956_v23  ;;  %4591 = vmatprep.subr.bf16.mxu1 %v15879_v40 }
 0xac0   :  { %4549 = vmatpush1.bf16.msra.mxu0 %v15961_v7  ;;  %4592 = vmatpush1.bf16.msra.mxu1 %v15884_v39 }
 0xac1   :  { %4550 = vmatprep.subr.bf16.mxu0 %v15968_v21  ;;  %4593 = vmatprep.subr.bf16.mxu1 %v15893_v60 }
 0xac4   :  { %4551 = vmatpush1.bf16.msra.mxu0 %v15973_v22  ;;  %4594 = vmatpush1.bf16.msra.mxu1 %v15898_v33 }
 0xac5   :  { %4552 = vmatprep.subr.bf16.mxu0 %v15980_v10  ;;  %4595 = vmatprep.subr.bf16.mxu1 %v15985_v62 }
 0xac8   :  { %4553 = vmatpush1.bf16.msra.mxu0 %v15990_v0  ;;  %4596 = vmatpush1.bf16.msra.mxu1 %v15995_v11 }
 0xac9   :  { %4554 = vmatprep.subr.bf16.mxu0 %v16004_v51  ;;  %4597 = vmatprep.subr.bf16.mxu1 %v16009_v8 }
 0xacc   :  { %4555 = vmatpush1.bf16.msra.mxu0 %v16014_v26  ;;  %4598 = vmatpush1.bf16.msra.mxu1 %v16019_v48 }
 0xacd   :  { %4556 = vmatprep.subr.bf16.mxu0 %v16033_v2  ;;  %4599 = vmatprep.subr.bf16.mxu1 %v16043_v58 }
 0xad0   :  { %4557 = vmatpush1.bf16.msra.mxu0 %v16028_v16  ;;  %4600 = vmatpush1.bf16.msra.mxu1 %v16038_v30 }
 0xb86   :  { %v4219_v35 = vpop.f32.mrb[40].mxu0  ;;  %v4262_v55 = vpop.f32.mrb[56].mxu1 }
 0xb87   :  { %v13363_v56 = vadd.f32 %v4219_v35, %v15290_v13  ;;  %v4221_v41 = vpop.f32.mrb[41].mxu0  ;;  %v4264_v52 = vpop.f32.mrb[57].mxu1  ;;  %v13439_v25 = vadd.f32 %v4262_v55, %v15296_v20 }
 0xb88   :  { %v13364_v37 = vadd.f32 %v4221_v41, %v14947_v14  ;;  %v4223_v54 = vpop.f32.mrb[42].mxu0  ;;  %v4266_v36 = vpop.f32.mrb[58].mxu1  ;;  %v13440_v6 = vadd.f32 %v4264_v52, %v15302_v9 }
 0xb89   :  { %v4291_v34 = vmul.f32 0.5, %v13363_v56  ;;  %v13365_v50 = vadd.f32 %v4223_v54, %v15290_v13  ;;  %v4225_v40 = vpop.f32.mrb[43].mxu0  ;;  %v4268_v39 = vpop.f32.mrb[59].mxu1  ;;  %v13441_v3 = vadd.f32 %v4266_v36, %v15296_v20 }
 0xb8a   :  { %v4315_v60 = vmul.f32 0.5, %v13364_v37  ;;  %v13366_v33 = vadd.f32 %v4225_v40, %v14947_v14  ;;  %v13442_v61 = vadd.f32 %v4268_v39, %v15302_v9  ;;  %v4305_v24 = vmul.f32 0.5, %v13440_v6  ;;  %v16187_v6 = vld [vmem:[%s18238_s2 + $0xc] ss:$16 sps:$4 sm:$0xff]  }
 0xb8b   :  { %14442 = vtanh.f32 %v4291_v34  ;;  %v4292_v53 = vmul.f32 0.5, %v13365_v50  ;;  %4942 = vmatprep.subr.bf16.mxu1 %v16187_v6 }
 0xb8c   :  { %14444 = vtanh.f32 %v4315_v60  ;;  %v4316_v63 = vmul.f32 0.5, %v13366_v33  ;;  %v4306_v42 = vmul.f32 0.5, %v13442_v61  ;;  %v16192_v61 = vld [vmem:[%s18238_s2] ss:$16 sps:$4 sm:$0xff]  }
 0xb8d   :  { %14446 = vtanh.f32 %v4292_v53 }
 0xb8e   :  { %14448 = vtanh.f32 %v13439_v25 }
 0xb8f   :  { %14450 = vtanh.f32 %v4316_v63 }
 0xb90   :  { %14452 = vtanh.f32 %v13441_v3 }
 0xb91   :  { %14454 = vtanh.f32 %v4305_v24  ;;  %v16216_v24 = vld [vmem:[%s18238_s2 + $0x20] ss:$16 sps:$4 sm:$0xff]  }
 0xb92   :  { %14456 = vtanh.f32 %v4306_v42  ;;  %v16230_v42 = vld [vmem:[%s18238_s2 + $0x44] ss:$16 sps:$4 sm:$0xff]  }
 0xb95   :  { %v14443_v4 = vpop.eup %14442 }
 0xb96   :  { %v14445_v27 = vpop.eup %14444  ;;  %v4295_v12 = vmul.f32 0.5, %v14443_v4  ;;  %v16197_v4 = vld [vmem:[%s18238_s2 + $0x8] ss:$16 sps:$4 sm:$0xff]  }
 0xb97   :  { %v4319_v19 = vmul.f32 0.5, %v14445_v27  ;;  %v14447_v29 = vpop.eup %14446  ;;  %v16206_v27 = vld [vmem:[%s18238_s2 + $0x24] ss:$16 sps:$4 sm:$0xff]  }
 0xb98   :  { %v4297_v59 = vadd.f32 0.5, %v4295_v12  ;;  %v14449_v32 = vpop.eup %14448  ;;  %v4296_v17 = vmul.f32 0.5, %v14447_v29  ;;  %v16211_v12 = vld [vmem:[%s18238_s2 + $0x2c] ss:$16 sps:$4 sm:$0xff]  }
 0xb99   :  { %v4321_v47 = vadd.f32 0.5, %v4319_v19  ;;  %v14451_v18 = vpop.eup %14450  ;;  %v16221_v19 = vld [vmem:[%s18238_s2 + $0x28] ss:$16 sps:$4 sm:$0xff]   ;;  %v16235_v29 = vld [vmem:[%s18238_s2 + $0x4c] ss:$16 sps:$4 sm:$0xff]  }
 0xb9a   :  { %v4325_v31 = vmul.f32 %v14449_v32, %v4297_v59  ;;  %v4298_v35 = vadd.f32 0.5, %v4296_v17  ;;  %v4320_v55 = vmul.f32 0.5, %v14451_v18  ;;  %v14453_v56 = vpop.eup %14452  ;;  %v16240_v59 = vld [vmem:[%s18238_s2 + $0x40] ss:$16 sps:$4 sm:$0xff]   ;;  %v16245_v32 = vld [vmem:[%s18238_s2 + $0x48] ss:$16 sps:$4 sm:$0xff]  }
 0xb9b   :  { %v4323_v28 = vmul.f32 %v4321_v47, %v16114_v57  ;;  %v14455_v34 = vpop.eup %14454  ;;  %v16255_v47 = vld [vmem:[%s18238_s2 + $0x6c] ss:$16 sps:$4 sm:$0xff]   ;;  %v16260_v17 = vld [vmem:[%s18238_s2 + $0x68] ss:$16 sps:$4 sm:$0xff]  }
 0xb9c   :  { %v4322_v52 = vadd.f32 0.5, %v4320_v55  ;;  %v4326_v37 = vmul.f32 %v14453_v56, %v4298_v35  ;;  %v14457_v50 = vpop.eup %14456  ;;  %v4309_v40 = vmul.f32 0.5, %v14455_v34  ;;  %v16274_v18 = vld [vmem:[%s18238_s2 + $0x88] ss:$16 sps:$4 sm:$0xff]  }
 0xb9d   :  { %v16166_v41 = vadd.f32 %v4325_v31, %v4323_v28  ;;  %v4310_v57 = vmul.f32 0.5, %v14457_v50 }
 0xb9e   :  { %v4324_v54 = vmul.f32 %v4322_v52, %v16118_v38  ;;  %v4311_v60 = vadd.f32 0.5, %v4309_v40  ;;  %v16182_v38 = vld [vmem:[%s18238_s2 + $0x4] ss:$16 sps:$4 sm:$0xff]  }
 0xb9f   :  { %14458 = vtanh.f32 %v16166_v41  ;;  %v4312_v33 = vadd.f32 0.5, %v4310_v57  ;;  %4899 = vmatprep.subr.bf16.mxu0 %v16182_v38 }
 0xba0   :  { %v16170_v36 = vadd.f32 %v4326_v37, %v4324_v54 }
 0xba2   :  { %14460 = vtanh.f32 %v16170_v36 }
 0xba9   :  { %v14459_v39 = vpop.eup %14458 }
 0xbaa   :  { %v4331_v53 = vmul.f32 %v14459_v39, %v4311_v60 }
 0xbac   :  { %v14461_v25 = vpop.eup %14460 }
 0xbad   :  { %v4332_v63 = vmul.f32 %v14461_v25, %v4312_v33 }
 0xbaf   :  { %v16173_v3 = vpack.c.bf16 %v4332_v63, %v4331_v53 }
 0xbb1   :  { %18301 = vst [vmem:[#allocation26_spill] sm:$0xff] %v16173_v3  ;;  %4575 = vmatmul.mubr.bf16.vlgmr.msra.gmra.mrb[44].mxu0 %v16173_v3  ;;  %4618 = vmatmul.mubr.bf16.vlgmr.msra.gmra.mrb[60].mxu1 %v16173_v3 }
 0xbb2   :  { %4931 = vmatprep.mubr.bf16.mxu0 %v18293_v15  ;;  %4974 = vmatprep.mubr.bf16.mxu1 %v18293_v15 }
 0xbb3   :  { %4900 = vmatpush1.bf16.msra.mxu0 %v16192_v61  ;;  %4943 = vmatpush1.bf16.msra.mxu1 %v16197_v4 }
 0xbb4   :  { %4901 = vmatprep.subr.bf16.mxu0 %v16206_v27  ;;  %4944 = vmatprep.subr.bf16.mxu1 %v16211_v12 }
 0xbb7   :  { %4902 = vmatpush1.bf16.msra.mxu0 %v16216_v24  ;;  %4945 = vmatpush1.bf16.msra.mxu1 %v16221_v19 }
 0xbb8   :  { %4903 = vmatprep.subr.bf16.mxu0 %v16230_v42  ;;  %4946 = vmatprep.subr.bf16.mxu1 %v16235_v29 }
 0xbbb   :  { %4904 = vmatpush1.bf16.msra.mxu0 %v16240_v59  ;;  %4947 = vmatpush1.bf16.msra.mxu1 %v16245_v32 }
 0xbbc   :  { %4905 = vmatprep.subr.bf16.mxu0 %v15956_v23  ;;  %4948 = vmatprep.subr.bf16.mxu1 %v16255_v47  ;;  %v16269_v23 = vld [vmem:[%s18238_s2 + $0x8c] ss:$16 sps:$4 sm:$0xff]  }
 0xbbf   :  { %4906 = vmatpush1.bf16.msra.mxu0 %v15961_v7  ;;  %4949 = vmatpush1.bf16.msra.mxu1 %v16260_v17 }
 0xbc0   :  { %4907 = vmatprep.subr.bf16.mxu0 %v15968_v21  ;;  %4950 = vmatprep.subr.bf16.mxu1 %v16269_v23 }
 0xbc3   :  { %4908 = vmatpush1.bf16.msra.mxu0 %v15973_v22  ;;  %4951 = vmatpush1.bf16.msra.mxu1 %v16274_v18 }
 0xbc4   :  { %4909 = vmatprep.subr.bf16.mxu0 %v15980_v10  ;;  %4952 = vmatprep.subr.bf16.mxu1 %v15985_v62 }
 0xbc7   :  { %4910 = vmatpush1.bf16.msra.mxu0 %v15990_v0  ;;  %4953 = vmatpush1.bf16.msra.mxu1 %v15995_v11 }
 0xbc8   :  { %4911 = vmatprep.subr.bf16.mxu0 %v16004_v51  ;;  %4954 = vmatprep.subr.bf16.mxu1 %v16009_v8 }
 0xbcb   :  { %4912 = vmatpush1.bf16.msra.mxu0 %v16014_v26  ;;  %4955 = vmatpush1.bf16.msra.mxu1 %v16019_v48 }
 0xbcc   :  { %4913 = vmatprep.subr.bf16.mxu0 %v16033_v2  ;;  %4956 = vmatprep.subr.bf16.mxu1 %v16043_v58 }
 0xbcf   :  { %4914 = vmatpush1.bf16.msra.mxu0 %v16028_v16  ;;  %4957 = vmatpush1.bf16.msra.mxu1 %v16038_v30 }
 0xbd0   :  { %5256 = vmatprep.subr.bf16.mxu0 %v16182_v38  ;;  %5299 = vmatprep.subr.bf16.mxu1 %v16187_v6 }
 0xc84   :  { %v4576_v7 = vpop.f32.mrb[44].mxu0  ;;  %v4619_v21 = vpop.f32.mrb[60].mxu1 }
 0xc85   :  { %v13367_v22 = vadd.f32 %v4576_v7, %v15290_v13  ;;  %v4578_v10 = vpop.f32.mrb[45].mxu0  ;;  %v4621_v62 = vpop.f32.mrb[61].mxu1  ;;  %v13443_v58 = vadd.f32 %v4619_v21, %v15296_v20 }
 0xc86   :  { %v13368_v0 = vadd.f32 %v4578_v10, %v14947_v14  ;;  %v4580_v11 = vpop.f32.mrb[46].mxu0  ;;  %v4623_v51 = vpop.f32.mrb[62].mxu1  ;;  %v13444_v55 = vadd.f32 %v4621_v62, %v15302_v9 }
 0xc87   :  { %v4648_v8 = vmul.f32 0.5, %v13367_v22  ;;  %v13369_v26 = vadd.f32 %v4580_v11, %v15290_v13  ;;  %v4582_v48 = vpop.f32.mrb[47].mxu0  ;;  %v4625_v16 = vpop.f32.mrb[63].mxu1  ;;  %v13445_v35 = vadd.f32 %v4623_v51, %v15296_v20 }
 0xc88   :  { %v4672_v2 = vmul.f32 0.5, %v13368_v0  ;;  %v13370_v30 = vadd.f32 %v4582_v48, %v14947_v14  ;;  %v13446_v56 = vadd.f32 %v4625_v16, %v15302_v9  ;;  %v4662_v34 = vmul.f32 0.5, %v13444_v55 }
 0xc89   :  { %14462 = vtanh.f32 %v4648_v8  ;;  %v4649_v31 = vmul.f32 0.5, %v13369_v26 }
 0xc8a   :  { %14464 = vtanh.f32 %v4672_v2  ;;  %v4673_v28 = vmul.f32 0.5, %v13370_v30  ;;  %v4663_v40 = vmul.f32 0.5, %v13446_v56  ;;  %v16337_v56 = vld [vmem:[%s18238_s2 + $0x60] ss:$16 sps:$4 sm:$0xff]  }
 0xc8b   :  { %14466 = vtanh.f32 %v4649_v31 }
 0xc8c   :  { %14468 = vtanh.f32 %v13443_v58 }
 0xc8d   :  { %14470 = vtanh.f32 %v4673_v28 }
 0xc8e   :  { %14472 = vtanh.f32 %v13445_v35 }
 0xc8f   :  { %14474 = vtanh.f32 %v4662_v34  ;;  %v16361_v34 = vld [vmem:[%s18238_s2 + $0xac] ss:$16 sps:$4 sm:$0xff]  }
 0xc90   :  { %14476 = vtanh.f32 %v4663_v40  ;;  %v16371_v40 = vld [vmem:[%s18238_s2 + $0xa8] ss:$16 sps:$4 sm:$0xff]  }
 0xc93   :  { %v14463_v52 = vpop.eup %14462 }
 0xc94   :  { %v14465_v37 = vpop.eup %14464  ;;  %v4652_v54 = vmul.f32 0.5, %v14463_v52  ;;  %v16344_v52 = vld [vmem:[%s18238_s2 + $0x84] ss:$16 sps:$4 sm:$0xff]  }
 0xc95   :  { %v4676_v50 = vmul.f32 0.5, %v14465_v37  ;;  %v14467_v57 = vpop.eup %14466  ;;  %v16349_v37 = vld [vmem:[%s18238_s2 + $0x80] ss:$16 sps:$4 sm:$0xff]  }
 0xc96   :  { %v4654_v39 = vadd.f32 0.5, %v4652_v54  ;;  %v14469_v60 = vpop.eup %14468  ;;  %v4653_v25 = vmul.f32 0.5, %v14467_v57  ;;  %v16356_v54 = vld [vmem:[%s18238_s2 + $0xa4] ss:$16 sps:$4 sm:$0xff]  }
 0xc97   :  { %v4678_v33 = vadd.f32 0.5, %v4676_v50  ;;  %v14471_v53 = vpop.eup %14470  ;;  %v16366_v50 = vld [vmem:[%s18238_s2 + $0xa0] ss:$16 sps:$4 sm:$0xff]   ;;  %v16380_v57 = vld [vmem:[%s18238_s2 + $0xc4] ss:$16 sps:$4 sm:$0xff]  }
 0xc98   :  { %v4682_v63 = vmul.f32 %v14469_v60, %v4654_v39  ;;  %v4655_v21 = vadd.f32 0.5, %v4653_v25  ;;  %v4677_v22 = vmul.f32 0.5, %v14471_v53  ;;  %v14473_v10 = vpop.eup %14472  ;;  %v16385_v39 = vld [vmem:[%s18238_s2 + $0xcc] ss:$16 sps:$4 sm:$0xff]   ;;  %v16390_v60 = vld [vmem:[%s18238_s2 + $0xc0] ss:$16 sps:$4 sm:$0xff]  }
 0xc99   :  { %v4680_v7 = vmul.f32 %v4678_v33, %v16166_v41  ;;  %v14475_v26 = vpop.eup %14474  ;;  %v16395_v33 = vld [vmem:[%s18238_s2 + $0xc8] ss:$16 sps:$4 sm:$0xff]   ;;  %v16404_v25 = vld [vmem:[%s18238_s2 + $0xe0] ss:$16 sps:$4 sm:$0xff]   ;;  %v16409_v53 = vld [vmem:[%s18238_s2 + $0xe4] ss:$16 sps:$4 sm:$0xff]  }
 0xc9a   :  { %v4679_v0 = vadd.f32 0.5, %v4677_v22  ;;  %v4683_v11 = vmul.f32 %v14473_v10, %v4655_v21  ;;  %v14477_v48 = vpop.eup %14476  ;;  %v4666_v16 = vmul.f32 0.5, %v14475_v26  ;;  %v375_v21 = vadd.f32 %v15253_v43, %v15290_v13 }
 0xc9b   :  { %v16302_v62 = vadd.f32 %v4682_v63, %v4680_v7  ;;  %v4667_v41 = vmul.f32 0.5, %v14477_v48  ;;  %v16414_v63 = vld [vmem:[%s18238_s2 + $0xe8] ss:$16 sps:$4 sm:$0xff]   ;;  %v16419_v7 = vld [vmem:[%s18238_s2 + $0xec] ss:$16 sps:$4 sm:$0xff]   ;;  %v377_v22 = vadd.f32 %v15255_v44, %v14947_v14 }
 0xc9c   :  { %v4681_v51 = vmul.f32 %v4679_v0, %v16170_v36  ;;  %v4668_v30 = vadd.f32 0.5, %v4666_v16  ;;  %v16332_v36 = vld [vmem:[%s18238_s2 + $0x64] ss:$16 sps:$4 sm:$0xff]   ;;  %v381_v16 = vadd.f32 %v15259_v46, %v14947_v14 }
 0xc9d   :  { %14478 = vtanh.f32 %v16302_v62  ;;  %v4669_v58 = vadd.f32 0.5, %v4667_v41 }
 0xc9e   :  { %v16306_v8 = vadd.f32 %v4683_v11, %v4681_v51  ;;  %v379_v11 = vadd.f32 %v15257_v45, %v15290_v13 }
 0xca0   :  { %14480 = vtanh.f32 %v16306_v8 }
 0xca7   :  { %v14479_v2 = vpop.eup %14478 }
 0xca8   :  { %v4688_v28 = vmul.f32 %v14479_v2, %v4668_v30 }
 0xcaa   :  { %v14481_v31 = vpop.eup %14480 }
 0xcab   :  { %v4689_v35 = vmul.f32 %v14481_v31, %v4669_v58 }
 0xcad   :  { %v16309_v55 = vpack.c.bf16 %v4689_v35, %v4688_v28 }
 0xcaf   :  { %18302 = vst [vmem:[#allocation27_spill] sm:$0xff] %v16309_v55  ;;  %4932 = vmatmul.mubr.bf16.vlgmr.msra.gmra.mrb[48].mxu0 %v16309_v55  ;;  %4975 = vmatmul.mubr.bf16.vlgmr.msra.gmra.mrb[64].mxu1 %v16309_v55 }
 0xcb0   :  { %5257 = vmatpush1.bf16.msra.mxu0 %v16192_v61  ;;  %5300 = vmatpush1.bf16.msra.mxu1 %v16197_v4 }
 0xcb1   :  { %5258 = vmatprep.subr.bf16.mxu0 %v16206_v27  ;;  %5301 = vmatprep.subr.bf16.mxu1 %v16211_v12 }
 0xcb2   :  { %5288 = vmatprep.mubr.bf16.mxu0 %v18293_v15  ;;  %5331 = vmatprep.mubr.bf16.mxu1 %v18293_v15 }
 0xcb4   :  { %5259 = vmatpush1.bf16.msra.mxu0 %v16216_v24  ;;  %5302 = vmatpush1.bf16.msra.mxu1 %v16221_v19 }
 0xcb5   :  { %5260 = vmatprep.subr.bf16.mxu0 %v16230_v42  ;;  %5303 = vmatprep.subr.bf16.mxu1 %v16235_v29 }
 0xcb8   :  { %5261 = vmatpush1.bf16.msra.mxu0 %v16240_v59  ;;  %5304 = vmatpush1.bf16.msra.mxu1 %v16245_v32 }
 0xcb9   :  { %5305 = vmatprep.subr.bf16.mxu1 %v16255_v47  ;;  %5262 = vmatprep.subr.bf16.mxu0 %v16332_v36 }
 0xcbc   :  { %5306 = vmatpush1.bf16.msra.mxu1 %v16260_v17  ;;  %5263 = vmatpush1.bf16.msra.mxu0 %v16337_v56 }
 0xcbd   :  { %5307 = vmatprep.subr.bf16.mxu1 %v16269_v23  ;;  %5264 = vmatprep.subr.bf16.mxu0 %v16344_v52 }
 0xcc0   :  { %5308 = vmatpush1.bf16.msra.mxu1 %v16274_v18  ;;  %5265 = vmatpush1.bf16.msra.mxu0 %v16349_v37 }
 0xcc1   :  { %5266 = vmatprep.subr.bf16.mxu0 %v16356_v54  ;;  %5309 = vmatprep.subr.bf16.mxu1 %v16361_v34 }
 0xcc4   :  { %5267 = vmatpush1.bf16.msra.mxu0 %v16366_v50  ;;  %5310 = vmatpush1.bf16.msra.mxu1 %v16371_v40 }
 0xcc5   :  { %5268 = vmatprep.subr.bf16.mxu0 %v16380_v57  ;;  %5311 = vmatprep.subr.bf16.mxu1 %v16385_v39 }
 0xcc8   :  { %5269 = vmatpush1.bf16.msra.mxu0 %v16390_v60  ;;  %5312 = vmatpush1.bf16.msra.mxu1 %v16395_v33 }
 0xcc9   :  { %5270 = vmatprep.subr.bf16.mxu0 %v16409_v53  ;;  %5313 = vmatprep.subr.bf16.mxu1 %v16419_v7 }
 0xccc   :  { %5271 = vmatpush1.bf16.msra.mxu0 %v16404_v25  ;;  %5314 = vmatpush1.bf16.msra.mxu1 %v16414_v63 }
 0xccd   :  { %5613 = vmatprep.subr.bf16.mxu0 %v16182_v38  ;;  %5656 = vmatprep.subr.bf16.mxu1 %v16187_v6 }
 0xd82   :  { %v4933_v10 = vpop.f32.mrb[48].mxu0  ;;  %v4976_v0 = vpop.f32.mrb[64].mxu1 }
 0xd83   :  { %v4985_v51 = vadd.f32 %v4933_v10, %v375_v21  ;;  %v4935_v26 = vpop.f32.mrb[49].mxu0  ;;  %v4978_v48 = vpop.f32.mrb[65].mxu1  ;;  %v13447_v55 = vadd.f32 %v4976_v0, %v15296_v20 }
 0xd84   :  { %v4986_v41 = vadd.f32 %v4935_v26, %v377_v22  ;;  %v4937_v2 = vpop.f32.mrb[50].mxu0  ;;  %v4980_v30 = vpop.f32.mrb[66].mxu1  ;;  %v13448_v46 = vadd.f32 %v4978_v48, %v15302_v9 }
 0xd85   :  { %v5005_v58 = vmul.f32 0.5, %v4985_v51  ;;  %v4989_v31 = vadd.f32 %v4937_v2, %v379_v11  ;;  %v4939_v43 = vpop.f32.mrb[51].mxu0  ;;  %v4982_v28 = vpop.f32.mrb[67].mxu1  ;;  %v13449_v21 = vadd.f32 %v4980_v30, %v15296_v20 }
 0xd86   :  { %v5029_v35 = vmul.f32 0.5, %v4986_v41  ;;  %v4990_v44 = vadd.f32 %v4939_v43, %v381_v16  ;;  %v13450_v22 = vadd.f32 %v4982_v28, %v15302_v9  ;;  %v5019_v26 = vmul.f32 0.5, %v13448_v46 }
 0xd87   :  { %14482 = vtanh.f32 %v5005_v58  ;;  %v5006_v3 = vmul.f32 0.5, %v4989_v31 }
 0xd88   :  { %14484 = vtanh.f32 %v5029_v35  ;;  %v5030_v45 = vmul.f32 0.5, %v4990_v44  ;;  %v5020_v41 = vmul.f32 0.5, %v13450_v22 }
 0xd89   :  { %14486 = vtanh.f32 %v5006_v3 }
 0xd8a   :  { %14488 = vtanh.f32 %v13447_v55 }
 0xd8b   :  { %14490 = vtanh.f32 %v5030_v45 }
 0xd8c   :  { %14492 = vtanh.f32 %v13449_v21 }
 0xd8d   :  { %14494 = vtanh.f32 %v5019_v26 }
 0xd8e   :  { %14496 = vtanh.f32 %v5020_v41 }
 0xd91   :  { %v14483_v10 = vpop.eup %14482 }
 0xd92   :  { %v14485_v11 = vpop.eup %14484  ;;  %v5009_v51 = vmul.f32 0.5, %v14483_v10 }
 0xd93   :  { %v5033_v16 = vmul.f32 0.5, %v14485_v11  ;;  %v14487_v0 = vpop.eup %14486 }
 0xd94   :  { %v5011_v2 = vadd.f32 0.5, %v5009_v51  ;;  %v14489_v58 = vpop.eup %14488  ;;  %v5010_v3 = vmul.f32 0.5, %v14487_v0 }
 0xd95   :  { %v5035_v31 = vadd.f32 0.5, %v5033_v16  ;;  %v14491_v43 = vpop.eup %14490 }
 0xd96   :  { %v5039_v30 = vmul.f32 %v14489_v58, %v5011_v2  ;;  %v5012_v48 = vadd.f32 0.5, %v5010_v3  ;;  %v5034_v35 = vmul.f32 0.5, %v14491_v43  ;;  %v14493_v28 = vpop.eup %14492  ;;  %v18303_v3 = vld [vmem:[#allocation7_spill] sm:$0xff] }
 0xd97   :  { %v5037_v55 = vmul.f32 %v5035_v31, %v16302_v62  ;;  %v14495_v10 = vpop.eup %14494  ;;  %v387_v43 = vadd.f32 %v18303_v3, %v14947_v14 }
 0xd98   :  { %v5036_v45 = vadd.f32 0.5, %v5034_v35  ;;  %v5040_v21 = vmul.f32 %v14493_v28, %v5012_v48  ;;  %v14497_v11 = vpop.eup %14496  ;;  %v5023_v51 = vmul.f32 0.5, %v14495_v10  ;;  %v18304_v48 = vld [vmem:[#allocation8_spill] sm:$0xff] }
 0xd99   :  { %v16440_v44 = vadd.f32 %v5039_v30, %v5037_v55  ;;  %v5024_v62 = vmul.f32 0.5, %v14497_v11  ;;  %v389_v35 = vadd.f32 %v18304_v48, %v15290_v13 }
 0xd9a   :  { %v5038_v46 = vmul.f32 %v5036_v45, %v16306_v8  ;;  %v5025_v16 = vadd.f32 0.5, %v5023_v51  ;;  %v385_v8 = vadd.f32 %v15261_v49, %v15290_v13 }
 0xd9b   :  { %14498 = vtanh.f32 %v16440_v44  ;;  %v5026_v41 = vadd.f32 0.5, %v5024_v62 }
 0xd9c   :  { %v16444_v22 = vadd.f32 %v5040_v21, %v5038_v46  ;;  %v18305_v46 = vld [vmem:[#allocation9_spill] sm:$0xff] }
 0xd9d   :  { %v391_v10 = vadd.f32 %v18305_v46, %v14947_v14 }
 0xd9e   :  { %14500 = vtanh.f32 %v16444_v22 }
 0xda5   :  { %v14499_v26 = vpop.eup %14498 }
 0xda6   :  { %v5045_v2 = vmul.f32 %v14499_v26, %v5025_v16 }
 0xda8   :  { %v14501_v0 = vpop.eup %14500 }
 0xda9   :  { %v5046_v58 = vmul.f32 %v14501_v0, %v5026_v41 }
 0xdab   :  { %v16447_v31 = vpack.c.bf16 %v5046_v58, %v5045_v2 }
 0xdad   :  { %5289 = vmatmul.mubr.bf16.vlgmr.msra.gmra.mrb[52].mxu0 %v16447_v31  ;;  %5332 = vmatmul.mubr.bf16.vlgmr.msra.gmra.mrb[68].mxu1 %v16447_v31 }
 0xdae   :  { %5614 = vmatpush1.bf16.msra.mxu0 %v16192_v61  ;;  %5657 = vmatpush1.bf16.msra.mxu1 %v16197_v4 }
 0xdaf   :  { %5615 = vmatprep.subr.bf16.mxu0 %v16206_v27  ;;  %5658 = vmatprep.subr.bf16.mxu1 %v16211_v12 }
 0xdb0   :  { %5645 = vmatprep.mubr.bf16.mxu0 %v18293_v15  ;;  %5688 = vmatprep.mubr.bf16.mxu1 %v18293_v15 }
 0xdb2   :  { %5616 = vmatpush1.bf16.msra.mxu0 %v16216_v24  ;;  %5659 = vmatpush1.bf16.msra.mxu1 %v16221_v19 }
 0xdb3   :  { %5617 = vmatprep.subr.bf16.mxu0 %v16230_v42  ;;  %5660 = vmatprep.subr.bf16.mxu1 %v16235_v29 }
 0xdb6   :  { %5618 = vmatpush1.bf16.msra.mxu0 %v16240_v59  ;;  %5661 = vmatpush1.bf16.msra.mxu1 %v16245_v32 }
 0xdb7   :  { %5619 = vmatprep.subr.bf16.mxu0 %v16332_v36  ;;  %5662 = vmatprep.subr.bf16.mxu1 %v16255_v47 }
 0xdba   :  { %5620 = vmatpush1.bf16.msra.mxu0 %v16337_v56  ;;  %5663 = vmatpush1.bf16.msra.mxu1 %v16260_v17 }
 0xdbb   :  { %5621 = vmatprep.subr.bf16.mxu0 %v16344_v52  ;;  %5664 = vmatprep.subr.bf16.mxu1 %v16269_v23 }
 0xdbe   :  { %5622 = vmatpush1.bf16.msra.mxu0 %v16349_v37  ;;  %5665 = vmatpush1.bf16.msra.mxu1 %v16274_v18 }
 0xdbf   :  { %5623 = vmatprep.subr.bf16.mxu0 %v16356_v54  ;;  %5666 = vmatprep.subr.bf16.mxu1 %v16361_v34 }
 0xdc2   :  { %5624 = vmatpush1.bf16.msra.mxu0 %v16366_v50  ;;  %5667 = vmatpush1.bf16.msra.mxu1 %v16371_v40 }
 0xdc3   :  { %5625 = vmatprep.subr.bf16.mxu0 %v16380_v57  ;;  %5668 = vmatprep.subr.bf16.mxu1 %v16385_v39 }
 0xdc6   :  { %5626 = vmatpush1.bf16.msra.mxu0 %v16390_v60  ;;  %5669 = vmatpush1.bf16.msra.mxu1 %v16395_v33 }
 0xdc7   :  { %5627 = vmatprep.subr.bf16.mxu0 %v16409_v53  ;;  %5670 = vmatprep.subr.bf16.mxu1 %v16419_v7 }
 0xdca   :  { %5628 = vmatpush1.bf16.msra.mxu0 %v16404_v25  ;;  %5671 = vmatpush1.bf16.msra.mxu1 %v16414_v63 }
 0xdcb   :  { %5970 = vmatprep.subr.bf16.mxu0 %v16182_v38  ;;  %6013 = vmatprep.subr.bf16.mxu1 %v16187_v6 }
 0xe80   :  { %v5290_v30 = vpop.f32.mrb[52].mxu0  ;;  %v5333_v55 = vpop.f32.mrb[68].mxu1 }
 0xe81   :  { %v5342_v28 = vadd.f32 %v5290_v30, %v385_v8  ;;  %v5292_v45 = vpop.f32.mrb[53].mxu0  ;;  %v5335_v21 = vpop.f32.mrb[69].mxu1  ;;  %v13451_v0 = vadd.f32 %v5333_v55, %v15296_v20 }
 0xe82   :  { %v5343_v38 = vadd.f32 %v5292_v45, %v387_v43  ;;  %v5294_v11 = vpop.f32.mrb[54].mxu0  ;;  %v5337_v6 = vpop.f32.mrb[70].mxu1  ;;  %v13452_v3 = vadd.f32 %v5335_v21, %v15302_v9 }
 0xe83   :  { %v5362_v51 = vmul.f32 0.5, %v5342_v28  ;;  %v5346_v62 = vadd.f32 %v5294_v11, %v389_v35  ;;  %v5296_v49 = vpop.f32.mrb[55].mxu0  ;;  %v5339_v26 = vpop.f32.mrb[71].mxu1  ;;  %v13453_v8 = vadd.f32 %v5337_v6, %v15296_v20 }
 0xe84   :  { %v5386_v16 = vmul.f32 0.5, %v5343_v38  ;;  %v5347_v41 = vadd.f32 %v5296_v49, %v391_v10  ;;  %v13454_v43 = vadd.f32 %v5339_v26, %v15302_v9  ;;  %v5376_v28 = vmul.f32 0.5, %v13452_v3 }
 0xe85   :  { %14502 = vtanh.f32 %v5362_v51  ;;  %v5363_v2 = vmul.f32 0.5, %v5346_v62 }
 0xe86   :  { %14504 = vtanh.f32 %v5386_v16  ;;  %v5387_v58 = vmul.f32 0.5, %v5347_v41  ;;  %v5377_v46 = vmul.f32 0.5, %v13454_v43 }
 0xe87   :  { %14506 = vtanh.f32 %v5363_v2 }
 0xe88   :  { %14508 = vtanh.f32 %v13451_v0 }
 0xe89   :  { %14510 = vtanh.f32 %v5387_v58 }
 0xe8a   :  { %14512 = vtanh.f32 %v13453_v8 }
 0xe8b   :  { %14514 = vtanh.f32 %v5376_v28 }
 0xe8c   :  { %14516 = vtanh.f32 %v5377_v46 }
 0xe8f   :  { %v14503_v30 = vpop.eup %14502 }
 0xe90   :  { %v14505_v48 = vpop.eup %14504  ;;  %v5366_v35 = vmul.f32 0.5, %v14503_v30 }
 0xe91   :  { %v5390_v45 = vmul.f32 0.5, %v14505_v48  ;;  %v14507_v55 = vpop.eup %14506 }
 0xe92   :  { %v5368_v10 = vadd.f32 0.5, %v5366_v35  ;;  %v14509_v38 = vpop.eup %14508  ;;  %v5367_v51 = vmul.f32 0.5, %v14507_v55 }
 0xe93   :  { %v5392_v11 = vadd.f32 0.5, %v5390_v45  ;;  %v14511_v62 = vpop.eup %14510 }
 0xe94   :  { %v5396_v6 = vmul.f32 %v14509_v38, %v5368_v10  ;;  %v5369_v21 = vadd.f32 0.5, %v5367_v51  ;;  %v5391_v16 = vmul.f32 0.5, %v14511_v62  ;;  %v14513_v26 = vpop.eup %14512 }
 0xe95   :  { %v5394_v49 = vmul.f32 %v5392_v11, %v16440_v44  ;;  %v14515_v3 = vpop.eup %14514 }
 0xe96   :  { %v5393_v0 = vadd.f32 0.5, %v5391_v16  ;;  %v5397_v2 = vmul.f32 %v14513_v26, %v5369_v21  ;;  %v14517_v43 = vpop.eup %14516  ;;  %v5380_v30 = vmul.f32 0.5, %v14515_v3 }
 0xe97   :  { %v16498_v41 = vadd.f32 %v5396_v6, %v5394_v49  ;;  %v5381_v44 = vmul.f32 0.5, %v14517_v43 }
 0xe98   :  { %v5395_v58 = vmul.f32 %v5393_v0, %v16444_v22  ;;  %v5382_v35 = vadd.f32 0.5, %v5380_v30 }
 0xe99   :  { %14518 = vtanh.f32 %v16498_v41  ;;  %v5383_v28 = vadd.f32 0.5, %v5381_v44 }
 0xe9a   :  { %v16502_v8 = vadd.f32 %v5397_v2, %v5395_v58 }
 0xe9c   :  { %14520 = vtanh.f32 %v16502_v8 }
 0xea3   :  { %v14519_v48 = vpop.eup %14518 }
 0xea4   :  { %v5402_v46 = vmul.f32 %v14519_v48, %v5382_v35 }
 0xea6   :  { %v14521_v45 = vpop.eup %14520 }
 0xea7   :  { %v5403_v55 = vmul.f32 %v14521_v45, %v5383_v28 }
 0xea9   :  { %v16505_v10 = vpack.c.bf16 %v5403_v55, %v5402_v46 }
 0xeab   :  { %5646 = vmatmul.mubr.bf16.vlgmr.msra.gmra.mrb[56].mxu0 %v16505_v10  ;;  %5689 = vmatmul.mubr.bf16.vlgmr.msra.gmra.mrb[72].mxu1 %v16505_v10 }
 0xeac   :  { %5971 = vmatpush1.bf16.msra.mxu0 %v16192_v61  ;;  %6014 = vmatpush1.bf16.msra.mxu1 %v16197_v4  ;;  %v14008_v61 = vld [vmem:[%s18239_s4 + $0x4] ss:$16 sps:$4 sm:$0xff]   ;;  %v14011_v4 = vld [vmem:[%s18239_s4 + $0xc] ss:$16 sps:$4 sm:$0xff]  }
 0xead   :  { %5972 = vmatprep.subr.bf16.mxu0 %v16206_v27  ;;  %6015 = vmatprep.subr.bf16.mxu1 %v16211_v12  ;;  %v18306_v27 = vld [vmem:[#allocation10_spill] sm:$0xff] }
 0xeae   :  { %6002 = vmatprep.mubr.bf16.mxu0 %v18293_v15  ;;  %6045 = vmatprep.mubr.bf16.mxu1 %v18293_v15  ;;  %v395_v12 = vadd.f32 %v18306_v27, %v15290_v13 }
 0xeb0   :  { %5973 = vmatpush1.bf16.msra.mxu0 %v16216_v24  ;;  %6016 = vmatpush1.bf16.msra.mxu1 %v16221_v19  ;;  %v18307_v24 = vld [vmem:[#allocation11_spill] sm:$0xff] }
 0xeb1   :  { %5974 = vmatprep.subr.bf16.mxu0 %v16230_v42  ;;  %6017 = vmatprep.subr.bf16.mxu1 %v16235_v29  ;;  %v397_v19 = vadd.f32 %v18307_v24, %v14947_v14 }
 0xeb4   :  { %5975 = vmatpush1.bf16.msra.mxu0 %v16240_v59  ;;  %6018 = vmatpush1.bf16.msra.mxu1 %v16245_v32  ;;  %v18308_v59 = vld [vmem:[#allocation12_spill] sm:$0xff] }
 0xeb5   :  { %5976 = vmatprep.subr.bf16.mxu0 %v16332_v36  ;;  %6019 = vmatprep.subr.bf16.mxu1 %v16255_v47  ;;  %v399_v32 = vadd.f32 %v18308_v59, %v15290_v13  ;;  %v14009_v59 = vld [vmem:[%s18239_s4 + $0x8] ss:$16 sps:$4 sm:$0xff]  }
 0xeb8   :  { %5977 = vmatpush1.bf16.msra.mxu0 %v16337_v56  ;;  %6020 = vmatpush1.bf16.msra.mxu1 %v16260_v17 }
 0xeb9   :  { %5978 = vmatprep.subr.bf16.mxu0 %v16344_v52  ;;  %6021 = vmatprep.subr.bf16.mxu1 %v16269_v23 }
 0xebc   :  { %5979 = vmatpush1.bf16.msra.mxu0 %v16349_v37  ;;  %6022 = vmatpush1.bf16.msra.mxu1 %v16274_v18  ;;  %v18309_v18 = vld [vmem:[#allocation13_spill] sm:$0xff] }
 0xebd   :  { %5980 = vmatprep.subr.bf16.mxu0 %v16356_v54  ;;  %6023 = vmatprep.subr.bf16.mxu1 %v16361_v34  ;;  %v401_v36 = vadd.f32 %v18309_v18, %v14947_v14  ;;  %v14015_v18 = vld [vmem:[%s18239_s4 + $0x28] ss:$16 sps:$4 sm:$0xff]  }
 0xec0   :  { %5981 = vmatpush1.bf16.msra.mxu0 %v16366_v50  ;;  %6024 = vmatpush1.bf16.msra.mxu1 %v16371_v40 }
 0xec1   :  { %5982 = vmatprep.subr.bf16.mxu0 %v16380_v57  ;;  %6025 = vmatprep.subr.bf16.mxu1 %v16385_v39 }
 0xec4   :  { %5983 = vmatpush1.bf16.msra.mxu0 %v16390_v60  ;;  %6026 = vmatpush1.bf16.msra.mxu1 %v16395_v33 }
 0xec5   :  { %5984 = vmatprep.subr.bf16.mxu0 %v16409_v53  ;;  %6027 = vmatprep.subr.bf16.mxu1 %v16419_v7 }
 0xec8   :  { %5985 = vmatpush1.bf16.msra.mxu0 %v16404_v25  ;;  %6028 = vmatpush1.bf16.msra.mxu1 %v16414_v63 }
 0xec9   :  { %6353 = vmatprep.subr.bf16.mxu0 %v14008_v61  ;;  %6546 = vmatprep.subr.bf16.mxu1 %v14011_v4 }
 0xf7e   :  { %v5647_v42 = vpop.f32.mrb[56].mxu0  ;;  %v5690_v29 = vpop.f32.mrb[72].mxu1 }
 0xf7f   :  { %v5699_v47 = vadd.f32 %v5647_v42, %v395_v12  ;;  %v5649_v17 = vpop.f32.mrb[57].mxu0  ;;  %v5692_v23 = vpop.f32.mrb[73].mxu1  ;;  %v13455_v60 = vadd.f32 %v5690_v29, %v15296_v20 }
 0xf80   :  { %v5700_v56 = vadd.f32 %v5649_v17, %v397_v19  ;;  %v5651_v52 = vpop.f32.mrb[58].mxu0  ;;  %v5694_v37 = vpop.f32.mrb[74].mxu1  ;;  %v13456_v63 = vadd.f32 %v5692_v23, %v15302_v9  ;;  %v14017_v17 = vld [vmem:[%s18239_s4 + $0x2c] ss:$16 sps:$4 sm:$0xff]   ;;  %v14012_v23 = vld [vmem:[%s18239_s4 + $0x20] ss:$16 sps:$4 sm:$0xff]  }
 0xf81   :  { %v5719_v54 = vmul.f32 0.5, %v5699_v47  ;;  %v5703_v34 = vadd.f32 %v5651_v52, %v399_v32  ;;  %v5653_v50 = vpop.f32.mrb[59].mxu0  ;;  %v5696_v40 = vpop.f32.mrb[75].mxu1  ;;  %v13457_v53 = vadd.f32 %v5694_v37, %v15296_v20  ;;  %v14014_v47 = vld [vmem:[%s18239_s4 + $0x24] ss:$16 sps:$4 sm:$0xff]  }
 0xf82   :  { %v5743_v57 = vmul.f32 0.5, %v5700_v56  ;;  %v5704_v39 = vadd.f32 %v5653_v50, %v401_v36  ;;  %v13458_v7 = vadd.f32 %v5696_v40, %v15302_v9  ;;  %v5733_v51 = vmul.f32 0.5, %v13456_v63  ;;  %v14020_v36 = vld [vmem:[%s18239_s4 + $0x44] ss:$16 sps:$4 sm:$0xff]   ;;  %v14023_v56 = vld [vmem:[%s18239_s4 + $0x4c] ss:$16 sps:$4 sm:$0xff]  }
 0xf83   :  { %14522 = vtanh.f32 %v5719_v54  ;;  %v5720_v33 = vmul.f32 0.5, %v5703_v34  ;;  %v14018_v52 = vld [vmem:[%s18239_s4 + $0x40] ss:$16 sps:$4 sm:$0xff]   ;;  %v14021_v37 = vld [vmem:[%s18239_s4 + $0x48] ss:$16 sps:$4 sm:$0xff]  }
 0xf84   :  { %14524 = vtanh.f32 %v5743_v57  ;;  %v5744_v25 = vmul.f32 0.5, %v5704_v39  ;;  %v5734_v6 = vmul.f32 0.5, %v13458_v7  ;;  %v14026_v54 = vld [vmem:[%s18239_s4 + $0x64] ss:$16 sps:$4 sm:$0xff]   ;;  %v14029_v34 = vld [vmem:[%s18239_s4 + $0x6c] ss:$16 sps:$4 sm:$0xff]  }
 0xf85   :  { %14526 = vtanh.f32 %v5720_v33  ;;  %v14024_v50 = vld [vmem:[%s18239_s4 + $0x60] ss:$16 sps:$4 sm:$0xff]   ;;  %v14027_v40 = vld [vmem:[%s18239_s4 + $0x68] ss:$16 sps:$4 sm:$0xff]   ;;  %v14032_v57 = vld [vmem:[%s18239_s4 + $0x84] ss:$16 sps:$4 sm:$0xff]  }
 0xf86   :  { %14528 = vtanh.f32 %v13455_v60  ;;  %v14035_v39 = vld [vmem:[%s18239_s4 + $0x8c] ss:$16 sps:$4 sm:$0xff]   ;;  %v14030_v60 = vld [vmem:[%s18239_s4 + $0x80] ss:$16 sps:$4 sm:$0xff]   ;;  %v14033_v33 = vld [vmem:[%s18239_s4 + $0x88] ss:$16 sps:$4 sm:$0xff]  }
 0xf87   :  { %14530 = vtanh.f32 %v5744_v25  ;;  %v14038_v25 = vld [vmem:[%s18239_s4 + $0xa4] ss:$16 sps:$4 sm:$0xff]   ;;  %v14036_v63 = vld [vmem:[%s18239_s4 + $0xa0] ss:$16 sps:$4 sm:$0xff]   ;;  %v14039_v7 = vld [vmem:[%s18239_s4 + $0xa8] ss:$16 sps:$4 sm:$0xff]  }
 0xf88   :  { %14532 = vtanh.f32 %v13457_v53  ;;  %v14041_v53 = vld [vmem:[%s18239_s4 + $0xac] ss:$16 sps:$4 sm:$0xff]  }
 0xf89   :  { %14534 = vtanh.f32 %v5733_v51  ;;  %v14045_v51 = vld [vmem:[%s18239_s4 + $0xc8] ss:$16 sps:$4 sm:$0xff]  }
 0xf8a   :  { %14536 = vtanh.f32 %v5734_v6  ;;  %v14053_v6 = vld [vmem:[%s18239_s4 + $0xec] ss:$16 sps:$4 sm:$0xff]  }
 0xf8d   :  { %v14523_v22 = vpop.eup %14522 }
 0xf8e   :  { %v14525_v38 = vpop.eup %14524  ;;  %v5723_v11 = vmul.f32 0.5, %v14523_v22  ;;  %v14044_v22 = vld [vmem:[%s18239_s4 + $0xc4] ss:$16 sps:$4 sm:$0xff]  }
 0xf8f   :  { %v5747_v62 = vmul.f32 0.5, %v14525_v38  ;;  %v14527_v49 = vpop.eup %14526  ;;  %v14047_v38 = vld [vmem:[%s18239_s4 + $0xcc] ss:$16 sps:$4 sm:$0xff]  }
 0xf90   :  { %v5725_v21 = vadd.f32 0.5, %v5723_v11  ;;  %v14529_v16 = vpop.eup %14528  ;;  %v5724_v0 = vmul.f32 0.5, %v14527_v49  ;;  %v14042_v11 = vld [vmem:[%s18239_s4 + $0xc0] ss:$16 sps:$4 sm:$0xff]  }
 0xf91   :  { %v5749_v26 = vadd.f32 0.5, %v5747_v62  ;;  %v14531_v2 = vpop.eup %14530  ;;  %v14050_v62 = vld [vmem:[%s18239_s4 + $0xe4] ss:$16 sps:$4 sm:$0xff]   ;;  %v14048_v49 = vld [vmem:[%s18239_s4 + $0xe0] ss:$16 sps:$4 sm:$0xff]  }
 0xf92   :  { %v5753_v58 = vmul.f32 %v14529_v16, %v5725_v21  ;;  %v5726_v43 = vadd.f32 0.5, %v5724_v0  ;;  %v5748_v30 = vmul.f32 0.5, %v14531_v2  ;;  %v14533_v44 = vpop.eup %14532  ;;  %v14051_v21 = vld [vmem:[%s18239_s4 + $0xe8] ss:$16 sps:$4 sm:$0xff]   ;;  %v16666_v16 = vld [vmem:[%s18240_s5 + $0x4] ss:$16 sps:$4 sm:$0xff]  }
 0xf93   :  { %v5751_v3 = vmul.f32 %v5749_v26, %v16498_v41  ;;  %v14535_v55 = vpop.eup %14534  ;;  %v16671_v26 = vld [vmem:[%s18240_s5 + $0xc] ss:$16 sps:$4 sm:$0xff]   ;;  %v16676_v0 = vld [vmem:[%s18240_s5] ss:$16 sps:$4 sm:$0xff]   ;;  %v16681_v2 = vld [vmem:[%s18240_s5 + $0x8] ss:$16 sps:$4 sm:$0xff]  }
 0xf94   :  { %v5750_v35 = vadd.f32 0.5, %v5748_v30  ;;  %v5754_v28 = vmul.f32 %v14533_v44, %v5726_v43  ;;  %v14537_v61 = vpop.eup %14536  ;;  %v5737_v4 = vmul.f32 0.5, %v14535_v55  ;;  %v18310_v43 = vld [vmem:[#allocation18_spill] sm:$0xff]  ;;  %v16700_v30 = vld [vmem:[%s18240_s5 + $0x20] ss:$16 sps:$4 sm:$0xff]  }
 0xf95   :  { %v16560_v48 = vadd.f32 %v5753_v58, %v5751_v3  ;;  %v5738_v41 = vmul.f32 0.5, %v14537_v61  ;;  %v16686_v58 = vld [vmem:[%s18240_s5 + $0x24] ss:$16 sps:$4 sm:$0xff]   ;;  %v16691_v3 = vld [vmem:[%s18240_s5 + $0x2c] ss:$16 sps:$4 sm:$0xff]  }
 0xf96   :  { %v5752_v45 = vmul.f32 %v5750_v35, %v16502_v8  ;;  %v5739_v12 = vadd.f32 0.5, %v5737_v4  ;;  %v14006_v8 = vld [vmem:[%s18239_s4] ss:$16 sps:$4 sm:$0xff]   ;;  %v16705_v44 = vld [vmem:[%s18240_s5 + $0x28] ss:$16 sps:$4 sm:$0xff]  }
 0xf97   :  { %14538 = vtanh.f32 %v16560_v48  ;;  %v5740_v24 = vadd.f32 0.5, %v5738_v41  ;;  %v16712_v35 = vld [vmem:[%s18240_s5 + $0x44] ss:$16 sps:$4 sm:$0xff]   ;;  %v16731_v55 = vld [vmem:[%s18240_s5 + $0x48] ss:$16 sps:$4 sm:$0xff]  }
 0xf98   :  { %v16564_v46 = vadd.f32 %v5754_v28, %v5752_v45  ;;  %v16717_v28 = vld [vmem:[%s18240_s5 + $0x4c] ss:$16 sps:$4 sm:$0xff]   ;;  %v16726_v45 = vld [vmem:[%s18240_s5 + $0x40] ss:$16 sps:$4 sm:$0xff]   ;;  %v16736_v61 = vld [vmem:[%s18240_s5 + $0x64] ss:$16 sps:$4 sm:$0xff]  }
 0xf99   :  { %v16741_v4 = vld [vmem:[%s18240_s5 + $0x6c] ss:$16 sps:$4 sm:$0xff]   ;;  %v18311_v41 = vld [vmem:[#allocation19_spill] sm:$0xff] }
 0xf9a   :  { %14540 = vtanh.f32 %v16564_v46 }
 0xfa1   :  { %v14539_v27 = vpop.eup %14538 }
 0xfa2   :  { %v5759_v42 = vmul.f32 %v14539_v27, %v5739_v12  ;;  %v16752_v27 = vld [vmem:[%s18240_s5 + $0x60] ss:$16 sps:$4 sm:$0xff]   ;;  %v16757_v12 = vld [vmem:[%s18240_s5 + $0x68] ss:$16 sps:$4 sm:$0xff]  }
 0xfa4   :  { %v14541_v19 = vpop.eup %14540 }
 0xfa5   :  { %v5760_v29 = vmul.f32 %v14541_v19, %v5740_v24  ;;  %v18312_v24 = vld [vmem:[#allocation20_spill] sm:$0xff]  ;;  %v18313_v19 = vld [vmem:[#allocation21_spill] sm:$0xff] }
 0xfa7   :  { %v16573_v32 = vpack.c.bf16 %v5760_v29, %v5759_v42  ;;  %v18314_v42 = vld [vmem:[#allocation22_spill] sm:$0xff]  ;;  %v18315_v29 = vld [vmem:[#allocation23_spill] sm:$0xff] }
 0xfa9   :  { %6003 = vmatmul.mubr.bf16.vlgmr.msra.gmra.mrb[60].mxu0 %v16573_v32  ;;  %6046 = vmatmul.mubr.bf16.vlgmr.msra.gmra.mrb[76].mxu1 %v16573_v32 }
 0xfaa   :  { %6354 = vmatpush1.bf16.msra.mxu0 %v14006_v8  ;;  %6547 = vmatpush1.bf16.msra.mxu1 %v14009_v59  ;;  %v18316_v8 = vld [vmem:[#allocation24_spill] sm:$0xff]  ;;  %v18317_v59 = vld [vmem:[#allocation25_spill] sm:$0xff] }
 0xfab   :  { %6355 = vmatprep.subr.bf16.mxu0 %v14014_v47  ;;  %6548 = vmatprep.subr.bf16.mxu1 %v14017_v17  ;;  %v18318_v47 = vld [vmem:[#allocation26_spill] sm:$0xff]  ;;  %v16809_v17 = vld [vmem:[%s18240_s5 + $0x84] ss:$16 sps:$4 sm:$0xff]  }
 0xfac   :  { %6385 = vmatprep.mubr.bf16.mxu0 %v18293_v15  ;;  %6578 = vmatprep.mubr.bf16.mxu1 %v18293_v15 }
 0xfae   :  { %6356 = vmatpush1.bf16.msra.mxu0 %v14012_v23  ;;  %6549 = vmatpush1.bf16.msra.mxu1 %v14015_v18  ;;  %v16821_v23 = vld [vmem:[%s18240_s5 + $0x8c] ss:$16 sps:$4 sm:$0xff]   ;;  %v16826_v18 = vld [vmem:[%s18240_s5 + $0xa4] ss:$16 sps:$4 sm:$0xff]  }
 0xfaf   :  { %6357 = vmatprep.subr.bf16.mxu0 %v14020_v36  ;;  %6550 = vmatprep.subr.bf16.mxu1 %v14023_v56  ;;  %v16832_v36 = vld [vmem:[%s18240_s5 + $0xac] ss:$16 sps:$4 sm:$0xff]   ;;  %v16839_v56 = vld [vmem:[%s18240_s5 + $0xa0] ss:$16 sps:$4 sm:$0xff]  }
 0xfb2   :  { %6358 = vmatpush1.bf16.msra.mxu0 %v14018_v52  ;;  %6551 = vmatpush1.bf16.msra.mxu1 %v14021_v37  ;;  %v16847_v52 = vld [vmem:[%s18240_s5 + $0xa8] ss:$16 sps:$4 sm:$0xff]   ;;  %v18319_v37 = vld [vmem:[#allocation27_spill] sm:$0xff] }
 0xfb3   :  { %6359 = vmatprep.subr.bf16.mxu0 %v14026_v54  ;;  %6552 = vmatprep.subr.bf16.mxu1 %v14029_v34  ;;  %v16880_v54 = vld [vmem:[%s18240_s5 + $0xc0] ss:$16 sps:$4 sm:$0xff]   ;;  %v16894_v34 = vld [vmem:[%s18240_s5 + $0xe4] ss:$16 sps:$4 sm:$0xff]  }
 0xfb6   :  { %6360 = vmatpush1.bf16.msra.mxu0 %v14024_v50  ;;  %6553 = vmatpush1.bf16.msra.mxu1 %v14027_v40  ;;  %v16899_v50 = vld [vmem:[%s18240_s5 + $0xec] ss:$16 sps:$4 sm:$0xff]   ;;  %v16904_v40 = vld [vmem:[%s18240_s5 + $0xe0] ss:$16 sps:$4 sm:$0xff]  }
 0xfb7   :  { %6361 = vmatprep.subr.bf16.mxu0 %v14032_v57  ;;  %6554 = vmatprep.subr.bf16.mxu1 %v14035_v39  ;;  %v16909_v57 = vld [vmem:[%s18240_s5 + $0xe8] ss:$16 sps:$4 sm:$0xff]  }
 0xfb8   :  { %v18320_v39 = vld [vmem:[#allocation14_spill] sm:$0xff] }
 0xfba   :  { %6362 = vmatpush1.bf16.msra.mxu0 %v14030_v60  ;;  %6555 = vmatpush1.bf16.msra.mxu1 %v14033_v33  ;;  %v405_v60 = vadd.f32 %v18320_v39, %v15290_v13  ;;  %v18321_v33 = vld [vmem:[#allocation15_spill] sm:$0xff] }
 0xfbb   :  { %6363 = vmatprep.subr.bf16.mxu0 %v14038_v25  ;;  %6556 = vmatprep.subr.bf16.mxu1 %v14041_v53  ;;  %v407_v25 = vadd.f32 %v18321_v33, %v14947_v14 }
 0xfbe   :  { %6364 = vmatpush1.bf16.msra.mxu0 %v14036_v63  ;;  %6557 = vmatpush1.bf16.msra.mxu1 %v14039_v7  ;;  %v18322_v7 = vld [vmem:[#allocation16_spill] sm:$0xff] }
 0xfbf   :  { %6365 = vmatprep.subr.bf16.mxu0 %v14044_v22  ;;  %6558 = vmatprep.subr.bf16.mxu1 %v14047_v38  ;;  %v409_v22 = vadd.f32 %v18322_v7, %v15290_v13 }
 0xfc2   :  { %6366 = vmatpush1.bf16.msra.mxu0 %v14042_v11  ;;  %6559 = vmatpush1.bf16.msra.mxu1 %v14045_v51 }
 0xfc3   :  { %6367 = vmatprep.subr.bf16.mxu0 %v14050_v62  ;;  %6560 = vmatprep.subr.bf16.mxu1 %v14053_v6  ;;  %v18323_v62 = vld [vmem:[#allocation17_spill] sm:$0xff] }
 0xfc4   :  { %v411_v6 = vadd.f32 %v18323_v62, %v14947_v14 }
 0xfc6   :  { %6368 = vmatpush1.bf16.msra.mxu0 %v14048_v49  ;;  %6561 = vmatpush1.bf16.msra.mxu1 %v14051_v21 }
 0xfc7   :  { %7102 = vmatprep.subr.bf16.mxu0 %v16666_v16  ;;  %7145 = vmatprep.subr.bf16.mxu1 %v16671_v26 }
 0xfc9   :  { %6386 = vmatmul.mubr.bf16.vlgmr.msra.gmra.mrb[64].mxu0 %v18310_v43  ;;  %6579 = vmatmul.mubr.bf16.vlgmr.msra.gmra.mrb[80].mxu1 %v18310_v43 }
 0xfca   :  { %6395 = vmatprep.mubr.bf16.mxu0 %v18293_v15  ;;  %6588 = vmatprep.mubr.bf16.mxu1 %v18293_v15 }
 0xfcb   :  { %7103 = vmatpush1.bf16.msra.mxu0 %v16676_v0  ;;  %7146 = vmatpush1.bf16.msra.mxu1 %v16681_v2 }
 0xfcc   :  { %7104 = vmatprep.subr.bf16.mxu0 %v16686_v58  ;;  %7147 = vmatprep.subr.bf16.mxu1 %v16691_v3 }
 0xfcf   :  { %7105 = vmatpush1.bf16.msra.mxu0 %v16700_v30  ;;  %7148 = vmatpush1.bf16.msra.mxu1 %v16705_v44 }
 0xfd0   :  { %7106 = vmatprep.subr.bf16.mxu0 %v16712_v35  ;;  %7149 = vmatprep.subr.bf16.mxu1 %v16717_v28 }
 0xfd1   :  { %6396 = vmatmul.mubr.bf16.gmra.mrb[68].mxu0 %v18311_v41  ;;  %6589 = vmatmul.mubr.bf16.gmra.mrb[84].mxu1 %v18311_v41 }
 0xfd2   :  { %6405 = vmatprep.mubr.bf16.mxu0 %v18293_v15  ;;  %6598 = vmatprep.mubr.bf16.mxu1 %v18293_v15 }
 0xfd3   :  { %7107 = vmatpush1.bf16.msra.mxu0 %v16726_v45  ;;  %7150 = vmatpush1.bf16.msra.mxu1 %v16731_v55 }
 0xfd4   :  { %7108 = vmatprep.subr.bf16.mxu0 %v16736_v61  ;;  %7151 = vmatprep.subr.bf16.mxu1 %v16741_v4 }
 0xfd7   :  { %7109 = vmatpush1.bf16.msra.mxu0 %v16752_v27  ;;  %7152 = vmatpush1.bf16.msra.mxu1 %v16757_v12 }
 0xfd8   :  { %7110 = vmatprep.subr.bf16.mxu0 %v16809_v17  ;;  %7153 = vmatprep.subr.bf16.mxu1 %v16821_v23 }
 0xfd9   :  { %6406 = vmatmul.mubr.bf16.gmra.mrb[72].mxu0 %v18312_v24  ;;  %6599 = vmatmul.mubr.bf16.gmra.mrb[88].mxu1 %v18312_v24 }
 0xfda   :  { %6415 = vmatprep.mubr.bf16.mxu0 %v18293_v15  ;;  %6608 = vmatprep.mubr.bf16.mxu1 %v18293_v15 }
 0xfe1   :  { %6416 = vmatmul.mubr.bf16.gmra.mrb[76].mxu0 %v18313_v19  ;;  %6609 = vmatmul.mubr.bf16.gmra.mrb[92].mxu1 %v18313_v19 }
 0xfe2   :  { %6425 = vmatprep.mubr.bf16.mxu0 %v18293_v15  ;;  %6618 = vmatprep.mubr.bf16.mxu1 %v18293_v15 }
 0xfe9   :  { %6426 = vmatmul.mubr.bf16.gmra.mrb[80].mxu0 %v18314_v42  ;;  %6619 = vmatmul.mubr.bf16.gmra.mrb[96].mxu1 %v18314_v42 }
 0xfea   :  { %6435 = vmatprep.mubr.bf16.mxu0 %v18293_v15  ;;  %6628 = vmatprep.mubr.bf16.mxu1 %v18293_v15 }
 0xff1   :  { %6436 = vmatmul.mubr.bf16.gmra.mrb[84].mxu0 %v18315_v29  ;;  %6629 = vmatmul.mubr.bf16.gmra.mrb[100].mxu1 %v18315_v29 }
 0xff2   :  { %6445 = vmatprep.mubr.bf16.mxu0 %v18293_v15  ;;  %6638 = vmatprep.mubr.bf16.mxu1 %v18293_v15 }
 0xff9   :  { %6446 = vmatmul.mubr.bf16.gmra.mrb[88].mxu0 %v18316_v8  ;;  %6639 = vmatmul.mubr.bf16.gmra.mrb[104].mxu1 %v18316_v8 }
 0xffa   :  { %6455 = vmatprep.mubr.bf16.mxu0 %v18293_v15  ;;  %6648 = vmatprep.mubr.bf16.mxu1 %v18293_v15 }
0x1001   :  { %6456 = vmatmul.mubr.bf16.gmra.mrb[92].mxu0 %v18317_v59  ;;  %6649 = vmatmul.mubr.bf16.gmra.mrb[108].mxu1 %v18317_v59 }
0x1002   :  { %6465 = vmatprep.mubr.bf16.mxu0 %v18293_v15  ;;  %6658 = vmatprep.mubr.bf16.mxu1 %v18293_v15 }
0x1009   :  { %6466 = vmatmul.mubr.bf16.gmra.mrb[96].mxu0 %v16067_v5  ;;  %6659 = vmatmul.mubr.bf16.gmra.mrb[112].mxu1 %v16067_v5  ;;  %v16804_v5 = vld [vmem:[%s18240_s5 + $0x80] ss:$16 sps:$4 sm:$0xff]  }
0x100a   :  { %6475 = vmatprep.mubr.bf16.mxu0 %v18293_v15  ;;  %6668 = vmatprep.mubr.bf16.mxu1 %v18293_v15 }
0x100b   :  { %7111 = vmatpush1.bf16.msra.mxu0 %v16804_v5 }
0x100c   :  { %7112 = vmatprep.subr.bf16.mxu0 %v16826_v18 }
0x100f   :  { %7113 = vmatpush1.bf16.msra.mxu0 %v16839_v56 }
0x1011   :  { %6476 = vmatmul.mubr.bf16.gmra.mrb[100].mxu0 %v16121_v1  ;;  %6669 = vmatmul.mubr.bf16.gmra.mrb[116].mxu1 %v16121_v1  ;;  %v16814_v1 = vld [vmem:[%s18240_s5 + $0x88] ss:$16 sps:$4 sm:$0xff]  }
0x1012   :  { %6485 = vmatprep.mubr.bf16.mxu0 %v18293_v15  ;;  %6678 = vmatprep.mubr.bf16.mxu1 %v18293_v15 }
0x1013   :  { %7154 = vmatpush1.bf16.msra.mxu1 %v16814_v1 }
0x1014   :  { %7155 = vmatprep.subr.bf16.mxu1 %v16832_v36 }
0x1017   :  { %7156 = vmatpush1.bf16.msra.mxu1 %v16847_v52 }
0x1019   :  { %6486 = vmatmul.mubr.bf16.gmra.mrb[104].mxu0 %v18318_v47  ;;  %6679 = vmatmul.mubr.bf16.gmra.mrb[120].mxu1 %v18318_v47 }
0x101a   :  { %6495 = vmatprep.mubr.bf16.mxu0 %v18293_v15  ;;  %6688 = vmatprep.mubr.bf16.mxu1 %v18293_v15 }
0x1021   :  { %6496 = vmatmul.mubr.bf16.gmra.mrb[108].mxu0 %v18319_v37  ;;  %6689 = vmatmul.mubr.bf16.gmra.mrb[124].mxu1 %v18319_v37 }
0x1022   :  { %6505 = vmatprep.mubr.bf16.mxu0 %v18293_v15  ;;  %6698 = vmatprep.mubr.bf16.mxu1 %v18293_v15 }
0x1029   :  { %6506 = vmatmul.mubr.bf16.gmra.mrb[112].mxu0 %v16447_v31  ;;  %6699 = vmatmul.mubr.bf16.gmra.mrb[128].mxu1 %v16447_v31  ;;  %v16870_v31 = vld [vmem:[%s18240_s5 + $0xc4] ss:$16 sps:$4 sm:$0xff]  }
0x102a   :  { %6515 = vmatprep.mubr.bf16.mxu0 %v18293_v15  ;;  %6708 = vmatprep.mubr.bf16.mxu1 %v18293_v15 }
0x102b   :  { %7114 = vmatprep.subr.bf16.mxu0 %v16870_v31 }
0x102c   :  { %7115 = vmatpush1.bf16.msra.mxu0 %v16880_v54 }
0x102d   :  { %7116 = vmatprep.subr.bf16.mxu0 %v16894_v34 }
0x1030   :  { %7117 = vmatpush1.bf16.msra.mxu0 %v16904_v40 }
0x1031   :  { %6516 = vmatmul.mubr.bf16.gmra.mrb[116].mxu0 %v16505_v10  ;;  %6709 = vmatmul.mubr.bf16.gmra.mrb[132].mxu1 %v16505_v10  ;;  %v16875_v10 = vld [vmem:[%s18240_s5 + $0xcc] ss:$16 sps:$4 sm:$0xff]  }
0x1032   :  { %6525 = vmatprep.mubr.bf16.mxu0 %v18293_v15  ;;  %6718 = vmatprep.mubr.bf16.mxu1 %v18293_v15 }
0x1033   :  { %7157 = vmatprep.subr.bf16.mxu1 %v16875_v10  ;;  %7455 = vmatprep.subr.bf16.mxu0 %v16666_v16 }
0x1039   :  { %6526 = vmatmul.mubr.bf16.gmra.mrb[120].mxu0 %v16573_v32  ;;  %6719 = vmatmul.mubr.bf16.gmra.mrb[136].mxu1 %v16573_v32  ;;  %v16885_v32 = vld [vmem:[%s18240_s5 + $0xc8] ss:$16 sps:$4 sm:$0xff]  }
0x103a   :  { %6535 = vmatprep.mubr.bf16.mxu0 %v18293_v15  ;;  %6728 = vmatprep.mubr.bf16.mxu1 %v18293_v15 }
0x103b   :  { %7158 = vmatpush1.bf16.msra.mxu1 %v16885_v32 }
0x103c   :  { %7159 = vmatprep.subr.bf16.mxu1 %v16899_v50 }
0x103f   :  { %7160 = vmatpush1.bf16.msra.mxu1 %v16909_v57 }
0x1040   :  { %7498 = vmatprep.subr.bf16.mxu1 %v16671_v26 }
0x107c   :  { %v6004_v53 = vpop.f32.mrb[60].mxu0  ;;  %v6047_v63 = vpop.f32.mrb[76].mxu1 }
0x107d   :  { %v6056_v38 = vadd.f32 %v6004_v53, %v405_v60  ;;  %v6006_v11 = vpop.f32.mrb[61].mxu0  ;;  %v6049_v51 = vpop.f32.mrb[77].mxu1  ;;  %v13459_v59 = vadd.f32 %v6047_v63, %v15296_v20 }
0x107e   :  { %v6057_v49 = vadd.f32 %v6006_v11, %v407_v25  ;;  %v6008_v21 = vpop.f32.mrb[62].mxu0  ;;  %v6051_v43 = vpop.f32.mrb[78].mxu1  ;;  %v13460_v14 = vadd.f32 %v6049_v51, %v15302_v9 }
0x107f   :  { %v6076_v41 = vmul.f32 0.5, %v6056_v38  ;;  %v6060_v24 = vadd.f32 %v6008_v21, %v409_v22  ;;  %v6010_v19 = vpop.f32.mrb[63].mxu0  ;;  %v6053_v42 = vpop.f32.mrb[79].mxu1  ;;  %v13461_v37 = vadd.f32 %v6051_v43, %v15296_v20 }
0x1080   :  { %v6100_v29 = vmul.f32 0.5, %v6057_v49  ;;  %v6061_v8 = vadd.f32 %v6010_v19, %v411_v6  ;;  %v6090_v39 = vmul.f32 0.5, %v13460_v14  ;;  %v13462_v60 = vadd.f32 %v6053_v42, %v15302_v9 }
0x1081   :  { %14542 = vtanh.f32 %v6076_v41  ;;  %v6077_v47 = vmul.f32 0.5, %v6060_v24 }
0x1082   :  { %14544 = vtanh.f32 %v6100_v29  ;;  %v6101_v13 = vmul.f32 0.5, %v6061_v8  ;;  %v6091_v63 = vmul.f32 0.5, %v13462_v60 }
0x1083   :  { %14546 = vtanh.f32 %v6077_v47  ;;  %v18324_v47 = vld [vmem:[#allocation5_spill] sm:$0xff] }
0x1084   :  { %14548 = vtanh.f32 %v13459_v59  ;;  %v14878_v59 = vld [vmem:[%s18237_s6] sm:$0xf] }
0x1085   :  { %14550 = vtanh.f32 %v6101_v13  ;;  %v18325_v13 = vsub.s32 0, %v18324_v47 }
0x1086   :  { %14552 = vtanh.f32 %v13461_v37 }
0x1087   :  { %14554 = vtanh.f32 %v6090_v39  ;;  %v16936_v37 = vrot.slane %v14878_v59, %v18325_v13 }
0x1088   :  { %14556 = vtanh.f32 %v6091_v63 }
0x108b   :  { %v14543_v33 = vpop.eup %14542 }
0x108c   :  { %v14545_v25 = vpop.eup %14544  ;;  %v6080_v53 = vmul.f32 0.5, %v14543_v33  ;;  %v18326_v33 = vsub.s32 2, %v18324_v47 }
0x108d   :  { %v6104_v7 = vmul.f32 0.5, %v14545_v25  ;;  %v14547_v22 = vpop.eup %14546 }
0x108e   :  { %v6082_v38 = vadd.f32 0.5, %v6080_v53  ;;  %v14549_v11 = vpop.eup %14548  ;;  %v6081_v6 = vmul.f32 0.5, %v14547_v22  ;;  %v16940_v25 = vrot.slane %v14878_v59, %v18326_v33 }
0x108f   :  { %v6106_v62 = vadd.f32 0.5, %v6104_v7  ;;  %v14551_v20 = vpop.eup %14550 }
0x1090   :  { %v6110_v49 = vmul.f32 %v14549_v11, %v6082_v38  ;;  %v6083_v21 = vadd.f32 0.5, %v6081_v6  ;;  %v6105_v43 = vmul.f32 0.5, %v14551_v20  ;;  %v14553_v41 = vpop.eup %14552  ;;  %v18327_v6 = vsub.s32 3, %v18324_v47 }
0x1091   :  { %v6108_v51 = vmul.f32 %v6106_v62, %v16560_v48  ;;  %v14555_v29 = vpop.eup %14554 }
0x1092   :  { %v6107_v24 = vadd.f32 0.5, %v6105_v43  ;;  %v6111_v19 = vmul.f32 %v14553_v41, %v6083_v21  ;;  %v6094_v48 = vmul.f32 0.5, %v14555_v29  ;;  %v14557_v14 = vpop.eup %14556  ;;  %v16945_v20 = vrot.slane %v14878_v59, %v18327_v6 }
0x1093   :  { %v6112_v9 = vadd.f32 %v6110_v49, %v6108_v51  ;;  %v6095_v22 = vmul.f32 0.5, %v14557_v14 }
0x1094   :  { %v6109_v42 = vmul.f32 %v6107_v24, %v16564_v46  ;;  %v6096_v63 = vadd.f32 0.5, %v6094_v48 }
0x1095   :  { %14558 = vtanh.f32 %v6112_v9 }
0x1096   :  { %v6113_v8 = vadd.f32 %v6111_v19, %v6109_v42  ;;  %v6097_v19 = vadd.f32 0.5, %v6095_v22 }
0x1098   :  { %14560 = vtanh.f32 %v6113_v8 }
0x109c   :  { %v6387_v39 = vpop.f32.mrb[64].mxu0  ;;  %v6580_v60 = vpop.f32.mrb[80].mxu1 }
0x109d   :  { %v6388_v46 = vadd.f32 %v6387_v39, %v16936_v37  ;;  %v6389_v53 = vpop.f32.mrb[65].mxu0  ;;  %v6582_v7 = vpop.f32.mrb[81].mxu1  ;;  %v6581_v9 = vadd.f32 %v6580_v60, %v16940_v25 }
0x109e   :  { %v6391_v38 = vpop.f32.mrb[66].mxu0  ;;  %v6584_v11 = vpop.f32.mrb[82].mxu1  ;;  %v6583_v29 = vadd.f32 %v6582_v7, %v16945_v20 }
0x109f   :  { %v14559_v62 = vpop.eup %14558  ;;  %v6869_v49 = vmul.f32 0.5, %v6388_v46  ;;  %v6392_v51 = vadd.f32 %v6391_v38, %v16936_v37  ;;  %v6393_v21 = vpop.f32.mrb[67].mxu0  ;;  %v6585_v8 = vadd.f32 %v6584_v11, %v16940_v25 }
0x10a0   :  { %v6586_v43 = vpop.f32.mrb[83].mxu1  ;;  %v6116_v41 = vmul.f32 %v14559_v62, %v6096_v63  ;;  %v6883_v48 = vmul.f32 0.5, %v6583_v29 }
0x10a1   :  { %14562 = vtanh.f32 %v6869_v49  ;;  %v6870_v24 = vmul.f32 0.5, %v6392_v51  ;;  %v6587_v59 = vadd.f32 %v6586_v43, %v16945_v20 }
0x10a2   :  { %v14561_v42 = vpop.eup %14560 }
0x10a3   :  { %14564 = vtanh.f32 %v6870_v24  ;;  %v6117_v47 = vmul.f32 %v14561_v42, %v6097_v19  ;;  %v6884_v14 = vmul.f32 0.5, %v6587_v59 }
0x10a4   :  { %14566 = vtanh.f32 %v6581_v9 }
0x10a5   :  { %v6120_v13 = vpack.c.bf16 %v6117_v47, %v6116_v41  ;;  %14568 = vtanh.f32 %v6585_v8 }
0x10a6   :  { %14570 = vtanh.f32 %v6883_v48  ;;  %v18328_v48 = vld [vmem:[#allocation6_spill] sm:$0xff] }
0x10a7   :  { %6536 = vmatmul.mubr.bf16.gmra.mrb[124].mxu0 %v6120_v13  ;;  %6729 = vmatmul.mubr.bf16.gmra.mrb[140].mxu1 %v6120_v13  ;;  %14572 = vtanh.f32 %v6884_v14 }
0x10a8   :  { %7134 = vmatprep.mubr.bf16.mxu0 %v18293_v15  ;;  %7177 = vmatprep.mubr.bf16.mxu1 %v18293_v15 }
0x10ab   :  { %v14563_v39 = vpop.eup %14562 }
0x10ac   :  { %v6873_v60 = vmul.f32 0.5, %v14563_v39 }
0x10ad   :  { %v14565_v33 = vpop.eup %14564 }
0x10ae   :  { %v6875_v46 = vadd.f32 0.5, %v6873_v60  ;;  %v6874_v53 = vmul.f32 0.5, %v14565_v33  ;;  %v14567_v7 = vpop.eup %14566 }
0x10af   :  { %v14569_v38 = vpop.eup %14568 }
0x10b0   :  { %v16954_v63 = vmul.f32 %v14567_v7, %v6875_v46  ;;  %v6876_v22 = vadd.f32 0.5, %v6874_v53  ;;  %v14571_v62 = vpop.eup %14570 }
0x10b1   :  { %v14573_v6 = vpop.eup %14572  ;;  %v6887_v49 = vmul.f32 0.5, %v14571_v62 }
0x10b2   :  { %14574 = vtanh.f32 %v16954_v63  ;;  %v16957_v11 = vmul.f32 %v14569_v38, %v6876_v22  ;;  %v6888_v51 = vmul.f32 0.5, %v14573_v6 }
0x10b3   :  { %v6889_v43 = vadd.f32 0.5, %v6887_v49 }
0x10b4   :  { %14576 = vtanh.f32 %v16957_v11  ;;  %v6890_v41 = vadd.f32 0.5, %v6888_v51 }
0x10bc   :  { %v14575_v21 = vpop.eup %14574 }
0x10bd   :  { %v6895_v24 = vmul.f32 %v14575_v21, %v6889_v43 }
0x10be   :  { %v14577_v9 = vpop.eup %14576 }
0x10bf   :  { %v6896_v19 = vmul.f32 %v14577_v9, %v6890_v41 }
0x10c1   :  { %v16960_v42 = vpack.c.bf16 %v6896_v19, %v6895_v24 }
0x10c3   :  { %7135 = vmatmul.mubr.bf16.vlgmr.msra.gmra.mrb[68].mxu0 %v16960_v42  ;;  %7178 = vmatmul.mubr.bf16.vlgmr.msra.gmra.mrb[84].mxu1 %v16960_v42 }
0x10c4   :  { %7456 = vmatpush1.bf16.msra.mxu0 %v16676_v0  ;;  %7499 = vmatpush1.bf16.msra.mxu1 %v16681_v2 }
0x10c5   :  { %7457 = vmatprep.subr.bf16.mxu0 %v16686_v58  ;;  %7500 = vmatprep.subr.bf16.mxu1 %v16691_v3 }
0x10c6   :  { %7487 = vmatprep.mubr.bf16.mxu0 %v18293_v15  ;;  %7530 = vmatprep.mubr.bf16.mxu1 %v18293_v15 }
0x10c8   :  { %7458 = vmatpush1.bf16.msra.mxu0 %v16700_v30  ;;  %7501 = vmatpush1.bf16.msra.mxu1 %v16705_v44 }
0x10c9   :  { %7459 = vmatprep.subr.bf16.mxu0 %v16712_v35  ;;  %7502 = vmatprep.subr.bf16.mxu1 %v16717_v28 }
0x10cc   :  { %7460 = vmatpush1.bf16.msra.mxu0 %v16726_v45  ;;  %7503 = vmatpush1.bf16.msra.mxu1 %v16731_v55 }
0x10cd   :  { %7461 = vmatprep.subr.bf16.mxu0 %v16736_v61  ;;  %7504 = vmatprep.subr.bf16.mxu1 %v16741_v4 }
0x10d0   :  { %7462 = vmatpush1.bf16.msra.mxu0 %v16752_v27  ;;  %7505 = vmatpush1.bf16.msra.mxu1 %v16757_v12 }
0x10d1   :  { %7463 = vmatprep.subr.bf16.mxu0 %v16809_v17  ;;  %7506 = vmatprep.subr.bf16.mxu1 %v16821_v23 }
0x10d4   :  { %7464 = vmatpush1.bf16.msra.mxu0 %v16804_v5  ;;  %7507 = vmatpush1.bf16.msra.mxu1 %v16814_v1 }
0x10d5   :  { %7465 = vmatprep.subr.bf16.mxu0 %v16826_v18  ;;  %7508 = vmatprep.subr.bf16.mxu1 %v16832_v36 }
0x10d8   :  { %7466 = vmatpush1.bf16.msra.mxu0 %v16839_v56  ;;  %7509 = vmatpush1.bf16.msra.mxu1 %v16847_v52 }
0x10d9   :  { %7467 = vmatprep.subr.bf16.mxu0 %v16870_v31  ;;  %7510 = vmatprep.subr.bf16.mxu1 %v16875_v10 }
0x10dc   :  { %7468 = vmatpush1.bf16.msra.mxu0 %v16880_v54  ;;  %7511 = vmatpush1.bf16.msra.mxu1 %v16885_v32 }
0x10dd   :  { %7469 = vmatprep.subr.bf16.mxu0 %v16894_v34  ;;  %7512 = vmatprep.subr.bf16.mxu1 %v16899_v50 }
0x10e0   :  { %7470 = vmatpush1.bf16.msra.mxu0 %v16904_v40  ;;  %7513 = vmatpush1.bf16.msra.mxu1 %v16909_v57 }
0x10e1   :  { %7808 = vmatprep.subr.bf16.mxu0 %v16666_v16  ;;  %7851 = vmatprep.subr.bf16.mxu1 %v16671_v26 }
0x1196   :  { %v7136_v29 = vpop.f32.mrb[68].mxu0  ;;  %v7179_v8 = vpop.f32.mrb[84].mxu1 }
0x1197   :  { %v13463_v59 = vadd.f32 %v7136_v29, %v16936_v37  ;;  %v7138_v47 = vpop.f32.mrb[69].mxu0  ;;  %v7181_v13 = vpop.f32.mrb[85].mxu1  ;;  %v13523_v26 = vadd.f32 %v7179_v8, %v16940_v25 }
0x1198   :  { %v13464_v14 = vadd.f32 %v7138_v47, %v18328_v48  ;;  %v7140_v39 = vpop.f32.mrb[70].mxu0  ;;  %v7183_v60 = vpop.f32.mrb[86].mxu1  ;;  %v13524_v49 = vadd.f32 %v7181_v13, %v16945_v20 }
0x1199   :  { %v7208_v33 = vmul.f32 0.5, %v13463_v59  ;;  %v13465_v46 = vadd.f32 %v7140_v39, %v16936_v37  ;;  %v7142_v53 = vpop.f32.mrb[71].mxu0  ;;  %v7185_v7 = vpop.f32.mrb[87].mxu1  ;;  %v13525_v6 = vadd.f32 %v7183_v60, %v16940_v25 }
0x119a   :  { %v7232_v22 = vmul.f32 0.5, %v13464_v14  ;;  %v13466_v16 = vadd.f32 %v7142_v53, %v18328_v48  ;;  %v13526_v51 = vadd.f32 %v7185_v7, %v16945_v20  ;;  %v7222_v9 = vmul.f32 0.5, %v13524_v49 }
0x119b   :  { %14578 = vtanh.f32 %v7208_v33  ;;  %v7209_v38 = vmul.f32 0.5, %v13465_v46 }
0x119c   :  { %14580 = vtanh.f32 %v7232_v22  ;;  %v7233_v62 = vmul.f32 0.5, %v13466_v16  ;;  %v7223_v19 = vmul.f32 0.5, %v13526_v51 }
0x119d   :  { %14582 = vtanh.f32 %v7209_v38 }
0x119e   :  { %14584 = vtanh.f32 %v13523_v26 }
0x119f   :  { %14586 = vtanh.f32 %v7233_v62 }
0x11a0   :  { %14588 = vtanh.f32 %v13525_v6 }
0x11a1   :  { %14590 = vtanh.f32 %v7222_v9 }
0x11a2   :  { %14592 = vtanh.f32 %v7223_v19 }
0x11a5   :  { %v14579_v21 = vpop.eup %14578 }
0x11a6   :  { %v14581_v43 = vpop.eup %14580  ;;  %v7212_v41 = vmul.f32 0.5, %v14579_v21 }
0x11a7   :  { %v7236_v24 = vmul.f32 0.5, %v14581_v43  ;;  %v14583_v29 = vpop.eup %14582 }
0x11a8   :  { %v7214_v8 = vadd.f32 0.5, %v7212_v41  ;;  %v14585_v59 = vpop.eup %14584  ;;  %v7213_v14 = vmul.f32 0.5, %v14583_v29 }
0x11a9   :  { %v7238_v47 = vadd.f32 0.5, %v7236_v24  ;;  %v14587_v39 = vpop.eup %14586 }
0x11aa   :  { %v7242_v60 = vmul.f32 %v14585_v59, %v7214_v8  ;;  %v7215_v13 = vadd.f32 0.5, %v7213_v14  ;;  %v7237_v46 = vmul.f32 0.5, %v14587_v39  ;;  %v14589_v53 = vpop.eup %14588 }
0x11ab   :  { %v7240_v33 = vmul.f32 %v7238_v47, %v16954_v63  ;;  %v14591_v62 = vpop.eup %14590 }
0x11ac   :  { %v7239_v22 = vadd.f32 0.5, %v7237_v46  ;;  %v7243_v16 = vmul.f32 %v14589_v53, %v7215_v13  ;;  %v14593_v6 = vpop.eup %14592  ;;  %v7226_v49 = vmul.f32 0.5, %v14591_v62 }
0x11ad   :  { %v17007_v7 = vadd.f32 %v7242_v60, %v7240_v33  ;;  %v7227_v63 = vmul.f32 0.5, %v14593_v6 }
0x11ae   :  { %v7241_v26 = vmul.f32 %v7239_v22, %v16957_v11  ;;  %v7228_v21 = vadd.f32 0.5, %v7226_v49 }
0x11af   :  { %14594 = vtanh.f32 %v17007_v7  ;;  %v7229_v43 = vadd.f32 0.5, %v7227_v63 }
0x11b0   :  { %v17011_v38 = vadd.f32 %v7243_v16, %v7241_v26 }
0x11b2   :  { %14596 = vtanh.f32 %v17011_v38 }
0x11b9   :  { %v14595_v51 = vpop.eup %14594 }
0x11ba   :  { %v7248_v9 = vmul.f32 %v14595_v51, %v7228_v21 }
0x11bc   :  { %v14597_v41 = vpop.eup %14596 }
0x11bd   :  { %v7249_v24 = vmul.f32 %v14597_v41, %v7229_v43 }
0x11bf   :  { %v17014_v19 = vpack.c.bf16 %v7249_v24, %v7248_v9 }
0x11c1   :  { %7488 = vmatmul.mubr.bf16.vlgmr.msra.gmra.mrb[72].mxu0 %v17014_v19  ;;  %7531 = vmatmul.mubr.bf16.vlgmr.msra.gmra.mrb[88].mxu1 %v17014_v19 }
0x11c2   :  { %7809 = vmatpush1.bf16.msra.mxu0 %v16676_v0  ;;  %7852 = vmatpush1.bf16.msra.mxu1 %v16681_v2 }
0x11c3   :  { %7810 = vmatprep.subr.bf16.mxu0 %v16686_v58  ;;  %7853 = vmatprep.subr.bf16.mxu1 %v16691_v3 }
0x11c4   :  { %7840 = vmatprep.mubr.bf16.mxu0 %v18293_v15  ;;  %7883 = vmatprep.mubr.bf16.mxu1 %v18293_v15 }
0x11c6   :  { %7811 = vmatpush1.bf16.msra.mxu0 %v16700_v30  ;;  %7854 = vmatpush1.bf16.msra.mxu1 %v16705_v44 }
0x11c7   :  { %7812 = vmatprep.subr.bf16.mxu0 %v16712_v35  ;;  %7855 = vmatprep.subr.bf16.mxu1 %v16717_v28 }
0x11ca   :  { %7813 = vmatpush1.bf16.msra.mxu0 %v16726_v45  ;;  %7856 = vmatpush1.bf16.msra.mxu1 %v16731_v55 }
0x11cb   :  { %7814 = vmatprep.subr.bf16.mxu0 %v16736_v61  ;;  %7857 = vmatprep.subr.bf16.mxu1 %v16741_v4 }
0x11ce   :  { %7815 = vmatpush1.bf16.msra.mxu0 %v16752_v27  ;;  %7858 = vmatpush1.bf16.msra.mxu1 %v16757_v12 }
0x11cf   :  { %7816 = vmatprep.subr.bf16.mxu0 %v16809_v17  ;;  %7859 = vmatprep.subr.bf16.mxu1 %v16821_v23 }
0x11d2   :  { %7817 = vmatpush1.bf16.msra.mxu0 %v16804_v5  ;;  %7860 = vmatpush1.bf16.msra.mxu1 %v16814_v1 }
0x11d3   :  { %7818 = vmatprep.subr.bf16.mxu0 %v16826_v18  ;;  %7861 = vmatprep.subr.bf16.mxu1 %v16832_v36 }
0x11d6   :  { %7819 = vmatpush1.bf16.msra.mxu0 %v16839_v56  ;;  %7862 = vmatpush1.bf16.msra.mxu1 %v16847_v52 }
0x11d7   :  { %7820 = vmatprep.subr.bf16.mxu0 %v16870_v31  ;;  %7863 = vmatprep.subr.bf16.mxu1 %v16875_v10 }
0x11da   :  { %7821 = vmatpush1.bf16.msra.mxu0 %v16880_v54  ;;  %7864 = vmatpush1.bf16.msra.mxu1 %v16885_v32 }
0x11db   :  { %7822 = vmatprep.subr.bf16.mxu0 %v16894_v34  ;;  %7865 = vmatprep.subr.bf16.mxu1 %v16899_v50 }
0x11de   :  { %7823 = vmatpush1.bf16.msra.mxu0 %v16904_v40  ;;  %7866 = vmatpush1.bf16.msra.mxu1 %v16909_v57 }
0x1294   :  { %v7489_v0 = vpop.f32.mrb[72].mxu0  ;;  %v7532_v2 = vpop.f32.mrb[88].mxu1 }
0x1295   :  { %v13467_v58 = vadd.f32 %v7489_v0, %v16936_v37  ;;  %v7491_v3 = vpop.f32.mrb[73].mxu0  ;;  %v7534_v30 = vpop.f32.mrb[89].mxu1  ;;  %v13527_v11 = vadd.f32 %v7532_v2, %v16940_v25 }
0x1296   :  { %v13468_v44 = vadd.f32 %v7491_v3, %v18328_v48  ;;  %v7493_v35 = vpop.f32.mrb[74].mxu0  ;;  %v7536_v28 = vpop.f32.mrb[90].mxu1  ;;  %v13528_v47 = vadd.f32 %v7534_v30, %v16945_v20 }
0x1297   :  { %v7561_v45 = vmul.f32 0.5, %v13467_v58  ;;  %v13469_v55 = vadd.f32 %v7493_v35, %v16936_v37  ;;  %v7495_v61 = vpop.f32.mrb[75].mxu0  ;;  %v7538_v4 = vpop.f32.mrb[91].mxu1  ;;  %v13529_v59 = vadd.f32 %v7536_v28, %v16940_v25 }
0x1298   :  { %v7585_v27 = vmul.f32 0.5, %v13468_v44  ;;  %v13470_v12 = vadd.f32 %v7495_v61, %v18328_v48  ;;  %v13530_v14 = vadd.f32 %v7538_v4, %v16945_v20  ;;  %v7575_v13 = vmul.f32 0.5, %v13528_v47  ;;  %v17109_v47 = vld [vmem:[%s18240_s5 + $0x20] ss:$16 sps:$4 sm:$0xff]  }
0x1299   :  { %14598 = vtanh.f32 %v7561_v45  ;;  %v7562_v29 = vmul.f32 0.5, %v13469_v55 }
0x129a   :  { %14600 = vtanh.f32 %v7585_v27  ;;  %v7586_v8 = vmul.f32 0.5, %v13470_v12  ;;  %v7576_v53 = vmul.f32 0.5, %v13530_v14  ;;  %v17080_v12 = vld [vmem:[%s18240_s5 + $0xc] ss:$16 sps:$4 sm:$0xff]   ;;  %v17114_v14 = vld [vmem:[%s18240_s5 + $0x28] ss:$16 sps:$4 sm:$0xff]  }
0x129b   :  { %14602 = vtanh.f32 %v7562_v29  ;;  %v17090_v29 = vld [vmem:[%s18240_s5 + $0x8] ss:$16 sps:$4 sm:$0xff]   ;;  %8204 = vmatprep.subr.bf16.mxu1 %v17080_v12 }
0x129c   :  { %14604 = vtanh.f32 %v13527_v11  ;;  %v17085_v11 = vld [vmem:[%s18240_s5] ss:$16 sps:$4 sm:$0xff]  }
0x129d   :  { %14606 = vtanh.f32 %v7586_v8  ;;  %v17099_v8 = vld [vmem:[%s18240_s5 + $0x24] ss:$16 sps:$4 sm:$0xff]  }
0x129e   :  { %14608 = vtanh.f32 %v13529_v59  ;;  %v17104_v59 = vld [vmem:[%s18240_s5 + $0x2c] ss:$16 sps:$4 sm:$0xff]  }
0x129f   :  { %14610 = vtanh.f32 %v7575_v13  ;;  %v17138_v13 = vld [vmem:[%s18240_s5 + $0x48] ss:$16 sps:$4 sm:$0xff]  }
0x12a0   :  { %14612 = vtanh.f32 %v7576_v53  ;;  %v17152_v53 = vld [vmem:[%s18240_s5 + $0x6c] ss:$16 sps:$4 sm:$0xff]  }
0x12a3   :  { %v14599_v39 = vpop.eup %14598 }
0x12a4   :  { %v14601_v60 = vpop.eup %14600  ;;  %v7565_v33 = vmul.f32 0.5, %v14599_v39  ;;  %v17123_v39 = vld [vmem:[%s18240_s5 + $0x44] ss:$16 sps:$4 sm:$0xff]  }
0x12a5   :  { %v7589_v46 = vmul.f32 0.5, %v14601_v60  ;;  %v14603_v22 = vpop.eup %14602  ;;  %v17128_v60 = vld [vmem:[%s18240_s5 + $0x4c] ss:$16 sps:$4 sm:$0xff]  }
0x12a6   :  { %v7567_v16 = vadd.f32 0.5, %v7565_v33  ;;  %v14605_v26 = vpop.eup %14604  ;;  %v7566_v6 = vmul.f32 0.5, %v14603_v22  ;;  %v17133_v33 = vld [vmem:[%s18240_s5 + $0x40] ss:$16 sps:$4 sm:$0xff]  }
0x12a7   :  { %v7591_v62 = vadd.f32 0.5, %v7589_v46  ;;  %v14607_v49 = vpop.eup %14606  ;;  %v17147_v46 = vld [vmem:[%s18240_s5 + $0x64] ss:$16 sps:$4 sm:$0xff]   ;;  %v17157_v22 = vld [vmem:[%s18240_s5 + $0x60] ss:$16 sps:$4 sm:$0xff]  }
0x12a8   :  { %v7595_v63 = vmul.f32 %v14605_v26, %v7567_v16  ;;  %v7568_v21 = vadd.f32 0.5, %v7566_v6  ;;  %v7590_v43 = vmul.f32 0.5, %v14607_v49  ;;  %v14609_v41 = vpop.eup %14608  ;;  %v17162_v16 = vld [vmem:[%s18240_s5 + $0x68] ss:$16 sps:$4 sm:$0xff]  }
0x12a9   :  { %v7593_v51 = vmul.f32 %v7591_v62, %v17007_v7  ;;  %v14611_v3 = vpop.eup %14610 }
0x12aa   :  { %v7592_v24 = vadd.f32 0.5, %v7590_v43  ;;  %v7596_v0 = vmul.f32 %v14609_v41, %v7568_v21  ;;  %v14613_v30 = vpop.eup %14612  ;;  %v7579_v44 = vmul.f32 0.5, %v14611_v3 }
0x12ab   :  { %v17059_v9 = vadd.f32 %v7595_v63, %v7593_v51  ;;  %v7580_v7 = vmul.f32 0.5, %v14613_v30 }
0x12ac   :  { %v7594_v2 = vmul.f32 %v7592_v24, %v17011_v38  ;;  %v7581_v28 = vadd.f32 0.5, %v7579_v44  ;;  %v17075_v38 = vld [vmem:[%s18240_s5 + $0x4] ss:$16 sps:$4 sm:$0xff]  }
0x12ad   :  { %14614 = vtanh.f32 %v17059_v9  ;;  %v7582_v45 = vadd.f32 0.5, %v7580_v7  ;;  %8161 = vmatprep.subr.bf16.mxu0 %v17075_v38 }
0x12ae   :  { %v17063_v58 = vadd.f32 %v7596_v0, %v7594_v2 }
0x12b0   :  { %14616 = vtanh.f32 %v17063_v58 }
0x12b7   :  { %v14615_v35 = vpop.eup %14614 }
0x12b8   :  { %v7601_v61 = vmul.f32 %v14615_v35, %v7581_v28 }
0x12ba   :  { %v14617_v55 = vpop.eup %14616 }
0x12bb   :  { %v7602_v4 = vmul.f32 %v14617_v55, %v7582_v45 }
0x12bd   :  { %v17066_v27 = vpack.c.bf16 %v7602_v4, %v7601_v61 }
0x12bf   :  { %18329 = vst [vmem:[#allocation7_spill] sm:$0xff] %v17066_v27  ;;  %7841 = vmatmul.mubr.bf16.vlgmr.msra.gmra.mrb[76].mxu0 %v17066_v27  ;;  %7884 = vmatmul.mubr.bf16.vlgmr.msra.gmra.mrb[92].mxu1 %v17066_v27 }
0x12c0   :  { %8193 = vmatprep.mubr.bf16.mxu0 %v18293_v15  ;;  %8236 = vmatprep.mubr.bf16.mxu1 %v18293_v15 }
0x12c1   :  { %8162 = vmatpush1.bf16.msra.mxu0 %v17085_v11  ;;  %8205 = vmatpush1.bf16.msra.mxu1 %v17090_v29 }
0x12c2   :  { %8163 = vmatprep.subr.bf16.mxu0 %v17099_v8  ;;  %8206 = vmatprep.subr.bf16.mxu1 %v17104_v59 }
0x12c5   :  { %8164 = vmatpush1.bf16.msra.mxu0 %v17109_v47  ;;  %8207 = vmatpush1.bf16.msra.mxu1 %v17114_v14 }
0x12c6   :  { %8165 = vmatprep.subr.bf16.mxu0 %v17123_v39  ;;  %8208 = vmatprep.subr.bf16.mxu1 %v17128_v60 }
0x12c9   :  { %8166 = vmatpush1.bf16.msra.mxu0 %v17133_v33  ;;  %8209 = vmatpush1.bf16.msra.mxu1 %v17138_v13 }
0x12ca   :  { %8167 = vmatprep.subr.bf16.mxu0 %v17147_v46  ;;  %8210 = vmatprep.subr.bf16.mxu1 %v17152_v53 }
0x12cd   :  { %8168 = vmatpush1.bf16.msra.mxu0 %v17157_v22  ;;  %8211 = vmatpush1.bf16.msra.mxu1 %v17162_v16 }
0x12ce   :  { %8169 = vmatprep.subr.bf16.mxu0 %v16809_v17  ;;  %8212 = vmatprep.subr.bf16.mxu1 %v16821_v23 }
0x12d1   :  { %8170 = vmatpush1.bf16.msra.mxu0 %v16804_v5  ;;  %8213 = vmatpush1.bf16.msra.mxu1 %v16814_v1 }
0x12d2   :  { %8171 = vmatprep.subr.bf16.mxu0 %v16826_v18  ;;  %8214 = vmatprep.subr.bf16.mxu1 %v16832_v36 }
0x12d5   :  { %8172 = vmatpush1.bf16.msra.mxu0 %v16839_v56  ;;  %8215 = vmatpush1.bf16.msra.mxu1 %v16847_v52 }
0x12d6   :  { %8173 = vmatprep.subr.bf16.mxu0 %v16870_v31  ;;  %8216 = vmatprep.subr.bf16.mxu1 %v16875_v10 }
0x12d9   :  { %8174 = vmatpush1.bf16.msra.mxu0 %v16880_v54  ;;  %8217 = vmatpush1.bf16.msra.mxu1 %v16885_v32 }
0x12da   :  { %8175 = vmatprep.subr.bf16.mxu0 %v16894_v34  ;;  %8218 = vmatprep.subr.bf16.mxu1 %v16899_v50 }
0x12dd   :  { %8176 = vmatpush1.bf16.msra.mxu0 %v16904_v40  ;;  %8219 = vmatpush1.bf16.msra.mxu1 %v16909_v57 }
0x12de   :  { %8514 = vmatprep.subr.bf16.mxu0 %v17075_v38  ;;  %8557 = vmatprep.subr.bf16.mxu1 %v17080_v12 }
0x1392   :  { %v7842_v5 = vpop.f32.mrb[76].mxu0  ;;  %v7885_v17 = vpop.f32.mrb[92].mxu1 }
0x1393   :  { %v13471_v1 = vadd.f32 %v7842_v5, %v16936_v37  ;;  %v7844_v23 = vpop.f32.mrb[77].mxu0  ;;  %v7887_v18 = vpop.f32.mrb[93].mxu1  ;;  %v13531_v40 = vadd.f32 %v7885_v17, %v16940_v25 }
0x1394   :  { %v13472_v36 = vadd.f32 %v7844_v23, %v18328_v48  ;;  %v7846_v56 = vpop.f32.mrb[78].mxu0  ;;  %v7889_v52 = vpop.f32.mrb[94].mxu1  ;;  %v13532_v6 = vadd.f32 %v7887_v18, %v16945_v20 }
0x1395   :  { %v7914_v31 = vmul.f32 0.5, %v13471_v1  ;;  %v13473_v10 = vadd.f32 %v7846_v56, %v16936_v37  ;;  %v7848_v54 = vpop.f32.mrb[79].mxu0  ;;  %v7891_v32 = vpop.f32.mrb[95].mxu1  ;;  %v13533_v62 = vadd.f32 %v7889_v52, %v16940_v25 }
0x1396   :  { %v7938_v34 = vmul.f32 0.5, %v13472_v36  ;;  %v13474_v50 = vadd.f32 %v7848_v54, %v18328_v48  ;;  %v13534_v49 = vadd.f32 %v7891_v32, %v16945_v20  ;;  %v7928_v43 = vmul.f32 0.5, %v13532_v6  ;;  %v17254_v6 = vld [vmem:[%s18240_s5 + $0xac] ss:$16 sps:$4 sm:$0xff]  }
0x1397   :  { %14618 = vtanh.f32 %v7914_v31  ;;  %v7915_v57 = vmul.f32 0.5, %v13473_v10 }
0x1398   :  { %14620 = vtanh.f32 %v7938_v34  ;;  %v7939_v26 = vmul.f32 0.5, %v13474_v50  ;;  %v7929_v24 = vmul.f32 0.5, %v13534_v49  ;;  %v17259_v49 = vld [vmem:[%s18240_s5 + $0xa0] ss:$16 sps:$4 sm:$0xff]  }
0x1399   :  { %14622 = vtanh.f32 %v7915_v57  ;;  %v17235_v57 = vld [vmem:[%s18240_s5 + $0x80] ss:$16 sps:$4 sm:$0xff]  }
0x139a   :  { %14624 = vtanh.f32 %v13531_v40  ;;  %v17230_v40 = vld [vmem:[%s18240_s5 + $0x8c] ss:$16 sps:$4 sm:$0xff]  }
0x139b   :  { %14626 = vtanh.f32 %v7939_v26  ;;  %v17240_v26 = vld [vmem:[%s18240_s5 + $0x88] ss:$16 sps:$4 sm:$0xff]  }
0x139c   :  { %14628 = vtanh.f32 %v13533_v62  ;;  %v17249_v62 = vld [vmem:[%s18240_s5 + $0xa4] ss:$16 sps:$4 sm:$0xff]  }
0x139d   :  { %14630 = vtanh.f32 %v7928_v43  ;;  %v17283_v43 = vld [vmem:[%s18240_s5 + $0xc0] ss:$16 sps:$4 sm:$0xff]  }
0x139e   :  { %14632 = vtanh.f32 %v7929_v24  ;;  %v17297_v24 = vld [vmem:[%s18240_s5 + $0xe0] ss:$16 sps:$4 sm:$0xff]  }
0x13a1   :  { %v14619_v63 = vpop.eup %14618 }
0x13a2   :  { %v14621_v51 = vpop.eup %14620  ;;  %v7918_v21 = vmul.f32 0.5, %v14619_v63  ;;  %v17264_v63 = vld [vmem:[%s18240_s5 + $0xa8] ss:$16 sps:$4 sm:$0xff]  }
0x13a3   :  { %v7942_v41 = vmul.f32 0.5, %v14621_v51  ;;  %v14623_v0 = vpop.eup %14622  ;;  %v17273_v51 = vld [vmem:[%s18240_s5 + $0xc4] ss:$16 sps:$4 sm:$0xff]  }
0x13a4   :  { %v7920_v2 = vadd.f32 0.5, %v7918_v21  ;;  %v14625_v3 = vpop.eup %14624  ;;  %v7919_v44 = vmul.f32 0.5, %v14623_v0  ;;  %v17278_v21 = vld [vmem:[%s18240_s5 + $0xcc] ss:$16 sps:$4 sm:$0xff]   ;;  %v17302_v0 = vld [vmem:[%s18240_s5 + $0xe4] ss:$16 sps:$4 sm:$0xff]  }
0x13a5   :  { %v7944_v30 = vadd.f32 0.5, %v7942_v41  ;;  %v14627_v7 = vpop.eup %14626  ;;  %v17288_v41 = vld [vmem:[%s18240_s5 + $0xc8] ss:$16 sps:$4 sm:$0xff]  }
0x13a6   :  { %v7948_v35 = vmul.f32 %v14625_v3, %v7920_v2  ;;  %v7921_v45 = vadd.f32 0.5, %v7919_v44  ;;  %v7943_v55 = vmul.f32 0.5, %v14627_v7  ;;  %v14629_v61 = vpop.eup %14628  ;;  %v17307_v2 = vld [vmem:[%s18240_s5 + $0xe8] ss:$16 sps:$4 sm:$0xff]   ;;  %v17312_v3 = vld [vmem:[%s18240_s5 + $0xec] ss:$16 sps:$4 sm:$0xff]  }
0x13a7   :  { %v7946_v28 = vmul.f32 %v7944_v30, %v17059_v9  ;;  %v14631_v18 = vpop.eup %14630 }
0x13a8   :  { %v7945_v5 = vadd.f32 0.5, %v7943_v55  ;;  %v7949_v17 = vmul.f32 %v14629_v61, %v7921_v45  ;;  %v14633_v36 = vpop.eup %14632  ;;  %v7932_v56 = vmul.f32 0.5, %v14631_v18 }
0x13a9   :  { %v17195_v4 = vadd.f32 %v7948_v35, %v7946_v28  ;;  %v7933_v9 = vmul.f32 0.5, %v14633_v36 }
0x13aa   :  { %v7947_v1 = vmul.f32 %v7945_v5, %v17063_v58  ;;  %v7934_v31 = vadd.f32 0.5, %v7932_v56  ;;  %v17225_v58 = vld [vmem:[%s18240_s5 + $0x84] ss:$16 sps:$4 sm:$0xff]  }
0x13ab   :  { %14634 = vtanh.f32 %v17195_v4  ;;  %v7935_v10 = vadd.f32 0.5, %v7933_v9 }
0x13ac   :  { %v17199_v23 = vadd.f32 %v7949_v17, %v7947_v1 }
0x13ae   :  { %14636 = vtanh.f32 %v17199_v23 }
0x13b5   :  { %v14635_v52 = vpop.eup %14634 }
0x13b6   :  { %v7954_v32 = vmul.f32 %v14635_v52, %v7934_v31 }
0x13b8   :  { %v14637_v54 = vpop.eup %14636 }
0x13b9   :  { %v7955_v34 = vmul.f32 %v14637_v54, %v7935_v10 }
0x13bb   :  { %v17202_v50 = vpack.c.bf16 %v7955_v34, %v7954_v32 }
0x13bd   :  { %18330 = vst [vmem:[#allocation8_spill] sm:$0xff] %v17202_v50  ;;  %8194 = vmatmul.mubr.bf16.vlgmr.msra.gmra.mrb[80].mxu0 %v17202_v50  ;;  %8237 = vmatmul.mubr.bf16.vlgmr.msra.gmra.mrb[96].mxu1 %v17202_v50 }
0x13be   :  { %8515 = vmatpush1.bf16.msra.mxu0 %v17085_v11  ;;  %8558 = vmatpush1.bf16.msra.mxu1 %v17090_v29 }
0x13bf   :  { %8516 = vmatprep.subr.bf16.mxu0 %v17099_v8  ;;  %8559 = vmatprep.subr.bf16.mxu1 %v17104_v59 }
0x13c0   :  { %8546 = vmatprep.mubr.bf16.mxu0 %v18293_v15  ;;  %8589 = vmatprep.mubr.bf16.mxu1 %v18293_v15 }
0x13c2   :  { %8517 = vmatpush1.bf16.msra.mxu0 %v17109_v47  ;;  %8560 = vmatpush1.bf16.msra.mxu1 %v17114_v14 }
0x13c3   :  { %8518 = vmatprep.subr.bf16.mxu0 %v17123_v39  ;;  %8561 = vmatprep.subr.bf16.mxu1 %v17128_v60 }
0x13c6   :  { %8519 = vmatpush1.bf16.msra.mxu0 %v17133_v33  ;;  %8562 = vmatpush1.bf16.msra.mxu1 %v17138_v13 }
0x13c7   :  { %8520 = vmatprep.subr.bf16.mxu0 %v17147_v46  ;;  %8563 = vmatprep.subr.bf16.mxu1 %v17152_v53 }
0x13ca   :  { %8521 = vmatpush1.bf16.msra.mxu0 %v17157_v22  ;;  %8564 = vmatpush1.bf16.msra.mxu1 %v17162_v16 }
0x13cb   :  { %8522 = vmatprep.subr.bf16.mxu0 %v17225_v58  ;;  %8565 = vmatprep.subr.bf16.mxu1 %v17230_v40 }
0x13ce   :  { %8523 = vmatpush1.bf16.msra.mxu0 %v17235_v57  ;;  %8566 = vmatpush1.bf16.msra.mxu1 %v17240_v26 }
0x13cf   :  { %8524 = vmatprep.subr.bf16.mxu0 %v17249_v62  ;;  %8567 = vmatprep.subr.bf16.mxu1 %v17254_v6 }
0x13d2   :  { %8525 = vmatpush1.bf16.msra.mxu0 %v17259_v49  ;;  %8568 = vmatpush1.bf16.msra.mxu1 %v17264_v63 }
0x13d3   :  { %8526 = vmatprep.subr.bf16.mxu0 %v17273_v51  ;;  %8569 = vmatprep.subr.bf16.mxu1 %v17278_v21 }
0x13d6   :  { %8527 = vmatpush1.bf16.msra.mxu0 %v17283_v43  ;;  %8570 = vmatpush1.bf16.msra.mxu1 %v17288_v41 }
0x13d7   :  { %8528 = vmatprep.subr.bf16.mxu0 %v17302_v0  ;;  %8571 = vmatprep.subr.bf16.mxu1 %v17312_v3 }
0x13da   :  { %8529 = vmatpush1.bf16.msra.mxu0 %v17297_v24  ;;  %8572 = vmatpush1.bf16.msra.mxu1 %v17307_v2 }
0x13db   :  { %8867 = vmatprep.subr.bf16.mxu0 %v17075_v38  ;;  %8910 = vmatprep.subr.bf16.mxu1 %v17080_v12 }
0x1490   :  { %v8195_v30 = vpop.f32.mrb[80].mxu0  ;;  %v8238_v44 = vpop.f32.mrb[96].mxu1 }
0x1491   :  { %v13475_v7 = vadd.f32 %v8195_v30, %v16936_v37  ;;  %v8197_v35 = vpop.f32.mrb[81].mxu0  ;;  %v8240_v28 = vpop.f32.mrb[97].mxu1  ;;  %v13535_v9 = vadd.f32 %v8238_v44, %v16940_v25 }
0x1492   :  { %v13476_v45 = vadd.f32 %v8197_v35, %v18328_v48  ;;  %v8199_v55 = vpop.f32.mrb[82].mxu0  ;;  %v8242_v61 = vpop.f32.mrb[98].mxu1  ;;  %v13536_v54 = vadd.f32 %v8240_v28, %v16945_v20 }
0x1493   :  { %v8267_v5 = vmul.f32 0.5, %v13475_v7  ;;  %v13477_v17 = vadd.f32 %v8199_v55, %v16936_v37  ;;  %v8201_v1 = vpop.f32.mrb[83].mxu0  ;;  %v8244_v18 = vpop.f32.mrb[99].mxu1  ;;  %v13537_v10 = vadd.f32 %v8242_v61, %v16940_v25 }
0x1494   :  { %v8291_v36 = vmul.f32 0.5, %v13476_v45  ;;  %v13478_v56 = vadd.f32 %v8201_v1, %v18328_v48  ;;  %v13538_v32 = vadd.f32 %v8244_v18, %v16945_v20  ;;  %v8281_v35 = vmul.f32 0.5, %v13536_v54 }
0x1495   :  { %14638 = vtanh.f32 %v8267_v5  ;;  %v8268_v52 = vmul.f32 0.5, %v13477_v17 }
0x1496   :  { %14640 = vtanh.f32 %v8291_v36  ;;  %v8292_v31 = vmul.f32 0.5, %v13478_v56  ;;  %v8282_v55 = vmul.f32 0.5, %v13538_v32 }
0x1497   :  { %14642 = vtanh.f32 %v8268_v52 }
0x1498   :  { %14644 = vtanh.f32 %v13535_v9 }
0x1499   :  { %14646 = vtanh.f32 %v8292_v31 }
0x149a   :  { %14648 = vtanh.f32 %v13537_v10 }
0x149b   :  { %14650 = vtanh.f32 %v8281_v35 }
0x149c   :  { %14652 = vtanh.f32 %v8282_v55 }
0x149f   :  { %v14639_v34 = vpop.eup %14638 }
0x14a0   :  { %v14641_v30 = vpop.eup %14640  ;;  %v8271_v7 = vmul.f32 0.5, %v14639_v34 }
0x14a1   :  { %v8295_v45 = vmul.f32 0.5, %v14641_v30  ;;  %v14643_v44 = vpop.eup %14642 }
0x14a2   :  { %v8273_v5 = vadd.f32 0.5, %v8271_v7  ;;  %v14645_v17 = vpop.eup %14644  ;;  %v8272_v36 = vmul.f32 0.5, %v14643_v44 }
0x14a3   :  { %v8297_v1 = vadd.f32 0.5, %v8295_v45  ;;  %v14647_v56 = vpop.eup %14646 }
0x14a4   :  { %v8301_v61 = vmul.f32 %v14645_v17, %v8273_v5  ;;  %v8274_v28 = vadd.f32 0.5, %v8272_v36  ;;  %v8296_v52 = vmul.f32 0.5, %v14647_v56  ;;  %v14649_v18 = vpop.eup %14648 }
0x14a5   :  { %v8299_v9 = vmul.f32 %v8297_v1, %v17195_v4  ;;  %v14651_v30 = vpop.eup %14650 }
0x14a6   :  { %v8298_v10 = vadd.f32 0.5, %v8296_v52  ;;  %v8302_v54 = vmul.f32 %v14649_v18, %v8274_v28  ;;  %v14653_v7 = vpop.eup %14652  ;;  %v8285_v35 = vmul.f32 0.5, %v14651_v30 }
0x14a7   :  { %v17329_v31 = vadd.f32 %v8301_v61, %v8299_v9  ;;  %v8286_v4 = vmul.f32 0.5, %v14653_v7 }
0x14a8   :  { %v8300_v32 = vmul.f32 %v8298_v10, %v17199_v23  ;;  %v8287_v44 = vadd.f32 0.5, %v8285_v35 }
0x14a9   :  { %14654 = vtanh.f32 %v17329_v31  ;;  %v8288_v55 = vadd.f32 0.5, %v8286_v4 }
0x14aa   :  { %v17333_v34 = vadd.f32 %v8302_v54, %v8300_v32 }
0x14ac   :  { %14656 = vtanh.f32 %v17333_v34 }
0x14b3   :  { %v14655_v45 = vpop.eup %14654 }
0x14b4   :  { %v8307_v17 = vmul.f32 %v14655_v45, %v8287_v44 }
0x14b6   :  { %v14657_v5 = vpop.eup %14656 }
0x14b7   :  { %v8308_v1 = vmul.f32 %v14657_v5, %v8288_v55 }
0x14b9   :  { %v17336_v36 = vpack.c.bf16 %v8308_v1, %v8307_v17 }
0x14bb   :  { %18331 = vst [vmem:[#allocation9_spill] sm:$0xff] %v17336_v36  ;;  %8547 = vmatmul.mubr.bf16.vlgmr.msra.gmra.mrb[84].mxu0 %v17336_v36  ;;  %8590 = vmatmul.mubr.bf16.vlgmr.msra.gmra.mrb[100].mxu1 %v17336_v36 }
0x14bc   :  { %8868 = vmatpush1.bf16.msra.mxu0 %v17085_v11  ;;  %8911 = vmatpush1.bf16.msra.mxu1 %v17090_v29 }
0x14bd   :  { %8869 = vmatprep.subr.bf16.mxu0 %v17099_v8  ;;  %8912 = vmatprep.subr.bf16.mxu1 %v17104_v59 }
0x14be   :  { %8899 = vmatprep.mubr.bf16.mxu0 %v18293_v15  ;;  %8942 = vmatprep.mubr.bf16.mxu1 %v18293_v15 }
0x14c0   :  { %8870 = vmatpush1.bf16.msra.mxu0 %v17109_v47  ;;  %8913 = vmatpush1.bf16.msra.mxu1 %v17114_v14 }
0x14c1   :  { %8871 = vmatprep.subr.bf16.mxu0 %v17123_v39  ;;  %8914 = vmatprep.subr.bf16.mxu1 %v17128_v60 }
0x14c4   :  { %8872 = vmatpush1.bf16.msra.mxu0 %v17133_v33  ;;  %8915 = vmatpush1.bf16.msra.mxu1 %v17138_v13 }
0x14c5   :  { %8873 = vmatprep.subr.bf16.mxu0 %v17147_v46  ;;  %8916 = vmatprep.subr.bf16.mxu1 %v17152_v53 }
0x14c8   :  { %8874 = vmatpush1.bf16.msra.mxu0 %v17157_v22  ;;  %8917 = vmatpush1.bf16.msra.mxu1 %v17162_v16 }
0x14c9   :  { %8875 = vmatprep.subr.bf16.mxu0 %v17225_v58  ;;  %8918 = vmatprep.subr.bf16.mxu1 %v17230_v40 }
0x14cc   :  { %8876 = vmatpush1.bf16.msra.mxu0 %v17235_v57  ;;  %8919 = vmatpush1.bf16.msra.mxu1 %v17240_v26 }
0x14cd   :  { %8877 = vmatprep.subr.bf16.mxu0 %v17249_v62  ;;  %8920 = vmatprep.subr.bf16.mxu1 %v17254_v6 }
0x14d0   :  { %8878 = vmatpush1.bf16.msra.mxu0 %v17259_v49  ;;  %8921 = vmatpush1.bf16.msra.mxu1 %v17264_v63 }
0x14d1   :  { %8879 = vmatprep.subr.bf16.mxu0 %v17273_v51  ;;  %8922 = vmatprep.subr.bf16.mxu1 %v17278_v21 }
0x14d4   :  { %8880 = vmatpush1.bf16.msra.mxu0 %v17283_v43  ;;  %8923 = vmatpush1.bf16.msra.mxu1 %v17288_v41 }
0x14d5   :  { %8881 = vmatprep.subr.bf16.mxu0 %v17302_v0  ;;  %8924 = vmatprep.subr.bf16.mxu1 %v17312_v3 }
0x14d8   :  { %8882 = vmatpush1.bf16.msra.mxu0 %v17297_v24  ;;  %8925 = vmatpush1.bf16.msra.mxu1 %v17307_v2 }
0x14d9   :  { %9220 = vmatprep.subr.bf16.mxu0 %v17075_v38  ;;  %9263 = vmatprep.subr.bf16.mxu1 %v17080_v12 }
0x158e   :  { %v8548_v23 = vpop.f32.mrb[84].mxu0  ;;  %v8591_v56 = vpop.f32.mrb[100].mxu1 }
0x158f   :  { %v13479_v61 = vadd.f32 %v8548_v23, %v16936_v37  ;;  %v8550_v9 = vpop.f32.mrb[85].mxu0  ;;  %v8593_v28 = vpop.f32.mrb[101].mxu1  ;;  %v13539_v12 = vadd.f32 %v8591_v56, %v16940_v25 }
0x1590   :  { %v13480_v52 = vadd.f32 %v8550_v9, %v18328_v48  ;;  %v8552_v18 = vpop.f32.mrb[86].mxu0  ;;  %v8595_v10 = vpop.f32.mrb[102].mxu1  ;;  %v13540_v55 = vadd.f32 %v8593_v28, %v16945_v20 }
0x1591   :  { %v8620_v54 = vmul.f32 0.5, %v13479_v61  ;;  %v13481_v32 = vadd.f32 %v8552_v18, %v16936_v37  ;;  %v8554_v30 = vpop.f32.mrb[87].mxu0  ;;  %v8597_v7 = vpop.f32.mrb[103].mxu1  ;;  %v13541_v44 = vadd.f32 %v8595_v10, %v16940_v25 }
0x1592   :  { %v8644_v35 = vmul.f32 0.5, %v13480_v52  ;;  %v13482_v38 = vadd.f32 %v8554_v30, %v18328_v48  ;;  %v13542_v5 = vadd.f32 %v8597_v7, %v16945_v20  ;;  %v8634_v61 = vmul.f32 0.5, %v13540_v55 }
0x1593   :  { %14658 = vtanh.f32 %v8620_v54  ;;  %v8621_v4 = vmul.f32 0.5, %v13481_v32 }
0x1594   :  { %14660 = vtanh.f32 %v8644_v35  ;;  %v8645_v45 = vmul.f32 0.5, %v13482_v38  ;;  %v8635_v52 = vmul.f32 0.5, %v13542_v5 }
0x1595   :  { %14662 = vtanh.f32 %v8621_v4 }
0x1596   :  { %14664 = vtanh.f32 %v13539_v12 }
0x1597   :  { %14666 = vtanh.f32 %v8645_v45 }
0x1598   :  { %14668 = vtanh.f32 %v13541_v44 }
0x1599   :  { %14670 = vtanh.f32 %v8634_v61 }
0x159a   :  { %14672 = vtanh.f32 %v8635_v52 }
0x159d   :  { %v14659_v17 = vpop.eup %14658 }
0x159e   :  { %v14661_v1 = vpop.eup %14660  ;;  %v8624_v23 = vmul.f32 0.5, %v14659_v17 }
0x159f   :  { %v8648_v9 = vmul.f32 0.5, %v14661_v1  ;;  %v14663_v56 = vpop.eup %14662 }
0x15a0   :  { %v8626_v18 = vadd.f32 0.5, %v8624_v23  ;;  %v14665_v54 = vpop.eup %14664  ;;  %v8625_v30 = vmul.f32 0.5, %v14663_v56 }
0x15a1   :  { %v8650_v32 = vadd.f32 0.5, %v8648_v9  ;;  %v14667_v35 = vpop.eup %14666 }
0x15a2   :  { %v8654_v10 = vmul.f32 %v14665_v54, %v8626_v18  ;;  %v8627_v28 = vadd.f32 0.5, %v8625_v30  ;;  %v8649_v12 = vmul.f32 0.5, %v14667_v35  ;;  %v14669_v7 = vpop.eup %14668 }
0x15a3   :  { %v8652_v38 = vmul.f32 %v8650_v32, %v17329_v31  ;;  %v14671_v17 = vpop.eup %14670 }
0x15a4   :  { %v8651_v45 = vadd.f32 0.5, %v8649_v12  ;;  %v8655_v44 = vmul.f32 %v14669_v7, %v8627_v28  ;;  %v14673_v1 = vpop.eup %14672  ;;  %v8638_v23 = vmul.f32 0.5, %v14671_v17 }
0x15a5   :  { %v17383_v4 = vadd.f32 %v8654_v10, %v8652_v38  ;;  %v8639_v31 = vmul.f32 0.5, %v14673_v1 }
0x15a6   :  { %v8653_v55 = vmul.f32 %v8651_v45, %v17333_v34  ;;  %v8640_v9 = vadd.f32 0.5, %v8638_v23 }
0x15a7   :  { %14674 = vtanh.f32 %v17383_v4  ;;  %v8641_v52 = vadd.f32 0.5, %v8639_v31 }
0x15a8   :  { %v17387_v5 = vadd.f32 %v8655_v44, %v8653_v55 }
0x15aa   :  { %14676 = vtanh.f32 %v17387_v5 }
0x15b1   :  { %v14675_v61 = vpop.eup %14674 }
0x15b2   :  { %v8660_v18 = vmul.f32 %v14675_v61, %v8640_v9 }
0x15b4   :  { %v14677_v56 = vpop.eup %14676 }
0x15b5   :  { %v8661_v54 = vmul.f32 %v14677_v56, %v8641_v52 }
0x15b7   :  { %v17390_v32 = vpack.c.bf16 %v8661_v54, %v8660_v18 }
0x15b9   :  { %18332 = vst [vmem:[#allocation10_spill] sm:$0xff] %v17390_v32  ;;  %8900 = vmatmul.mubr.bf16.vlgmr.msra.gmra.mrb[88].mxu0 %v17390_v32  ;;  %8943 = vmatmul.mubr.bf16.vlgmr.msra.gmra.mrb[104].mxu1 %v17390_v32 }
0x15ba   :  { %9221 = vmatpush1.bf16.msra.mxu0 %v17085_v11  ;;  %9264 = vmatpush1.bf16.msra.mxu1 %v17090_v29 }
0x15bb   :  { %9222 = vmatprep.subr.bf16.mxu0 %v17099_v8  ;;  %9265 = vmatprep.subr.bf16.mxu1 %v17104_v59 }
0x15bc   :  { %9252 = vmatprep.mubr.bf16.mxu0 %v18293_v15  ;;  %9295 = vmatprep.mubr.bf16.mxu1 %v18293_v15 }
0x15be   :  { %9223 = vmatpush1.bf16.msra.mxu0 %v17109_v47  ;;  %9266 = vmatpush1.bf16.msra.mxu1 %v17114_v14 }
0x15bf   :  { %9224 = vmatprep.subr.bf16.mxu0 %v17123_v39  ;;  %9267 = vmatprep.subr.bf16.mxu1 %v17128_v60 }
0x15c2   :  { %9225 = vmatpush1.bf16.msra.mxu0 %v17133_v33  ;;  %9268 = vmatpush1.bf16.msra.mxu1 %v17138_v13 }
0x15c3   :  { %9226 = vmatprep.subr.bf16.mxu0 %v17147_v46  ;;  %9269 = vmatprep.subr.bf16.mxu1 %v17152_v53 }
0x15c6   :  { %9227 = vmatpush1.bf16.msra.mxu0 %v17157_v22  ;;  %9270 = vmatpush1.bf16.msra.mxu1 %v17162_v16 }
0x15c7   :  { %9228 = vmatprep.subr.bf16.mxu0 %v17225_v58  ;;  %9271 = vmatprep.subr.bf16.mxu1 %v17230_v40 }
0x15ca   :  { %9229 = vmatpush1.bf16.msra.mxu0 %v17235_v57  ;;  %9272 = vmatpush1.bf16.msra.mxu1 %v17240_v26 }
0x15cb   :  { %9230 = vmatprep.subr.bf16.mxu0 %v17249_v62  ;;  %9273 = vmatprep.subr.bf16.mxu1 %v17254_v6 }
0x15ce   :  { %9231 = vmatpush1.bf16.msra.mxu0 %v17259_v49  ;;  %9274 = vmatpush1.bf16.msra.mxu1 %v17264_v63 }
0x15cf   :  { %9232 = vmatprep.subr.bf16.mxu0 %v17273_v51  ;;  %9275 = vmatprep.subr.bf16.mxu1 %v17278_v21 }
0x15d2   :  { %9233 = vmatpush1.bf16.msra.mxu0 %v17283_v43  ;;  %9276 = vmatpush1.bf16.msra.mxu1 %v17288_v41 }
0x15d3   :  { %9234 = vmatprep.subr.bf16.mxu0 %v17302_v0  ;;  %9277 = vmatprep.subr.bf16.mxu1 %v17312_v3 }
0x15d6   :  { %9235 = vmatpush1.bf16.msra.mxu0 %v17297_v24  ;;  %9278 = vmatpush1.bf16.msra.mxu1 %v17307_v2 }
0x168c   :  { %v8901_v11 = vpop.f32.mrb[88].mxu0  ;;  %v8944_v29 = vpop.f32.mrb[104].mxu1 }
0x168d   :  { %v13483_v8 = vadd.f32 %v8901_v11, %v16936_v37  ;;  %v8903_v59 = vpop.f32.mrb[89].mxu0  ;;  %v8946_v47 = vpop.f32.mrb[105].mxu1  ;;  %v13543_v34 = vadd.f32 %v8944_v29, %v16940_v25 }
0x168e   :  { %v13484_v14 = vadd.f32 %v8903_v59, %v18328_v48  ;;  %v8905_v39 = vpop.f32.mrb[90].mxu0  ;;  %v8948_v60 = vpop.f32.mrb[106].mxu1  ;;  %v13544_v38 = vadd.f32 %v8946_v47, %v16945_v20 }
0x168f   :  { %v8973_v33 = vmul.f32 0.5, %v13483_v8  ;;  %v13485_v13 = vadd.f32 %v8905_v39, %v16936_v37  ;;  %v8907_v46 = vpop.f32.mrb[91].mxu0  ;;  %v8950_v53 = vpop.f32.mrb[107].mxu1  ;;  %v13545_v10 = vadd.f32 %v8948_v60, %v16940_v25 }
0x1690   :  { %v8997_v22 = vmul.f32 0.5, %v13484_v14  ;;  %v13486_v16 = vadd.f32 %v8907_v46, %v18328_v48  ;;  %v13546_v28 = vadd.f32 %v8950_v53, %v16945_v20  ;;  %v8987_v44 = vmul.f32 0.5, %v13544_v38  ;;  %v17461_v38 = vld [vmem:[%s18240_s5] ss:$16 sps:$4 sm:$0xff]  }
0x1691   :  { %14678 = vtanh.f32 %v8973_v33  ;;  %v8974_v30 = vmul.f32 0.5, %v13485_v13 }
0x1692   :  { %14680 = vtanh.f32 %v8997_v22  ;;  %v8998_v35 = vmul.f32 0.5, %v13486_v16  ;;  %v8988_v17 = vmul.f32 0.5, %v13546_v28  ;;  %v17466_v28 = vld [vmem:[%s18240_s5 + $0x8] ss:$16 sps:$4 sm:$0xff]  }
0x1693   :  { %14682 = vtanh.f32 %v8974_v30 }
0x1694   :  { %14684 = vtanh.f32 %v13543_v34 }
0x1695   :  { %14686 = vtanh.f32 %v8998_v35 }
0x1696   :  { %14688 = vtanh.f32 %v13545_v10  ;;  %v17456_v10 = vld [vmem:[%s18240_s5 + $0xc] ss:$16 sps:$4 sm:$0xff]  }
0x1697   :  { %14690 = vtanh.f32 %v8987_v44  ;;  %9616 = vmatprep.subr.bf16.mxu1 %v17456_v10  ;;  %v17490_v44 = vld [vmem:[%s18240_s5 + $0x28] ss:$16 sps:$4 sm:$0xff]  }
0x1698   :  { %14692 = vtanh.f32 %v8988_v17  ;;  %v17504_v17 = vld [vmem:[%s18240_s5 + $0x4c] ss:$16 sps:$4 sm:$0xff]  }
0x169b   :  { %v14679_v12 = vpop.eup %14678 }
0x169c   :  { %v14681_v7 = vpop.eup %14680  ;;  %v8977_v45 = vmul.f32 0.5, %v14679_v12  ;;  %v17475_v12 = vld [vmem:[%s18240_s5 + $0x24] ss:$16 sps:$4 sm:$0xff]  }
0x169d   :  { %v9001_v55 = vmul.f32 0.5, %v14681_v7  ;;  %v14683_v1 = vpop.eup %14682  ;;  %v17480_v7 = vld [vmem:[%s18240_s5 + $0x2c] ss:$16 sps:$4 sm:$0xff]  }
0x169e   :  { %v8979_v23 = vadd.f32 0.5, %v8977_v45  ;;  %v14685_v31 = vpop.eup %14684  ;;  %v8978_v9 = vmul.f32 0.5, %v14683_v1  ;;  %v17485_v45 = vld [vmem:[%s18240_s5 + $0x20] ss:$16 sps:$4 sm:$0xff]  }
0x169f   :  { %v9003_v61 = vadd.f32 0.5, %v9001_v55  ;;  %v14687_v52 = vpop.eup %14686  ;;  %v17499_v55 = vld [vmem:[%s18240_s5 + $0x44] ss:$16 sps:$4 sm:$0xff]   ;;  %v17509_v1 = vld [vmem:[%s18240_s5 + $0x40] ss:$16 sps:$4 sm:$0xff]  }
0x16a0   :  { %v9007_v56 = vmul.f32 %v14685_v31, %v8979_v23  ;;  %v8980_v54 = vadd.f32 0.5, %v8978_v9  ;;  %v9002_v11 = vmul.f32 0.5, %v14687_v52  ;;  %v14689_v29 = vpop.eup %14688  ;;  %v17514_v23 = vld [vmem:[%s18240_s5 + $0x48] ss:$16 sps:$4 sm:$0xff]   ;;  %v17523_v31 = vld [vmem:[%s18240_s5 + $0x64] ss:$16 sps:$4 sm:$0xff]  }
0x16a1   :  { %v9005_v18 = vmul.f32 %v9003_v61, %v17383_v4  ;;  %v14691_v60 = vpop.eup %14690  ;;  %v17528_v61 = vld [vmem:[%s18240_s5 + $0x6c] ss:$16 sps:$4 sm:$0xff]   ;;  %v17533_v9 = vld [vmem:[%s18240_s5 + $0x60] ss:$16 sps:$4 sm:$0xff]   ;;  %v17538_v52 = vld [vmem:[%s18240_s5 + $0x68] ss:$16 sps:$4 sm:$0xff]  }
0x16a2   :  { %v9004_v59 = vadd.f32 0.5, %v9002_v11  ;;  %v9008_v47 = vmul.f32 %v14689_v29, %v8980_v54  ;;  %v14693_v33 = vpop.eup %14692  ;;  %v8991_v13 = vmul.f32 0.5, %v14691_v60 }
0x16a3   :  { %v17435_v8 = vadd.f32 %v9007_v56, %v9005_v18  ;;  %v8992_v4 = vmul.f32 0.5, %v14693_v33 }
0x16a4   :  { %v9006_v14 = vmul.f32 %v9004_v59, %v17387_v5  ;;  %v8993_v53 = vadd.f32 0.5, %v8991_v13  ;;  %v17451_v5 = vld [vmem:[%s18240_s5 + $0x4] ss:$16 sps:$4 sm:$0xff]  }
0x16a5   :  { %14694 = vtanh.f32 %v17435_v8  ;;  %v8994_v22 = vadd.f32 0.5, %v8992_v4  ;;  %9573 = vmatprep.subr.bf16.mxu0 %v17451_v5 }
0x16a6   :  { %v17439_v39 = vadd.f32 %v9008_v47, %v9006_v14 }
0x16a8   :  { %14696 = vtanh.f32 %v17439_v39 }
0x16af   :  { %v14695_v46 = vpop.eup %14694 }
0x16b0   :  { %v9013_v34 = vmul.f32 %v14695_v46, %v8993_v53 }
0x16b2   :  { %v14697_v16 = vpop.eup %14696 }
0x16b3   :  { %v9014_v30 = vmul.f32 %v14697_v16, %v8994_v22 }
0x16b5   :  { %v17442_v35 = vpack.c.bf16 %v9014_v30, %v9013_v34 }
0x16b7   :  { %18333 = vst [vmem:[#allocation11_spill] sm:$0xff] %v17442_v35  ;;  %9253 = vmatmul.mubr.bf16.vlgmr.msra.gmra.mrb[92].mxu0 %v17442_v35  ;;  %9296 = vmatmul.mubr.bf16.vlgmr.msra.gmra.mrb[108].mxu1 %v17442_v35 }
0x16b8   :  { %9605 = vmatprep.mubr.bf16.mxu0 %v18293_v15  ;;  %9648 = vmatprep.mubr.bf16.mxu1 %v18293_v15 }
0x16b9   :  { %9574 = vmatpush1.bf16.msra.mxu0 %v17461_v38  ;;  %9617 = vmatpush1.bf16.msra.mxu1 %v17466_v28 }
0x16ba   :  { %9575 = vmatprep.subr.bf16.mxu0 %v17475_v12  ;;  %9618 = vmatprep.subr.bf16.mxu1 %v17480_v7 }
0x16bd   :  { %9576 = vmatpush1.bf16.msra.mxu0 %v17485_v45  ;;  %9619 = vmatpush1.bf16.msra.mxu1 %v17490_v44 }
0x16be   :  { %9577 = vmatprep.subr.bf16.mxu0 %v17499_v55  ;;  %9620 = vmatprep.subr.bf16.mxu1 %v17504_v17 }
0x16c1   :  { %9578 = vmatpush1.bf16.msra.mxu0 %v17509_v1  ;;  %9621 = vmatpush1.bf16.msra.mxu1 %v17514_v23 }
0x16c2   :  { %9579 = vmatprep.subr.bf16.mxu0 %v17523_v31  ;;  %9622 = vmatprep.subr.bf16.mxu1 %v17528_v61 }
0x16c5   :  { %9580 = vmatpush1.bf16.msra.mxu0 %v17533_v9  ;;  %9623 = vmatpush1.bf16.msra.mxu1 %v17538_v52 }
0x16c6   :  { %9581 = vmatprep.subr.bf16.mxu0 %v17225_v58  ;;  %9624 = vmatprep.subr.bf16.mxu1 %v17230_v40 }
0x16c9   :  { %9582 = vmatpush1.bf16.msra.mxu0 %v17235_v57  ;;  %9625 = vmatpush1.bf16.msra.mxu1 %v17240_v26 }
0x16ca   :  { %9583 = vmatprep.subr.bf16.mxu0 %v17249_v62  ;;  %9626 = vmatprep.subr.bf16.mxu1 %v17254_v6 }
0x16cd   :  { %9584 = vmatpush1.bf16.msra.mxu0 %v17259_v49  ;;  %9627 = vmatpush1.bf16.msra.mxu1 %v17264_v63 }
0x16ce   :  { %9585 = vmatprep.subr.bf16.mxu0 %v17273_v51  ;;  %9628 = vmatprep.subr.bf16.mxu1 %v17278_v21 }
0x16d1   :  { %9586 = vmatpush1.bf16.msra.mxu0 %v17283_v43  ;;  %9629 = vmatpush1.bf16.msra.mxu1 %v17288_v41 }
0x16d2   :  { %9587 = vmatprep.subr.bf16.mxu0 %v17302_v0  ;;  %9630 = vmatprep.subr.bf16.mxu1 %v17312_v3 }
0x16d5   :  { %9588 = vmatpush1.bf16.msra.mxu0 %v17297_v24  ;;  %9631 = vmatpush1.bf16.msra.mxu1 %v17307_v2 }
0x16d6   :  { %9926 = vmatprep.subr.bf16.mxu0 %v17451_v5  ;;  %9969 = vmatprep.subr.bf16.mxu1 %v17456_v10 }
0x178a   :  { %v9254_v58 = vpop.f32.mrb[92].mxu0  ;;  %v9297_v40 = vpop.f32.mrb[108].mxu1 }
0x178b   :  { %v13487_v57 = vadd.f32 %v9254_v58, %v16936_v37  ;;  %v9256_v26 = vpop.f32.mrb[93].mxu0  ;;  %v9299_v62 = vpop.f32.mrb[109].mxu1  ;;  %v13547_v2 = vadd.f32 %v9297_v40, %v16940_v25 }
0x178c   :  { %v13488_v6 = vadd.f32 %v9256_v26, %v18328_v48  ;;  %v9258_v49 = vpop.f32.mrb[94].mxu0  ;;  %v9301_v63 = vpop.f32.mrb[110].mxu1  ;;  %v13548_v54 = vadd.f32 %v9299_v62, %v16945_v20 }
0x178d   :  { %v9326_v51 = vmul.f32 0.5, %v13487_v57  ;;  %v13489_v21 = vadd.f32 %v9258_v49, %v16936_v37  ;;  %v9260_v43 = vpop.f32.mrb[95].mxu0  ;;  %v9303_v41 = vpop.f32.mrb[111].mxu1  ;;  %v13549_v18 = vadd.f32 %v9301_v63, %v16940_v25 }
0x178e   :  { %v9350_v24 = vmul.f32 0.5, %v13488_v6  ;;  %v13490_v0 = vadd.f32 %v9260_v43, %v18328_v48  ;;  %v13550_v11 = vadd.f32 %v9303_v41, %v16945_v20  ;;  %v9340_v14 = vmul.f32 0.5, %v13548_v54  ;;  %v17606_v54 = vld [vmem:[%s18240_s5 + $0x8c] ss:$16 sps:$4 sm:$0xff]  }
0x178f   :  { %14698 = vtanh.f32 %v9326_v51  ;;  %v9327_v3 = vmul.f32 0.5, %v13489_v21 }
0x1790   :  { %14700 = vtanh.f32 %v9350_v24  ;;  %v9351_v56 = vmul.f32 0.5, %v13490_v0  ;;  %v9341_v33 = vmul.f32 0.5, %v13550_v11  ;;  %v17611_v11 = vld [vmem:[%s18240_s5 + $0x80] ss:$16 sps:$4 sm:$0xff]  }
0x1791   :  { %14702 = vtanh.f32 %v9327_v3 }
0x1792   :  { %14704 = vtanh.f32 %v13547_v2 }
0x1793   :  { %14706 = vtanh.f32 %v9351_v56 }
0x1794   :  { %14708 = vtanh.f32 %v13549_v18 }
0x1795   :  { %14710 = vtanh.f32 %v9340_v14  ;;  %v17635_v14 = vld [vmem:[%s18240_s5 + $0xa0] ss:$16 sps:$4 sm:$0xff]  }
0x1796   :  { %14712 = vtanh.f32 %v9341_v33  ;;  %v17649_v33 = vld [vmem:[%s18240_s5 + $0xc4] ss:$16 sps:$4 sm:$0xff]  }
0x1799   :  { %v14699_v29 = vpop.eup %14698 }
0x179a   :  { %v14701_v59 = vpop.eup %14700  ;;  %v9330_v47 = vmul.f32 0.5, %v14699_v29  ;;  %v17616_v29 = vld [vmem:[%s18240_s5 + $0x88] ss:$16 sps:$4 sm:$0xff]  }
0x179b   :  { %v9354_v60 = vmul.f32 0.5, %v14701_v59  ;;  %v14703_v13 = vpop.eup %14702  ;;  %v17625_v59 = vld [vmem:[%s18240_s5 + $0xa4] ss:$16 sps:$4 sm:$0xff]  }
0x179c   :  { %v9332_v4 = vadd.f32 0.5, %v9330_v47  ;;  %v14705_v46 = vpop.eup %14704  ;;  %v9331_v22 = vmul.f32 0.5, %v14703_v13  ;;  %v17630_v47 = vld [vmem:[%s18240_s5 + $0xac] ss:$16 sps:$4 sm:$0xff]  }
0x179d   :  { %v9356_v53 = vadd.f32 0.5, %v9354_v60  ;;  %v14707_v16 = vpop.eup %14706  ;;  %v17640_v60 = vld [vmem:[%s18240_s5 + $0xa8] ss:$16 sps:$4 sm:$0xff]   ;;  %v17654_v13 = vld [vmem:[%s18240_s5 + $0xcc] ss:$16 sps:$4 sm:$0xff]  }
0x179e   :  { %v9360_v34 = vmul.f32 %v14705_v46, %v9332_v4  ;;  %v9333_v58 = vadd.f32 0.5, %v9331_v22  ;;  %v9355_v40 = vmul.f32 0.5, %v14707_v16  ;;  %v14709_v57 = vpop.eup %14708  ;;  %v17659_v4 = vld [vmem:[%s18240_s5 + $0xc0] ss:$16 sps:$4 sm:$0xff]   ;;  %v17664_v46 = vld [vmem:[%s18240_s5 + $0xc8] ss:$16 sps:$4 sm:$0xff]  }
0x179f   :  { %v9358_v30 = vmul.f32 %v9356_v53, %v17435_v8  ;;  %v14711_v51 = vpop.eup %14710  ;;  %v17673_v53 = vld [vmem:[%s18240_s5 + $0xe0] ss:$16 sps:$4 sm:$0xff]   ;;  %v17678_v22 = vld [vmem:[%s18240_s5 + $0xe4] ss:$16 sps:$4 sm:$0xff]   ;;  %v17683_v16 = vld [vmem:[%s18240_s5 + $0xe8] ss:$16 sps:$4 sm:$0xff]  }
0x17a0   :  { %v9357_v62 = vadd.f32 0.5, %v9355_v40  ;;  %v9361_v6 = vmul.f32 %v14709_v57, %v9333_v58  ;;  %v14713_v21 = vpop.eup %14712  ;;  %v9344_v43 = vmul.f32 0.5, %v14711_v51 }
0x17a1   :  { %v17571_v26 = vadd.f32 %v9360_v34, %v9358_v30  ;;  %v9345_v8 = vmul.f32 0.5, %v14713_v21  ;;  %v17688_v34 = vld [vmem:[%s18240_s5 + $0xec] ss:$16 sps:$4 sm:$0xff]  }
0x17a2   :  { %v9359_v49 = vmul.f32 %v9357_v62, %v17439_v39  ;;  %v9346_v24 = vadd.f32 0.5, %v9344_v43  ;;  %v17601_v39 = vld [vmem:[%s18240_s5 + $0x84] ss:$16 sps:$4 sm:$0xff]  }
0x17a3   :  { %14714 = vtanh.f32 %v17571_v26  ;;  %v9347_v0 = vadd.f32 0.5, %v9345_v8 }
0x17a4   :  { %v17575_v63 = vadd.f32 %v9361_v6, %v9359_v49 }
0x17a6   :  { %14716 = vtanh.f32 %v17575_v63 }
0x17ad   :  { %v14715_v41 = vpop.eup %14714 }
0x17ae   :  { %v9366_v3 = vmul.f32 %v14715_v41, %v9346_v24 }
0x17b0   :  { %v14717_v2 = vpop.eup %14716 }
0x17b1   :  { %v9367_v56 = vmul.f32 %v14717_v2, %v9347_v0 }
0x17b3   :  { %v17578_v18 = vpack.c.bf16 %v9367_v56, %v9366_v3 }
0x17b5   :  { %18334 = vst [vmem:[#allocation12_spill] sm:$0xff] %v17578_v18  ;;  %9606 = vmatmul.mubr.bf16.vlgmr.msra.gmra.mrb[96].mxu0 %v17578_v18  ;;  %9649 = vmatmul.mubr.bf16.vlgmr.msra.gmra.mrb[112].mxu1 %v17578_v18 }
0x17b6   :  { %9927 = vmatpush1.bf16.msra.mxu0 %v17461_v38  ;;  %9970 = vmatpush1.bf16.msra.mxu1 %v17466_v28 }
0x17b7   :  { %9928 = vmatprep.subr.bf16.mxu0 %v17475_v12  ;;  %9971 = vmatprep.subr.bf16.mxu1 %v17480_v7 }
0x17b8   :  { %9958 = vmatprep.mubr.bf16.mxu0 %v18293_v15  ;;  %10001 = vmatprep.mubr.bf16.mxu1 %v18293_v15 }
0x17ba   :  { %9929 = vmatpush1.bf16.msra.mxu0 %v17485_v45  ;;  %9972 = vmatpush1.bf16.msra.mxu1 %v17490_v44 }
0x17bb   :  { %9930 = vmatprep.subr.bf16.mxu0 %v17499_v55  ;;  %9973 = vmatprep.subr.bf16.mxu1 %v17504_v17 }
0x17be   :  { %9931 = vmatpush1.bf16.msra.mxu0 %v17509_v1  ;;  %9974 = vmatpush1.bf16.msra.mxu1 %v17514_v23 }
0x17bf   :  { %9932 = vmatprep.subr.bf16.mxu0 %v17523_v31  ;;  %9975 = vmatprep.subr.bf16.mxu1 %v17528_v61 }
0x17c2   :  { %9933 = vmatpush1.bf16.msra.mxu0 %v17533_v9  ;;  %9976 = vmatpush1.bf16.msra.mxu1 %v17538_v52 }
0x17c3   :  { %9934 = vmatprep.subr.bf16.mxu0 %v17601_v39  ;;  %9977 = vmatprep.subr.bf16.mxu1 %v17606_v54 }
0x17c6   :  { %9935 = vmatpush1.bf16.msra.mxu0 %v17611_v11  ;;  %9978 = vmatpush1.bf16.msra.mxu1 %v17616_v29 }
0x17c7   :  { %9936 = vmatprep.subr.bf16.mxu0 %v17625_v59  ;;  %9979 = vmatprep.subr.bf16.mxu1 %v17630_v47 }
0x17ca   :  { %9937 = vmatpush1.bf16.msra.mxu0 %v17635_v14  ;;  %9980 = vmatpush1.bf16.msra.mxu1 %v17640_v60 }
0x17cb   :  { %9938 = vmatprep.subr.bf16.mxu0 %v17649_v33  ;;  %9981 = vmatprep.subr.bf16.mxu1 %v17654_v13 }
0x17ce   :  { %9939 = vmatpush1.bf16.msra.mxu0 %v17659_v4  ;;  %9982 = vmatpush1.bf16.msra.mxu1 %v17664_v46 }
0x17cf   :  { %9940 = vmatprep.subr.bf16.mxu0 %v17678_v22  ;;  %9983 = vmatprep.subr.bf16.mxu1 %v17688_v34 }
0x17d2   :  { %9941 = vmatpush1.bf16.msra.mxu0 %v17673_v53  ;;  %9984 = vmatpush1.bf16.msra.mxu1 %v17683_v16 }
0x17d3   :  { %10279 = vmatprep.subr.bf16.mxu0 %v17451_v5  ;;  %10322 = vmatprep.subr.bf16.mxu1 %v17456_v10 }
0x1888   :  { %v9607_v30 = vpop.f32.mrb[96].mxu0  ;;  %v9650_v58 = vpop.f32.mrb[112].mxu1 }
0x1889   :  { %v13491_v40 = vadd.f32 %v9607_v30, %v16936_v37  ;;  %v9609_v57 = vpop.f32.mrb[97].mxu0  ;;  %v9652_v62 = vpop.f32.mrb[113].mxu1  ;;  %v13551_v2 = vadd.f32 %v9650_v58, %v16940_v25 }
0x188a   :  { %v13492_v6 = vadd.f32 %v9609_v57, %v18328_v48  ;;  %v9611_v49 = vpop.f32.mrb[98].mxu0  ;;  %v9654_v51 = vpop.f32.mrb[114].mxu1 }
0x188b   :  { %v9679_v21 = vmul.f32 0.5, %v13491_v40  ;;  %v13493_v43 = vadd.f32 %v9611_v49, %v16936_v37  ;;  %v9613_v8 = vpop.f32.mrb[99].mxu0  ;;  %v9656_v41 = vpop.f32.mrb[115].mxu1  ;;  %v13553_v30 = vadd.f32 %v9654_v51, %v16940_v25  ;;  %v13552_v40 = vadd.f32 %v9652_v62, %v16945_v20 }
0x188c   :  { %v9703_v24 = vmul.f32 0.5, %v13492_v6  ;;  %v13494_v0 = vadd.f32 %v9613_v8, %v18328_v48  ;;  %v13554_v57 = vadd.f32 %v9656_v41, %v16945_v20 }
0x188d   :  { %14718 = vtanh.f32 %v9679_v21  ;;  %v9680_v3 = vmul.f32 0.5, %v13493_v43  ;;  %v9693_v8 = vmul.f32 0.5, %v13552_v40 }
0x188e   :  { %14720 = vtanh.f32 %v9703_v24  ;;  %v9704_v56 = vmul.f32 0.5, %v13494_v0  ;;  %v9694_v35 = vmul.f32 0.5, %v13554_v57 }
0x188f   :  { %14722 = vtanh.f32 %v9680_v3 }
0x1890   :  { %14724 = vtanh.f32 %v13551_v2 }
0x1891   :  { %14726 = vtanh.f32 %v9704_v56 }
0x1892   :  { %14728 = vtanh.f32 %v13553_v30 }
0x1893   :  { %14730 = vtanh.f32 %v9693_v8 }
0x1894   :  { %14732 = vtanh.f32 %v9694_v35 }
0x1897   :  { %v14719_v49 = vpop.eup %14718 }
0x1898   :  { %v14721_v6 = vpop.eup %14720  ;;  %v9683_v18 = vmul.f32 0.5, %v14719_v49 }
0x1899   :  { %v9707_v21 = vmul.f32 0.5, %v14721_v6  ;;  %v14723_v58 = vpop.eup %14722 }
0x189a   :  { %v9685_v43 = vadd.f32 0.5, %v9683_v18  ;;  %v14725_v24 = vpop.eup %14724  ;;  %v9684_v3 = vmul.f32 0.5, %v14723_v58 }
0x189b   :  { %v9709_v0 = vadd.f32 0.5, %v9707_v21  ;;  %v14727_v32 = vpop.eup %14726 }
0x189c   :  { %v9713_v51 = vmul.f32 %v14725_v24, %v9685_v43  ;;  %v9686_v62 = vadd.f32 0.5, %v9684_v3  ;;  %v9708_v56 = vmul.f32 0.5, %v14727_v32  ;;  %v14729_v41 = vpop.eup %14728 }
0x189d   :  { %v9711_v2 = vmul.f32 %v9709_v0, %v17571_v26  ;;  %v14731_v6 = vpop.eup %14730 }
0x189e   :  { %v9710_v49 = vadd.f32 0.5, %v9708_v56  ;;  %v9714_v40 = vmul.f32 %v14729_v41, %v9686_v62  ;;  %v14733_v8 = vpop.eup %14732  ;;  %v9697_v21 = vmul.f32 0.5, %v14731_v6 }
0x189f   :  { %v17705_v30 = vadd.f32 %v9713_v51, %v9711_v2  ;;  %v9698_v26 = vmul.f32 0.5, %v14733_v8 }
0x18a0   :  { %v9712_v57 = vmul.f32 %v9710_v49, %v17575_v63  ;;  %v9699_v32 = vadd.f32 0.5, %v9697_v21 }
0x18a1   :  { %14734 = vtanh.f32 %v17705_v30  ;;  %v9700_v35 = vadd.f32 0.5, %v9698_v26 }
0x18a2   :  { %v17709_v18 = vadd.f32 %v9714_v40, %v9712_v57 }
0x18a4   :  { %14736 = vtanh.f32 %v17709_v18 }
0x18ab   :  { %v14735_v58 = vpop.eup %14734 }
0x18ac   :  { %v9719_v24 = vmul.f32 %v14735_v58, %v9699_v32 }
0x18ae   :  { %v14737_v43 = vpop.eup %14736 }
0x18af   :  { %v9720_v0 = vmul.f32 %v14737_v43, %v9700_v35 }
0x18b1   :  { %v17712_v3 = vpack.c.bf16 %v9720_v0, %v9719_v24 }
0x18b3   :  { %9959 = vmatmul.mubr.bf16.vlgmr.msra.gmra.mrb[100].mxu0 %v17712_v3  ;;  %10002 = vmatmul.mubr.bf16.vlgmr.msra.gmra.mrb[116].mxu1 %v17712_v3 }
0x18b4   :  { %10280 = vmatpush1.bf16.msra.mxu0 %v17461_v38  ;;  %10323 = vmatpush1.bf16.msra.mxu1 %v17466_v28 }
0x18b5   :  { %10281 = vmatprep.subr.bf16.mxu0 %v17475_v12  ;;  %10324 = vmatprep.subr.bf16.mxu1 %v17480_v7 }
0x18b6   :  { %10311 = vmatprep.mubr.bf16.mxu0 %v18293_v15  ;;  %10354 = vmatprep.mubr.bf16.mxu1 %v18293_v15 }
0x18b8   :  { %10282 = vmatpush1.bf16.msra.mxu0 %v17485_v45  ;;  %10325 = vmatpush1.bf16.msra.mxu1 %v17490_v44 }
0x18b9   :  { %10283 = vmatprep.subr.bf16.mxu0 %v17499_v55  ;;  %10326 = vmatprep.subr.bf16.mxu1 %v17504_v17 }
0x18bc   :  { %10284 = vmatpush1.bf16.msra.mxu0 %v17509_v1  ;;  %10327 = vmatpush1.bf16.msra.mxu1 %v17514_v23 }
0x18bd   :  { %10285 = vmatprep.subr.bf16.mxu0 %v17523_v31  ;;  %10328 = vmatprep.subr.bf16.mxu1 %v17528_v61 }
0x18c0   :  { %10286 = vmatpush1.bf16.msra.mxu0 %v17533_v9  ;;  %10329 = vmatpush1.bf16.msra.mxu1 %v17538_v52 }
0x18c1   :  { %10287 = vmatprep.subr.bf16.mxu0 %v17601_v39  ;;  %10330 = vmatprep.subr.bf16.mxu1 %v17606_v54 }
0x18c4   :  { %10288 = vmatpush1.bf16.msra.mxu0 %v17611_v11  ;;  %10331 = vmatpush1.bf16.msra.mxu1 %v17616_v29 }
0x18c5   :  { %10289 = vmatprep.subr.bf16.mxu0 %v17625_v59  ;;  %10332 = vmatprep.subr.bf16.mxu1 %v17630_v47 }
0x18c8   :  { %10290 = vmatpush1.bf16.msra.mxu0 %v17635_v14  ;;  %10333 = vmatpush1.bf16.msra.mxu1 %v17640_v60 }
0x18c9   :  { %10291 = vmatprep.subr.bf16.mxu0 %v17649_v33  ;;  %10334 = vmatprep.subr.bf16.mxu1 %v17654_v13 }
0x18cc   :  { %10292 = vmatpush1.bf16.msra.mxu0 %v17659_v4  ;;  %10335 = vmatpush1.bf16.msra.mxu1 %v17664_v46 }
0x18cd   :  { %10293 = vmatprep.subr.bf16.mxu0 %v17678_v22  ;;  %10336 = vmatprep.subr.bf16.mxu1 %v17688_v34 }
0x18d0   :  { %10294 = vmatpush1.bf16.msra.mxu0 %v17673_v53  ;;  %10337 = vmatpush1.bf16.msra.mxu1 %v17683_v16 }
0x18d1   :  { %10632 = vmatprep.subr.bf16.mxu0 %v17451_v5  ;;  %10675 = vmatprep.subr.bf16.mxu1 %v17456_v10 }
0x1986   :  { %v9960_v63 = vpop.f32.mrb[100].mxu0  ;;  %v10003_v51 = vpop.f32.mrb[116].mxu1 }
0x1987   :  { %v13495_v2 = vadd.f32 %v9960_v63, %v16936_v37  ;;  %v9962_v62 = vpop.f32.mrb[101].mxu0  ;;  %v10005_v56 = vpop.f32.mrb[117].mxu1  ;;  %v13555_v10 = vadd.f32 %v10003_v51, %v16940_v25 }
0x1988   :  { %v13496_v41 = vadd.f32 %v9962_v62, %v18328_v48  ;;  %v9964_v49 = vpop.f32.mrb[102].mxu0  ;;  %v10007_v40 = vpop.f32.mrb[118].mxu1  ;;  %v13556_v43 = vadd.f32 %v10005_v56, %v16945_v20 }
0x1989   :  { %v10032_v57 = vmul.f32 0.5, %v13495_v2  ;;  %v13497_v6 = vadd.f32 %v9964_v49, %v16936_v37  ;;  %v9966_v8 = vpop.f32.mrb[103].mxu0  ;;  %v10009_v21 = vpop.f32.mrb[119].mxu1  ;;  %v13557_v35 = vadd.f32 %v10007_v40, %v16940_v25 }
0x198a   :  { %v10056_v26 = vmul.f32 0.5, %v13496_v41  ;;  %v13498_v5 = vadd.f32 %v9966_v8, %v18328_v48  ;;  %v13558_v24 = vadd.f32 %v10009_v21, %v16945_v20  ;;  %v10046_v62 = vmul.f32 0.5, %v13556_v43 }
0x198b   :  { %14738 = vtanh.f32 %v10032_v57  ;;  %v10033_v58 = vmul.f32 0.5, %v13497_v6 }
0x198c   :  { %14740 = vtanh.f32 %v10056_v26  ;;  %v10057_v32 = vmul.f32 0.5, %v13498_v5  ;;  %v10047_v49 = vmul.f32 0.5, %v13558_v24 }
0x198d   :  { %14742 = vtanh.f32 %v10033_v58 }
0x198e   :  { %14744 = vtanh.f32 %v13555_v10 }
0x198f   :  { %14746 = vtanh.f32 %v10057_v32 }
0x1990   :  { %14748 = vtanh.f32 %v13557_v35 }
0x1991   :  { %14750 = vtanh.f32 %v10046_v62 }
0x1992   :  { %14752 = vtanh.f32 %v10047_v49 }
0x1995   :  { %v14739_v0 = vpop.eup %14738 }
0x1996   :  { %v14741_v63 = vpop.eup %14740  ;;  %v10036_v2 = vmul.f32 0.5, %v14739_v0 }
0x1997   :  { %v10060_v41 = vmul.f32 0.5, %v14741_v63  ;;  %v14743_v51 = vpop.eup %14742 }
0x1998   :  { %v10038_v57 = vadd.f32 0.5, %v10036_v2  ;;  %v14745_v6 = vpop.eup %14744  ;;  %v10037_v26 = vmul.f32 0.5, %v14743_v51 }
0x1999   :  { %v10062_v8 = vadd.f32 0.5, %v10060_v41  ;;  %v14747_v5 = vpop.eup %14746 }
0x199a   :  { %v10066_v40 = vmul.f32 %v14745_v6, %v10038_v57  ;;  %v10039_v56 = vadd.f32 0.5, %v10037_v26  ;;  %v10061_v58 = vmul.f32 0.5, %v14747_v5  ;;  %v14749_v21 = vpop.eup %14748 }
0x199b   :  { %v10064_v10 = vmul.f32 %v10062_v8, %v17705_v30  ;;  %v14751_v63 = vpop.eup %14750 }
0x199c   :  { %v10063_v35 = vadd.f32 0.5, %v10061_v58  ;;  %v10067_v43 = vmul.f32 %v14749_v21, %v10039_v56  ;;  %v14753_v2 = vpop.eup %14752  ;;  %v10050_v62 = vmul.f32 0.5, %v14751_v63 }
0x199d   :  { %v17759_v32 = vadd.f32 %v10066_v40, %v10064_v10  ;;  %v10051_v30 = vmul.f32 0.5, %v14753_v2 }
0x199e   :  { %v10065_v24 = vmul.f32 %v10063_v35, %v17709_v18  ;;  %v10052_v51 = vadd.f32 0.5, %v10050_v62 }
0x199f   :  { %14754 = vtanh.f32 %v17759_v32  ;;  %v10053_v49 = vadd.f32 0.5, %v10051_v30 }
0x19a0   :  { %v17763_v0 = vadd.f32 %v10067_v43, %v10065_v24 }
0x19a2   :  { %14756 = vtanh.f32 %v17763_v0 }
0x19a9   :  { %v14755_v41 = vpop.eup %14754 }
0x19aa   :  { %v10072_v6 = vmul.f32 %v14755_v41, %v10052_v51 }
0x19ac   :  { %v14757_v57 = vpop.eup %14756 }
0x19ad   :  { %v10073_v8 = vmul.f32 %v14757_v57, %v10053_v49 }
0x19af   :  { %v17766_v26 = vpack.c.bf16 %v10073_v8, %v10072_v6 }
0x19b1   :  { %10312 = vmatmul.mubr.bf16.vlgmr.msra.gmra.mrb[104].mxu0 %v17766_v26  ;;  %10355 = vmatmul.mubr.bf16.vlgmr.msra.gmra.mrb[120].mxu1 %v17766_v26 }
0x19b2   :  { %10633 = vmatpush1.bf16.msra.mxu0 %v17461_v38  ;;  %10676 = vmatpush1.bf16.msra.mxu1 %v17466_v28 }
0x19b3   :  { %10634 = vmatprep.subr.bf16.mxu0 %v17475_v12  ;;  %10677 = vmatprep.subr.bf16.mxu1 %v17480_v7 }
0x19b4   :  { %10664 = vmatprep.mubr.bf16.mxu0 %v18293_v15  ;;  %10707 = vmatprep.mubr.bf16.mxu1 %v18293_v15 }
0x19b6   :  { %10635 = vmatpush1.bf16.msra.mxu0 %v17485_v45  ;;  %10678 = vmatpush1.bf16.msra.mxu1 %v17490_v44 }
0x19b7   :  { %10636 = vmatprep.subr.bf16.mxu0 %v17499_v55  ;;  %10679 = vmatprep.subr.bf16.mxu1 %v17504_v17 }
0x19ba   :  { %10637 = vmatpush1.bf16.msra.mxu0 %v17509_v1  ;;  %10680 = vmatpush1.bf16.msra.mxu1 %v17514_v23 }
0x19bb   :  { %10638 = vmatprep.subr.bf16.mxu0 %v17523_v31  ;;  %10681 = vmatprep.subr.bf16.mxu1 %v17528_v61 }
0x19be   :  { %10639 = vmatpush1.bf16.msra.mxu0 %v17533_v9  ;;  %10682 = vmatpush1.bf16.msra.mxu1 %v17538_v52 }
0x19bf   :  { %10640 = vmatprep.subr.bf16.mxu0 %v17601_v39  ;;  %10683 = vmatprep.subr.bf16.mxu1 %v17606_v54 }
0x19c2   :  { %10641 = vmatpush1.bf16.msra.mxu0 %v17611_v11  ;;  %10684 = vmatpush1.bf16.msra.mxu1 %v17616_v29 }
0x19c3   :  { %10642 = vmatprep.subr.bf16.mxu0 %v17625_v59  ;;  %10685 = vmatprep.subr.bf16.mxu1 %v17630_v47 }
0x19c6   :  { %10643 = vmatpush1.bf16.msra.mxu0 %v17635_v14  ;;  %10686 = vmatpush1.bf16.msra.mxu1 %v17640_v60 }
0x19c7   :  { %10644 = vmatprep.subr.bf16.mxu0 %v17649_v33  ;;  %10687 = vmatprep.subr.bf16.mxu1 %v17654_v13 }
0x19ca   :  { %10645 = vmatpush1.bf16.msra.mxu0 %v17659_v4  ;;  %10688 = vmatpush1.bf16.msra.mxu1 %v17664_v46 }
0x19cb   :  { %10646 = vmatprep.subr.bf16.mxu0 %v17678_v22  ;;  %10689 = vmatprep.subr.bf16.mxu1 %v17688_v34 }
0x19ce   :  { %10647 = vmatpush1.bf16.msra.mxu0 %v17673_v53  ;;  %10690 = vmatpush1.bf16.msra.mxu1 %v17683_v16 }
0x1a84   :  { %v10313_v38 = vpop.f32.mrb[104].mxu0  ;;  %v10356_v28 = vpop.f32.mrb[120].mxu1 }
0x1a85   :  { %v13499_v12 = vadd.f32 %v10313_v38, %v16936_v37  ;;  %v10315_v7 = vpop.f32.mrb[105].mxu0  ;;  %v10358_v45 = vpop.f32.mrb[121].mxu1  ;;  %v13559_v18 = vadd.f32 %v10356_v28, %v16940_v25 }
0x1a86   :  { %v13500_v44 = vadd.f32 %v10315_v7, %v18328_v48  ;;  %v10317_v55 = vpop.f32.mrb[106].mxu0  ;;  %v10360_v17 = vpop.f32.mrb[122].mxu1  ;;  %v13560_v56 = vadd.f32 %v10358_v45, %v16945_v20 }
0x1a87   :  { %v10385_v1 = vmul.f32 0.5, %v13499_v12  ;;  %v13501_v23 = vadd.f32 %v10317_v55, %v16936_v37  ;;  %v10319_v31 = vpop.f32.mrb[107].mxu0  ;;  %v10362_v61 = vpop.f32.mrb[123].mxu1  ;;  %v13561_v10 = vadd.f32 %v10360_v17, %v16940_v25 }
0x1a88   :  { %v10409_v9 = vmul.f32 0.5, %v13500_v44  ;;  %v13502_v52 = vadd.f32 %v10319_v31, %v18328_v48  ;;  %v13562_v58 = vadd.f32 %v10362_v61, %v16945_v20  ;;  %v10399_v24 = vmul.f32 0.5, %v13560_v56  ;;  %v17832_v56 = vld [vmem:[%s18240_s5 + $0xc] ss:$16 sps:$4 sm:$0xff]  }
0x1a89   :  { %14758 = vtanh.f32 %v10385_v1  ;;  %v10386_v5 = vmul.f32 0.5, %v13501_v23  ;;  %11028 = vmatprep.subr.bf16.mxu1 %v17832_v56 }
0x1a8a   :  { %14760 = vtanh.f32 %v10409_v9  ;;  %v10410_v40 = vmul.f32 0.5, %v13502_v52  ;;  %v10400_v2 = vmul.f32 0.5, %v13562_v58  ;;  %v17837_v58 = vld [vmem:[%s18240_s5] ss:$16 sps:$4 sm:$0xff]  }
0x1a8b   :  { %14762 = vtanh.f32 %v10386_v5 }
0x1a8c   :  { %14764 = vtanh.f32 %v13559_v18 }
0x1a8d   :  { %14766 = vtanh.f32 %v10410_v40 }
0x1a8e   :  { %14768 = vtanh.f32 %v13561_v10 }
0x1a8f   :  { %14770 = vtanh.f32 %v10399_v24  ;;  %v17861_v24 = vld [vmem:[%s18240_s5 + $0x20] ss:$16 sps:$4 sm:$0xff]  }
0x1a90   :  { %14772 = vtanh.f32 %v10400_v2  ;;  %v17875_v2 = vld [vmem:[%s18240_s5 + $0x44] ss:$16 sps:$4 sm:$0xff]  }
0x1a93   :  { %v14759_v21 = vpop.eup %14758 }
0x1a94   :  { %v14761_v35 = vpop.eup %14760  ;;  %v10389_v43 = vmul.f32 0.5, %v14759_v21  ;;  %v17842_v21 = vld [vmem:[%s18240_s5 + $0x8] ss:$16 sps:$4 sm:$0xff]  }
0x1a95   :  { %v10413_v63 = vmul.f32 0.5, %v14761_v35  ;;  %v14763_v62 = vpop.eup %14762  ;;  %v17851_v35 = vld [vmem:[%s18240_s5 + $0x24] ss:$16 sps:$4 sm:$0xff]  }
0x1a96   :  { %v10391_v30 = vadd.f32 0.5, %v10389_v43  ;;  %v14765_v41 = vpop.eup %14764  ;;  %v10390_v49 = vmul.f32 0.5, %v14763_v62  ;;  %v17856_v43 = vld [vmem:[%s18240_s5 + $0x2c] ss:$16 sps:$4 sm:$0xff]  }
0x1a97   :  { %v10415_v51 = vadd.f32 0.5, %v10413_v63  ;;  %v14767_v57 = vpop.eup %14766  ;;  %v17866_v63 = vld [vmem:[%s18240_s5 + $0x28] ss:$16 sps:$4 sm:$0xff]   ;;  %v17880_v62 = vld [vmem:[%s18240_s5 + $0x4c] ss:$16 sps:$4 sm:$0xff]  }
0x1a98   :  { %v10419_v6 = vmul.f32 %v14765_v41, %v10391_v30  ;;  %v10392_v38 = vadd.f32 0.5, %v10390_v49  ;;  %v10414_v28 = vmul.f32 0.5, %v14767_v57  ;;  %v14769_v12 = vpop.eup %14768  ;;  %v17885_v30 = vld [vmem:[%s18240_s5 + $0x40] ss:$16 sps:$4 sm:$0xff]   ;;  %v17890_v41 = vld [vmem:[%s18240_s5 + $0x48] ss:$16 sps:$4 sm:$0xff]  }
0x1a99   :  { %v10417_v8 = vmul.f32 %v10415_v51, %v17759_v32  ;;  %v14771_v1 = vpop.eup %14770  ;;  %v17899_v51 = vld [vmem:[%s18240_s5 + $0x64] ss:$16 sps:$4 sm:$0xff]   ;;  %v17904_v49 = vld [vmem:[%s18240_s5 + $0x6c] ss:$16 sps:$4 sm:$0xff]   ;;  %v17909_v57 = vld [vmem:[%s18240_s5 + $0x60] ss:$16 sps:$4 sm:$0xff]  }
0x1a9a   :  { %v10416_v45 = vadd.f32 0.5, %v10414_v28  ;;  %v10420_v44 = vmul.f32 %v14769_v12, %v10392_v38  ;;  %v14773_v23 = vpop.eup %14772  ;;  %v10403_v31 = vmul.f32 0.5, %v14771_v1 }
0x1a9b   :  { %v17811_v7 = vadd.f32 %v10419_v6, %v10417_v8  ;;  %v10404_v32 = vmul.f32 0.5, %v14773_v23  ;;  %v17914_v6 = vld [vmem:[%s18240_s5 + $0x68] ss:$16 sps:$4 sm:$0xff]  }
0x1a9c   :  { %v10418_v55 = vmul.f32 %v10416_v45, %v17763_v0  ;;  %v10405_v9 = vadd.f32 0.5, %v10403_v31  ;;  %v17827_v0 = vld [vmem:[%s18240_s5 + $0x4] ss:$16 sps:$4 sm:$0xff]  }
0x1a9d   :  { %14774 = vtanh.f32 %v17811_v7  ;;  %v10406_v52 = vadd.f32 0.5, %v10404_v32  ;;  %10985 = vmatprep.subr.bf16.mxu0 %v17827_v0 }
0x1a9e   :  { %v17815_v17 = vadd.f32 %v10420_v44, %v10418_v55 }
0x1aa0   :  { %14776 = vtanh.f32 %v17815_v17 }
0x1aa7   :  { %v14775_v61 = vpop.eup %14774 }
0x1aa8   :  { %v10425_v5 = vmul.f32 %v14775_v61, %v10405_v9 }
0x1aaa   :  { %v14777_v18 = vpop.eup %14776 }
0x1aab   :  { %v10426_v40 = vmul.f32 %v14777_v18, %v10406_v52 }
0x1aad   :  { %v17818_v10 = vpack.c.bf16 %v10426_v40, %v10425_v5 }
0x1aaf   :  { %10665 = vmatmul.mubr.bf16.vlgmr.msra.gmra.mrb[108].mxu0 %v17818_v10  ;;  %10708 = vmatmul.mubr.bf16.vlgmr.msra.gmra.mrb[124].mxu1 %v17818_v10 }
0x1ab0   :  { %11017 = vmatprep.mubr.bf16.mxu0 %v18293_v15  ;;  %11060 = vmatprep.mubr.bf16.mxu1 %v18293_v15 }
0x1ab1   :  { %10986 = vmatpush1.bf16.msra.mxu0 %v17837_v58  ;;  %11029 = vmatpush1.bf16.msra.mxu1 %v17842_v21 }
0x1ab2   :  { %10987 = vmatprep.subr.bf16.mxu0 %v17851_v35  ;;  %11030 = vmatprep.subr.bf16.mxu1 %v17856_v43 }
0x1ab5   :  { %10988 = vmatpush1.bf16.msra.mxu0 %v17861_v24  ;;  %11031 = vmatpush1.bf16.msra.mxu1 %v17866_v63 }
0x1ab6   :  { %10989 = vmatprep.subr.bf16.mxu0 %v17875_v2  ;;  %11032 = vmatprep.subr.bf16.mxu1 %v17880_v62 }
0x1ab9   :  { %10990 = vmatpush1.bf16.msra.mxu0 %v17885_v30  ;;  %11033 = vmatpush1.bf16.msra.mxu1 %v17890_v41 }
0x1aba   :  { %10991 = vmatprep.subr.bf16.mxu0 %v17899_v51  ;;  %11034 = vmatprep.subr.bf16.mxu1 %v17904_v49 }
0x1abd   :  { %10992 = vmatpush1.bf16.msra.mxu0 %v17909_v57  ;;  %11035 = vmatpush1.bf16.msra.mxu1 %v17914_v6 }
0x1abe   :  { %10993 = vmatprep.subr.bf16.mxu0 %v17601_v39  ;;  %11036 = vmatprep.subr.bf16.mxu1 %v17606_v54 }
0x1ac1   :  { %10994 = vmatpush1.bf16.msra.mxu0 %v17611_v11  ;;  %11037 = vmatpush1.bf16.msra.mxu1 %v17616_v29 }
0x1ac2   :  { %10995 = vmatprep.subr.bf16.mxu0 %v17625_v59  ;;  %11038 = vmatprep.subr.bf16.mxu1 %v17630_v47 }
0x1ac5   :  { %10996 = vmatpush1.bf16.msra.mxu0 %v17635_v14  ;;  %11039 = vmatpush1.bf16.msra.mxu1 %v17640_v60 }
0x1ac6   :  { %10997 = vmatprep.subr.bf16.mxu0 %v17649_v33  ;;  %11040 = vmatprep.subr.bf16.mxu1 %v17654_v13 }
0x1ac9   :  { %10998 = vmatpush1.bf16.msra.mxu0 %v17659_v4  ;;  %11041 = vmatpush1.bf16.msra.mxu1 %v17664_v46 }
0x1aca   :  { %10999 = vmatprep.subr.bf16.mxu0 %v17678_v22  ;;  %11042 = vmatprep.subr.bf16.mxu1 %v17688_v34 }
0x1acd   :  { %11000 = vmatpush1.bf16.msra.mxu0 %v17673_v53  ;;  %11043 = vmatpush1.bf16.msra.mxu1 %v17683_v16 }
0x1ace   :  { %11338 = vmatprep.subr.bf16.mxu0 %v17827_v0  ;;  %11381 = vmatprep.subr.bf16.mxu1 %v17832_v56 }
0x1b82   :  { %v10666_v39 = vpop.f32.mrb[108].mxu0  ;;  %v10709_v54 = vpop.f32.mrb[124].mxu1 }
0x1b83   :  { %v13503_v11 = vadd.f32 %v10666_v39, %v16936_v37  ;;  %v10668_v29 = vpop.f32.mrb[109].mxu0  ;;  %v10711_v59 = vpop.f32.mrb[125].mxu1  ;;  %v13563_v16 = vadd.f32 %v10709_v54, %v16940_v25 }
0x1b84   :  { %v13504_v47 = vadd.f32 %v10668_v29, %v18328_v48  ;;  %v10670_v14 = vpop.f32.mrb[110].mxu0  ;;  %v10713_v60 = vpop.f32.mrb[126].mxu1  ;;  %v13564_v28 = vadd.f32 %v10711_v59, %v16945_v20 }
0x1b85   :  { %v10738_v33 = vmul.f32 0.5, %v13503_v11  ;;  %v13505_v13 = vadd.f32 %v10670_v14, %v16936_v37  ;;  %v10672_v4 = vpop.f32.mrb[111].mxu0  ;;  %v10715_v46 = vpop.f32.mrb[127].mxu1  ;;  %v13565_v38 = vadd.f32 %v10713_v60, %v16940_v25 }
0x1b86   :  { %v10762_v53 = vmul.f32 0.5, %v13504_v47  ;;  %v13506_v22 = vadd.f32 %v10672_v4, %v18328_v48  ;;  %v13566_v12 = vadd.f32 %v10715_v46, %v16945_v20  ;;  %v10752_v1 = vmul.f32 0.5, %v13564_v28 }
0x1b87   :  { %14778 = vtanh.f32 %v10738_v33  ;;  %v10739_v34 = vmul.f32 0.5, %v13505_v13 }
0x1b88   :  { %14780 = vtanh.f32 %v10762_v53  ;;  %v10763_v8 = vmul.f32 0.5, %v13506_v22  ;;  %v10753_v31 = vmul.f32 0.5, %v13566_v12  ;;  %v17982_v12 = vld [vmem:[%s18240_s5 + $0x8c] ss:$16 sps:$4 sm:$0xff]  }
0x1b89   :  { %14782 = vtanh.f32 %v10739_v34 }
0x1b8a   :  { %14784 = vtanh.f32 %v13563_v16 }
0x1b8b   :  { %14786 = vtanh.f32 %v10763_v8 }
0x1b8c   :  { %14788 = vtanh.f32 %v13565_v38 }
0x1b8d   :  { %14790 = vtanh.f32 %v10752_v1  ;;  %v18006_v1 = vld [vmem:[%s18240_s5 + $0xac] ss:$16 sps:$4 sm:$0xff]  }
0x1b8e   :  { %14792 = vtanh.f32 %v10753_v31  ;;  %v18016_v31 = vld [vmem:[%s18240_s5 + $0xa8] ss:$16 sps:$4 sm:$0xff]  }
0x1b91   :  { %v14779_v45 = vpop.eup %14778 }
0x1b92   :  { %v14781_v44 = vpop.eup %14780  ;;  %v10742_v55 = vmul.f32 0.5, %v14779_v45  ;;  %v17987_v45 = vld [vmem:[%s18240_s5 + $0x80] ss:$16 sps:$4 sm:$0xff]  }
0x1b93   :  { %v10766_v23 = vmul.f32 0.5, %v14781_v44  ;;  %v14783_v32 = vpop.eup %14782  ;;  %v17992_v44 = vld [vmem:[%s18240_s5 + $0x88] ss:$16 sps:$4 sm:$0xff]  }
0x1b94   :  { %v10744_v61 = vadd.f32 0.5, %v10742_v55  ;;  %v14785_v9 = vpop.eup %14784  ;;  %v10743_v18 = vmul.f32 0.5, %v14783_v32  ;;  %v18001_v55 = vld [vmem:[%s18240_s5 + $0xa4] ss:$16 sps:$4 sm:$0xff]  }
0x1b95   :  { %v10768_v52 = vadd.f32 0.5, %v10766_v23  ;;  %v14787_v5 = vpop.eup %14786  ;;  %v18011_v23 = vld [vmem:[%s18240_s5 + $0xa0] ss:$16 sps:$4 sm:$0xff]   ;;  %v18025_v32 = vld [vmem:[%s18240_s5 + $0xc4] ss:$16 sps:$4 sm:$0xff]  }
0x1b96   :  { %v10772_v40 = vmul.f32 %v14785_v9, %v10744_v61  ;;  %v10745_v54 = vadd.f32 0.5, %v10743_v18  ;;  %v10767_v11 = vmul.f32 0.5, %v14787_v5  ;;  %v14789_v29 = vpop.eup %14788  ;;  %v18030_v61 = vld [vmem:[%s18240_s5 + $0xcc] ss:$16 sps:$4 sm:$0xff]   ;;  %v18035_v9 = vld [vmem:[%s18240_s5 + $0xc0] ss:$16 sps:$4 sm:$0xff]  }
0x1b97   :  { %v10770_v39 = vmul.f32 %v10768_v52, %v17811_v7  ;;  %v14791_v13 = vpop.eup %14790  ;;  %v18040_v52 = vld [vmem:[%s18240_s5 + $0xc8] ss:$16 sps:$4 sm:$0xff]   ;;  %v18049_v18 = vld [vmem:[%s18240_s5 + $0xe0] ss:$16 sps:$4 sm:$0xff]   ;;  %v18054_v5 = vld [vmem:[%s18240_s5 + $0xe4] ss:$16 sps:$4 sm:$0xff]  }
0x1b98   :  { %v10769_v47 = vadd.f32 0.5, %v10767_v11  ;;  %v10773_v14 = vmul.f32 %v14789_v29, %v10745_v54  ;;  %v14793_v4 = vpop.eup %14792  ;;  %v10756_v46 = vmul.f32 0.5, %v14791_v13 }
0x1b99   :  { %v17947_v59 = vadd.f32 %v10772_v40, %v10770_v39  ;;  %v10757_v7 = vmul.f32 0.5, %v14793_v4  ;;  %v18059_v40 = vld [vmem:[%s18240_s5 + $0xe8] ss:$16 sps:$4 sm:$0xff]   ;;  %v18064_v39 = vld [vmem:[%s18240_s5 + $0xec] ss:$16 sps:$4 sm:$0xff]  }
0x1b9a   :  { %v10771_v60 = vmul.f32 %v10769_v47, %v17815_v17  ;;  %v10758_v22 = vadd.f32 0.5, %v10756_v46  ;;  %v17977_v17 = vld [vmem:[%s18240_s5 + $0x84] ss:$16 sps:$4 sm:$0xff]  }
0x1b9b   :  { %14794 = vtanh.f32 %v17947_v59  ;;  %v10759_v16 = vadd.f32 0.5, %v10757_v7 }
0x1b9c   :  { %v17951_v33 = vadd.f32 %v10773_v14, %v10771_v60 }
0x1b9e   :  { %14796 = vtanh.f32 %v17951_v33 }
0x1ba5   :  { %v14795_v53 = vpop.eup %14794 }
0x1ba6   :  { %v10778_v8 = vmul.f32 %v14795_v53, %v10758_v22 }
0x1ba8   :  { %v14797_v34 = vpop.eup %14796 }
0x1ba9   :  { %v10779_v38 = vmul.f32 %v14797_v34, %v10759_v16 }
0x1bab   :  { %v17954_v28 = vpack.c.bf16 %v10779_v38, %v10778_v8 }
0x1bad   :  { %18335 = vst [vmem:[#allocation13_spill] sm:$0xff] %v17954_v28  ;;  %11018 = vmatmul.mubr.bf16.vlgmr.msra.gmra.mrb[112].mxu0 %v17954_v28  ;;  %11061 = vmatmul.mubr.bf16.vlgmr.msra.gmra.mrb[128].mxu1 %v17954_v28 }
0x1bae   :  { %11339 = vmatpush1.bf16.msra.mxu0 %v17837_v58  ;;  %11382 = vmatpush1.bf16.msra.mxu1 %v17842_v21 }
0x1baf   :  { %11340 = vmatprep.subr.bf16.mxu0 %v17851_v35  ;;  %11383 = vmatprep.subr.bf16.mxu1 %v17856_v43 }
0x1bb0   :  { %11370 = vmatprep.mubr.bf16.mxu0 %v18293_v15  ;;  %11413 = vmatprep.mubr.bf16.mxu1 %v18293_v15 }
0x1bb2   :  { %11341 = vmatpush1.bf16.msra.mxu0 %v17861_v24  ;;  %11384 = vmatpush1.bf16.msra.mxu1 %v17866_v63 }
0x1bb3   :  { %11342 = vmatprep.subr.bf16.mxu0 %v17875_v2  ;;  %11385 = vmatprep.subr.bf16.mxu1 %v17880_v62 }
0x1bb6   :  { %11343 = vmatpush1.bf16.msra.mxu0 %v17885_v30  ;;  %11386 = vmatpush1.bf16.msra.mxu1 %v17890_v41 }
0x1bb7   :  { %11344 = vmatprep.subr.bf16.mxu0 %v17899_v51  ;;  %11387 = vmatprep.subr.bf16.mxu1 %v17904_v49 }
0x1bba   :  { %11345 = vmatpush1.bf16.msra.mxu0 %v17909_v57  ;;  %11388 = vmatpush1.bf16.msra.mxu1 %v17914_v6 }
0x1bbb   :  { %11346 = vmatprep.subr.bf16.mxu0 %v17977_v17  ;;  %11389 = vmatprep.subr.bf16.mxu1 %v17982_v12 }
0x1bbe   :  { %11347 = vmatpush1.bf16.msra.mxu0 %v17987_v45  ;;  %11390 = vmatpush1.bf16.msra.mxu1 %v17992_v44 }
0x1bbf   :  { %11348 = vmatprep.subr.bf16.mxu0 %v18001_v55  ;;  %11391 = vmatprep.subr.bf16.mxu1 %v18006_v1 }
0x1bc2   :  { %11349 = vmatpush1.bf16.msra.mxu0 %v18011_v23  ;;  %11392 = vmatpush1.bf16.msra.mxu1 %v18016_v31 }
0x1bc3   :  { %11350 = vmatprep.subr.bf16.mxu0 %v18025_v32  ;;  %11393 = vmatprep.subr.bf16.mxu1 %v18030_v61 }
0x1bc6   :  { %11351 = vmatpush1.bf16.msra.mxu0 %v18035_v9  ;;  %11394 = vmatpush1.bf16.msra.mxu1 %v18040_v52 }
0x1bc7   :  { %11352 = vmatprep.subr.bf16.mxu0 %v18054_v5  ;;  %11395 = vmatprep.subr.bf16.mxu1 %v18064_v39 }
0x1bca   :  { %11353 = vmatpush1.bf16.msra.mxu0 %v18049_v18  ;;  %11396 = vmatpush1.bf16.msra.mxu1 %v18059_v40 }
0x1bcb   :  { %11691 = vmatprep.subr.bf16.mxu0 %v17827_v0  ;;  %11734 = vmatprep.subr.bf16.mxu1 %v17832_v56 }
0x1c80   :  { %v11019_v54 = vpop.f32.mrb[112].mxu0  ;;  %v11062_v11 = vpop.f32.mrb[128].mxu1 }
0x1c81   :  { %v13507_v29 = vadd.f32 %v11019_v54, %v16936_v37  ;;  %v11021_v47 = vpop.f32.mrb[113].mxu0  ;;  %v11064_v14 = vpop.f32.mrb[129].mxu1  ;;  %v13567_v8 = vadd.f32 %v11062_v11, %v16940_v25 }
0x1c82   :  { %v13508_v60 = vadd.f32 %v11021_v47, %v18328_v48  ;;  %v11023_v13 = vpop.f32.mrb[114].mxu0  ;;  %v11066_v4 = vpop.f32.mrb[130].mxu1 }
0x1c83   :  { %v11091_v46 = vmul.f32 0.5, %v13507_v29  ;;  %v13509_v7 = vadd.f32 %v11023_v13, %v16936_v37  ;;  %v11025_v53 = vpop.f32.mrb[115].mxu0  ;;  %v11068_v22 = vpop.f32.mrb[131].mxu1  ;;  %v13569_v36 = vadd.f32 %v11066_v4, %v16940_v25  ;;  %v13568_v29 = vadd.f32 %v11064_v14, %v16945_v20 }
0x1c84   :  { %v11115_v16 = vmul.f32 0.5, %v13508_v60  ;;  %v13510_v34 = vadd.f32 %v11025_v53, %v18328_v48  ;;  %v13570_v47 = vadd.f32 %v11068_v22, %v16945_v20 }
0x1c85   :  { %14798 = vtanh.f32 %v11091_v46  ;;  %v11092_v38 = vmul.f32 0.5, %v13509_v7  ;;  %v11105_v53 = vmul.f32 0.5, %v13568_v29 }
0x1c86   :  { %14800 = vtanh.f32 %v11115_v16  ;;  %v11116_v54 = vmul.f32 0.5, %v13510_v34  ;;  %v11106_v28 = vmul.f32 0.5, %v13570_v47 }
0x1c87   :  { %14802 = vtanh.f32 %v11092_v38 }
0x1c88   :  { %14804 = vtanh.f32 %v13567_v8 }
0x1c89   :  { %14806 = vtanh.f32 %v11116_v54 }
0x1c8a   :  { %14808 = vtanh.f32 %v13569_v36 }
0x1c8b   :  { %14810 = vtanh.f32 %v11105_v53 }
0x1c8c   :  { %14812 = vtanh.f32 %v11106_v28 }
0x1c8f   :  { %v14799_v13 = vpop.eup %14798 }
0x1c90   :  { %v14801_v60 = vpop.eup %14800  ;;  %v11095_v50 = vmul.f32 0.5, %v14799_v13 }
0x1c91   :  { %v11119_v46 = vmul.f32 0.5, %v14801_v60  ;;  %v14803_v11 = vpop.eup %14802 }
0x1c92   :  { %v11097_v7 = vadd.f32 0.5, %v11095_v50  ;;  %v14805_v16 = vpop.eup %14804  ;;  %v11096_v38 = vmul.f32 0.5, %v14803_v11 }
0x1c93   :  { %v11121_v34 = vadd.f32 0.5, %v11119_v46  ;;  %v14807_v27 = vpop.eup %14806 }
0x1c94   :  { %v11125_v4 = vmul.f32 %v14805_v16, %v11097_v7  ;;  %v11098_v14 = vadd.f32 0.5, %v11096_v38  ;;  %v11120_v36 = vmul.f32 0.5, %v14807_v27  ;;  %v14809_v22 = vpop.eup %14808 }
0x1c95   :  { %v11123_v8 = vmul.f32 %v11121_v34, %v17947_v59  ;;  %v14811_v60 = vpop.eup %14810 }
0x1c96   :  { %v11122_v13 = vadd.f32 0.5, %v11120_v36  ;;  %v11126_v29 = vmul.f32 %v14809_v22, %v11098_v14  ;;  %v14813_v53 = vpop.eup %14812  ;;  %v11109_v46 = vmul.f32 0.5, %v14811_v60 }
0x1c97   :  { %v18081_v54 = vadd.f32 %v11125_v4, %v11123_v8  ;;  %v11110_v59 = vmul.f32 0.5, %v14813_v53 }
0x1c98   :  { %v11124_v47 = vmul.f32 %v11122_v13, %v17951_v33  ;;  %v11111_v27 = vadd.f32 0.5, %v11109_v46 }
0x1c99   :  { %14814 = vtanh.f32 %v18081_v54  ;;  %v11112_v28 = vadd.f32 0.5, %v11110_v59 }
0x1c9a   :  { %v18085_v50 = vadd.f32 %v11126_v29, %v11124_v47 }
0x1c9c   :  { %14816 = vtanh.f32 %v18085_v50 }
0x1ca3   :  { %v14815_v11 = vpop.eup %14814 }
0x1ca4   :  { %v11131_v16 = vmul.f32 %v14815_v11, %v11111_v27 }
0x1ca6   :  { %v14817_v7 = vpop.eup %14816 }
0x1ca7   :  { %v11132_v34 = vmul.f32 %v14817_v7, %v11112_v28 }
0x1ca9   :  { %v18088_v38 = vpack.c.bf16 %v11132_v34, %v11131_v16 }
0x1cab   :  { %11371 = vmatmul.mubr.bf16.vlgmr.msra.gmra.mrb[116].mxu0 %v18088_v38  ;;  %11414 = vmatmul.mubr.bf16.vlgmr.msra.gmra.mrb[132].mxu1 %v18088_v38 }
0x1cac   :  { %11692 = vmatpush1.bf16.msra.mxu0 %v17837_v58  ;;  %11735 = vmatpush1.bf16.msra.mxu1 %v17842_v21 }
0x1cad   :  { %11693 = vmatprep.subr.bf16.mxu0 %v17851_v35  ;;  %11736 = vmatprep.subr.bf16.mxu1 %v17856_v43 }
0x1cae   :  { %11723 = vmatprep.mubr.bf16.mxu0 %v18293_v15  ;;  %11766 = vmatprep.mubr.bf16.mxu1 %v18293_v15 }
0x1cb0   :  { %11694 = vmatpush1.bf16.msra.mxu0 %v17861_v24  ;;  %11737 = vmatpush1.bf16.msra.mxu1 %v17866_v63 }
0x1cb1   :  { %11695 = vmatprep.subr.bf16.mxu0 %v17875_v2  ;;  %11738 = vmatprep.subr.bf16.mxu1 %v17880_v62 }
0x1cb4   :  { %11696 = vmatpush1.bf16.msra.mxu0 %v17885_v30  ;;  %11739 = vmatpush1.bf16.msra.mxu1 %v17890_v41 }
0x1cb5   :  { %11697 = vmatprep.subr.bf16.mxu0 %v17899_v51  ;;  %11740 = vmatprep.subr.bf16.mxu1 %v17904_v49 }
0x1cb8   :  { %11698 = vmatpush1.bf16.msra.mxu0 %v17909_v57  ;;  %11741 = vmatpush1.bf16.msra.mxu1 %v17914_v6 }
0x1cb9   :  { %11699 = vmatprep.subr.bf16.mxu0 %v17977_v17  ;;  %11742 = vmatprep.subr.bf16.mxu1 %v17982_v12 }
0x1cbc   :  { %11700 = vmatpush1.bf16.msra.mxu0 %v17987_v45  ;;  %11743 = vmatpush1.bf16.msra.mxu1 %v17992_v44 }
0x1cbd   :  { %11701 = vmatprep.subr.bf16.mxu0 %v18001_v55  ;;  %11744 = vmatprep.subr.bf16.mxu1 %v18006_v1 }
0x1cc0   :  { %11702 = vmatpush1.bf16.msra.mxu0 %v18011_v23  ;;  %11745 = vmatpush1.bf16.msra.mxu1 %v18016_v31 }
0x1cc1   :  { %11703 = vmatprep.subr.bf16.mxu0 %v18025_v32  ;;  %11746 = vmatprep.subr.bf16.mxu1 %v18030_v61 }
0x1cc4   :  { %11704 = vmatpush1.bf16.msra.mxu0 %v18035_v9  ;;  %11747 = vmatpush1.bf16.msra.mxu1 %v18040_v52 }
0x1cc5   :  { %11705 = vmatprep.subr.bf16.mxu0 %v18054_v5  ;;  %11748 = vmatprep.subr.bf16.mxu1 %v18064_v39 }
0x1cc8   :  { %11706 = vmatpush1.bf16.msra.mxu0 %v18049_v18  ;;  %11749 = vmatpush1.bf16.msra.mxu1 %v18059_v40 }
0x1cc9   :  { %12044 = vmatprep.subr.bf16.mxu0 %v17827_v0  ;;  %12087 = vmatprep.subr.bf16.mxu1 %v17832_v56 }
0x1d7e   :  { %v11372_v33 = vpop.f32.mrb[116].mxu0  ;;  %v11415_v4 = vpop.f32.mrb[132].mxu1 }
0x1d7f   :  { %v13511_v8 = vadd.f32 %v11372_v33, %v16936_v37  ;;  %v11374_v14 = vpop.f32.mrb[117].mxu0  ;;  %v11417_v36 = vpop.f32.mrb[133].mxu1  ;;  %v13571_v56 = vadd.f32 %v11415_v4, %v16940_v25 }
0x1d80   :  { %v13512_v22 = vadd.f32 %v11374_v14, %v18328_v48  ;;  %v11376_v13 = vpop.f32.mrb[118].mxu0  ;;  %v11419_v29 = vpop.f32.mrb[134].mxu1  ;;  %v13572_v7 = vadd.f32 %v11417_v36, %v16945_v20 }
0x1d81   :  { %v11444_v47 = vmul.f32 0.5, %v13511_v8  ;;  %v13513_v60 = vadd.f32 %v11376_v13, %v16936_v37  ;;  %v11378_v53 = vpop.f32.mrb[119].mxu0  ;;  %v11421_v46 = vpop.f32.mrb[135].mxu1  ;;  %v13573_v28 = vadd.f32 %v11419_v29, %v16940_v25 }
0x1d82   :  { %v11468_v59 = vmul.f32 0.5, %v13512_v22  ;;  %v13514_v0 = vadd.f32 %v11378_v53, %v18328_v48  ;;  %v13574_v16 = vadd.f32 %v11421_v46, %v16945_v20  ;;  %v11458_v14 = vmul.f32 0.5, %v13572_v7 }
0x1d83   :  { %14818 = vtanh.f32 %v11444_v47  ;;  %v11445_v11 = vmul.f32 0.5, %v13513_v60 }
0x1d84   :  { %14820 = vtanh.f32 %v11468_v59  ;;  %v11469_v27 = vmul.f32 0.5, %v13514_v0  ;;  %v11459_v13 = vmul.f32 0.5, %v13574_v16 }
0x1d85   :  { %14822 = vtanh.f32 %v11445_v11 }
0x1d86   :  { %14824 = vtanh.f32 %v13571_v56 }
0x1d87   :  { %14826 = vtanh.f32 %v11469_v27 }
0x1d88   :  { %14828 = vtanh.f32 %v13573_v28 }
0x1d89   :  { %14830 = vtanh.f32 %v11458_v14 }
0x1d8a   :  { %14832 = vtanh.f32 %v11459_v13 }
0x1d8d   :  { %v14819_v34 = vpop.eup %14818 }
0x1d8e   :  { %v14821_v33 = vpop.eup %14820  ;;  %v11448_v8 = vmul.f32 0.5, %v14819_v34 }
0x1d8f   :  { %v11472_v22 = vmul.f32 0.5, %v14821_v33  ;;  %v14823_v4 = vpop.eup %14822 }
0x1d90   :  { %v11450_v47 = vadd.f32 0.5, %v11448_v8  ;;  %v14825_v60 = vpop.eup %14824  ;;  %v11449_v59 = vmul.f32 0.5, %v14823_v4 }
0x1d91   :  { %v11474_v53 = vadd.f32 0.5, %v11472_v22  ;;  %v14827_v0 = vpop.eup %14826 }
0x1d92   :  { %v11478_v29 = vmul.f32 %v14825_v60, %v11450_v47  ;;  %v11451_v36 = vadd.f32 0.5, %v11449_v59  ;;  %v11473_v11 = vmul.f32 0.5, %v14827_v0  ;;  %v14829_v46 = vpop.eup %14828 }
0x1d93   :  { %v11476_v56 = vmul.f32 %v11474_v53, %v18081_v54  ;;  %v14831_v33 = vpop.eup %14830 }
0x1d94   :  { %v11475_v28 = vadd.f32 0.5, %v11473_v11  ;;  %v11479_v7 = vmul.f32 %v14829_v46, %v11451_v36  ;;  %v14833_v8 = vpop.eup %14832  ;;  %v11462_v14 = vmul.f32 0.5, %v14831_v33 }
0x1d95   :  { %v18135_v27 = vadd.f32 %v11478_v29, %v11476_v56  ;;  %v11463_v54 = vmul.f32 0.5, %v14833_v8 }
0x1d96   :  { %v11477_v16 = vmul.f32 %v11475_v28, %v18085_v50  ;;  %v11464_v4 = vadd.f32 0.5, %v11462_v14 }
0x1d97   :  { %14834 = vtanh.f32 %v18135_v27  ;;  %v11465_v13 = vadd.f32 0.5, %v11463_v54 }
0x1d98   :  { %v18139_v34 = vadd.f32 %v11479_v7, %v11477_v16 }
0x1d9a   :  { %14836 = vtanh.f32 %v18139_v34 }
0x1da1   :  { %v14835_v22 = vpop.eup %14834 }
0x1da2   :  { %v11484_v60 = vmul.f32 %v14835_v22, %v11464_v4 }
0x1da4   :  { %v14837_v47 = vpop.eup %14836 }
0x1da5   :  { %v11485_v53 = vmul.f32 %v14837_v47, %v11465_v13 }
0x1da7   :  { %v18142_v59 = vpack.c.bf16 %v11485_v53, %v11484_v60 }
0x1da9   :  { %11724 = vmatmul.mubr.bf16.vlgmr.msra.gmra.mrb[120].mxu0 %v18142_v59  ;;  %11767 = vmatmul.mubr.bf16.vlgmr.msra.gmra.mrb[136].mxu1 %v18142_v59 }
0x1daa   :  { %12045 = vmatpush1.bf16.msra.mxu0 %v17837_v58  ;;  %12088 = vmatpush1.bf16.msra.mxu1 %v17842_v21 }
0x1dab   :  { %12046 = vmatprep.subr.bf16.mxu0 %v17851_v35  ;;  %12089 = vmatprep.subr.bf16.mxu1 %v17856_v43 }
0x1dac   :  { %12076 = vmatprep.mubr.bf16.mxu0 %v18293_v15  ;;  %12119 = vmatprep.mubr.bf16.mxu1 %v18293_v15 }
0x1dae   :  { %12047 = vmatpush1.bf16.msra.mxu0 %v17861_v24  ;;  %12090 = vmatpush1.bf16.msra.mxu1 %v17866_v63 }
0x1daf   :  { %12048 = vmatprep.subr.bf16.mxu0 %v17875_v2  ;;  %12091 = vmatprep.subr.bf16.mxu1 %v17880_v62 }
0x1db2   :  { %12049 = vmatpush1.bf16.msra.mxu0 %v17885_v30  ;;  %12092 = vmatpush1.bf16.msra.mxu1 %v17890_v41 }
0x1db3   :  { %12050 = vmatprep.subr.bf16.mxu0 %v17899_v51  ;;  %12093 = vmatprep.subr.bf16.mxu1 %v17904_v49 }
0x1db6   :  { %12051 = vmatpush1.bf16.msra.mxu0 %v17909_v57  ;;  %12094 = vmatpush1.bf16.msra.mxu1 %v17914_v6 }
0x1db7   :  { %12052 = vmatprep.subr.bf16.mxu0 %v17977_v17  ;;  %12095 = vmatprep.subr.bf16.mxu1 %v17982_v12 }
0x1dba   :  { %12053 = vmatpush1.bf16.msra.mxu0 %v17987_v45  ;;  %12096 = vmatpush1.bf16.msra.mxu1 %v17992_v44 }
0x1dbb   :  { %12054 = vmatprep.subr.bf16.mxu0 %v18001_v55  ;;  %12097 = vmatprep.subr.bf16.mxu1 %v18006_v1 }
0x1dbe   :  { %12055 = vmatpush1.bf16.msra.mxu0 %v18011_v23  ;;  %12098 = vmatpush1.bf16.msra.mxu1 %v18016_v31 }
0x1dbf   :  { %12056 = vmatprep.subr.bf16.mxu0 %v18025_v32  ;;  %12099 = vmatprep.subr.bf16.mxu1 %v18030_v61 }
0x1dc2   :  { %12057 = vmatpush1.bf16.msra.mxu0 %v18035_v9  ;;  %12100 = vmatpush1.bf16.msra.mxu1 %v18040_v52 }
0x1dc3   :  { %12058 = vmatprep.subr.bf16.mxu0 %v18054_v5  ;;  %12101 = vmatprep.subr.bf16.mxu1 %v18064_v39 }
0x1dc6   :  { %12059 = vmatpush1.bf16.msra.mxu0 %v18049_v18  ;;  %12102 = vmatpush1.bf16.msra.mxu1 %v18059_v40 }
0x1dc7   :  { %13307 = vmatprep.subr.bf16.mxu0 %v17712_v3 }
0x1e7c   :  { %v11725_v15 = vpop.f32.mrb[120].mxu0  ;;  %v11768_v58 = vpop.f32.mrb[136].mxu1 }
0x1e7d   :  { %v13515_v21 = vadd.f32 %v11725_v15, %v16936_v37  ;;  %v11727_v35 = vpop.f32.mrb[121].mxu0  ;;  %v11770_v43 = vpop.f32.mrb[137].mxu1  ;;  %v13575_v3 = vadd.f32 %v11768_v58, %v16940_v25  ;;  %v18337_v15 = vld [vmem:[#allocation13_spill] sm:$0xff]  ;;  %v18338_v58 = vld [vmem:[#allocation8_spill] sm:$0xff] }
0x1e7e   :  { %v13516_v24 = vadd.f32 %v11727_v35, %v18328_v48  ;;  %v11729_v63 = vpop.f32.mrb[122].mxu0  ;;  %v11772_v2 = vpop.f32.mrb[138].mxu1  ;;  %v13576_v45 = vadd.f32 %v11770_v43, %v16945_v20  ;;  %v18340_v35 = vld [vmem:[#allocation10_spill] sm:$0xff] }
0x1e7f   :  { %v11797_v62 = vmul.f32 0.5, %v13515_v21  ;;  %v13517_v30 = vadd.f32 %v11729_v63, %v16936_v37  ;;  %v11731_v41 = vpop.f32.mrb[123].mxu0  ;;  %v11774_v51 = vpop.f32.mrb[139].mxu1  ;;  %v13577_v12 = vadd.f32 %v11772_v2, %v16940_v25  ;;  %v18339_v21 = vld [vmem:[#allocation9_spill] sm:$0xff] }
0x1e80   :  { %v11821_v49 = vmul.f32 0.5, %v13516_v24  ;;  %v13518_v57 = vadd.f32 %v11731_v41, %v18328_v48  ;;  %v13578_v44 = vadd.f32 %v11774_v51, %v16945_v20  ;;  %v11811_v31 = vmul.f32 0.5, %v13576_v45 }
0x1e81   :  { %14838 = vtanh.f32 %v11797_v62  ;;  %v11798_v6 = vmul.f32 0.5, %v13517_v30 }
0x1e82   :  { %14840 = vtanh.f32 %v11821_v49  ;;  %v11822_v17 = vmul.f32 0.5, %v13518_v57  ;;  %v11812_v61 = vmul.f32 0.5, %v13578_v44 }
0x1e83   :  { %14842 = vtanh.f32 %v11798_v6 }
0x1e84   :  { %14844 = vtanh.f32 %v13575_v3 }
0x1e85   :  { %14846 = vtanh.f32 %v11822_v17 }
0x1e86   :  { %14848 = vtanh.f32 %v13577_v12 }
0x1e87   :  { %14850 = vtanh.f32 %v11811_v31 }
0x1e88   :  { %14852 = vtanh.f32 %v11812_v61 }
0x1e8b   :  { %v14839_v55 = vpop.eup %14838 }
0x1e8c   :  { %v14841_v1 = vpop.eup %14840  ;;  %v11801_v23 = vmul.f32 0.5, %v14839_v55 }
0x1e8d   :  { %v11825_v32 = vmul.f32 0.5, %v14841_v1  ;;  %v14843_v9 = vpop.eup %14842 }
0x1e8e   :  { %v11803_v52 = vadd.f32 0.5, %v11801_v23  ;;  %v14845_v18 = vpop.eup %14844  ;;  %v11802_v40 = vmul.f32 0.5, %v14843_v9 }
0x1e8f   :  { %v11827_v5 = vadd.f32 0.5, %v11825_v32  ;;  %v14847_v39 = vpop.eup %14846 }
0x1e90   :  { %v11831_v50 = vmul.f32 %v14845_v18, %v11803_v52  ;;  %v11804_v29 = vadd.f32 0.5, %v11802_v40  ;;  %v11826_v56 = vmul.f32 0.5, %v14847_v39  ;;  %v14849_v36 = vpop.eup %14848 }
0x1e91   :  { %v11829_v0 = vmul.f32 %v11827_v5, %v18135_v27  ;;  %v14851_v33 = vpop.eup %14850 }
0x1e92   :  { %v11828_v46 = vadd.f32 0.5, %v11826_v56  ;;  %v11832_v28 = vmul.f32 %v14849_v36, %v11804_v29  ;;  %v14853_v8 = vpop.eup %14852  ;;  %v11815_v14 = vmul.f32 0.5, %v14851_v33 }
0x1e93   :  { %v18188_v11 = vadd.f32 %v11831_v50, %v11829_v0  ;;  %v11816_v27 = vmul.f32 0.5, %v14853_v8 }
0x1e94   :  { %v11830_v7 = vmul.f32 %v11828_v46, %v18139_v34  ;;  %v11817_v22 = vadd.f32 0.5, %v11815_v14  ;;  %v18336_v34 = vld [vmem:[#allocation7_spill] sm:$0xff] }
0x1e95   :  { %14854 = vtanh.f32 %v18188_v11  ;;  %v11818_v4 = vadd.f32 0.5, %v11816_v27 }
0x1e96   :  { %v18192_v16 = vadd.f32 %v11832_v28, %v11830_v7 }
0x1e98   :  { %14856 = vtanh.f32 %v18192_v16 }
0x1e9f   :  { %v14855_v54 = vpop.eup %14854 }
0x1ea0   :  { %v11837_v47 = vmul.f32 %v14855_v54, %v11817_v22 }
0x1ea2   :  { %v14857_v13 = vpop.eup %14856 }
0x1ea3   :  { %v11838_v60 = vmul.f32 %v14857_v13, %v11818_v4 }
0x1ea5   :  { %v11841_v53 = vpack.c.bf16 %v11838_v60, %v11837_v47  ;;  %v18342_v60 = vld [vmem:[#allocation12_spill] sm:$0xff] }
0x1ea7   :  { %12077 = vmatmul.mubr.bf16.vlgmr.msra.gmra.mrb[124].mxu0 %v11841_v53  ;;  %12120 = vmatmul.mubr.bf16.vlgmr.msra.gmra.mrb[140].mxu1 %v11841_v53 }
0x1ea8   :  { %13308 = vmatpush3.bf16.xpose.msra.mxu0 %v16960_v42  ;;  %v18341_v42 = vld [vmem:[#allocation11_spill] sm:$0xff] }
0x1ea9   :  { %13309 = vmatprep.subr.bf16.mxu0 %v17766_v26  ;;  %v12213_v26 = vld [vmem:[%s18242_s8] sm:$0xff] }
0x1eaa   :  { %12216 = vperm.xlu1 %13810, %v12213_v26  }
0x1eb0   :  { %13310 = vmatpush3.bf16.xpose.msra.mxu0 %v17014_v19  ;;  %v18210_v19 = vld [vmem:[%s18241_s7] sm:$0xf] }
0x1eb1   :  { %13311 = vmatprep.subr.bf16.mxu0 %v17818_v10  ;;  %13323 = vmatprep.mubr.bf16.mxu0 %v18210_v19 }
0x1eb8   :  { %13312 = vmatpush3.bf16.xpose.msra.mxu0 %v18336_v34 }
0x1eb9   :  { %13313 = vmatprep.subr.bf16.mxu0 %v18337_v15 }
0x1ec0   :  { %13314 = vmatpush3.bf16.xpose.msra.mxu0 %v18338_v58 }
0x1ec1   :  { %13315 = vmatprep.subr.bf16.mxu0 %v18088_v38 }
0x1ec8   :  { %13316 = vmatpush3.bf16.xpose.msra.mxu0 %v18339_v21 }
0x1ec9   :  { %13317 = vmatprep.subr.bf16.mxu0 %v18142_v59 }
0x1ed0   :  { %13318 = vmatpush3.bf16.xpose.msra.mxu0 %v18340_v35 }
0x1ed1   :  { %13319 = vmatprep.subr.bf16.mxu0 %v11841_v53 }
0x1ed8   :  { %13320 = vmatpush3.bf16.xpose.msra.mxu0 %v18341_v42 }
0x1f29   :  { %v12217_v53 = vpop.permute.xlu1 %12216 }
0x1f7a   :  { %v12078_v10 = vpop.f32.mrb[124].mxu0  ;;  %v12121_v38 = vpop.f32.mrb[140].mxu1 }
0x1f7b   :  { %v13519_v59 = vadd.f32 %v12078_v10, %v16936_v37  ;;  %v12080_v43 = vpop.f32.mrb[125].mxu0  ;;  %v12123_v24 = vpop.f32.mrb[141].mxu1  ;;  %v13579_v6 = vadd.f32 %v12121_v38, %v16940_v25 }
0x1f7c   :  { %v13520_v63 = vadd.f32 %v12080_v43, %v18328_v48  ;;  %v12082_v2 = vpop.f32.mrb[126].mxu0  ;;  %v12125_v62 = vpop.f32.mrb[142].mxu1  ;;  %v13580_v44 = vadd.f32 %v12123_v24, %v16945_v20 }
0x1f7d   :  { %v12150_v30 = vmul.f32 0.5, %v13519_v59  ;;  %v13521_v41 = vadd.f32 %v12082_v2, %v16936_v37  ;;  %v12084_v51 = vpop.f32.mrb[127].mxu0  ;;  %v12127_v49 = vpop.f32.mrb[143].mxu1  ;;  %v13581_v45 = vadd.f32 %v12125_v62, %v16940_v25 }
0x1f7e   :  { %v12174_v57 = vmul.f32 0.5, %v13520_v63  ;;  %v13522_v3 = vadd.f32 %v12084_v51, %v18328_v48  ;;  %v12164_v37 = vmul.f32 0.5, %v13580_v44  ;;  %v13582_v55 = vadd.f32 %v12127_v49, %v16945_v20 }
0x1f7f   :  { %14858 = vtanh.f32 %v12150_v30  ;;  %v12151_v17 = vmul.f32 0.5, %v13521_v41 }
0x1f80   :  { %14860 = vtanh.f32 %v12174_v57  ;;  %v12175_v12 = vmul.f32 0.5, %v13522_v3  ;;  %v12165_v32 = vmul.f32 0.5, %v13582_v55 }
0x1f81   :  { %14862 = vtanh.f32 %v12151_v17 }
0x1f82   :  { %14864 = vtanh.f32 %v13579_v6 }
0x1f83   :  { %14866 = vtanh.f32 %v12175_v12 }
0x1f84   :  { %14868 = vtanh.f32 %v13581_v45 }
0x1f85   :  { %14870 = vtanh.f32 %v12164_v37 }
0x1f86   :  { %14872 = vtanh.f32 %v12165_v32 }
0x1f89   :  { %v14859_v1 = vpop.eup %14858 }
0x1f8a   :  { %v14861_v23 = vpop.eup %14860  ;;  %v12154_v48 = vmul.f32 0.5, %v14859_v1 }
0x1f8b   :  { %v12178_v31 = vmul.f32 0.5, %v14861_v23  ;;  %v14863_v61 = vpop.eup %14862 }
0x1f8c   :  { %v12156_v9 = vadd.f32 0.5, %v12154_v48  ;;  %v14865_v52 = vpop.eup %14864  ;;  %v12155_v5 = vmul.f32 0.5, %v14863_v61 }
0x1f8d   :  { %v12180_v18 = vadd.f32 0.5, %v12178_v31  ;;  %v14867_v25 = vpop.eup %14866 }
0x1f8e   :  { %v12184_v40 = vmul.f32 %v14865_v52, %v12156_v9  ;;  %v12157_v50 = vadd.f32 0.5, %v12155_v5  ;;  %v12179_v0 = vmul.f32 0.5, %v14867_v25  ;;  %v14869_v29 = vpop.eup %14868 }
0x1f8f   :  { %v12182_v39 = vmul.f32 %v12180_v18, %v18188_v11  ;;  %v14871_v28 = vpop.eup %14870 }
0x1f90   :  { %v12181_v56 = vadd.f32 0.5, %v12179_v0  ;;  %v12185_v36 = vmul.f32 %v14869_v29, %v12157_v50  ;;  %v12168_v33 = vmul.f32 0.5, %v14871_v28  ;;  %v14873_v8 = vpop.eup %14872 }
0x1f91   :  { %v12186_v20 = vadd.f32 %v12184_v40, %v12182_v39  ;;  %v12169_v27 = vmul.f32 0.5, %v14873_v8 }
0x1f92   :  { %v12183_v46 = vmul.f32 %v12181_v56, %v18192_v16  ;;  %v12170_v14 = vadd.f32 0.5, %v12168_v33 }
0x1f93   :  { %14874 = vtanh.f32 %v12186_v20  ;;  %v12171_v11 = vadd.f32 0.5, %v12169_v27 }
0x1f94   :  { %v12187_v7 = vadd.f32 %v12185_v36, %v12183_v46 }
0x1f96   :  { %14876 = vtanh.f32 %v12187_v7 }
0x1f9d   :  { %v14875_v54 = vpop.eup %14874 }
0x1f9e   :  { %v12190_v22 = vmul.f32 %v14875_v54, %v12170_v14 }
0x1fa0   :  { %v14877_v4 = vpop.eup %14876 }
0x1fa1   :  { %v12191_v13 = vmul.f32 %v14877_v4, %v12171_v11 }
0x1fa3   :  { %v12194_v47 = vpack.c.bf16 %v12191_v13, %v12190_v22 }
0x1fa5   :  { %13321 = vmatprep.subr.bf16.mxu0 %v12194_v47 }
0x1fa6   :  { %13322 = vmatpush3.bf16.xpose.msra.mxu0 %v18342_v60 }
0x1fad   :  { %13324 = vmatmul.mubr.bf16.vlgmr.msra.gmra.mrb[128].mxu0 %v18210_v19 }
0x2080   :  { %v12253_v16 = vpop.f32.mrb[128].mxu0 }
0x2081   :  { %v12254_v34 = vadd.f32 %v12253_v16, %v12217_v53  ;;  %v12255_v15 = vpop.f32.mrb[129].mxu0 }
0x2082   :  { %v12256_v58 = vadd.f32 %v12255_v15, %v12217_v53  ;;  %v12257_v21 = vpop.f32.mrb[130].mxu0 }
0x2083   :  { %12260 = vst [vmem:[%s18243_s9] sm:$0xff] %v12254_v34  ;;  %v12258_v35 = vpop.f32.mrb[131].mxu0 }
0x2084   :  { %12261 = vst [vmem:[%s18243_s9 + $0x8] sm:$0xff] %v12256_v58 }

</bundles_post_ra>
